<compile_context>
chip_gen: v7x
topology: tpu7x:2x2x1
jax: 0.10.0
libtpu: 0.0.40
codegen_flags: <defaults>
</compile_context>

<pallas_src>
import functools

import jax
import jax.numpy as jnp
from jax import lax
from jax.experimental import pallas as pl
from jax.experimental.pallas import tpu as pltpu

BN_EPS = 1e-5


# ---------------------------------------------------------------------------
# In-kernel tap gathering + accumulation
# ---------------------------------------------------------------------------
def _accum_taps(planes, w_ref, wp, rows, acc):
    """Accumulate the 27 (kd, kh, kw) taps of a 3x3x3 conv on the MXU.

    planes: three refs, each a zero-padded, HW-flattened depth plane of shape
            ((H+3)*(W+2), Cin) (padded depths d, d+1, d+2).  For output row
            r = h*(W+2) + w', tap (kh, kw) is element r of the contiguous row
            window starting at kh*(W+2)+kw, so every tap is a plain
            sublane-offset slice of the plane already in VMEM.
    w_ref:  (27, Cin, Cout) weight ref (BN scale pre-folded, bf16).
    """
    for kd in range(3):
        for kh in range(3):
            for kw in range(3):
                t = kd * 9 + kh * 3 + kw
                tap = planes[kd][pl.ds(kh * wp + kw, rows), :]
                acc = acc + jnp.dot(tap, w_ref[t],
                                    preferred_element_type=jnp.float32)
    return acc


def _conv1_res_kernel(x0, x1, x2, w1_ref, wr_ref, b1_ref, br_ref,
                      o1_ref, or_ref, *, wp, rows):
    cout = w1_ref.shape[-1]
    acc = jnp.zeros((rows, cout), jnp.float32)
    acc = _accum_taps((x0, x1, x2), w1_ref, wp, rows, acc)
    o1_ref[...] = jnp.maximum(acc + b1_ref[...], 0.0).astype(o1_ref.dtype)
    # Residual branch: 1x1x1 conv (+ folded bn_res) reads the centre tap
    # (kd=kh=kw=1) of the middle plane, already resident in VMEM.
    ctr = x1[pl.ds(wp + 1, rows), :]
    racc = jnp.dot(ctr, wr_ref[...], preferred_element_type=jnp.float32)
    or_ref[...] = (racc + br_ref[...]).astype(or_ref.dtype)


def _conv_bn_add_relu_kernel(x0, x1, x2, w_ref, b_ref, r_ref, o_ref, *, wp, rows):
    cout = w_ref.shape[-1]
    acc = jnp.zeros((rows, cout), jnp.float32)
    acc = _accum_taps((x0, x1, x2), w_ref, wp, rows, acc)
    y = acc + b_ref[...] + r_ref[...].astype(jnp.float32)   # add in f32
    o_ref[...] = jnp.maximum(y, 0.0).astype(o_ref.dtype)


def _conv_plain_kernel(x0, x1, x2, w_ref, o_ref, *, wp, rows):
    cout = w_ref.shape[-1]
    acc = jnp.zeros((rows, cout), jnp.float32)
    acc = _accum_taps((x0, x1, x2), w_ref, wp, rows, acc)
    o_ref[...] = acc.astype(o_ref.dtype)


# ---------------------------------------------------------------------------
# Spec / layout helpers
# ---------------------------------------------------------------------------
def _compiler_params():
    vmem_limit = None
    try:  # generation-aware scoped-VMEM limit (v5e default is only 16 MiB)
        vmem_limit = int(pltpu.get_tpu_info().vmem_capacity_bytes * 3 // 4)
    except Exception:
        vmem_limit = None
    return pltpu.CompilerParams(
        dimension_semantics=("parallel", "parallel"),
        vmem_limit_bytes=vmem_limit)


def _x_view_specs(rin, cin):
    """Three depth-shifted views of the padded, flattened activation."""
    def spec(kd):
        return pl.BlockSpec((None, None, rin, cin),
                            lambda n, d, kd=kd: (n, d + kd, 0, 0))
    return [spec(0), spec(1), spec(2)]


def _full_spec(arr):
    zeros = (0,) * arr.ndim
    return pl.BlockSpec(arr.shape, lambda n, d: zeros)   # VMEM-resident


def _out_spec(rows, c):
    return pl.BlockSpec((None, None, rows, c), lambda n, d: (n, d, 0, 0))


def _lane_pad(c):
    # Lane-dense stores only when the extra HBM traffic is <= 2x.
    return ((c + 127) // 128) * 128 if c >= 64 else c


def _pad_last(a, c_to):
    pad = c_to - a.shape[-1]
    if pad == 0:
        return a
    return jnp.pad(a, ((0, 0),) * (a.ndim - 1) + ((0, pad),))


def _pad_and_flatten(x):
    """(N, D, H, W, C) -> zero-padded, HW-flattened (N, D+2, (H+3)*(W+2), C).

    H is padded (1, 2): the extra bottom row keeps the wrap-around windows of
    the two junk output columns in-bounds; valid outputs never read it."""
    n, d, h, w, c = x.shape
    xp = jnp.pad(x, ((0, 0), (1, 1), (1, 2), (1, 1), (0, 0)))
    return xp.reshape(n, d + 2, (h + 3) * (w + 2), c)


def _strip(raw, n, do, h, w, c):
    """(N, Do, H*(W+2), Cpad) raw layout -> (N, Do, H, W, C) (drop junk cols)."""
    wp = w + 2
    return raw.reshape(n, do, h, wp, raw.shape[-1])[:, :, :, :w, :c]


def _fold_bn(bn):
    gamma, beta, mean, var = bn
    s = gamma / jnp.sqrt(var + BN_EPS)
    return s, beta - mean * s


# ---------------------------------------------------------------------------
# pallas_call wrappers (one output depth-plane per grid step)
# ---------------------------------------------------------------------------
def conv1_with_residual(xflat, w1, wr, b1, br, *, h, w):
    n, dp, rin, cin = xflat.shape
    do, wp = dp - 2, w + 2
    rows = h * wp
    cout = w1.shape[-1]
    cpad = _lane_pad(cout)
    w1, wr = _pad_last(w1, cpad), _pad_last(wr, cpad)
    b1, br = _pad_last(b1, cpad), _pad_last(br, cpad)

    kernel = functools.partial(_conv1_res_kernel, wp=wp, rows=rows)
    flops = 2 * n * do * rows * (27 + 1) * cin * cpad
    bytes_acc = (3 * n * do * rin * cin * 2 + (w1.size + wr.size) * 2
                 + (b1.size + br.size) * 4 + 2 * n * do * rows * cpad * 2)
    out1, res = pl.pallas_call(
        kernel,
        grid=(n, do),
        in_specs=_x_view_specs(rin, cin) + [_full_spec(w1), _full_spec(wr),
                                            _full_spec(b1), _full_spec(br)],
        out_specs=(_out_spec(rows, cpad), _out_spec(rows, cpad)),
        out_shape=(jax.ShapeDtypeStruct((n, do, rows, cpad), jnp.bfloat16),
                   jax.ShapeDtypeStruct((n, do, rows, cpad), jnp.bfloat16)),
        compiler_params=_compiler_params(),
        cost_estimate=pl.CostEstimate(flops=int(flops), transcendentals=0,
                                      bytes_accessed=int(bytes_acc)),
    )(xflat, xflat, xflat, w1, wr, b1, br)
    return out1, res


def conv_bn_add_relu(xflat, w2, b2, res_raw, *, h, w):
    n, dp, rin, cin = xflat.shape
    do, wp = dp - 2, w + 2
    rows = h * wp
    cout = w2.shape[-1]
    cpad = _lane_pad(cout)
    w2, b2 = _pad_last(w2, cpad), _pad_last(b2, cpad)
    assert res_raw.shape == (n, do, rows, cpad), res_raw.shape

    kernel = functools.partial(_conv_bn_add_relu_kernel, wp=wp, rows=rows)
    flops = 2 * n * do * rows * 27 * cin * cpad
    bytes_acc = (3 * n * do * rin * cin * 2 + w2.size * 2 + b2.size * 4
                 + 2 * n * do * rows * cpad * 2)
    return pl.pallas_call(
        kernel,
        grid=(n, do),
        in_specs=_x_view_specs(rin, cin) + [_full_spec(w2), _full_spec(b2),
                                            _out_spec(rows, cpad)],
        out_specs=_out_spec(rows, cpad),
        out_shape=jax.ShapeDtypeStruct((n, do, rows, cpad), jnp.bfloat16),
        compiler_params=_compiler_params(),
        cost_estimate=pl.CostEstimate(flops=int(flops), transcendentals=0,
                                      bytes_accessed=int(bytes_acc)),
    )(xflat, xflat, xflat, w2, b2, res_raw)


def conv_plain(xflat, wk, *, h, w, out_dtype=jnp.float32):
    n, dp, rin, cin = xflat.shape
    do, wp = dp - 2, w + 2
    rows = h * wp
    cout = wk.shape[-1]
    cpad = _lane_pad(cout)
    wk = _pad_last(wk, cpad)

    kernel = functools.partial(_conv_plain_kernel, wp=wp, rows=rows)
    flops = 2 * n * do * rows * 27 * cin * cpad
    bytes_acc = (3 * n * do * rin * cin * 2 + wk.size * 2
                 + n * do * rows * cpad * jnp.dtype(out_dtype).itemsize)
    return pl.pallas_call(
        kernel,
        grid=(n, do),
        in_specs=_x_view_specs(rin, cin) + [_full_spec(wk)],
        out_specs=_out_spec(rows, cpad),
        out_shape=jax.ShapeDtypeStruct((n, do, rows, cpad), out_dtype),
        compiler_params=_compiler_params(),
        cost_estimate=pl.CostEstimate(flops=int(flops), transcendentals=0,
                                      bytes_accessed=int(bytes_acc)),
    )(xflat, xflat, xflat, wk)


# ---------------------------------------------------------------------------
# Parameters
# ---------------------------------------------------------------------------
def init_params(key, in_channels, out_channels, num_classes):
    ks = jax.random.split(key, 8)

    def conv_w(k, kd, kh, kw, cin, cout):
        fan_in = kd * kh * kw * cin
        return jax.random.normal(k, (kd, kh, kw, cin, cout),
                                 jnp.float32) / jnp.sqrt(float(fan_in))

    def bn_p(k, c):
        k1, k2, k3, k4 = jax.random.split(k, 4)
        gamma = 1.0 + 0.1 * jax.random.normal(k1, (c,), jnp.float32)
        beta = 0.1 * jax.random.normal(k2, (c,), jnp.float32)
        mean = 0.1 * jax.random.normal(k3, (c,), jnp.float32)
        var = 1.0 + 0.1 * jax.random.uniform(k4, (c,), jnp.float32)
        return gamma, beta, mean, var

    return {
        "w1": conv_w(ks[0], 3, 3, 3, in_channels, out_channels),
        "bn1": bn_p(ks[1], out_channels),
        "w2": conv_w(ks[2], 3, 3, 3, out_channels, out_channels),
        "bn2": bn_p(ks[3], out_channels),
        "w_res": conv_w(ks[4], 1, 1, 1, in_channels, out_channels),
        "bn_res": bn_p(ks[5], out_channels),
        "w_seg": conv_w(ks[6], 3, 3, 3, out_channels, num_classes),
    }


# ---------------------------------------------------------------------------
# BottleneckBlock forward
# ---------------------------------------------------------------------------
def bottleneck_forward(x_ncdhw, params, stride=1):
    if stride != 1:
        # TODO(synk): stride>1 needs strided row windows in the tap gather.
        raise NotImplementedError("Pallas path implemented for stride=1 only")

    n, cin, d, h, w = x_ncdhw.shape
    cout = params["w1"].shape[-1]
    ncls = params["w_seg"].shape[-1]

    # NCDHW -> NDHWC bf16 (f32 accumulation happens on the MXU in-kernel).
    x = jnp.transpose(x_ncdhw, (0, 2, 3, 4, 1)).astype(jnp.bfloat16)

    # Fold BN scale into the conv weights; epilogues become bias(+res)+relu.
    s1, b1 = _fold_bn(params["bn1"])
    s2, b2 = _fold_bn(params["bn2"])
    sr, br = _fold_bn(params["bn_res"])
    w1 = (params["w1"] * s1).reshape(27, cin, cout).astype(jnp.bfloat16)
    w2 = (params["w2"] * s2).reshape(27, cout, cout).astype(jnp.bfloat16)
    wr = (params["w_res"] * sr).reshape(cin, cout).astype(jnp.bfloat16)
    wseg = params["w_seg"].reshape(27, cout, ncls).astype(jnp.bfloat16)
    b1 = b1.reshape(1, cout).astype(jnp.float32)
    b2 = b2.reshape(1, cout).astype(jnp.float32)
    br = br.reshape(1, cout).astype(jnp.float32)

    # conv1 + bn1 + relu fused with the residual 1x1x1 conv + bn_res.
    xf = _pad_and_flatten(x)
    out1_raw, res_raw = conv1_with_residual(xf, w1, wr, b1, br, h=h, w=w)

    # conv2 + bn2 + residual add + relu.  The residual stays in the raw
    # junk-column layout so the in-kernel add needs no reformatting.
    out1 = _strip(out1_raw, n, d, h, w, cout)
    out2_raw = conv_bn_add_relu(_pad_and_flatten(out1), w2, b2, res_raw, h=h, w=w)

    # reg_seg_conv (no BN, no relu).
    out2 = _strip(out2_raw, n, d, h, w, cout)
    seg_raw = conv_plain(_pad_and_flatten(out2), wseg, h=h, w=w)
    seg = _strip(seg_raw, n, d, h, w, ncls).astype(jnp.float32)
    return jnp.transpose(seg, (0, 4, 1, 2, 3))  # back to NCDHW


# ---------------------------------------------------------------------------
# Pure-JAX f32 reference (lax.conv) for the correctness check
# ---------------------------------------------------------------------------
def ref_forward(x_ncdhw, params, stride=1):
    x = jnp.transpose(x_ncdhw, (0, 2, 3, 4, 1)).astype(jnp.float32)

    def conv(v, wgt, s, pad):
        return lax.conv_general_dilated(
            v, wgt, (s, s, s), [(pad, pad)] * 3,
            dimension_numbers=("NDHWC", "DHWIO", "NDHWC"))

    def bn(v, p):
        sc, bi = _fold_bn(p)
        return v * sc + bi

    out = jax.nn.relu(bn(conv(x, params["w1"], stride, 1), params["bn1"]))
    res = bn(conv(x, params["w_res"], stride, 0), params["bn_res"])
    out = jax.nn.relu(bn(conv(out, params["w2"], 1, 1), params["bn2"]) + res)
    seg = conv(out, params["w_seg"], 1, 1)
    return jnp.transpose(seg, (0, 4, 1, 2, 3))


if __name__ == "__main__":
    N, C_IN, C_OUT, N_CLS = 2, 4, 8, 3
    D = H = W = 8

    key = jax.random.PRNGKey(0)
    kx, kp = jax.random.split(key)
    x = jax.random.normal(kx, (N, C_IN, D, H, W), jnp.float32)  # NCDHW
    params = init_params(kp, C_IN, C_OUT, N_CLS)

    fwd = jax.jit(bottleneck_forward)
    out = jax.block_until_ready(fwd(x, params))

    ref = jax.block_until_ready(ref_forward(x, params))
    assert out.shape == (N, N_CLS, D, H, W), out.shape
    # bf16 MXU inputs / bf16 intermediates vs full-f32 reference.
    err = float(jnp.max(jnp.abs(out - ref)) / jnp.max(jnp.abs(ref)))
    assert err < 5e-2, err

    print("KERNEL_OK")
</pallas_src>

<mosaic_0001>
module attributes {stable_mosaic.version = 11 : i64} {
  func.func @_conv1_res_kernel(%arg0: i32, %arg1: i32, %arg2: memref<1x1x110x4xbf16, #tpu.memory_space<vmem>>, %arg3: memref<1x1x110x4xbf16, #tpu.memory_space<vmem>>, %arg4: memref<1x1x110x4xbf16, #tpu.memory_space<vmem>>, %arg5: memref<27x4x8xbf16, #tpu.memory_space<vmem>>, %arg6: memref<4x8xbf16, #tpu.memory_space<vmem>>, %arg7: memref<1x8xf32, #tpu.memory_space<vmem>>, %arg8: memref<1x8xf32, #tpu.memory_space<vmem>>, %arg9: memref<1x1x80x8xbf16, #tpu.memory_space<vmem>>, %arg10: memref<1x1x80x8xbf16, #tpu.memory_space<vmem>>) attributes {dimension_semantics = [#tpu.dimension_semantics<parallel>, #tpu.dimension_semantics<parallel>], iteration_bounds = array<i64: 2, 8>, scalar_prefetch = 0 : i64, scratch_operands = 0 : i64, tpu.core_type = #tpu.core_type<tc>, window_params = [{transform_indices = @transform_0, window_bounds = array<i64: 1, 1, 110, 4>}, {transform_indices = @transform_1, window_bounds = array<i64: 1, 1, 110, 4>}, {transform_indices = @transform_2, window_bounds = array<i64: 1, 1, 110, 4>}, {pipeline_mode = #tpu.pipeline_mode<synchronous>, transform_indices = @transform_3, window_bounds = array<i64: 27, 4, 8>}, {pipeline_mode = #tpu.pipeline_mode<synchronous>, transform_indices = @transform_4, window_bounds = array<i64: 4, 8>}, {pipeline_mode = #tpu.pipeline_mode<synchronous>, transform_indices = @transform_5, window_bounds = array<i64: 1, 8>}, {pipeline_mode = #tpu.pipeline_mode<synchronous>, transform_indices = @transform_6, window_bounds = array<i64: 1, 8>}, {transform_indices = @transform_7, window_bounds = array<i64: 1, 1, 80, 8>}, {transform_indices = @transform_8, window_bounds = array<i64: 1, 1, 80, 8>}]} {
    %cst = arith.constant 0.000000e+00 : f32
    %0 = vector.broadcast %cst : f32 to vector<80x8xf32>
    %c0 = arith.constant 0 : index
    %c0_0 = arith.constant 0 : index
    %c0_1 = arith.constant 0 : index
    %c0_2 = arith.constant 0 : index
    %1 = vector.load %arg2[%c0, %c0_0, %c0_1, %c0_2] : memref<1x1x110x4xbf16, #tpu.memory_space<vmem>>, vector<1x1x80x4xbf16>
    %2 = vector.shape_cast %1 : vector<1x1x80x4xbf16> to vector<80x4xbf16>
    %c0_3 = arith.constant 0 : index
    %c0_4 = arith.constant 0 : index
    %c0_5 = arith.constant 0 : index
    %3 = vector.load %arg5[%c0_3, %c0_4, %c0_5] : memref<27x4x8xbf16, #tpu.memory_space<vmem>>, vector<1x4x8xbf16>
    %4 = vector.shape_cast %3 : vector<1x4x8xbf16> to vector<4x8xbf16>
    %cst_6 = arith.constant dense<0.000000e+00> : vector<80x8xf32>
    %5 = tpu.matmul %2, %4, %cst_6 {dimension_numbers = #tpu.dot_dimension_numbers<[1], [0], [0], [1], [0, 0, 1, 1], [], []>} : vector<80x4xbf16>, vector<4x8xbf16>, vector<80x8xf32> -> vector<80x8xf32>
    %6 = arith.addf %0, %5 : vector<80x8xf32>
    %c0_7 = arith.constant 0 : index
    %c0_8 = arith.constant 0 : index
    %c1 = arith.constant 1 : index
    %c0_9 = arith.constant 0 : index
    %7 = vector.load %arg2[%c0_7, %c0_8, %c1, %c0_9] : memref<1x1x110x4xbf16, #tpu.memory_space<vmem>>, vector<1x1x80x4xbf16>
    %8 = vector.shape_cast %7 : vector<1x1x80x4xbf16> to vector<80x4xbf16>
    %c1_10 = arith.constant 1 : index
    %c0_11 = arith.constant 0 : index
    %c0_12 = arith.constant 0 : index
    %9 = vector.load %arg5[%c1_10, %c0_11, %c0_12] : memref<27x4x8xbf16, #tpu.memory_space<vmem>>, vector<1x4x8xbf16>
    %10 = vector.shape_cast %9 : vector<1x4x8xbf16> to vector<4x8xbf16>
    %cst_13 = arith.constant dense<0.000000e+00> : vector<80x8xf32>
    %11 = tpu.matmul %8, %10, %cst_13 {dimension_numbers = #tpu.dot_dimension_numbers<[1], [0], [0], [1], [0, 0, 1, 1], [], []>} : vector<80x4xbf16>, vector<4x8xbf16>, vector<80x8xf32> -> vector<80x8xf32>
    %12 = arith.addf %6, %11 : vector<80x8xf32>
    %c0_14 = arith.constant 0 : index
    %c0_15 = arith.constant 0 : index
    %c2 = arith.constant 2 : index
    %c0_16 = arith.constant 0 : index
    %13 = vector.load %arg2[%c0_14, %c0_15, %c2, %c0_16] : memref<1x1x110x4xbf16, #tpu.memory_space<vmem>>, vector<1x1x80x4xbf16>
    %14 = vector.shape_cast %13 : vector<1x1x80x4xbf16> to vector<80x4xbf16>
    %c2_17 = arith.constant 2 : index
    %c0_18 = arith.constant 0 : index
    %c0_19 = arith.constant 0 : index
    %15 = vector.load %arg5[%c2_17, %c0_18, %c0_19] : memref<27x4x8xbf16, #tpu.memory_space<vmem>>, vector<1x4x8xbf16>
    %16 = vector.shape_cast %15 : vector<1x4x8xbf16> to vector<4x8xbf16>
    %cst_20 = arith.constant dense<0.000000e+00> : vector<80x8xf32>
    %17 = tpu.matmul %14, %16, %cst_20 {dimension_numbers = #tpu.dot_dimension_numbers<[1], [0], [0], [1], [0, 0, 1, 1], [], []>} : vector<80x4xbf16>, vector<4x8xbf16>, vector<80x8xf32> -> vector<80x8xf32>
    %18 = arith.addf %12, %17 : vector<80x8xf32>
    %c0_21 = arith.constant 0 : index
    %c0_22 = arith.constant 0 : index
    %c10 = arith.constant 10 : index
    %c0_23 = arith.constant 0 : index
    %19 = vector.load %arg2[%c0_21, %c0_22, %c10, %c0_23] : memref<1x1x110x4xbf16, #tpu.memory_space<vmem>>, vector<1x1x80x4xbf16>
    %20 = vector.shape_cast %19 : vector<1x1x80x4xbf16> to vector<80x4xbf16>
    %c3 = arith.constant 3 : index
    %c0_24 = arith.constant 0 : index
    %c0_25 = arith.constant 0 : index
    %21 = vector.load %arg5[%c3, %c0_24, %c0_25] : memref<27x4x8xbf16, #tpu.memory_space<vmem>>, vector<1x4x8xbf16>
    %22 = vector.shape_cast %21 : vector<1x4x8xbf16> to vector<4x8xbf16>
    %cst_26 = arith.constant dense<0.000000e+00> : vector<80x8xf32>
    %23 = tpu.matmul %20, %22, %cst_26 {dimension_numbers = #tpu.dot_dimension_numbers<[1], [0], [0], [1], [0, 0, 1, 1], [], []>} : vector<80x4xbf16>, vector<4x8xbf16>, vector<80x8xf32> -> vector<80x8xf32>
    %24 = arith.addf %18, %23 : vector<80x8xf32>
    %c0_27 = arith.constant 0 : index
    %c0_28 = arith.constant 0 : index
    %c11 = arith.constant 11 : index
    %c0_29 = arith.constant 0 : index
    %25 = vector.load %arg2[%c0_27, %c0_28, %c11, %c0_29] : memref<1x1x110x4xbf16, #tpu.memory_space<vmem>>, vector<1x1x80x4xbf16>
    %26 = vector.shape_cast %25 : vector<1x1x80x4xbf16> to vector<80x4xbf16>
    %c4 = arith.constant 4 : index
    %c0_30 = arith.constant 0 : index
    %c0_31 = arith.constant 0 : index
    %27 = vector.load %arg5[%c4, %c0_30, %c0_31] : memref<27x4x8xbf16, #tpu.memory_space<vmem>>, vector<1x4x8xbf16>
    %28 = vector.shape_cast %27 : vector<1x4x8xbf16> to vector<4x8xbf16>
    %cst_32 = arith.constant dense<0.000000e+00> : vector<80x8xf32>
    %29 = tpu.matmul %26, %28, %cst_32 {dimension_numbers = #tpu.dot_dimension_numbers<[1], [0], [0], [1], [0, 0, 1, 1], [], []>} : vector<80x4xbf16>, vector<4x8xbf16>, vector<80x8xf32> -> vector<80x8xf32>
    %30 = arith.addf %24, %29 : vector<80x8xf32>
    %c0_33 = arith.constant 0 : index
    %c0_34 = arith.constant 0 : index
    %c12 = arith.constant 12 : index
    %c0_35 = arith.constant 0 : index
    %31 = vector.load %arg2[%c0_33, %c0_34, %c12, %c0_35] : memref<1x1x110x4xbf16, #tpu.memory_space<vmem>>, vector<1x1x80x4xbf16>
    %32 = vector.shape_cast %31 : vector<1x1x80x4xbf16> to vector<80x4xbf16>
    %c5 = arith.constant 5 : index
    %c0_36 = arith.constant 0 : index
    %c0_37 = arith.constant 0 : index
    %33 = vector.load %arg5[%c5, %c0_36, %c0_37] : memref<27x4x8xbf16, #tpu.memory_space<vmem>>, vector<1x4x8xbf16>
    %34 = vector.shape_cast %33 : vector<1x4x8xbf16> to vector<4x8xbf16>
    %cst_38 = arith.constant dense<0.000000e+00> : vector<80x8xf32>
    %35 = tpu.matmul %32, %34, %cst_38 {dimension_numbers = #tpu.dot_dimension_numbers<[1], [0], [0], [1], [0, 0, 1, 1], [], []>} : vector<80x4xbf16>, vector<4x8xbf16>, vector<80x8xf32> -> vector<80x8xf32>
    %36 = arith.addf %30, %35 : vector<80x8xf32>
    %c0_39 = arith.constant 0 : index
    %c0_40 = arith.constant 0 : index
    %c20 = arith.constant 20 : index
    %c0_41 = arith.constant 0 : index
    %37 = vector.load %arg2[%c0_39, %c0_40, %c20, %c0_41] : memref<1x1x110x4xbf16, #tpu.memory_space<vmem>>, vector<1x1x80x4xbf16>
    %38 = vector.shape_cast %37 : vector<1x1x80x4xbf16> to vector<80x4xbf16>
    %c6 = arith.constant 6 : index
    %c0_42 = arith.constant 0 : index
    %c0_43 = arith.constant 0 : index
    %39 = vector.load %arg5[%c6, %c0_42, %c0_43] : memref<27x4x8xbf16, #tpu.memory_space<vmem>>, vector<1x4x8xbf16>
    %40 = vector.shape_cast %39 : vector<1x4x8xbf16> to vector<4x8xbf16>
    %cst_44 = arith.constant dense<0.000000e+00> : vector<80x8xf32>
    %41 = tpu.matmul %38, %40, %cst_44 {dimension_numbers = #tpu.dot_dimension_numbers<[1], [0], [0], [1], [0, 0, 1, 1], [], []>} : vector<80x4xbf16>, vector<4x8xbf16>, vector<80x8xf32> -> vector<80x8xf32>
    %42 = arith.addf %36, %41 : vector<80x8xf32>
    %c0_45 = arith.constant 0 : index
    %c0_46 = arith.constant 0 : index
    %c21 = arith.constant 21 : index
    %c0_47 = arith.constant 0 : index
    %43 = vector.load %arg2[%c0_45, %c0_46, %c21, %c0_47] : memref<1x1x110x4xbf16, #tpu.memory_space<vmem>>, vector<1x1x80x4xbf16>
    %44 = vector.shape_cast %43 : vector<1x1x80x4xbf16> to vector<80x4xbf16>
    %c7 = arith.constant 7 : index
    %c0_48 = arith.constant 0 : index
    %c0_49 = arith.constant 0 : index
    %45 = vector.load %arg5[%c7, %c0_48, %c0_49] : memref<27x4x8xbf16, #tpu.memory_space<vmem>>, vector<1x4x8xbf16>
    %46 = vector.shape_cast %45 : vector<1x4x8xbf16> to vector<4x8xbf16>
    %cst_50 = arith.constant dense<0.000000e+00> : vector<80x8xf32>
    %47 = tpu.matmul %44, %46, %cst_50 {dimension_numbers = #tpu.dot_dimension_numbers<[1], [0], [0], [1], [0, 0, 1, 1], [], []>} : vector<80x4xbf16>, vector<4x8xbf16>, vector<80x8xf32> -> vector<80x8xf32>
    %48 = arith.addf %42, %47 : vector<80x8xf32>
    %c0_51 = arith.constant 0 : index
    %c0_52 = arith.constant 0 : index
    %c22 = arith.constant 22 : index
    %c0_53 = arith.constant 0 : index
    %49 = vector.load %arg2[%c0_51, %c0_52, %c22, %c0_53] : memref<1x1x110x4xbf16, #tpu.memory_space<vmem>>, vector<1x1x80x4xbf16>
    %50 = vector.shape_cast %49 : vector<1x1x80x4xbf16> to vector<80x4xbf16>
    %c8 = arith.constant 8 : index
    %c0_54 = arith.constant 0 : index
    %c0_55 = arith.constant 0 : index
    %51 = vector.load %arg5[%c8, %c0_54, %c0_55] : memref<27x4x8xbf16, #tpu.memory_space<vmem>>, vector<1x4x8xbf16>
    %52 = vector.shape_cast %51 : vector<1x4x8xbf16> to vector<4x8xbf16>
    %cst_56 = arith.constant dense<0.000000e+00> : vector<80x8xf32>
    %53 = tpu.matmul %50, %52, %cst_56 {dimension_numbers = #tpu.dot_dimension_numbers<[1], [0], [0], [1], [0, 0, 1, 1], [], []>} : vector<80x4xbf16>, vector<4x8xbf16>, vector<80x8xf32> -> vector<80x8xf32>
    %54 = arith.addf %48, %53 : vector<80x8xf32>
    %c0_57 = arith.constant 0 : index
    %c0_58 = arith.constant 0 : index
    %c0_59 = arith.constant 0 : index
    %c0_60 = arith.constant 0 : index
    %55 = vector.load %arg3[%c0_57, %c0_58, %c0_59, %c0_60] : memref<1x1x110x4xbf16, #tpu.memory_space<vmem>>, vector<1x1x80x4xbf16>
    %56 = vector.shape_cast %55 : vector<1x1x80x4xbf16> to vector<80x4xbf16>
    %c9 = arith.constant 9 : index
    %c0_61 = arith.constant 0 : index
    %c0_62 = arith.constant 0 : index
    %57 = vector.load %arg5[%c9, %c0_61, %c0_62] : memref<27x4x8xbf16, #tpu.memory_space<vmem>>, vector<1x4x8xbf16>
    %58 = vector.shape_cast %57 : vector<1x4x8xbf16> to vector<4x8xbf16>
    %cst_63 = arith.constant dense<0.000000e+00> : vector<80x8xf32>
    %59 = tpu.matmul %56, %58, %cst_63 {dimension_numbers = #tpu.dot_dimension_numbers<[1], [0], [0], [1], [0, 0, 1, 1], [], []>} : vector<80x4xbf16>, vector<4x8xbf16>, vector<80x8xf32> -> vector<80x8xf32>
    %60 = arith.addf %54, %59 : vector<80x8xf32>
    %c0_64 = arith.constant 0 : index
    %c0_65 = arith.constant 0 : index
    %c1_66 = arith.constant 1 : index
    %c0_67 = arith.constant 0 : index
    %61 = vector.load %arg3[%c0_64, %c0_65, %c1_66, %c0_67] : memref<1x1x110x4xbf16, #tpu.memory_space<vmem>>, vector<1x1x80x4xbf16>
    %62 = vector.shape_cast %61 : vector<1x1x80x4xbf16> to vector<80x4xbf16>
    %c10_68 = arith.constant 10 : index
    %c0_69 = arith.constant 0 : index
    %c0_70 = arith.constant 0 : index
    %63 = vector.load %arg5[%c10_68, %c0_69, %c0_70] : memref<27x4x8xbf16, #tpu.memory_space<vmem>>, vector<1x4x8xbf16>
    %64 = vector.shape_cast %63 : vector<1x4x8xbf16> to vector<4x8xbf16>
    %cst_71 = arith.constant dense<0.000000e+00> : vector<80x8xf32>
    %65 = tpu.matmul %62, %64, %cst_71 {dimension_numbers = #tpu.dot_dimension_numbers<[1], [0], [0], [1], [0, 0, 1, 1], [], []>} : vector<80x4xbf16>, vector<4x8xbf16>, vector<80x8xf32> -> vector<80x8xf32>
    %66 = arith.addf %60, %65 : vector<80x8xf32>
    %c0_72 = arith.constant 0 : index
    %c0_73 = arith.constant 0 : index
    %c2_74 = arith.constant 2 : index
    %c0_75 = arith.constant 0 : index
    %67 = vector.load %arg3[%c0_72, %c0_73, %c2_74, %c0_75] : memref<1x1x110x4xbf16, #tpu.memory_space<vmem>>, vector<1x1x80x4xbf16>
    %68 = vector.shape_cast %67 : vector<1x1x80x4xbf16> to vector<80x4xbf16>
    %c11_76 = arith.constant 11 : index
    %c0_77 = arith.constant 0 : index
    %c0_78 = arith.constant 0 : index
    %69 = vector.load %arg5[%c11_76, %c0_77, %c0_78] : memref<27x4x8xbf16, #tpu.memory_space<vmem>>, vector<1x4x8xbf16>
    %70 = vector.shape_cast %69 : vector<1x4x8xbf16> to vector<4x8xbf16>
    %cst_79 = arith.constant dense<0.000000e+00> : vector<80x8xf32>
    %71 = tpu.matmul %68, %70, %cst_79 {dimension_numbers = #tpu.dot_dimension_numbers<[1], [0], [0], [1], [0, 0, 1, 1], [], []>} : vector<80x4xbf16>, vector<4x8xbf16>, vector<80x8xf32> -> vector<80x8xf32>
    %72 = arith.addf %66, %71 : vector<80x8xf32>
    %c0_80 = arith.constant 0 : index
    %c0_81 = arith.constant 0 : index
    %c10_82 = arith.constant 10 : index
    %c0_83 = arith.constant 0 : index
    %73 = vector.load %arg3[%c0_80, %c0_81, %c10_82, %c0_83] : memref<1x1x110x4xbf16, #tpu.memory_space<vmem>>, vector<1x1x80x4xbf16>
    %74 = vector.shape_cast %73 : vector<1x1x80x4xbf16> to vector<80x4xbf16>
    %c12_84 = arith.constant 12 : index
    %c0_85 = arith.constant 0 : index
    %c0_86 = arith.constant 0 : index
    %75 = vector.load %arg5[%c12_84, %c0_85, %c0_86] : memref<27x4x8xbf16, #tpu.memory_space<vmem>>, vector<1x4x8xbf16>
    %76 = vector.shape_cast %75 : vector<1x4x8xbf16> to vector<4x8xbf16>
    %cst_87 = arith.constant dense<0.000000e+00> : vector<80x8xf32>
    %77 = tpu.matmul %74, %76, %cst_87 {dimension_numbers = #tpu.dot_dimension_numbers<[1], [0], [0], [1], [0, 0, 1, 1], [], []>} : vector<80x4xbf16>, vector<4x8xbf16>, vector<80x8xf32> -> vector<80x8xf32>
    %78 = arith.addf %72, %77 : vector<80x8xf32>
    %c0_88 = arith.constant 0 : index
    %c0_89 = arith.constant 0 : index
    %c11_90 = arith.constant 11 : index
    %c0_91 = arith.constant 0 : index
    %79 = vector.load %arg3[%c0_88, %c0_89, %c11_90, %c0_91] : memref<1x1x110x4xbf16, #tpu.memory_space<vmem>>, vector<1x1x80x4xbf16>
    %80 = vector.shape_cast %79 : vector<1x1x80x4xbf16> to vector<80x4xbf16>
    %c13 = arith.constant 13 : index
    %c0_92 = arith.constant 0 : index
    %c0_93 = arith.constant 0 : index
    %81 = vector.load %arg5[%c13, %c0_92, %c0_93] : memref<27x4x8xbf16, #tpu.memory_space<vmem>>, vector<1x4x8xbf16>
    %82 = vector.shape_cast %81 : vector<1x4x8xbf16> to vector<4x8xbf16>
    %cst_94 = arith.constant dense<0.000000e+00> : vector<80x8xf32>
    %83 = tpu.matmul %80, %82, %cst_94 {dimension_numbers = #tpu.dot_dimension_numbers<[1], [0], [0], [1], [0, 0, 1, 1], [], []>} : vector<80x4xbf16>, vector<4x8xbf16>, vector<80x8xf32> -> vector<80x8xf32>
    %84 = arith.addf %78, %83 : vector<80x8xf32>
    %c0_95 = arith.constant 0 : index
    %c0_96 = arith.constant 0 : index
    %c12_97 = arith.constant 12 : index
    %c0_98 = arith.constant 0 : index
    %85 = vector.load %arg3[%c0_95, %c0_96, %c12_97, %c0_98] : memref<1x1x110x4xbf16, #tpu.memory_space<vmem>>, vector<1x1x80x4xbf16>
    %86 = vector.shape_cast %85 : vector<1x1x80x4xbf16> to vector<80x4xbf16>
    %c14 = arith.constant 14 : index
    %c0_99 = arith.constant 0 : index
    %c0_100 = arith.constant 0 : index
    %87 = vector.load %arg5[%c14, %c0_99, %c0_100] : memref<27x4x8xbf16, #tpu.memory_space<vmem>>, vector<1x4x8xbf16>
    %88 = vector.shape_cast %87 : vector<1x4x8xbf16> to vector<4x8xbf16>
    %cst_101 = arith.constant dense<0.000000e+00> : vector<80x8xf32>
    %89 = tpu.matmul %86, %88, %cst_101 {dimension_numbers = #tpu.dot_dimension_numbers<[1], [0], [0], [1], [0, 0, 1, 1], [], []>} : vector<80x4xbf16>, vector<4x8xbf16>, vector<80x8xf32> -> vector<80x8xf32>
    %90 = arith.addf %84, %89 : vector<80x8xf32>
    %c0_102 = arith.constant 0 : index
    %c0_103 = arith.constant 0 : index
    %c20_104 = arith.constant 20 : index
    %c0_105 = arith.constant 0 : index
    %91 = vector.load %arg3[%c0_102, %c0_103, %c20_104, %c0_105] : memref<1x1x110x4xbf16, #tpu.memory_space<vmem>>, vector<1x1x80x4xbf16>
    %92 = vector.shape_cast %91 : vector<1x1x80x4xbf16> to vector<80x4xbf16>
    %c15 = arith.constant 15 : index
    %c0_106 = arith.constant 0 : index
    %c0_107 = arith.constant 0 : index
    %93 = vector.load %arg5[%c15, %c0_106, %c0_107] : memref<27x4x8xbf16, #tpu.memory_space<vmem>>, vector<1x4x8xbf16>
    %94 = vector.shape_cast %93 : vector<1x4x8xbf16> to vector<4x8xbf16>
    %cst_108 = arith.constant dense<0.000000e+00> : vector<80x8xf32>
    %95 = tpu.matmul %92, %94, %cst_108 {dimension_numbers = #tpu.dot_dimension_numbers<[1], [0], [0], [1], [0, 0, 1, 1], [], []>} : vector<80x4xbf16>, vector<4x8xbf16>, vector<80x8xf32> -> vector<80x8xf32>
    %96 = arith.addf %90, %95 : vector<80x8xf32>
    %c0_109 = arith.constant 0 : index
    %c0_110 = arith.constant 0 : index
    %c21_111 = arith.constant 21 : index
    %c0_112 = arith.constant 0 : index
    %97 = vector.load %arg3[%c0_109, %c0_110, %c21_111, %c0_112] : memref<1x1x110x4xbf16, #tpu.memory_space<vmem>>, vector<1x1x80x4xbf16>
    %98 = vector.shape_cast %97 : vector<1x1x80x4xbf16> to vector<80x4xbf16>
    %c16 = arith.constant 16 : index
    %c0_113 = arith.constant 0 : index
    %c0_114 = arith.constant 0 : index
    %99 = vector.load %arg5[%c16, %c0_113, %c0_114] : memref<27x4x8xbf16, #tpu.memory_space<vmem>>, vector<1x4x8xbf16>
    %100 = vector.shape_cast %99 : vector<1x4x8xbf16> to vector<4x8xbf16>
    %cst_115 = arith.constant dense<0.000000e+00> : vector<80x8xf32>
    %101 = tpu.matmul %98, %100, %cst_115 {dimension_numbers = #tpu.dot_dimension_numbers<[1], [0], [0], [1], [0, 0, 1, 1], [], []>} : vector<80x4xbf16>, vector<4x8xbf16>, vector<80x8xf32> -> vector<80x8xf32>
    %102 = arith.addf %96, %101 : vector<80x8xf32>
    %c0_116 = arith.constant 0 : index
    %c0_117 = arith.constant 0 : index
    %c22_118 = arith.constant 22 : index
    %c0_119 = arith.constant 0 : index
    %103 = vector.load %arg3[%c0_116, %c0_117, %c22_118, %c0_119] : memref<1x1x110x4xbf16, #tpu.memory_space<vmem>>, vector<1x1x80x4xbf16>
    %104 = vector.shape_cast %103 : vector<1x1x80x4xbf16> to vector<80x4xbf16>
    %c17 = arith.constant 17 : index
    %c0_120 = arith.constant 0 : index
    %c0_121 = arith.constant 0 : index
    %105 = vector.load %arg5[%c17, %c0_120, %c0_121] : memref<27x4x8xbf16, #tpu.memory_space<vmem>>, vector<1x4x8xbf16>
    %106 = vector.shape_cast %105 : vector<1x4x8xbf16> to vector<4x8xbf16>
    %cst_122 = arith.constant dense<0.000000e+00> : vector<80x8xf32>
    %107 = tpu.matmul %104, %106, %cst_122 {dimension_numbers = #tpu.dot_dimension_numbers<[1], [0], [0], [1], [0, 0, 1, 1], [], []>} : vector<80x4xbf16>, vector<4x8xbf16>, vector<80x8xf32> -> vector<80x8xf32>
    %108 = arith.addf %102, %107 : vector<80x8xf32>
    %c0_123 = arith.constant 0 : index
    %c0_124 = arith.constant 0 : index
    %c0_125 = arith.constant 0 : index
    %c0_126 = arith.constant 0 : index
    %109 = vector.load %arg4[%c0_123, %c0_124, %c0_125, %c0_126] : memref<1x1x110x4xbf16, #tpu.memory_space<vmem>>, vector<1x1x80x4xbf16>
    %110 = vector.shape_cast %109 : vector<1x1x80x4xbf16> to vector<80x4xbf16>
    %c18 = arith.constant 18 : index
    %c0_127 = arith.constant 0 : index
    %c0_128 = arith.constant 0 : index
    %111 = vector.load %arg5[%c18, %c0_127, %c0_128] : memref<27x4x8xbf16, #tpu.memory_space<vmem>>, vector<1x4x8xbf16>
    %112 = vector.shape_cast %111 : vector<1x4x8xbf16> to vector<4x8xbf16>
    %cst_129 = arith.constant dense<0.000000e+00> : vector<80x8xf32>
    %113 = tpu.matmul %110, %112, %cst_129 {dimension_numbers = #tpu.dot_dimension_numbers<[1], [0], [0], [1], [0, 0, 1, 1], [], []>} : vector<80x4xbf16>, vector<4x8xbf16>, vector<80x8xf32> -> vector<80x8xf32>
    %114 = arith.addf %108, %113 : vector<80x8xf32>
    %c0_130 = arith.constant 0 : index
    %c0_131 = arith.constant 0 : index
    %c1_132 = arith.constant 1 : index
    %c0_133 = arith.constant 0 : index
    %115 = vector.load %arg4[%c0_130, %c0_131, %c1_132, %c0_133] : memref<1x1x110x4xbf16, #tpu.memory_space<vmem>>, vector<1x1x80x4xbf16>
    %116 = vector.shape_cast %115 : vector<1x1x80x4xbf16> to vector<80x4xbf16>
    %c19 = arith.constant 19 : index
    %c0_134 = arith.constant 0 : index
    %c0_135 = arith.constant 0 : index
    %117 = vector.load %arg5[%c19, %c0_134, %c0_135] : memref<27x4x8xbf16, #tpu.memory_space<vmem>>, vector<1x4x8xbf16>
    %118 = vector.shape_cast %117 : vector<1x4x8xbf16> to vector<4x8xbf16>
    %cst_136 = arith.constant dense<0.000000e+00> : vector<80x8xf32>
    %119 = tpu.matmul %116, %118, %cst_136 {dimension_numbers = #tpu.dot_dimension_numbers<[1], [0], [0], [1], [0, 0, 1, 1], [], []>} : vector<80x4xbf16>, vector<4x8xbf16>, vector<80x8xf32> -> vector<80x8xf32>
    %120 = arith.addf %114, %119 : vector<80x8xf32>
    %c0_137 = arith.constant 0 : index
    %c0_138 = arith.constant 0 : index
    %c2_139 = arith.constant 2 : index
    %c0_140 = arith.constant 0 : index
    %121 = vector.load %arg4[%c0_137, %c0_138, %c2_139, %c0_140] : memref<1x1x110x4xbf16, #tpu.memory_space<vmem>>, vector<1x1x80x4xbf16>
    %122 = vector.shape_cast %121 : vector<1x1x80x4xbf16> to vector<80x4xbf16>
    %c20_141 = arith.constant 20 : index
    %c0_142 = arith.constant 0 : index
    %c0_143 = arith.constant 0 : index
    %123 = vector.load %arg5[%c20_141, %c0_142, %c0_143] : memref<27x4x8xbf16, #tpu.memory_space<vmem>>, vector<1x4x8xbf16>
    %124 = vector.shape_cast %123 : vector<1x4x8xbf16> to vector<4x8xbf16>
    %cst_144 = arith.constant dense<0.000000e+00> : vector<80x8xf32>
    %125 = tpu.matmul %122, %124, %cst_144 {dimension_numbers = #tpu.dot_dimension_numbers<[1], [0], [0], [1], [0, 0, 1, 1], [], []>} : vector<80x4xbf16>, vector<4x8xbf16>, vector<80x8xf32> -> vector<80x8xf32>
    %126 = arith.addf %120, %125 : vector<80x8xf32>
    %c0_145 = arith.constant 0 : index
    %c0_146 = arith.constant 0 : index
    %c10_147 = arith.constant 10 : index
    %c0_148 = arith.constant 0 : index
    %127 = vector.load %arg4[%c0_145, %c0_146, %c10_147, %c0_148] : memref<1x1x110x4xbf16, #tpu.memory_space<vmem>>, vector<1x1x80x4xbf16>
    %128 = vector.shape_cast %127 : vector<1x1x80x4xbf16> to vector<80x4xbf16>
    %c21_149 = arith.constant 21 : index
    %c0_150 = arith.constant 0 : index
    %c0_151 = arith.constant 0 : index
    %129 = vector.load %arg5[%c21_149, %c0_150, %c0_151] : memref<27x4x8xbf16, #tpu.memory_space<vmem>>, vector<1x4x8xbf16>
    %130 = vector.shape_cast %129 : vector<1x4x8xbf16> to vector<4x8xbf16>
    %cst_152 = arith.constant dense<0.000000e+00> : vector<80x8xf32>
    %131 = tpu.matmul %128, %130, %cst_152 {dimension_numbers = #tpu.dot_dimension_numbers<[1], [0], [0], [1], [0, 0, 1, 1], [], []>} : vector<80x4xbf16>, vector<4x8xbf16>, vector<80x8xf32> -> vector<80x8xf32>
    %132 = arith.addf %126, %131 : vector<80x8xf32>
    %c0_153 = arith.constant 0 : index
    %c0_154 = arith.constant 0 : index
    %c11_155 = arith.constant 11 : index
    %c0_156 = arith.constant 0 : index
    %133 = vector.load %arg4[%c0_153, %c0_154, %c11_155, %c0_156] : memref<1x1x110x4xbf16, #tpu.memory_space<vmem>>, vector<1x1x80x4xbf16>
    %134 = vector.shape_cast %133 : vector<1x1x80x4xbf16> to vector<80x4xbf16>
    %c22_157 = arith.constant 22 : index
    %c0_158 = arith.constant 0 : index
    %c0_159 = arith.constant 0 : index
    %135 = vector.load %arg5[%c22_157, %c0_158, %c0_159] : memref<27x4x8xbf16, #tpu.memory_space<vmem>>, vector<1x4x8xbf16>
    %136 = vector.shape_cast %135 : vector<1x4x8xbf16> to vector<4x8xbf16>
    %cst_160 = arith.constant dense<0.000000e+00> : vector<80x8xf32>
    %137 = tpu.matmul %134, %136, %cst_160 {dimension_numbers = #tpu.dot_dimension_numbers<[1], [0], [0], [1], [0, 0, 1, 1], [], []>} : vector<80x4xbf16>, vector<4x8xbf16>, vector<80x8xf32> -> vector<80x8xf32>
    %138 = arith.addf %132, %137 : vector<80x8xf32>
    %c0_161 = arith.constant 0 : index
    %c0_162 = arith.constant 0 : index
    %c12_163 = arith.constant 12 : index
    %c0_164 = arith.constant 0 : index
    %139 = vector.load %arg4[%c0_161, %c0_162, %c12_163, %c0_164] : memref<1x1x110x4xbf16, #tpu.memory_space<vmem>>, vector<1x1x80x4xbf16>
    %140 = vector.shape_cast %139 : vector<1x1x80x4xbf16> to vector<80x4xbf16>
    %c23 = arith.constant 23 : index
    %c0_165 = arith.constant 0 : index
    %c0_166 = arith.constant 0 : index
    %141 = vector.load %arg5[%c23, %c0_165, %c0_166] : memref<27x4x8xbf16, #tpu.memory_space<vmem>>, vector<1x4x8xbf16>
    %142 = vector.shape_cast %141 : vector<1x4x8xbf16> to vector<4x8xbf16>
    %cst_167 = arith.constant dense<0.000000e+00> : vector<80x8xf32>
    %143 = tpu.matmul %140, %142, %cst_167 {dimension_numbers = #tpu.dot_dimension_numbers<[1], [0], [0], [1], [0, 0, 1, 1], [], []>} : vector<80x4xbf16>, vector<4x8xbf16>, vector<80x8xf32> -> vector<80x8xf32>
    %144 = arith.addf %138, %143 : vector<80x8xf32>
    %c0_168 = arith.constant 0 : index
    %c0_169 = arith.constant 0 : index
    %c20_170 = arith.constant 20 : index
    %c0_171 = arith.constant 0 : index
    %145 = vector.load %arg4[%c0_168, %c0_169, %c20_170, %c0_171] : memref<1x1x110x4xbf16, #tpu.memory_space<vmem>>, vector<1x1x80x4xbf16>
    %146 = vector.shape_cast %145 : vector<1x1x80x4xbf16> to vector<80x4xbf16>
    %c24 = arith.constant 24 : index
    %c0_172 = arith.constant 0 : index
    %c0_173 = arith.constant 0 : index
    %147 = vector.load %arg5[%c24, %c0_172, %c0_173] : memref<27x4x8xbf16, #tpu.memory_space<vmem>>, vector<1x4x8xbf16>
    %148 = vector.shape_cast %147 : vector<1x4x8xbf16> to vector<4x8xbf16>
    %cst_174 = arith.constant dense<0.000000e+00> : vector<80x8xf32>
    %149 = tpu.matmul %146, %148, %cst_174 {dimension_numbers = #tpu.dot_dimension_numbers<[1], [0], [0], [1], [0, 0, 1, 1], [], []>} : vector<80x4xbf16>, vector<4x8xbf16>, vector<80x8xf32> -> vector<80x8xf32>
    %150 = arith.addf %144, %149 : vector<80x8xf32>
    %c0_175 = arith.constant 0 : index
    %c0_176 = arith.constant 0 : index
    %c21_177 = arith.constant 21 : index
    %c0_178 = arith.constant 0 : index
    %151 = vector.load %arg4[%c0_175, %c0_176, %c21_177, %c0_178] : memref<1x1x110x4xbf16, #tpu.memory_space<vmem>>, vector<1x1x80x4xbf16>
    %152 = vector.shape_cast %151 : vector<1x1x80x4xbf16> to vector<80x4xbf16>
    %c25 = arith.constant 25 : index
    %c0_179 = arith.constant 0 : index
    %c0_180 = arith.constant 0 : index
    %153 = vector.load %arg5[%c25, %c0_179, %c0_180] : memref<27x4x8xbf16, #tpu.memory_space<vmem>>, vector<1x4x8xbf16>
    %154 = vector.shape_cast %153 : vector<1x4x8xbf16> to vector<4x8xbf16>
    %cst_181 = arith.constant dense<0.000000e+00> : vector<80x8xf32>
    %155 = tpu.matmul %152, %154, %cst_181 {dimension_numbers = #tpu.dot_dimension_numbers<[1], [0], [0], [1], [0, 0, 1, 1], [], []>} : vector<80x4xbf16>, vector<4x8xbf16>, vector<80x8xf32> -> vector<80x8xf32>
    %156 = arith.addf %150, %155 : vector<80x8xf32>
    %c0_182 = arith.constant 0 : index
    %c0_183 = arith.constant 0 : index
    %c22_184 = arith.constant 22 : index
    %c0_185 = arith.constant 0 : index
    %157 = vector.load %arg4[%c0_182, %c0_183, %c22_184, %c0_185] : memref<1x1x110x4xbf16, #tpu.memory_space<vmem>>, vector<1x1x80x4xbf16>
    %158 = vector.shape_cast %157 : vector<1x1x80x4xbf16> to vector<80x4xbf16>
    %c26 = arith.constant 26 : index
    %c0_186 = arith.constant 0 : index
    %c0_187 = arith.constant 0 : index
    %159 = vector.load %arg5[%c26, %c0_186, %c0_187] : memref<27x4x8xbf16, #tpu.memory_space<vmem>>, vector<1x4x8xbf16>
    %160 = vector.shape_cast %159 : vector<1x4x8xbf16> to vector<4x8xbf16>
    %cst_188 = arith.constant dense<0.000000e+00> : vector<80x8xf32>
    %161 = tpu.matmul %158, %160, %cst_188 {dimension_numbers = #tpu.dot_dimension_numbers<[1], [0], [0], [1], [0, 0, 1, 1], [], []>} : vector<80x4xbf16>, vector<4x8xbf16>, vector<80x8xf32> -> vector<80x8xf32>
    %162 = arith.addf %156, %161 : vector<80x8xf32>
    %c0_189 = arith.constant 0 : index
    %c0_190 = arith.constant 0 : index
    %163 = vector.load %arg7[%c0_189, %c0_190] : memref<1x8xf32, #tpu.memory_space<vmem>>, vector<1x8xf32>
    %164 = vector.broadcast %163 : vector<1x8xf32> to vector<80x8xf32>
    %165 = arith.addf %162, %164 : vector<80x8xf32>
    %cst_191 = arith.constant 0.000000e+00 : f32
    %166 = vector.broadcast %cst_191 : f32 to vector<80x8xf32>
    %167 = arith.maximumf %165, %166 : vector<80x8xf32>
    %168 = arith.truncf %167 : vector<80x8xf32> to vector<80x8xbf16>
    %c0_192 = arith.constant 0 : index
    %c0_193 = arith.constant 0 : index
    %c0_194 = arith.constant 0 : index
    %c0_195 = arith.constant 0 : index
    %169 = vector.load %arg9[%c0_192, %c0_193, %c0_194, %c0_195] : memref<1x1x80x8xbf16, #tpu.memory_space<vmem>>, vector<1x1x80x8xbf16>
    %170 = vector.shape_cast %169 : vector<1x1x80x8xbf16> to vector<80x8xbf16>
    %171 = vector.shape_cast %168 : vector<80x8xbf16> to vector<1x1x80x8xbf16>
    tpu.vector_store %arg9[%c0_192, %c0_193, %c0_194, %c0_195], %171 {strides = array<i32>} : memref<1x1x80x8xbf16, #tpu.memory_space<vmem>>, vector<1x1x80x8xbf16>,
    %c0_196 = arith.constant 0 : index
    %c0_197 = arith.constant 0 : index
    %c11_198 = arith.constant 11 : index
    %c0_199 = arith.constant 0 : index
    %172 = vector.load %arg3[%c0_196, %c0_197, %c11_198, %c0_199] : memref<1x1x110x4xbf16, #tpu.memory_space<vmem>>, vector<1x1x80x4xbf16>
    %173 = vector.shape_cast %172 : vector<1x1x80x4xbf16> to vector<80x4xbf16>
    %c0_200 = arith.constant 0 : index
    %c0_201 = arith.constant 0 : index
    %174 = vector.load %arg6[%c0_200, %c0_201] : memref<4x8xbf16, #tpu.memory_space<vmem>>, vector<4x8xbf16>
    %cst_202 = arith.constant dense<0.000000e+00> : vector<80x8xf32>
    %175 = tpu.matmul %173, %174, %cst_202 {dimension_numbers = #tpu.dot_dimension_numbers<[1], [0], [0], [1], [0, 0, 1, 1], [], []>} : vector<80x4xbf16>, vector<4x8xbf16>, vector<80x8xf32> -> vector<80x8xf32>
    %c0_203 = arith.constant 0 : index
    %c0_204 = arith.constant 0 : index
    %176 = vector.load %arg8[%c0_203, %c0_204] : memref<1x8xf32, #tpu.memory_space<vmem>>, vector<1x8xf32>
    %177 = vector.broadcast %176 : vector<1x8xf32> to vector<80x8xf32>
    %178 = arith.addf %175, %177 : vector<80x8xf32>
    %179 = arith.truncf %178 : vector<80x8xf32> to vector<80x8xbf16>
    %c0_205 = arith.constant 0 : index
    %c0_206 = arith.constant 0 : index
    %c0_207 = arith.constant 0 : index
    %c0_208 = arith.constant 0 : index
    %180 = vector.load %arg10[%c0_205, %c0_206, %c0_207, %c0_208] : memref<1x1x80x8xbf16, #tpu.memory_space<vmem>>, vector<1x1x80x8xbf16>
    %181 = vector.shape_cast %180 : vector<1x1x80x8xbf16> to vector<80x8xbf16>
    %182 = vector.shape_cast %179 : vector<80x8xbf16> to vector<1x1x80x8xbf16>
    tpu.vector_store %arg10[%c0_205, %c0_206, %c0_207, %c0_208], %182 {strides = array<i32>} : memref<1x1x80x8xbf16, #tpu.memory_space<vmem>>, vector<1x1x80x8xbf16>,
    return
  }
  func.func @transform_0(%arg0: i32, %arg1: i32) -> (i32, i32, i32, i32) {
    %c0_i32 = arith.constant 0 : i32
    %0 = arith.addi %arg1, %c0_i32 : i32
    %c0_i32_0 = arith.constant 0 : i32
    %c0_i32_1 = arith.constant 0 : i32
    %c0_i32_2 = arith.constant 0 : i32
    return %arg0, %0, %c0_i32_0, %c0_i32_1 : i32, i32, i32, i32
  }
  func.func @transform_1(%arg0: i32, %arg1: i32) -> (i32, i32, i32, i32) {
    %c1_i32 = arith.constant 1 : i32
    %0 = arith.addi %arg1, %c1_i32 : i32
    %c0_i32 = arith.constant 0 : i32
    %c0_i32_0 = arith.constant 0 : i32
    %c0_i32_1 = arith.constant 0 : i32
    return %arg0, %0, %c0_i32, %c0_i32_0 : i32, i32, i32, i32
  }
  func.func @transform_2(%arg0: i32, %arg1: i32) -> (i32, i32, i32, i32) {
    %c2_i32 = arith.constant 2 : i32
    %0 = arith.addi %arg1, %c2_i32 : i32
    %c0_i32 = arith.constant 0 : i32
    %c0_i32_0 = arith.constant 0 : i32
    %c0_i32_1 = arith.constant 0 : i32
    return %arg0, %0, %c0_i32, %c0_i32_0 : i32, i32, i32, i32
  }
  func.func @transform_3(%arg0: i32, %arg1: i32) -> (i32, i32, i32) {
    %c0_i32 = arith.constant 0 : i32
    %c0_i32_0 = arith.constant 0 : i32
    %c0_i32_1 = arith.constant 0 : i32
    %c0_i32_2 = arith.constant 0 : i32
    return %c0_i32, %c0_i32_0, %c0_i32_1 : i32, i32, i32
  }
  func.func @transform_4(%arg0: i32, %arg1: i32) -> (i32, i32) {
    %c0_i32 = arith.constant 0 : i32
    %c0_i32_0 = arith.constant 0 : i32
    %c0_i32_1 = arith.constant 0 : i32
    return %c0_i32, %c0_i32_0 : i32, i32
  }
  func.func @transform_5(%arg0: i32, %arg1: i32) -> (i32, i32) {
    %c0_i32 = arith.constant 0 : i32
    %c0_i32_0 = arith.constant 0 : i32
    %c0_i32_1 = arith.constant 0 : i32
    return %c0_i32, %c0_i32_0 : i32, i32
  }
  func.func @transform_6(%arg0: i32, %arg1: i32) -> (i32, i32) {
    %c0_i32 = arith.constant 0 : i32
    %c0_i32_0 = arith.constant 0 : i32
    %c0_i32_1 = arith.constant 0 : i32
    return %c0_i32, %c0_i32_0 : i32, i32
  }
  func.func @transform_7(%arg0: i32, %arg1: i32) -> (i32, i32, i32, i32) {
    %c0_i32 = arith.constant 0 : i32
    %c0_i32_0 = arith.constant 0 : i32
    %c0_i32_1 = arith.constant 0 : i32
    return %arg0, %arg1, %c0_i32, %c0_i32_0 : i32, i32, i32, i32
  }
  func.func @transform_8(%arg0: i32, %arg1: i32) -> (i32, i32, i32, i32) {
    %c0_i32 = arith.constant 0 : i32
    %c0_i32_0 = arith.constant 0 : i32
    %c0_i32_1 = arith.constant 0 : i32
    return %arg0, %arg1, %c0_i32, %c0_i32_0 : i32, i32, i32, i32
  }
}

module attributes {stable_mosaic.version = 11 : i64} {
  func.func @_conv_bn_add_relu_kernel(%arg0: i32, %arg1: i32, %arg2: memref<1x1x110x8xbf16, #tpu.memory_space<vmem>>, %arg3: memref<1x1x110x8xbf16, #tpu.memory_space<vmem>>, %arg4: memref<1x1x110x8xbf16, #tpu.memory_space<vmem>>, %arg5: memref<27x8x8xbf16, #tpu.memory_space<vmem>>, %arg6: memref<1x8xf32, #tpu.memory_space<vmem>>, %arg7: memref<1x1x80x8xbf16, #tpu.memory_space<vmem>>, %arg8: memref<1x1x80x8xbf16, #tpu.memory_space<vmem>>) attributes {dimension_semantics = [#tpu.dimension_semantics<parallel>, #tpu.dimension_semantics<parallel>], iteration_bounds = array<i64: 2, 8>, scalar_prefetch = 0 : i64, scratch_operands = 0 : i64, tpu.core_type = #tpu.core_type<tc>, window_params = [{transform_indices = @transform_0, window_bounds = array<i64: 1, 1, 110, 8>}, {transform_indices = @transform_1, window_bounds = array<i64: 1, 1, 110, 8>}, {transform_indices = @transform_2, window_bounds = array<i64: 1, 1, 110, 8>}, {pipeline_mode = #tpu.pipeline_mode<synchronous>, transform_indices = @transform_3, window_bounds = array<i64: 27, 8, 8>}, {pipeline_mode = #tpu.pipeline_mode<synchronous>, transform_indices = @transform_4, window_bounds = array<i64: 1, 8>}, {transform_indices = @transform_5, window_bounds = array<i64: 1, 1, 80, 8>}, {transform_indices = @transform_6, window_bounds = array<i64: 1, 1, 80, 8>}]} {
    %cst = arith.constant 0.000000e+00 : f32
    %0 = vector.broadcast %cst : f32 to vector<80x8xf32>
    %c0 = arith.constant 0 : index
    %c0_0 = arith.constant 0 : index
    %c0_1 = arith.constant 0 : index
    %c0_2 = arith.constant 0 : index
    %1 = vector.load %arg2[%c0, %c0_0, %c0_1, %c0_2] : memref<1x1x110x8xbf16, #tpu.memory_space<vmem>>, vector<1x1x80x8xbf16>
    %2 = vector.shape_cast %1 : vector<1x1x80x8xbf16> to vector<80x8xbf16>
    %c0_3 = arith.constant 0 : index
    %c0_4 = arith.constant 0 : index
    %c0_5 = arith.constant 0 : index
    %3 = vector.load %arg5[%c0_3, %c0_4, %c0_5] : memref<27x8x8xbf16, #tpu.memory_space<vmem>>, vector<1x8x8xbf16>
    %4 = vector.shape_cast %3 : vector<1x8x8xbf16> to vector<8x8xbf16>
    %cst_6 = arith.constant dense<0.000000e+00> : vector<80x8xf32>
    %5 = tpu.matmul %2, %4, %cst_6 {dimension_numbers = #tpu.dot_dimension_numbers<[1], [0], [0], [1], [0, 0, 1, 1], [], []>} : vector<80x8xbf16>, vector<8x8xbf16>, vector<80x8xf32> -> vector<80x8xf32>
    %6 = arith.addf %0, %5 : vector<80x8xf32>
    %c0_7 = arith.constant 0 : index
    %c0_8 = arith.constant 0 : index
    %c1 = arith.constant 1 : index
    %c0_9 = arith.constant 0 : index
    %7 = vector.load %arg2[%c0_7, %c0_8, %c1, %c0_9] : memref<1x1x110x8xbf16, #tpu.memory_space<vmem>>, vector<1x1x80x8xbf16>
    %8 = vector.shape_cast %7 : vector<1x1x80x8xbf16> to vector<80x8xbf16>
    %c1_10 = arith.constant 1 : index
    %c0_11 = arith.constant 0 : index
    %c0_12 = arith.constant 0 : index
    %9 = vector.load %arg5[%c1_10, %c0_11, %c0_12] : memref<27x8x8xbf16, #tpu.memory_space<vmem>>, vector<1x8x8xbf16>
    %10 = vector.shape_cast %9 : vector<1x8x8xbf16> to vector<8x8xbf16>
    %cst_13 = arith.constant dense<0.000000e+00> : vector<80x8xf32>
    %11 = tpu.matmul %8, %10, %cst_13 {dimension_numbers = #tpu.dot_dimension_numbers<[1], [0], [0], [1], [0, 0, 1, 1], [], []>} : vector<80x8xbf16>, vector<8x8xbf16>, vector<80x8xf32> -> vector<80x8xf32>
    %12 = arith.addf %6, %11 : vector<80x8xf32>
    %c0_14 = arith.constant 0 : index
    %c0_15 = arith.constant 0 : index
    %c2 = arith.constant 2 : index
    %c0_16 = arith.constant 0 : index
    %13 = vector.load %arg2[%c0_14, %c0_15, %c2, %c0_16] : memref<1x1x110x8xbf16, #tpu.memory_space<vmem>>, vector<1x1x80x8xbf16>
    %14 = vector.shape_cast %13 : vector<1x1x80x8xbf16> to vector<80x8xbf16>
    %c2_17 = arith.constant 2 : index
    %c0_18 = arith.constant 0 : index
    %c0_19 = arith.constant 0 : index
    %15 = vector.load %arg5[%c2_17, %c0_18, %c0_19] : memref<27x8x8xbf16, #tpu.memory_space<vmem>>, vector<1x8x8xbf16>
    %16 = vector.shape_cast %15 : vector<1x8x8xbf16> to vector<8x8xbf16>
    %cst_20 = arith.constant dense<0.000000e+00> : vector<80x8xf32>
    %17 = tpu.matmul %14, %16, %cst_20 {dimension_numbers = #tpu.dot_dimension_numbers<[1], [0], [0], [1], [0, 0, 1, 1], [], []>} : vector<80x8xbf16>, vector<8x8xbf16>, vector<80x8xf32> -> vector<80x8xf32>
    %18 = arith.addf %12, %17 : vector<80x8xf32>
    %c0_21 = arith.constant 0 : index
    %c0_22 = arith.constant 0 : index
    %c10 = arith.constant 10 : index
    %c0_23 = arith.constant 0 : index
    %19 = vector.load %arg2[%c0_21, %c0_22, %c10, %c0_23] : memref<1x1x110x8xbf16, #tpu.memory_space<vmem>>, vector<1x1x80x8xbf16>
    %20 = vector.shape_cast %19 : vector<1x1x80x8xbf16> to vector<80x8xbf16>
    %c3 = arith.constant 3 : index
    %c0_24 = arith.constant 0 : index
    %c0_25 = arith.constant 0 : index
    %21 = vector.load %arg5[%c3, %c0_24, %c0_25] : memref<27x8x8xbf16, #tpu.memory_space<vmem>>, vector<1x8x8xbf16>
    %22 = vector.shape_cast %21 : vector<1x8x8xbf16> to vector<8x8xbf16>
    %cst_26 = arith.constant dense<0.000000e+00> : vector<80x8xf32>
    %23 = tpu.matmul %20, %22, %cst_26 {dimension_numbers = #tpu.dot_dimension_numbers<[1], [0], [0], [1], [0, 0, 1, 1], [], []>} : vector<80x8xbf16>, vector<8x8xbf16>, vector<80x8xf32> -> vector<80x8xf32>
    %24 = arith.addf %18, %23 : vector<80x8xf32>
    %c0_27 = arith.constant 0 : index
    %c0_28 = arith.constant 0 : index
    %c11 = arith.constant 11 : index
    %c0_29 = arith.constant 0 : index
    %25 = vector.load %arg2[%c0_27, %c0_28, %c11, %c0_29] : memref<1x1x110x8xbf16, #tpu.memory_space<vmem>>, vector<1x1x80x8xbf16>
    %26 = vector.shape_cast %25 : vector<1x1x80x8xbf16> to vector<80x8xbf16>
    %c4 = arith.constant 4 : index
    %c0_30 = arith.constant 0 : index
    %c0_31 = arith.constant 0 : index
    %27 = vector.load %arg5[%c4, %c0_30, %c0_31] : memref<27x8x8xbf16, #tpu.memory_space<vmem>>, vector<1x8x8xbf16>
    %28 = vector.shape_cast %27 : vector<1x8x8xbf16> to vector<8x8xbf16>
    %cst_32 = arith.constant dense<0.000000e+00> : vector<80x8xf32>
    %29 = tpu.matmul %26, %28, %cst_32 {dimension_numbers = #tpu.dot_dimension_numbers<[1], [0], [0], [1], [0, 0, 1, 1], [], []>} : vector<80x8xbf16>, vector<8x8xbf16>, vector<80x8xf32> -> vector<80x8xf32>
    %30 = arith.addf %24, %29 : vector<80x8xf32>
    %c0_33 = arith.constant 0 : index
    %c0_34 = arith.constant 0 : index
    %c12 = arith.constant 12 : index
    %c0_35 = arith.constant 0 : index
    %31 = vector.load %arg2[%c0_33, %c0_34, %c12, %c0_35] : memref<1x1x110x8xbf16, #tpu.memory_space<vmem>>, vector<1x1x80x8xbf16>
    %32 = vector.shape_cast %31 : vector<1x1x80x8xbf16> to vector<80x8xbf16>
    %c5 = arith.constant 5 : index
    %c0_36 = arith.constant 0 : index
    %c0_37 = arith.constant 0 : index
    %33 = vector.load %arg5[%c5, %c0_36, %c0_37] : memref<27x8x8xbf16, #tpu.memory_space<vmem>>, vector<1x8x8xbf16>
    %34 = vector.shape_cast %33 : vector<1x8x8xbf16> to vector<8x8xbf16>
    %cst_38 = arith.constant dense<0.000000e+00> : vector<80x8xf32>
    %35 = tpu.matmul %32, %34, %cst_38 {dimension_numbers = #tpu.dot_dimension_numbers<[1], [0], [0], [1], [0, 0, 1, 1], [], []>} : vector<80x8xbf16>, vector<8x8xbf16>, vector<80x8xf32> -> vector<80x8xf32>
    %36 = arith.addf %30, %35 : vector<80x8xf32>
    %c0_39 = arith.constant 0 : index
    %c0_40 = arith.constant 0 : index
    %c20 = arith.constant 20 : index
    %c0_41 = arith.constant 0 : index
    %37 = vector.load %arg2[%c0_39, %c0_40, %c20, %c0_41] : memref<1x1x110x8xbf16, #tpu.memory_space<vmem>>, vector<1x1x80x8xbf16>
    %38 = vector.shape_cast %37 : vector<1x1x80x8xbf16> to vector<80x8xbf16>
    %c6 = arith.constant 6 : index
    %c0_42 = arith.constant 0 : index
    %c0_43 = arith.constant 0 : index
    %39 = vector.load %arg5[%c6, %c0_42, %c0_43] : memref<27x8x8xbf16, #tpu.memory_space<vmem>>, vector<1x8x8xbf16>
    %40 = vector.shape_cast %39 : vector<1x8x8xbf16> to vector<8x8xbf16>
    %cst_44 = arith.constant dense<0.000000e+00> : vector<80x8xf32>
    %41 = tpu.matmul %38, %40, %cst_44 {dimension_numbers = #tpu.dot_dimension_numbers<[1], [0], [0], [1], [0, 0, 1, 1], [], []>} : vector<80x8xbf16>, vector<8x8xbf16>, vector<80x8xf32> -> vector<80x8xf32>
    %42 = arith.addf %36, %41 : vector<80x8xf32>
    %c0_45 = arith.constant 0 : index
    %c0_46 = arith.constant 0 : index
    %c21 = arith.constant 21 : index
    %c0_47 = arith.constant 0 : index
    %43 = vector.load %arg2[%c0_45, %c0_46, %c21, %c0_47] : memref<1x1x110x8xbf16, #tpu.memory_space<vmem>>, vector<1x1x80x8xbf16>
    %44 = vector.shape_cast %43 : vector<1x1x80x8xbf16> to vector<80x8xbf16>
    %c7 = arith.constant 7 : index
    %c0_48 = arith.constant 0 : index
    %c0_49 = arith.constant 0 : index
    %45 = vector.load %arg5[%c7, %c0_48, %c0_49] : memref<27x8x8xbf16, #tpu.memory_space<vmem>>, vector<1x8x8xbf16>
    %46 = vector.shape_cast %45 : vector<1x8x8xbf16> to vector<8x8xbf16>
    %cst_50 = arith.constant dense<0.000000e+00> : vector<80x8xf32>
    %47 = tpu.matmul %44, %46, %cst_50 {dimension_numbers = #tpu.dot_dimension_numbers<[1], [0], [0], [1], [0, 0, 1, 1], [], []>} : vector<80x8xbf16>, vector<8x8xbf16>, vector<80x8xf32> -> vector<80x8xf32>
    %48 = arith.addf %42, %47 : vector<80x8xf32>
    %c0_51 = arith.constant 0 : index
    %c0_52 = arith.constant 0 : index
    %c22 = arith.constant 22 : index
    %c0_53 = arith.constant 0 : index
    %49 = vector.load %arg2[%c0_51, %c0_52, %c22, %c0_53] : memref<1x1x110x8xbf16, #tpu.memory_space<vmem>>, vector<1x1x80x8xbf16>
    %50 = vector.shape_cast %49 : vector<1x1x80x8xbf16> to vector<80x8xbf16>
    %c8 = arith.constant 8 : index
    %c0_54 = arith.constant 0 : index
    %c0_55 = arith.constant 0 : index
    %51 = vector.load %arg5[%c8, %c0_54, %c0_55] : memref<27x8x8xbf16, #tpu.memory_space<vmem>>, vector<1x8x8xbf16>
    %52 = vector.shape_cast %51 : vector<1x8x8xbf16> to vector<8x8xbf16>
    %cst_56 = arith.constant dense<0.000000e+00> : vector<80x8xf32>
    %53 = tpu.matmul %50, %52, %cst_56 {dimension_numbers = #tpu.dot_dimension_numbers<[1], [0], [0], [1], [0, 0, 1, 1], [], []>} : vector<80x8xbf16>, vector<8x8xbf16>, vector<80x8xf32> -> vector<80x8xf32>
    %54 = arith.addf %48, %53 : vector<80x8xf32>
    %c0_57 = arith.constant 0 : index
    %c0_58 = arith.constant 0 : index
    %c0_59 = arith.constant 0 : index
    %c0_60 = arith.constant 0 : index
    %55 = vector.load %arg3[%c0_57, %c0_58, %c0_59, %c0_60] : memref<1x1x110x8xbf16, #tpu.memory_space<vmem>>, vector<1x1x80x8xbf16>
    %56 = vector.shape_cast %55 : vector<1x1x80x8xbf16> to vector<80x8xbf16>
    %c9 = arith.constant 9 : index
    %c0_61 = arith.constant 0 : index
    %c0_62 = arith.constant 0 : index
    %57 = vector.load %arg5[%c9, %c0_61, %c0_62] : memref<27x8x8xbf16, #tpu.memory_space<vmem>>, vector<1x8x8xbf16>
    %58 = vector.shape_cast %57 : vector<1x8x8xbf16> to vector<8x8xbf16>
    %cst_63 = arith.constant dense<0.000000e+00> : vector<80x8xf32>
    %59 = tpu.matmul %56, %58, %cst_63 {dimension_numbers = #tpu.dot_dimension_numbers<[1], [0], [0], [1], [0, 0, 1, 1], [], []>} : vector<80x8xbf16>, vector<8x8xbf16>, vector<80x8xf32> -> vector<80x8xf32>
    %60 = arith.addf %54, %59 : vector<80x8xf32>
    %c0_64 = arith.constant 0 : index
    %c0_65 = arith.constant 0 : index
    %c1_66 = arith.constant 1 : index
    %c0_67 = arith.constant 0 : index
    %61 = vector.load %arg3[%c0_64, %c0_65, %c1_66, %c0_67] : memref<1x1x110x8xbf16, #tpu.memory_space<vmem>>, vector<1x1x80x8xbf16>
    %62 = vector.shape_cast %61 : vector<1x1x80x8xbf16> to vector<80x8xbf16>
    %c10_68 = arith.constant 10 : index
    %c0_69 = arith.constant 0 : index
    %c0_70 = arith.constant 0 : index
    %63 = vector.load %arg5[%c10_68, %c0_69, %c0_70] : memref<27x8x8xbf16, #tpu.memory_space<vmem>>, vector<1x8x8xbf16>
    %64 = vector.shape_cast %63 : vector<1x8x8xbf16> to vector<8x8xbf16>
    %cst_71 = arith.constant dense<0.000000e+00> : vector<80x8xf32>
    %65 = tpu.matmul %62, %64, %cst_71 {dimension_numbers = #tpu.dot_dimension_numbers<[1], [0], [0], [1], [0, 0, 1, 1], [], []>} : vector<80x8xbf16>, vector<8x8xbf16>, vector<80x8xf32> -> vector<80x8xf32>
    %66 = arith.addf %60, %65 : vector<80x8xf32>
    %c0_72 = arith.constant 0 : index
    %c0_73 = arith.constant 0 : index
    %c2_74 = arith.constant 2 : index
    %c0_75 = arith.constant 0 : index
    %67 = vector.load %arg3[%c0_72, %c0_73, %c2_74, %c0_75] : memref<1x1x110x8xbf16, #tpu.memory_space<vmem>>, vector<1x1x80x8xbf16>
    %68 = vector.shape_cast %67 : vector<1x1x80x8xbf16> to vector<80x8xbf16>
    %c11_76 = arith.constant 11 : index
    %c0_77 = arith.constant 0 : index
    %c0_78 = arith.constant 0 : index
    %69 = vector.load %arg5[%c11_76, %c0_77, %c0_78] : memref<27x8x8xbf16, #tpu.memory_space<vmem>>, vector<1x8x8xbf16>
    %70 = vector.shape_cast %69 : vector<1x8x8xbf16> to vector<8x8xbf16>
    %cst_79 = arith.constant dense<0.000000e+00> : vector<80x8xf32>
    %71 = tpu.matmul %68, %70, %cst_79 {dimension_numbers = #tpu.dot_dimension_numbers<[1], [0], [0], [1], [0, 0, 1, 1], [], []>} : vector<80x8xbf16>, vector<8x8xbf16>, vector<80x8xf32> -> vector<80x8xf32>
    %72 = arith.addf %66, %71 : vector<80x8xf32>
    %c0_80 = arith.constant 0 : index
    %c0_81 = arith.constant 0 : index
    %c10_82 = arith.constant 10 : index
    %c0_83 = arith.constant 0 : index
    %73 = vector.load %arg3[%c0_80, %c0_81, %c10_82, %c0_83] : memref<1x1x110x8xbf16, #tpu.memory_space<vmem>>, vector<1x1x80x8xbf16>
    %74 = vector.shape_cast %73 : vector<1x1x80x8xbf16> to vector<80x8xbf16>
    %c12_84 = arith.constant 12 : index
    %c0_85 = arith.constant 0 : index
    %c0_86 = arith.constant 0 : index
    %75 = vector.load %arg5[%c12_84, %c0_85, %c0_86] : memref<27x8x8xbf16, #tpu.memory_space<vmem>>, vector<1x8x8xbf16>
    %76 = vector.shape_cast %75 : vector<1x8x8xbf16> to vector<8x8xbf16>
    %cst_87 = arith.constant dense<0.000000e+00> : vector<80x8xf32>
    %77 = tpu.matmul %74, %76, %cst_87 {dimension_numbers = #tpu.dot_dimension_numbers<[1], [0], [0], [1], [0, 0, 1, 1], [], []>} : vector<80x8xbf16>, vector<8x8xbf16>, vector<80x8xf32> -> vector<80x8xf32>
    %78 = arith.addf %72, %77 : vector<80x8xf32>
    %c0_88 = arith.constant 0 : index
    %c0_89 = arith.constant 0 : index
    %c11_90 = arith.constant 11 : index
    %c0_91 = arith.constant 0 : index
    %79 = vector.load %arg3[%c0_88, %c0_89, %c11_90, %c0_91] : memref<1x1x110x8xbf16, #tpu.memory_space<vmem>>, vector<1x1x80x8xbf16>
    %80 = vector.shape_cast %79 : vector<1x1x80x8xbf16> to vector<80x8xbf16>
    %c13 = arith.constant 13 : index
    %c0_92 = arith.constant 0 : index
    %c0_93 = arith.constant 0 : index
    %81 = vector.load %arg5[%c13, %c0_92, %c0_93] : memref<27x8x8xbf16, #tpu.memory_space<vmem>>, vector<1x8x8xbf16>
    %82 = vector.shape_cast %81 : vector<1x8x8xbf16> to vector<8x8xbf16>
    %cst_94 = arith.constant dense<0.000000e+00> : vector<80x8xf32>
    %83 = tpu.matmul %80, %82, %cst_94 {dimension_numbers = #tpu.dot_dimension_numbers<[1], [0], [0], [1], [0, 0, 1, 1], [], []>} : vector<80x8xbf16>, vector<8x8xbf16>, vector<80x8xf32> -> vector<80x8xf32>
    %84 = arith.addf %78, %83 : vector<80x8xf32>
    %c0_95 = arith.constant 0 : index
    %c0_96 = arith.constant 0 : index
    %c12_97 = arith.constant 12 : index
    %c0_98 = arith.constant 0 : index
    %85 = vector.load %arg3[%c0_95, %c0_96, %c12_97, %c0_98] : memref<1x1x110x8xbf16, #tpu.memory_space<vmem>>, vector<1x1x80x8xbf16>
    %86 = vector.shape_cast %85 : vector<1x1x80x8xbf16> to vector<80x8xbf16>
    %c14 = arith.constant 14 : index
    %c0_99 = arith.constant 0 : index
    %c0_100 = arith.constant 0 : index
    %87 = vector.load %arg5[%c14, %c0_99, %c0_100] : memref<27x8x8xbf16, #tpu.memory_space<vmem>>, vector<1x8x8xbf16>
    %88 = vector.shape_cast %87 : vector<1x8x8xbf16> to vector<8x8xbf16>
    %cst_101 = arith.constant dense<0.000000e+00> : vector<80x8xf32>
    %89 = tpu.matmul %86, %88, %cst_101 {dimension_numbers = #tpu.dot_dimension_numbers<[1], [0], [0], [1], [0, 0, 1, 1], [], []>} : vector<80x8xbf16>, vector<8x8xbf16>, vector<80x8xf32> -> vector<80x8xf32>
    %90 = arith.addf %84, %89 : vector<80x8xf32>
    %c0_102 = arith.constant 0 : index
    %c0_103 = arith.constant 0 : index
    %c20_104 = arith.constant 20 : index
    %c0_105 = arith.constant 0 : index
    %91 = vector.load %arg3[%c0_102, %c0_103, %c20_104, %c0_105] : memref<1x1x110x8xbf16, #tpu.memory_space<vmem>>, vector<1x1x80x8xbf16>
    %92 = vector.shape_cast %91 : vector<1x1x80x8xbf16> to vector<80x8xbf16>
    %c15 = arith.constant 15 : index
    %c0_106 = arith.constant 0 : index
    %c0_107 = arith.constant 0 : index
    %93 = vector.load %arg5[%c15, %c0_106, %c0_107] : memref<27x8x8xbf16, #tpu.memory_space<vmem>>, vector<1x8x8xbf16>
    %94 = vector.shape_cast %93 : vector<1x8x8xbf16> to vector<8x8xbf16>
    %cst_108 = arith.constant dense<0.000000e+00> : vector<80x8xf32>
    %95 = tpu.matmul %92, %94, %cst_108 {dimension_numbers = #tpu.dot_dimension_numbers<[1], [0], [0], [1], [0, 0, 1, 1], [], []>} : vector<80x8xbf16>, vector<8x8xbf16>, vector<80x8xf32> -> vector<80x8xf32>
    %96 = arith.addf %90, %95 : vector<80x8xf32>
    %c0_109 = arith.constant 0 : index
    %c0_110 = arith.constant 0 : index
    %c21_111 = arith.constant 21 : index
    %c0_112 = arith.constant 0 : index
    %97 = vector.load %arg3[%c0_109, %c0_110, %c21_111, %c0_112] : memref<1x1x110x8xbf16, #tpu.memory_space<vmem>>, vector<1x1x80x8xbf16>
    %98 = vector.shape_cast %97 : vector<1x1x80x8xbf16> to vector<80x8xbf16>
    %c16 = arith.constant 16 : index
    %c0_113 = arith.constant 0 : index
    %c0_114 = arith.constant 0 : index
    %99 = vector.load %arg5[%c16, %c0_113, %c0_114] : memref<27x8x8xbf16, #tpu.memory_space<vmem>>, vector<1x8x8xbf16>
    %100 = vector.shape_cast %99 : vector<1x8x8xbf16> to vector<8x8xbf16>
    %cst_115 = arith.constant dense<0.000000e+00> : vector<80x8xf32>
    %101 = tpu.matmul %98, %100, %cst_115 {dimension_numbers = #tpu.dot_dimension_numbers<[1], [0], [0], [1], [0, 0, 1, 1], [], []>} : vector<80x8xbf16>, vector<8x8xbf16>, vector<80x8xf32> -> vector<80x8xf32>
    %102 = arith.addf %96, %101 : vector<80x8xf32>
    %c0_116 = arith.constant 0 : index
    %c0_117 = arith.constant 0 : index
    %c22_118 = arith.constant 22 : index
    %c0_119 = arith.constant 0 : index
    %103 = vector.load %arg3[%c0_116, %c0_117, %c22_118, %c0_119] : memref<1x1x110x8xbf16, #tpu.memory_space<vmem>>, vector<1x1x80x8xbf16>
    %104 = vector.shape_cast %103 : vector<1x1x80x8xbf16> to vector<80x8xbf16>
    %c17 = arith.constant 17 : index
    %c0_120 = arith.constant 0 : index
    %c0_121 = arith.constant 0 : index
    %105 = vector.load %arg5[%c17, %c0_120, %c0_121] : memref<27x8x8xbf16, #tpu.memory_space<vmem>>, vector<1x8x8xbf16>
    %106 = vector.shape_cast %105 : vector<1x8x8xbf16> to vector<8x8xbf16>
    %cst_122 = arith.constant dense<0.000000e+00> : vector<80x8xf32>
    %107 = tpu.matmul %104, %106, %cst_122 {dimension_numbers = #tpu.dot_dimension_numbers<[1], [0], [0], [1], [0, 0, 1, 1], [], []>} : vector<80x8xbf16>, vector<8x8xbf16>, vector<80x8xf32> -> vector<80x8xf32>
    %108 = arith.addf %102, %107 : vector<80x8xf32>
    %c0_123 = arith.constant 0 : index
    %c0_124 = arith.constant 0 : index
    %c0_125 = arith.constant 0 : index
    %c0_126 = arith.constant 0 : index
    %109 = vector.load %arg4[%c0_123, %c0_124, %c0_125, %c0_126] : memref<1x1x110x8xbf16, #tpu.memory_space<vmem>>, vector<1x1x80x8xbf16>
    %110 = vector.shape_cast %109 : vector<1x1x80x8xbf16> to vector<80x8xbf16>
    %c18 = arith.constant 18 : index
    %c0_127 = arith.constant 0 : index
    %c0_128 = arith.constant 0 : index
    %111 = vector.load %arg5[%c18, %c0_127, %c0_128] : memref<27x8x8xbf16, #tpu.memory_space<vmem>>, vector<1x8x8xbf16>
    %112 = vector.shape_cast %111 : vector<1x8x8xbf16> to vector<8x8xbf16>
    %cst_129 = arith.constant dense<0.000000e+00> : vector<80x8xf32>
    %113 = tpu.matmul %110, %112, %cst_129 {dimension_numbers = #tpu.dot_dimension_numbers<[1], [0], [0], [1], [0, 0, 1, 1], [], []>} : vector<80x8xbf16>, vector<8x8xbf16>, vector<80x8xf32> -> vector<80x8xf32>
    %114 = arith.addf %108, %113 : vector<80x8xf32>
    %c0_130 = arith.constant 0 : index
    %c0_131 = arith.constant 0 : index
    %c1_132 = arith.constant 1 : index
    %c0_133 = arith.constant 0 : index
    %115 = vector.load %arg4[%c0_130, %c0_131, %c1_132, %c0_133] : memref<1x1x110x8xbf16, #tpu.memory_space<vmem>>, vector<1x1x80x8xbf16>
    %116 = vector.shape_cast %115 : vector<1x1x80x8xbf16> to vector<80x8xbf16>
    %c19 = arith.constant 19 : index
    %c0_134 = arith.constant 0 : index
    %c0_135 = arith.constant 0 : index
    %117 = vector.load %arg5[%c19, %c0_134, %c0_135] : memref<27x8x8xbf16, #tpu.memory_space<vmem>>, vector<1x8x8xbf16>
    %118 = vector.shape_cast %117 : vector<1x8x8xbf16> to vector<8x8xbf16>
    %cst_136 = arith.constant dense<0.000000e+00> : vector<80x8xf32>
    %119 = tpu.matmul %116, %118, %cst_136 {dimension_numbers = #tpu.dot_dimension_numbers<[1], [0], [0], [1], [0, 0, 1, 1], [], []>} : vector<80x8xbf16>, vector<8x8xbf16>, vector<80x8xf32> -> vector<80x8xf32>
    %120 = arith.addf %114, %119 : vector<80x8xf32>
    %c0_137 = arith.constant 0 : index
    %c0_138 = arith.constant 0 : index
    %c2_139 = arith.constant 2 : index
    %c0_140 = arith.constant 0 : index
    %121 = vector.load %arg4[%c0_137, %c0_138, %c2_139, %c0_140] : memref<1x1x110x8xbf16, #tpu.memory_space<vmem>>, vector<1x1x80x8xbf16>
    %122 = vector.shape_cast %121 : vector<1x1x80x8xbf16> to vector<80x8xbf16>
    %c20_141 = arith.constant 20 : index
    %c0_142 = arith.constant 0 : index
    %c0_143 = arith.constant 0 : index
    %123 = vector.load %arg5[%c20_141, %c0_142, %c0_143] : memref<27x8x8xbf16, #tpu.memory_space<vmem>>, vector<1x8x8xbf16>
    %124 = vector.shape_cast %123 : vector<1x8x8xbf16> to vector<8x8xbf16>
    %cst_144 = arith.constant dense<0.000000e+00> : vector<80x8xf32>
    %125 = tpu.matmul %122, %124, %cst_144 {dimension_numbers = #tpu.dot_dimension_numbers<[1], [0], [0], [1], [0, 0, 1, 1], [], []>} : vector<80x8xbf16>, vector<8x8xbf16>, vector<80x8xf32> -> vector<80x8xf32>
    %126 = arith.addf %120, %125 : vector<80x8xf32>
    %c0_145 = arith.constant 0 : index
    %c0_146 = arith.constant 0 : index
    %c10_147 = arith.constant 10 : index
    %c0_148 = arith.constant 0 : index
    %127 = vector.load %arg4[%c0_145, %c0_146, %c10_147, %c0_148] : memref<1x1x110x8xbf16, #tpu.memory_space<vmem>>, vector<1x1x80x8xbf16>
    %128 = vector.shape_cast %127 : vector<1x1x80x8xbf16> to vector<80x8xbf16>
    %c21_149 = arith.constant 21 : index
    %c0_150 = arith.constant 0 : index
    %c0_151 = arith.constant 0 : index
    %129 = vector.load %arg5[%c21_149, %c0_150, %c0_151] : memref<27x8x8xbf16, #tpu.memory_space<vmem>>, vector<1x8x8xbf16>
    %130 = vector.shape_cast %129 : vector<1x8x8xbf16> to vector<8x8xbf16>
    %cst_152 = arith.constant dense<0.000000e+00> : vector<80x8xf32>
    %131 = tpu.matmul %128, %130, %cst_152 {dimension_numbers = #tpu.dot_dimension_numbers<[1], [0], [0], [1], [0, 0, 1, 1], [], []>} : vector<80x8xbf16>, vector<8x8xbf16>, vector<80x8xf32> -> vector<80x8xf32>
    %132 = arith.addf %126, %131 : vector<80x8xf32>
    %c0_153 = arith.constant 0 : index
    %c0_154 = arith.constant 0 : index
    %c11_155 = arith.constant 11 : index
    %c0_156 = arith.constant 0 : index
    %133 = vector.load %arg4[%c0_153, %c0_154, %c11_155, %c0_156] : memref<1x1x110x8xbf16, #tpu.memory_space<vmem>>, vector<1x1x80x8xbf16>
    %134 = vector.shape_cast %133 : vector<1x1x80x8xbf16> to vector<80x8xbf16>
    %c22_157 = arith.constant 22 : index
    %c0_158 = arith.constant 0 : index
    %c0_159 = arith.constant 0 : index
    %135 = vector.load %arg5[%c22_157, %c0_158, %c0_159] : memref<27x8x8xbf16, #tpu.memory_space<vmem>>, vector<1x8x8xbf16>
    %136 = vector.shape_cast %135 : vector<1x8x8xbf16> to vector<8x8xbf16>
    %cst_160 = arith.constant dense<0.000000e+00> : vector<80x8xf32>
    %137 = tpu.matmul %134, %136, %cst_160 {dimension_numbers = #tpu.dot_dimension_numbers<[1], [0], [0], [1], [0, 0, 1, 1], [], []>} : vector<80x8xbf16>, vector<8x8xbf16>, vector<80x8xf32> -> vector<80x8xf32>
    %138 = arith.addf %132, %137 : vector<80x8xf32>
    %c0_161 = arith.constant 0 : index
    %c0_162 = arith.constant 0 : index
    %c12_163 = arith.constant 12 : index
    %c0_164 = arith.constant 0 : index
    %139 = vector.load %arg4[%c0_161, %c0_162, %c12_163, %c0_164] : memref<1x1x110x8xbf16, #tpu.memory_space<vmem>>, vector<1x1x80x8xbf16>
    %140 = vector.shape_cast %139 : vector<1x1x80x8xbf16> to vector<80x8xbf16>
    %c23 = arith.constant 23 : index
    %c0_165 = arith.constant 0 : index
    %c0_166 = arith.constant 0 : index
    %141 = vector.load %arg5[%c23, %c0_165, %c0_166] : memref<27x8x8xbf16, #tpu.memory_space<vmem>>, vector<1x8x8xbf16>
    %142 = vector.shape_cast %141 : vector<1x8x8xbf16> to vector<8x8xbf16>
    %cst_167 = arith.constant dense<0.000000e+00> : vector<80x8xf32>
    %143 = tpu.matmul %140, %142, %cst_167 {dimension_numbers = #tpu.dot_dimension_numbers<[1], [0], [0], [1], [0, 0, 1, 1], [], []>} : vector<80x8xbf16>, vector<8x8xbf16>, vector<80x8xf32> -> vector<80x8xf32>
    %144 = arith.addf %138, %143 : vector<80x8xf32>
    %c0_168 = arith.constant 0 : index
    %c0_169 = arith.constant 0 : index
    %c20_170 = arith.constant 20 : index
    %c0_171 = arith.constant 0 : index
    %145 = vector.load %arg4[%c0_168, %c0_169, %c20_170, %c0_171] : memref<1x1x110x8xbf16, #tpu.memory_space<vmem>>, vector<1x1x80x8xbf16>
    %146 = vector.shape_cast %145 : vector<1x1x80x8xbf16> to vector<80x8xbf16>
    %c24 = arith.constant 24 : index
    %c0_172 = arith.constant 0 : index
    %c0_173 = arith.constant 0 : index
    %147 = vector.load %arg5[%c24, %c0_172, %c0_173] : memref<27x8x8xbf16, #tpu.memory_space<vmem>>, vector<1x8x8xbf16>
    %148 = vector.shape_cast %147 : vector<1x8x8xbf16> to vector<8x8xbf16>
    %cst_174 = arith.constant dense<0.000000e+00> : vector<80x8xf32>
    %149 = tpu.matmul %146, %148, %cst_174 {dimension_numbers = #tpu.dot_dimension_numbers<[1], [0], [0], [1], [0, 0, 1, 1], [], []>} : vector<80x8xbf16>, vector<8x8xbf16>, vector<80x8xf32> -> vector<80x8xf32>
    %150 = arith.addf %144, %149 : vector<80x8xf32>
    %c0_175 = arith.constant 0 : index
    %c0_176 = arith.constant 0 : index
    %c21_177 = arith.constant 21 : index
    %c0_178 = arith.constant 0 : index
    %151 = vector.load %arg4[%c0_175, %c0_176, %c21_177, %c0_178] : memref<1x1x110x8xbf16, #tpu.memory_space<vmem>>, vector<1x1x80x8xbf16>
    %152 = vector.shape_cast %151 : vector<1x1x80x8xbf16> to vector<80x8xbf16>
    %c25 = arith.constant 25 : index
    %c0_179 = arith.constant 0 : index
    %c0_180 = arith.constant 0 : index
    %153 = vector.load %arg5[%c25, %c0_179, %c0_180] : memref<27x8x8xbf16, #tpu.memory_space<vmem>>, vector<1x8x8xbf16>
    %154 = vector.shape_cast %153 : vector<1x8x8xbf16> to vector<8x8xbf16>
    %cst_181 = arith.constant dense<0.000000e+00> : vector<80x8xf32>
    %155 = tpu.matmul %152, %154, %cst_181 {dimension_numbers = #tpu.dot_dimension_numbers<[1], [0], [0], [1], [0, 0, 1, 1], [], []>} : vector<80x8xbf16>, vector<8x8xbf16>, vector<80x8xf32> -> vector<80x8xf32>
    %156 = arith.addf %150, %155 : vector<80x8xf32>
    %c0_182 = arith.constant 0 : index
    %c0_183 = arith.constant 0 : index
    %c22_184 = arith.constant 22 : index
    %c0_185 = arith.constant 0 : index
    %157 = vector.load %arg4[%c0_182, %c0_183, %c22_184, %c0_185] : memref<1x1x110x8xbf16, #tpu.memory_space<vmem>>, vector<1x1x80x8xbf16>
    %158 = vector.shape_cast %157 : vector<1x1x80x8xbf16> to vector<80x8xbf16>
    %c26 = arith.constant 26 : index
    %c0_186 = arith.constant 0 : index
    %c0_187 = arith.constant 0 : index
    %159 = vector.load %arg5[%c26, %c0_186, %c0_187] : memref<27x8x8xbf16, #tpu.memory_space<vmem>>, vector<1x8x8xbf16>
    %160 = vector.shape_cast %159 : vector<1x8x8xbf16> to vector<8x8xbf16>
    %cst_188 = arith.constant dense<0.000000e+00> : vector<80x8xf32>
    %161 = tpu.matmul %158, %160, %cst_188 {dimension_numbers = #tpu.dot_dimension_numbers<[1], [0], [0], [1], [0, 0, 1, 1], [], []>} : vector<80x8xbf16>, vector<8x8xbf16>, vector<80x8xf32> -> vector<80x8xf32>
    %162 = arith.addf %156, %161 : vector<80x8xf32>
    %c0_189 = arith.constant 0 : index
    %c0_190 = arith.constant 0 : index
    %163 = vector.load %arg6[%c0_189, %c0_190] : memref<1x8xf32, #tpu.memory_space<vmem>>, vector<1x8xf32>
    %164 = vector.broadcast %163 : vector<1x8xf32> to vector<80x8xf32>
    %165 = arith.addf %162, %164 : vector<80x8xf32>
    %c0_191 = arith.constant 0 : index
    %c0_192 = arith.constant 0 : index
    %c0_193 = arith.constant 0 : index
    %c0_194 = arith.constant 0 : index
    %166 = vector.load %arg7[%c0_191, %c0_192, %c0_193, %c0_194] : memref<1x1x80x8xbf16, #tpu.memory_space<vmem>>, vector<1x1x80x8xbf16>
    %167 = vector.shape_cast %166 : vector<1x1x80x8xbf16> to vector<80x8xbf16>
    %168 = arith.extf %167 : vector<80x8xbf16> to vector<80x8xf32>
    %169 = arith.addf %165, %168 : vector<80x8xf32>
    %cst_195 = arith.constant 0.000000e+00 : f32
    %170 = vector.broadcast %cst_195 : f32 to vector<80x8xf32>
    %171 = arith.maximumf %169, %170 : vector<80x8xf32>
    %172 = arith.truncf %171 : vector<80x8xf32> to vector<80x8xbf16>
    %c0_196 = arith.constant 0 : index
    %c0_197 = arith.constant 0 : index
    %c0_198 = arith.constant 0 : index
    %c0_199 = arith.constant 0 : index
    %173 = vector.load %arg8[%c0_196, %c0_197, %c0_198, %c0_199] : memref<1x1x80x8xbf16, #tpu.memory_space<vmem>>, vector<1x1x80x8xbf16>
    %174 = vector.shape_cast %173 : vector<1x1x80x8xbf16> to vector<80x8xbf16>
    %175 = vector.shape_cast %172 : vector<80x8xbf16> to vector<1x1x80x8xbf16>
    tpu.vector_store %arg8[%c0_196, %c0_197, %c0_198, %c0_199], %175 {strides = array<i32>} : memref<1x1x80x8xbf16, #tpu.memory_space<vmem>>, vector<1x1x80x8xbf16>,
    return
  }
  func.func @transform_0(%arg0: i32, %arg1: i32) -> (i32, i32, i32, i32) {
    %c0_i32 = arith.constant 0 : i32
    %0 = arith.addi %arg1, %c0_i32 : i32
    %c0_i32_0 = arith.constant 0 : i32
    %c0_i32_1 = arith.constant 0 : i32
    %c0_i32_2 = arith.constant 0 : i32
    return %arg0, %0, %c0_i32_0, %c0_i32_1 : i32, i32, i32, i32
  }
  func.func @transform_1(%arg0: i32, %arg1: i32) -> (i32, i32, i32, i32) {
    %c1_i32 = arith.constant 1 : i32
    %0 = arith.addi %arg1, %c1_i32 : i32
    %c0_i32 = arith.constant 0 : i32
    %c0_i32_0 = arith.constant 0 : i32
    %c0_i32_1 = arith.constant 0 : i32
    return %arg0, %0, %c0_i32, %c0_i32_0 : i32, i32, i32, i32
  }
  func.func @transform_2(%arg0: i32, %arg1: i32) -> (i32, i32, i32, i32) {
    %c2_i32 = arith.constant 2 : i32
    %0 = arith.addi %arg1, %c2_i32 : i32
    %c0_i32 = arith.constant 0 : i32
    %c0_i32_0 = arith.constant 0 : i32
    %c0_i32_1 = arith.constant 0 : i32
    return %arg0, %0, %c0_i32, %c0_i32_0 : i32, i32, i32, i32
  }
  func.func @transform_3(%arg0: i32, %arg1: i32) -> (i32, i32, i32) {
    %c0_i32 = arith.constant 0 : i32
    %c0_i32_0 = arith.constant 0 : i32
    %c0_i32_1 = arith.constant 0 : i32
    %c0_i32_2 = arith.constant 0 : i32
    return %c0_i32, %c0_i32_0, %c0_i32_1 : i32, i32, i32
  }
  func.func @transform_4(%arg0: i32, %arg1: i32) -> (i32, i32) {
    %c0_i32 = arith.constant 0 : i32
    %c0_i32_0 = arith.constant 0 : i32
    %c0_i32_1 = arith.constant 0 : i32
    return %c0_i32, %c0_i32_0 : i32, i32
  }
  func.func @transform_5(%arg0: i32, %arg1: i32) -> (i32, i32, i32, i32) {
    %c0_i32 = arith.constant 0 : i32
    %c0_i32_0 = arith.constant 0 : i32
    %c0_i32_1 = arith.constant 0 : i32
    return %arg0, %arg1, %c0_i32, %c0_i32_0 : i32, i32, i32, i32
  }
  func.func @transform_6(%arg0: i32, %arg1: i32) -> (i32, i32, i32, i32) {
    %c0_i32 = arith.constant 0 : i32
    %c0_i32_0 = arith.constant 0 : i32
    %c0_i32_1 = arith.constant 0 : i32
    return %arg0, %arg1, %c0_i32, %c0_i32_0 : i32, i32, i32, i32
  }
}

module attributes {stable_mosaic.version = 11 : i64} {
  func.func @_conv_plain_kernel(%arg0: i32, %arg1: i32, %arg2: memref<1x1x110x8xbf16, #tpu.memory_space<vmem>>, %arg3: memref<1x1x110x8xbf16, #tpu.memory_space<vmem>>, %arg4: memref<1x1x110x8xbf16, #tpu.memory_space<vmem>>, %arg5: memref<27x8x3xbf16, #tpu.memory_space<vmem>>, %arg6: memref<1x1x80x3xf32, #tpu.memory_space<vmem>>) attributes {dimension_semantics = [#tpu.dimension_semantics<parallel>, #tpu.dimension_semantics<parallel>], iteration_bounds = array<i64: 2, 8>, scalar_prefetch = 0 : i64, scratch_operands = 0 : i64, tpu.core_type = #tpu.core_type<tc>, window_params = [{transform_indices = @transform_0, window_bounds = array<i64: 1, 1, 110, 8>}, {transform_indices = @transform_1, window_bounds = array<i64: 1, 1, 110, 8>}, {transform_indices = @transform_2, window_bounds = array<i64: 1, 1, 110, 8>}, {pipeline_mode = #tpu.pipeline_mode<synchronous>, transform_indices = @transform_3, window_bounds = array<i64: 27, 8, 3>}, {transform_indices = @transform_4, window_bounds = array<i64: 1, 1, 80, 3>}]} {
    %cst = arith.constant 0.000000e+00 : f32
    %0 = vector.broadcast %cst : f32 to vector<80x3xf32>
    %c0 = arith.constant 0 : index
    %c0_0 = arith.constant 0 : index
    %c0_1 = arith.constant 0 : index
    %c0_2 = arith.constant 0 : index
    %1 = vector.load %arg2[%c0, %c0_0, %c0_1, %c0_2] : memref<1x1x110x8xbf16, #tpu.memory_space<vmem>>, vector<1x1x80x8xbf16>
    %2 = vector.shape_cast %1 : vector<1x1x80x8xbf16> to vector<80x8xbf16>
    %c0_3 = arith.constant 0 : index
    %c0_4 = arith.constant 0 : index
    %c0_5 = arith.constant 0 : index
    %3 = vector.load %arg5[%c0_3, %c0_4, %c0_5] : memref<27x8x3xbf16, #tpu.memory_space<vmem>>, vector<1x8x3xbf16>
    %4 = vector.shape_cast %3 : vector<1x8x3xbf16> to vector<8x3xbf16>
    %cst_6 = arith.constant dense<0.000000e+00> : vector<80x3xf32>
    %5 = tpu.matmul %2, %4, %cst_6 {dimension_numbers = #tpu.dot_dimension_numbers<[1], [0], [0], [1], [0, 0, 1, 1], [], []>} : vector<80x8xbf16>, vector<8x3xbf16>, vector<80x3xf32> -> vector<80x3xf32>
    %6 = arith.addf %0, %5 : vector<80x3xf32>
    %c0_7 = arith.constant 0 : index
    %c0_8 = arith.constant 0 : index
    %c1 = arith.constant 1 : index
    %c0_9 = arith.constant 0 : index
    %7 = vector.load %arg2[%c0_7, %c0_8, %c1, %c0_9] : memref<1x1x110x8xbf16, #tpu.memory_space<vmem>>, vector<1x1x80x8xbf16>
    %8 = vector.shape_cast %7 : vector<1x1x80x8xbf16> to vector<80x8xbf16>
    %c1_10 = arith.constant 1 : index
    %c0_11 = arith.constant 0 : index
    %c0_12 = arith.constant 0 : index
    %9 = vector.load %arg5[%c1_10, %c0_11, %c0_12] : memref<27x8x3xbf16, #tpu.memory_space<vmem>>, vector<1x8x3xbf16>
    %10 = vector.shape_cast %9 : vector<1x8x3xbf16> to vector<8x3xbf16>
    %cst_13 = arith.constant dense<0.000000e+00> : vector<80x3xf32>
    %11 = tpu.matmul %8, %10, %cst_13 {dimension_numbers = #tpu.dot_dimension_numbers<[1], [0], [0], [1], [0, 0, 1, 1], [], []>} : vector<80x8xbf16>, vector<8x3xbf16>, vector<80x3xf32> -> vector<80x3xf32>
    %12 = arith.addf %6, %11 : vector<80x3xf32>
    %c0_14 = arith.constant 0 : index
    %c0_15 = arith.constant 0 : index
    %c2 = arith.constant 2 : index
    %c0_16 = arith.constant 0 : index
    %13 = vector.load %arg2[%c0_14, %c0_15, %c2, %c0_16] : memref<1x1x110x8xbf16, #tpu.memory_space<vmem>>, vector<1x1x80x8xbf16>
    %14 = vector.shape_cast %13 : vector<1x1x80x8xbf16> to vector<80x8xbf16>
    %c2_17 = arith.constant 2 : index
    %c0_18 = arith.constant 0 : index
    %c0_19 = arith.constant 0 : index
    %15 = vector.load %arg5[%c2_17, %c0_18, %c0_19] : memref<27x8x3xbf16, #tpu.memory_space<vmem>>, vector<1x8x3xbf16>
    %16 = vector.shape_cast %15 : vector<1x8x3xbf16> to vector<8x3xbf16>
    %cst_20 = arith.constant dense<0.000000e+00> : vector<80x3xf32>
    %17 = tpu.matmul %14, %16, %cst_20 {dimension_numbers = #tpu.dot_dimension_numbers<[1], [0], [0], [1], [0, 0, 1, 1], [], []>} : vector<80x8xbf16>, vector<8x3xbf16>, vector<80x3xf32> -> vector<80x3xf32>
    %18 = arith.addf %12, %17 : vector<80x3xf32>
    %c0_21 = arith.constant 0 : index
    %c0_22 = arith.constant 0 : index
    %c10 = arith.constant 10 : index
    %c0_23 = arith.constant 0 : index
    %19 = vector.load %arg2[%c0_21, %c0_22, %c10, %c0_23] : memref<1x1x110x8xbf16, #tpu.memory_space<vmem>>, vector<1x1x80x8xbf16>
    %20 = vector.shape_cast %19 : vector<1x1x80x8xbf16> to vector<80x8xbf16>
    %c3 = arith.constant 3 : index
    %c0_24 = arith.constant 0 : index
    %c0_25 = arith.constant 0 : index
    %21 = vector.load %arg5[%c3, %c0_24, %c0_25] : memref<27x8x3xbf16, #tpu.memory_space<vmem>>, vector<1x8x3xbf16>
    %22 = vector.shape_cast %21 : vector<1x8x3xbf16> to vector<8x3xbf16>
    %cst_26 = arith.constant dense<0.000000e+00> : vector<80x3xf32>
    %23 = tpu.matmul %20, %22, %cst_26 {dimension_numbers = #tpu.dot_dimension_numbers<[1], [0], [0], [1], [0, 0, 1, 1], [], []>} : vector<80x8xbf16>, vector<8x3xbf16>, vector<80x3xf32> -> vector<80x3xf32>
    %24 = arith.addf %18, %23 : vector<80x3xf32>
    %c0_27 = arith.constant 0 : index
    %c0_28 = arith.constant 0 : index
    %c11 = arith.constant 11 : index
    %c0_29 = arith.constant 0 : index
    %25 = vector.load %arg2[%c0_27, %c0_28, %c11, %c0_29] : memref<1x1x110x8xbf16, #tpu.memory_space<vmem>>, vector<1x1x80x8xbf16>
    %26 = vector.shape_cast %25 : vector<1x1x80x8xbf16> to vector<80x8xbf16>
    %c4 = arith.constant 4 : index
    %c0_30 = arith.constant 0 : index
    %c0_31 = arith.constant 0 : index
    %27 = vector.load %arg5[%c4, %c0_30, %c0_31] : memref<27x8x3xbf16, #tpu.memory_space<vmem>>, vector<1x8x3xbf16>
    %28 = vector.shape_cast %27 : vector<1x8x3xbf16> to vector<8x3xbf16>
    %cst_32 = arith.constant dense<0.000000e+00> : vector<80x3xf32>
    %29 = tpu.matmul %26, %28, %cst_32 {dimension_numbers = #tpu.dot_dimension_numbers<[1], [0], [0], [1], [0, 0, 1, 1], [], []>} : vector<80x8xbf16>, vector<8x3xbf16>, vector<80x3xf32> -> vector<80x3xf32>
    %30 = arith.addf %24, %29 : vector<80x3xf32>
    %c0_33 = arith.constant 0 : index
    %c0_34 = arith.constant 0 : index
    %c12 = arith.constant 12 : index
    %c0_35 = arith.constant 0 : index
    %31 = vector.load %arg2[%c0_33, %c0_34, %c12, %c0_35] : memref<1x1x110x8xbf16, #tpu.memory_space<vmem>>, vector<1x1x80x8xbf16>
    %32 = vector.shape_cast %31 : vector<1x1x80x8xbf16> to vector<80x8xbf16>
    %c5 = arith.constant 5 : index
    %c0_36 = arith.constant 0 : index
    %c0_37 = arith.constant 0 : index
    %33 = vector.load %arg5[%c5, %c0_36, %c0_37] : memref<27x8x3xbf16, #tpu.memory_space<vmem>>, vector<1x8x3xbf16>
    %34 = vector.shape_cast %33 : vector<1x8x3xbf16> to vector<8x3xbf16>
    %cst_38 = arith.constant dense<0.000000e+00> : vector<80x3xf32>
    %35 = tpu.matmul %32, %34, %cst_38 {dimension_numbers = #tpu.dot_dimension_numbers<[1], [0], [0], [1], [0, 0, 1, 1], [], []>} : vector<80x8xbf16>, vector<8x3xbf16>, vector<80x3xf32> -> vector<80x3xf32>
    %36 = arith.addf %30, %35 : vector<80x3xf32>
    %c0_39 = arith.constant 0 : index
    %c0_40 = arith.constant 0 : index
    %c20 = arith.constant 20 : index
    %c0_41 = arith.constant 0 : index
    %37 = vector.load %arg2[%c0_39, %c0_40, %c20, %c0_41] : memref<1x1x110x8xbf16, #tpu.memory_space<vmem>>, vector<1x1x80x8xbf16>
    %38 = vector.shape_cast %37 : vector<1x1x80x8xbf16> to vector<80x8xbf16>
    %c6 = arith.constant 6 : index
    %c0_42 = arith.constant 0 : index
    %c0_43 = arith.constant 0 : index
    %39 = vector.load %arg5[%c6, %c0_42, %c0_43] : memref<27x8x3xbf16, #tpu.memory_space<vmem>>, vector<1x8x3xbf16>
    %40 = vector.shape_cast %39 : vector<1x8x3xbf16> to vector<8x3xbf16>
    %cst_44 = arith.constant dense<0.000000e+00> : vector<80x3xf32>
    %41 = tpu.matmul %38, %40, %cst_44 {dimension_numbers = #tpu.dot_dimension_numbers<[1], [0], [0], [1], [0, 0, 1, 1], [], []>} : vector<80x8xbf16>, vector<8x3xbf16>, vector<80x3xf32> -> vector<80x3xf32>
    %42 = arith.addf %36, %41 : vector<80x3xf32>
    %c0_45 = arith.constant 0 : index
    %c0_46 = arith.constant 0 : index
    %c21 = arith.constant 21 : index
    %c0_47 = arith.constant 0 : index
    %43 = vector.load %arg2[%c0_45, %c0_46, %c21, %c0_47] : memref<1x1x110x8xbf16, #tpu.memory_space<vmem>>, vector<1x1x80x8xbf16>
    %44 = vector.shape_cast %43 : vector<1x1x80x8xbf16> to vector<80x8xbf16>
    %c7 = arith.constant 7 : index
    %c0_48 = arith.constant 0 : index
    %c0_49 = arith.constant 0 : index
    %45 = vector.load %arg5[%c7, %c0_48, %c0_49] : memref<27x8x3xbf16, #tpu.memory_space<vmem>>, vector<1x8x3xbf16>
    %46 = vector.shape_cast %45 : vector<1x8x3xbf16> to vector<8x3xbf16>
    %cst_50 = arith.constant dense<0.000000e+00> : vector<80x3xf32>
    %47 = tpu.matmul %44, %46, %cst_50 {dimension_numbers = #tpu.dot_dimension_numbers<[1], [0], [0], [1], [0, 0, 1, 1], [], []>} : vector<80x8xbf16>, vector<8x3xbf16>, vector<80x3xf32> -> vector<80x3xf32>
    %48 = arith.addf %42, %47 : vector<80x3xf32>
    %c0_51 = arith.constant 0 : index
    %c0_52 = arith.constant 0 : index
    %c22 = arith.constant 22 : index
    %c0_53 = arith.constant 0 : index
    %49 = vector.load %arg2[%c0_51, %c0_52, %c22, %c0_53] : memref<1x1x110x8xbf16, #tpu.memory_space<vmem>>, vector<1x1x80x8xbf16>
    %50 = vector.shape_cast %49 : vector<1x1x80x8xbf16> to vector<80x8xbf16>
    %c8 = arith.constant 8 : index
    %c0_54 = arith.constant 0 : index
    %c0_55 = arith.constant 0 : index
    %51 = vector.load %arg5[%c8, %c0_54, %c0_55] : memref<27x8x3xbf16, #tpu.memory_space<vmem>>, vector<1x8x3xbf16>
    %52 = vector.shape_cast %51 : vector<1x8x3xbf16> to vector<8x3xbf16>
    %cst_56 = arith.constant dense<0.000000e+00> : vector<80x3xf32>
    %53 = tpu.matmul %50, %52, %cst_56 {dimension_numbers = #tpu.dot_dimension_numbers<[1], [0], [0], [1], [0, 0, 1, 1], [], []>} : vector<80x8xbf16>, vector<8x3xbf16>, vector<80x3xf32> -> vector<80x3xf32>
    %54 = arith.addf %48, %53 : vector<80x3xf32>
    %c0_57 = arith.constant 0 : index
    %c0_58 = arith.constant 0 : index
    %c0_59 = arith.constant 0 : index
    %c0_60 = arith.constant 0 : index
    %55 = vector.load %arg3[%c0_57, %c0_58, %c0_59, %c0_60] : memref<1x1x110x8xbf16, #tpu.memory_space<vmem>>, vector<1x1x80x8xbf16>
    %56 = vector.shape_cast %55 : vector<1x1x80x8xbf16> to vector<80x8xbf16>
    %c9 = arith.constant 9 : index
    %c0_61 = arith.constant 0 : index
    %c0_62 = arith.constant 0 : index
    %57 = vector.load %arg5[%c9, %c0_61, %c0_62] : memref<27x8x3xbf16, #tpu.memory_space<vmem>>, vector<1x8x3xbf16>
    %58 = vector.shape_cast %57 : vector<1x8x3xbf16> to vector<8x3xbf16>
    %cst_63 = arith.constant dense<0.000000e+00> : vector<80x3xf32>
    %59 = tpu.matmul %56, %58, %cst_63 {dimension_numbers = #tpu.dot_dimension_numbers<[1], [0], [0], [1], [0, 0, 1, 1], [], []>} : vector<80x8xbf16>, vector<8x3xbf16>, vector<80x3xf32> -> vector<80x3xf32>
    %60 = arith.addf %54, %59 : vector<80x3xf32>
    %c0_64 = arith.constant 0 : index
    %c0_65 = arith.constant 0 : index
    %c1_66 = arith.constant 1 : index
    %c0_67 = arith.constant 0 : index
    %61 = vector.load %arg3[%c0_64, %c0_65, %c1_66, %c0_67] : memref<1x1x110x8xbf16, #tpu.memory_space<vmem>>, vector<1x1x80x8xbf16>
    %62 = vector.shape_cast %61 : vector<1x1x80x8xbf16> to vector<80x8xbf16>
    %c10_68 = arith.constant 10 : index
    %c0_69 = arith.constant 0 : index
    %c0_70 = arith.constant 0 : index
    %63 = vector.load %arg5[%c10_68, %c0_69, %c0_70] : memref<27x8x3xbf16, #tpu.memory_space<vmem>>, vector<1x8x3xbf16>
    %64 = vector.shape_cast %63 : vector<1x8x3xbf16> to vector<8x3xbf16>
    %cst_71 = arith.constant dense<0.000000e+00> : vector<80x3xf32>
    %65 = tpu.matmul %62, %64, %cst_71 {dimension_numbers = #tpu.dot_dimension_numbers<[1], [0], [0], [1], [0, 0, 1, 1], [], []>} : vector<80x8xbf16>, vector<8x3xbf16>, vector<80x3xf32> -> vector<80x3xf32>
    %66 = arith.addf %60, %65 : vector<80x3xf32>
    %c0_72 = arith.constant 0 : index
    %c0_73 = arith.constant 0 : index
    %c2_74 = arith.constant 2 : index
    %c0_75 = arith.constant 0 : index
    %67 = vector.load %arg3[%c0_72, %c0_73, %c2_74, %c0_75] : memref<1x1x110x8xbf16, #tpu.memory_space<vmem>>, vector<1x1x80x8xbf16>
    %68 = vector.shape_cast %67 : vector<1x1x80x8xbf16> to vector<80x8xbf16>
    %c11_76 = arith.constant 11 : index
    %c0_77 = arith.constant 0 : index
    %c0_78 = arith.constant 0 : index
    %69 = vector.load %arg5[%c11_76, %c0_77, %c0_78] : memref<27x8x3xbf16, #tpu.memory_space<vmem>>, vector<1x8x3xbf16>
    %70 = vector.shape_cast %69 : vector<1x8x3xbf16> to vector<8x3xbf16>
    %cst_79 = arith.constant dense<0.000000e+00> : vector<80x3xf32>
    %71 = tpu.matmul %68, %70, %cst_79 {dimension_numbers = #tpu.dot_dimension_numbers<[1], [0], [0], [1], [0, 0, 1, 1], [], []>} : vector<80x8xbf16>, vector<8x3xbf16>, vector<80x3xf32> -> vector<80x3xf32>
    %72 = arith.addf %66, %71 : vector<80x3xf32>
    %c0_80 = arith.constant 0 : index
    %c0_81 = arith.constant 0 : index
    %c10_82 = arith.constant 10 : index
    %c0_83 = arith.constant 0 : index
    %73 = vector.load %arg3[%c0_80, %c0_81, %c10_82, %c0_83] : memref<1x1x110x8xbf16, #tpu.memory_space<vmem>>, vector<1x1x80x8xbf16>
    %74 = vector.shape_cast %73 : vector<1x1x80x8xbf16> to vector<80x8xbf16>
    %c12_84 = arith.constant 12 : index
    %c0_85 = arith.constant 0 : index
    %c0_86 = arith.constant 0 : index
    %75 = vector.load %arg5[%c12_84, %c0_85, %c0_86] : memref<27x8x3xbf16, #tpu.memory_space<vmem>>, vector<1x8x3xbf16>
    %76 = vector.shape_cast %75 : vector<1x8x3xbf16> to vector<8x3xbf16>
    %cst_87 = arith.constant dense<0.000000e+00> : vector<80x3xf32>
    %77 = tpu.matmul %74, %76, %cst_87 {dimension_numbers = #tpu.dot_dimension_numbers<[1], [0], [0], [1], [0, 0, 1, 1], [], []>} : vector<80x8xbf16>, vector<8x3xbf16>, vector<80x3xf32> -> vector<80x3xf32>
    %78 = arith.addf %72, %77 : vector<80x3xf32>
    %c0_88 = arith.constant 0 : index
    %c0_89 = arith.constant 0 : index
    %c11_90 = arith.constant 11 : index
    %c0_91 = arith.constant 0 : index
    %79 = vector.load %arg3[%c0_88, %c0_89, %c11_90, %c0_91] : memref<1x1x110x8xbf16, #tpu.memory_space<vmem>>, vector<1x1x80x8xbf16>
    %80 = vector.shape_cast %79 : vector<1x1x80x8xbf16> to vector<80x8xbf16>
    %c13 = arith.constant 13 : index
    %c0_92 = arith.constant 0 : index
    %c0_93 = arith.constant 0 : index
    %81 = vector.load %arg5[%c13, %c0_92, %c0_93] : memref<27x8x3xbf16, #tpu.memory_space<vmem>>, vector<1x8x3xbf16>
    %82 = vector.shape_cast %81 : vector<1x8x3xbf16> to vector<8x3xbf16>
    %cst_94 = arith.constant dense<0.000000e+00> : vector<80x3xf32>
    %83 = tpu.matmul %80, %82, %cst_94 {dimension_numbers = #tpu.dot_dimension_numbers<[1], [0], [0], [1], [0, 0, 1, 1], [], []>} : vector<80x8xbf16>, vector<8x3xbf16>, vector<80x3xf32> -> vector<80x3xf32>
    %84 = arith.addf %78, %83 : vector<80x3xf32>
    %c0_95 = arith.constant 0 : index
    %c0_96 = arith.constant 0 : index
    %c12_97 = arith.constant 12 : index
    %c0_98 = arith.constant 0 : index
    %85 = vector.load %arg3[%c0_95, %c0_96, %c12_97, %c0_98] : memref<1x1x110x8xbf16, #tpu.memory_space<vmem>>, vector<1x1x80x8xbf16>
    %86 = vector.shape_cast %85 : vector<1x1x80x8xbf16> to vector<80x8xbf16>
    %c14 = arith.constant 14 : index
    %c0_99 = arith.constant 0 : index
    %c0_100 = arith.constant 0 : index
    %87 = vector.load %arg5[%c14, %c0_99, %c0_100] : memref<27x8x3xbf16, #tpu.memory_space<vmem>>, vector<1x8x3xbf16>
    %88 = vector.shape_cast %87 : vector<1x8x3xbf16> to vector<8x3xbf16>
    %cst_101 = arith.constant dense<0.000000e+00> : vector<80x3xf32>
    %89 = tpu.matmul %86, %88, %cst_101 {dimension_numbers = #tpu.dot_dimension_numbers<[1], [0], [0], [1], [0, 0, 1, 1], [], []>} : vector<80x8xbf16>, vector<8x3xbf16>, vector<80x3xf32> -> vector<80x3xf32>
    %90 = arith.addf %84, %89 : vector<80x3xf32>
    %c0_102 = arith.constant 0 : index
    %c0_103 = arith.constant 0 : index
    %c20_104 = arith.constant 20 : index
    %c0_105 = arith.constant 0 : index
    %91 = vector.load %arg3[%c0_102, %c0_103, %c20_104, %c0_105] : memref<1x1x110x8xbf16, #tpu.memory_space<vmem>>, vector<1x1x80x8xbf16>
    %92 = vector.shape_cast %91 : vector<1x1x80x8xbf16> to vector<80x8xbf16>
    %c15 = arith.constant 15 : index
    %c0_106 = arith.constant 0 : index
    %c0_107 = arith.constant 0 : index
    %93 = vector.load %arg5[%c15, %c0_106, %c0_107] : memref<27x8x3xbf16, #tpu.memory_space<vmem>>, vector<1x8x3xbf16>
    %94 = vector.shape_cast %93 : vector<1x8x3xbf16> to vector<8x3xbf16>
    %cst_108 = arith.constant dense<0.000000e+00> : vector<80x3xf32>
    %95 = tpu.matmul %92, %94, %cst_108 {dimension_numbers = #tpu.dot_dimension_numbers<[1], [0], [0], [1], [0, 0, 1, 1], [], []>} : vector<80x8xbf16>, vector<8x3xbf16>, vector<80x3xf32> -> vector<80x3xf32>
    %96 = arith.addf %90, %95 : vector<80x3xf32>
    %c0_109 = arith.constant 0 : index
    %c0_110 = arith.constant 0 : index
    %c21_111 = arith.constant 21 : index
    %c0_112 = arith.constant 0 : index
    %97 = vector.load %arg3[%c0_109, %c0_110, %c21_111, %c0_112] : memref<1x1x110x8xbf16, #tpu.memory_space<vmem>>, vector<1x1x80x8xbf16>
    %98 = vector.shape_cast %97 : vector<1x1x80x8xbf16> to vector<80x8xbf16>
    %c16 = arith.constant 16 : index
    %c0_113 = arith.constant 0 : index
    %c0_114 = arith.constant 0 : index
    %99 = vector.load %arg5[%c16, %c0_113, %c0_114] : memref<27x8x3xbf16, #tpu.memory_space<vmem>>, vector<1x8x3xbf16>
    %100 = vector.shape_cast %99 : vector<1x8x3xbf16> to vector<8x3xbf16>
    %cst_115 = arith.constant dense<0.000000e+00> : vector<80x3xf32>
    %101 = tpu.matmul %98, %100, %cst_115 {dimension_numbers = #tpu.dot_dimension_numbers<[1], [0], [0], [1], [0, 0, 1, 1], [], []>} : vector<80x8xbf16>, vector<8x3xbf16>, vector<80x3xf32> -> vector<80x3xf32>
    %102 = arith.addf %96, %101 : vector<80x3xf32>
    %c0_116 = arith.constant 0 : index
    %c0_117 = arith.constant 0 : index
    %c22_118 = arith.constant 22 : index
    %c0_119 = arith.constant 0 : index
    %103 = vector.load %arg3[%c0_116, %c0_117, %c22_118, %c0_119] : memref<1x1x110x8xbf16, #tpu.memory_space<vmem>>, vector<1x1x80x8xbf16>
    %104 = vector.shape_cast %103 : vector<1x1x80x8xbf16> to vector<80x8xbf16>
    %c17 = arith.constant 17 : index
    %c0_120 = arith.constant 0 : index
    %c0_121 = arith.constant 0 : index
    %105 = vector.load %arg5[%c17, %c0_120, %c0_121] : memref<27x8x3xbf16, #tpu.memory_space<vmem>>, vector<1x8x3xbf16>
    %106 = vector.shape_cast %105 : vector<1x8x3xbf16> to vector<8x3xbf16>
    %cst_122 = arith.constant dense<0.000000e+00> : vector<80x3xf32>
    %107 = tpu.matmul %104, %106, %cst_122 {dimension_numbers = #tpu.dot_dimension_numbers<[1], [0], [0], [1], [0, 0, 1, 1], [], []>} : vector<80x8xbf16>, vector<8x3xbf16>, vector<80x3xf32> -> vector<80x3xf32>
    %108 = arith.addf %102, %107 : vector<80x3xf32>
    %c0_123 = arith.constant 0 : index
    %c0_124 = arith.constant 0 : index
    %c0_125 = arith.constant 0 : index
    %c0_126 = arith.constant 0 : index
    %109 = vector.load %arg4[%c0_123, %c0_124, %c0_125, %c0_126] : memref<1x1x110x8xbf16, #tpu.memory_space<vmem>>, vector<1x1x80x8xbf16>
    %110 = vector.shape_cast %109 : vector<1x1x80x8xbf16> to vector<80x8xbf16>
    %c18 = arith.constant 18 : index
    %c0_127 = arith.constant 0 : index
    %c0_128 = arith.constant 0 : index
    %111 = vector.load %arg5[%c18, %c0_127, %c0_128] : memref<27x8x3xbf16, #tpu.memory_space<vmem>>, vector<1x8x3xbf16>
    %112 = vector.shape_cast %111 : vector<1x8x3xbf16> to vector<8x3xbf16>
    %cst_129 = arith.constant dense<0.000000e+00> : vector<80x3xf32>
    %113 = tpu.matmul %110, %112, %cst_129 {dimension_numbers = #tpu.dot_dimension_numbers<[1], [0], [0], [1], [0, 0, 1, 1], [], []>} : vector<80x8xbf16>, vector<8x3xbf16>, vector<80x3xf32> -> vector<80x3xf32>
    %114 = arith.addf %108, %113 : vector<80x3xf32>
    %c0_130 = arith.constant 0 : index
    %c0_131 = arith.constant 0 : index
    %c1_132 = arith.constant 1 : index
    %c0_133 = arith.constant 0 : index
    %115 = vector.load %arg4[%c0_130, %c0_131, %c1_132, %c0_133] : memref<1x1x110x8xbf16, #tpu.memory_space<vmem>>, vector<1x1x80x8xbf16>
    %116 = vector.shape_cast %115 : vector<1x1x80x8xbf16> to vector<80x8xbf16>
    %c19 = arith.constant 19 : index
    %c0_134 = arith.constant 0 : index
    %c0_135 = arith.constant 0 : index
    %117 = vector.load %arg5[%c19, %c0_134, %c0_135] : memref<27x8x3xbf16, #tpu.memory_space<vmem>>, vector<1x8x3xbf16>
    %118 = vector.shape_cast %117 : vector<1x8x3xbf16> to vector<8x3xbf16>
    %cst_136 = arith.constant dense<0.000000e+00> : vector<80x3xf32>
    %119 = tpu.matmul %116, %118, %cst_136 {dimension_numbers = #tpu.dot_dimension_numbers<[1], [0], [0], [1], [0, 0, 1, 1], [], []>} : vector<80x8xbf16>, vector<8x3xbf16>, vector<80x3xf32> -> vector<80x3xf32>
    %120 = arith.addf %114, %119 : vector<80x3xf32>
    %c0_137 = arith.constant 0 : index
    %c0_138 = arith.constant 0 : index
    %c2_139 = arith.constant 2 : index
    %c0_140 = arith.constant 0 : index
    %121 = vector.load %arg4[%c0_137, %c0_138, %c2_139, %c0_140] : memref<1x1x110x8xbf16, #tpu.memory_space<vmem>>, vector<1x1x80x8xbf16>
    %122 = vector.shape_cast %121 : vector<1x1x80x8xbf16> to vector<80x8xbf16>
    %c20_141 = arith.constant 20 : index
    %c0_142 = arith.constant 0 : index
    %c0_143 = arith.constant 0 : index
    %123 = vector.load %arg5[%c20_141, %c0_142, %c0_143] : memref<27x8x3xbf16, #tpu.memory_space<vmem>>, vector<1x8x3xbf16>
    %124 = vector.shape_cast %123 : vector<1x8x3xbf16> to vector<8x3xbf16>
    %cst_144 = arith.constant dense<0.000000e+00> : vector<80x3xf32>
    %125 = tpu.matmul %122, %124, %cst_144 {dimension_numbers = #tpu.dot_dimension_numbers<[1], [0], [0], [1], [0, 0, 1, 1], [], []>} : vector<80x8xbf16>, vector<8x3xbf16>, vector<80x3xf32> -> vector<80x3xf32>
    %126 = arith.addf %120, %125 : vector<80x3xf32>
    %c0_145 = arith.constant 0 : index
    %c0_146 = arith.constant 0 : index
    %c10_147 = arith.constant 10 : index
    %c0_148 = arith.constant 0 : index
    %127 = vector.load %arg4[%c0_145, %c0_146, %c10_147, %c0_148] : memref<1x1x110x8xbf16, #tpu.memory_space<vmem>>, vector<1x1x80x8xbf16>
    %128 = vector.shape_cast %127 : vector<1x1x80x8xbf16> to vector<80x8xbf16>
    %c21_149 = arith.constant 21 : index
    %c0_150 = arith.constant 0 : index
    %c0_151 = arith.constant 0 : index
    %129 = vector.load %arg5[%c21_149, %c0_150, %c0_151] : memref<27x8x3xbf16, #tpu.memory_space<vmem>>, vector<1x8x3xbf16>
    %130 = vector.shape_cast %129 : vector<1x8x3xbf16> to vector<8x3xbf16>
    %cst_152 = arith.constant dense<0.000000e+00> : vector<80x3xf32>
    %131 = tpu.matmul %128, %130, %cst_152 {dimension_numbers = #tpu.dot_dimension_numbers<[1], [0], [0], [1], [0, 0, 1, 1], [], []>} : vector<80x8xbf16>, vector<8x3xbf16>, vector<80x3xf32> -> vector<80x3xf32>
    %132 = arith.addf %126, %131 : vector<80x3xf32>
    %c0_153 = arith.constant 0 : index
    %c0_154 = arith.constant 0 : index
    %c11_155 = arith.constant 11 : index
    %c0_156 = arith.constant 0 : index
    %133 = vector.load %arg4[%c0_153, %c0_154, %c11_155, %c0_156] : memref<1x1x110x8xbf16, #tpu.memory_space<vmem>>, vector<1x1x80x8xbf16>
    %134 = vector.shape_cast %133 : vector<1x1x80x8xbf16> to vector<80x8xbf16>
    %c22_157 = arith.constant 22 : index
    %c0_158 = arith.constant 0 : index
    %c0_159 = arith.constant 0 : index
    %135 = vector.load %arg5[%c22_157, %c0_158, %c0_159] : memref<27x8x3xbf16, #tpu.memory_space<vmem>>, vector<1x8x3xbf16>
    %136 = vector.shape_cast %135 : vector<1x8x3xbf16> to vector<8x3xbf16>
    %cst_160 = arith.constant dense<0.000000e+00> : vector<80x3xf32>
    %137 = tpu.matmul %134, %136, %cst_160 {dimension_numbers = #tpu.dot_dimension_numbers<[1], [0], [0], [1], [0, 0, 1, 1], [], []>} : vector<80x8xbf16>, vector<8x3xbf16>, vector<80x3xf32> -> vector<80x3xf32>
    %138 = arith.addf %132, %137 : vector<80x3xf32>
    %c0_161 = arith.constant 0 : index
    %c0_162 = arith.constant 0 : index
    %c12_163 = arith.constant 12 : index
    %c0_164 = arith.constant 0 : index
    %139 = vector.load %arg4[%c0_161, %c0_162, %c12_163, %c0_164] : memref<1x1x110x8xbf16, #tpu.memory_space<vmem>>, vector<1x1x80x8xbf16>
    %140 = vector.shape_cast %139 : vector<1x1x80x8xbf16> to vector<80x8xbf16>
    %c23 = arith.constant 23 : index
    %c0_165 = arith.constant 0 : index
    %c0_166 = arith.constant 0 : index
    %141 = vector.load %arg5[%c23, %c0_165, %c0_166] : memref<27x8x3xbf16, #tpu.memory_space<vmem>>, vector<1x8x3xbf16>
    %142 = vector.shape_cast %141 : vector<1x8x3xbf16> to vector<8x3xbf16>
    %cst_167 = arith.constant dense<0.000000e+00> : vector<80x3xf32>
    %143 = tpu.matmul %140, %142, %cst_167 {dimension_numbers = #tpu.dot_dimension_numbers<[1], [0], [0], [1], [0, 0, 1, 1], [], []>} : vector<80x8xbf16>, vector<8x3xbf16>, vector<80x3xf32> -> vector<80x3xf32>
    %144 = arith.addf %138, %143 : vector<80x3xf32>
    %c0_168 = arith.constant 0 : index
    %c0_169 = arith.constant 0 : index
    %c20_170 = arith.constant 20 : index
    %c0_171 = arith.constant 0 : index
    %145 = vector.load %arg4[%c0_168, %c0_169, %c20_170, %c0_171] : memref<1x1x110x8xbf16, #tpu.memory_space<vmem>>, vector<1x1x80x8xbf16>
    %146 = vector.shape_cast %145 : vector<1x1x80x8xbf16> to vector<80x8xbf16>
    %c24 = arith.constant 24 : index
    %c0_172 = arith.constant 0 : index
    %c0_173 = arith.constant 0 : index
    %147 = vector.load %arg5[%c24, %c0_172, %c0_173] : memref<27x8x3xbf16, #tpu.memory_space<vmem>>, vector<1x8x3xbf16>
    %148 = vector.shape_cast %147 : vector<1x8x3xbf16> to vector<8x3xbf16>
    %cst_174 = arith.constant dense<0.000000e+00> : vector<80x3xf32>
    %149 = tpu.matmul %146, %148, %cst_174 {dimension_numbers = #tpu.dot_dimension_numbers<[1], [0], [0], [1], [0, 0, 1, 1], [], []>} : vector<80x8xbf16>, vector<8x3xbf16>, vector<80x3xf32> -> vector<80x3xf32>
    %150 = arith.addf %144, %149 : vector<80x3xf32>
    %c0_175 = arith.constant 0 : index
    %c0_176 = arith.constant 0 : index
    %c21_177 = arith.constant 21 : index
    %c0_178 = arith.constant 0 : index
    %151 = vector.load %arg4[%c0_175, %c0_176, %c21_177, %c0_178] : memref<1x1x110x8xbf16, #tpu.memory_space<vmem>>, vector<1x1x80x8xbf16>
    %152 = vector.shape_cast %151 : vector<1x1x80x8xbf16> to vector<80x8xbf16>
    %c25 = arith.constant 25 : index
    %c0_179 = arith.constant 0 : index
    %c0_180 = arith.constant 0 : index
    %153 = vector.load %arg5[%c25, %c0_179, %c0_180] : memref<27x8x3xbf16, #tpu.memory_space<vmem>>, vector<1x8x3xbf16>
    %154 = vector.shape_cast %153 : vector<1x8x3xbf16> to vector<8x3xbf16>
    %cst_181 = arith.constant dense<0.000000e+00> : vector<80x3xf32>
    %155 = tpu.matmul %152, %154, %cst_181 {dimension_numbers = #tpu.dot_dimension_numbers<[1], [0], [0], [1], [0, 0, 1, 1], [], []>} : vector<80x8xbf16>, vector<8x3xbf16>, vector<80x3xf32> -> vector<80x3xf32>
    %156 = arith.addf %150, %155 : vector<80x3xf32>
    %c0_182 = arith.constant 0 : index
    %c0_183 = arith.constant 0 : index
    %c22_184 = arith.constant 22 : index
    %c0_185 = arith.constant 0 : index
    %157 = vector.load %arg4[%c0_182, %c0_183, %c22_184, %c0_185] : memref<1x1x110x8xbf16, #tpu.memory_space<vmem>>, vector<1x1x80x8xbf16>
    %158 = vector.shape_cast %157 : vector<1x1x80x8xbf16> to vector<80x8xbf16>
    %c26 = arith.constant 26 : index
    %c0_186 = arith.constant 0 : index
    %c0_187 = arith.constant 0 : index
    %159 = vector.load %arg5[%c26, %c0_186, %c0_187] : memref<27x8x3xbf16, #tpu.memory_space<vmem>>, vector<1x8x3xbf16>
    %160 = vector.shape_cast %159 : vector<1x8x3xbf16> to vector<8x3xbf16>
    %cst_188 = arith.constant dense<0.000000e+00> : vector<80x3xf32>
    %161 = tpu.matmul %158, %160, %cst_188 {dimension_numbers = #tpu.dot_dimension_numbers<[1], [0], [0], [1], [0, 0, 1, 1], [], []>} : vector<80x8xbf16>, vector<8x3xbf16>, vector<80x3xf32> -> vector<80x3xf32>
    %162 = arith.addf %156, %161 : vector<80x3xf32>
    %c0_189 = arith.constant 0 : index
    %c0_190 = arith.constant 0 : index
    %c0_191 = arith.constant 0 : index
    %c0_192 = arith.constant 0 : index
    %163 = vector.load %arg6[%c0_189, %c0_190, %c0_191, %c0_192] : memref<1x1x80x3xf32, #tpu.memory_space<vmem>>, vector<1x1x80x3xf32>
    %164 = vector.shape_cast %163 : vector<1x1x80x3xf32> to vector<80x3xf32>
    %165 = vector.shape_cast %162 : vector<80x3xf32> to vector<1x1x80x3xf32>
    tpu.vector_store %arg6[%c0_189, %c0_190, %c0_191, %c0_192], %165 {strides = array<i32>} : memref<1x1x80x3xf32, #tpu.memory_space<vmem>>, vector<1x1x80x3xf32>,
    return
  }
  func.func @transform_0(%arg0: i32, %arg1: i32) -> (i32, i32, i32, i32) {
    %c0_i32 = arith.constant 0 : i32
    %0 = arith.addi %arg1, %c0_i32 : i32
    %c0_i32_0 = arith.constant 0 : i32
    %c0_i32_1 = arith.constant 0 : i32
    %c0_i32_2 = arith.constant 0 : i32
    return %arg0, %0, %c0_i32_0, %c0_i32_1 : i32, i32, i32, i32
  }
  func.func @transform_1(%arg0: i32, %arg1: i32) -> (i32, i32, i32, i32) {
    %c1_i32 = arith.constant 1 : i32
    %0 = arith.addi %arg1, %c1_i32 : i32
    %c0_i32 = arith.constant 0 : i32
    %c0_i32_0 = arith.constant 0 : i32
    %c0_i32_1 = arith.constant 0 : i32
    return %arg0, %0, %c0_i32, %c0_i32_0 : i32, i32, i32, i32
  }
  func.func @transform_2(%arg0: i32, %arg1: i32) -> (i32, i32, i32, i32) {
    %c2_i32 = arith.constant 2 : i32
    %0 = arith.addi %arg1, %c2_i32 : i32
    %c0_i32 = arith.constant 0 : i32
    %c0_i32_0 = arith.constant 0 : i32
    %c0_i32_1 = arith.constant 0 : i32
    return %arg0, %0, %c0_i32, %c0_i32_0 : i32, i32, i32, i32
  }
  func.func @transform_3(%arg0: i32, %arg1: i32) -> (i32, i32, i32) {
    %c0_i32 = arith.constant 0 : i32
    %c0_i32_0 = arith.constant 0 : i32
    %c0_i32_1 = arith.constant 0 : i32
    %c0_i32_2 = arith.constant 0 : i32
    return %c0_i32, %c0_i32_0, %c0_i32_1 : i32, i32, i32
  }
  func.func @transform_4(%arg0: i32, %arg1: i32) -> (i32, i32, i32, i32) {
    %c0_i32 = arith.constant 0 : i32
    %c0_i32_0 = arith.constant 0 : i32
    %c0_i32_1 = arith.constant 0 : i32
    return %arg0, %arg1, %c0_i32, %c0_i32_0 : i32, i32, i32, i32
  }
}

</mosaic_0001>

<bundles_post_ra>
// kernel: bottleneck_forward.3
= control target key start
LH: loop header
LB: loop body
LE: loop exit
PB: predicated region body
PF: predicated region fallthrough
CT: control target
= control target key end

     0   :  { %s6125_s27 = smov 0   ;;  %s6127_s28 = smov 0   ;;  %s7622_s0 = inlined_call_operand.vmem [shape: bf16[2,10,110,4], index: 0, kind: input, shape index: {}, may-alias: {0,1,2}]   ;;  %s7623_s1 = inlined_call_operand.vmem [shape: bf16[2,10,110,4], index: 1, kind: input, shape index: {}, may-alias: {0,1,2}]   ;;  %s7624_s2 = inlined_call_operand.vmem [shape: bf16[2,10,110,4], index: 2, kind: input, shape index: {}, may-alias: {0,1,2}]   ;;  %s7625_s3 = inlined_call_operand.vmem [shape: bf16[27,4,8], index: 3, kind: input, shape index: {}]   ;;  %s7626_s4 = inlined_call_operand.vmem [shape: bf16[4,8], index: 4, kind: input, shape index: {}]   ;;  %s7627_s5 = inlined_call_operand.vmem [shape: f32[1,8], index: 5, kind: input, shape index: {}]   ;;  %s7628_s6 = inlined_call_operand.vmem [shape: f32[1,8], index: 6, kind: input, shape index: {}]   ;;  %s7629_s7 = inlined_call_operand.vmem [shape: bf16[2,8,80,8], index: 7, kind: output, shape index: {0}]   ;;  %s7630_s8 = inlined_call_operand.vmem [shape: bf16[2,8,80,8], index: 8, kind: output, shape index: {1}]  }
   0x1   :  { %s6129_s29 = smov 0   ;;  %s6131_s30 = smov 0  }
   0x2   :  { %s6133_s9 = smov 0  }
   0x3 LB: > { %s28_s10 = sadd.s32 1, %s6068_s29  ;;  %s31_s11 = sadd.s32 1, %s6072_s30  ;;  %s6076_s9 = sphi %s6133_s9, %s19_s9   ;;  %s6072_s30 = sphi %s6131_s30, %s7634_s30   ;;  %s6068_s29 = sphi %s6129_s29, %s7633_s29   ;;  %s6064_s28 = sphi %s6127_s28, %s7632_s28   ;;  %s6060_s27 = sphi %s6125_s27, %s7631_s27  }
   0x4   : > { %p29_p0 = scmp.ge.s32.totalorder %s28_s10, 8  ;;  %p4820_p1 = scmp.ge.s32.totalorder %s6076_s9, 1 }
   0x5   : > { %p327_p2 = scmp.lt.s32.totalorder %s6076_s9, 17 }
   0x6   : > { %s7636_s10 = smov (%p29_p0, %s28_s10), 0  ;;  %s7638_s11 = smov (!%p29_p0, %s31_s11), %s6072_s30 }
   0x7   : > { %p328_p3 = pnand %p4820_p1, %p327_p2  ;;  %p33_p4 = scmp.ge.s32.totalorder %s7638_s11, 2 }
   0x8   : > { %v4826_v0 = vld [vmem:[%s7625_s3 + $0x2] sm:$0x3] (!%p328_p3)  ;;  %vm551_vm0 = vcmask (!%p328_p3), 1041408   ;;  %v458_v1 = vld [vmem:[%s7625_s3] sm:$0x3] (!%p328_p3)  ;;  %v6078_v2 = vmov (!%p328_p3), 0.0  }
   0x9   : > { %s7640_s11 = smov (%p33_p4, %s7638_s11), 0  ;;  %331 = sbr.rel (%p328_p3) target bundleno = 809 (0x329), region = 48 }
   0xa   : > { %5289 = vmatprep.subr.bf16.mxu0 (!%p328_p3), %v6078_v2  ;;  %v553_v3 = vsel (!%p328_p3), %vm551_vm0, %v4826_v0, 0  ;;  %5311 = vmatprep.subr.bf16.mxu1 (!%p328_p3), %v6078_v2  ;;  %v639_v4 = vsel (!%p328_p3), %vm551_vm0, %v458_v1, 0  ;;  %p398_p5 = scmp.lt.s32.totalorder (!%p328_p3), %s6064_s28, 1  ;;  %p400_p6 = scmp.lt.s32.totalorder (!%p328_p3), %s6060_s27, 9  ;;  %vm6079_vm1 = vmmov (!%p328_p3), 0   ;;  %vm535_vm2 = vcmask (!%p328_p3), 31744  }
   0xb   : > { %5290 = vmatpush3.bf16.msra.mxu0 (!%p328_p3), %v553_v3  ;;  %5312 = vmatpush3.bf16.msra.mxu1 (!%p328_p3), %v639_v4  ;;  %v4850_v5 = vld [vmem:[%s7625_s3 + $0x6] sm:$0x3] (!%p328_p3)  ;;  %v4843_v17 = vld [vmem:[%s7625_s3 + $0x4] sm:$0x3] (!%p328_p3)  ;;  %s407_s13 = sadd.s32 (!%p328_p3), 1, %s6060_s27  ;;  %vm720_vm4 = vcmask (!%p328_p3), 1046528  }
   0xc   : > { %5291 = vmatprep.mubr.msk.bf16.mxu0 (!%p328_p3), %vm6079_vm1, %v6078_v2  ;;  %5313 = vmatprep.mubr.msk.bf16.mxu1 (!%p328_p3), %vm6079_vm1, %v6078_v2  ;;  %v901_v10 = vsel (!%p328_p3), %vm551_vm0, %v4850_v5, 0  ;;  %vm490_vm3 = vsmask.f32 (!%p328_p3), 7424  ;;  %v748_v21 = vsel (!%p328_p3), %vm551_vm0, %v4843_v17, 0  ;;  %p410_p7 = scmp.lt.s32.totalorder (!%p328_p3), %s407_s13, 9  ;;  %vm1153_vm5 = vcmask (!%p328_p3), 1045504  }
   0xd   : > { %5333 = vmatprep.subr.bf16.mxu0 (!%p328_p3), %v6078_v2  ;;  %5355 = vmatprep.subr.bf16.mxu1 (!%p328_p3), %v6078_v2  ;;  %v4862_v50 = vld [vmem:[%s7625_s3 + $0x8] sm:$0x3] (!%p328_p3)  ;;  %v4869_v53 = vld [vmem:[%s7625_s3 + $0xa] sm:$0x3] (!%p328_p3)  ;;  %vm992_vm6 = vsmask.f32 (!%p328_p3), 6400 }
   0xe   : > { %v1181_v56 = vsel (!%p328_p3), %vm551_vm0, %v4869_v53, 0  ;;  %v1062_v59 = vsel (!%p328_p3), %vm551_vm0, %v4862_v50, 0  ;;  %vm1425_vm7 = vsmask.f32 (!%p328_p3), 5376  ;;  %vm1586_vm8 = vcmask (!%p328_p3), 1044480   ;;  %p431_p9 = scmp.lt.s32.totalorder (!%p328_p3), %s6060_s27, 7 }
   0xf   : > { %vm4374_vm9 = vcmask (!%p328_p3), 60416  }
  0x10   : > { %s7642_s28 = smov (!%p398_p5, %s6064_s28), 1  ;;  %s7644_s13 = smov (!%p410_p7, %s407_s13), 9 }
  0x11   : > { %s401_s16 = scalar_select %p400_p6, %s6060_s27, 9 }
  0x12   : > { %s6182_s17 = smul.u32 140, %s7642_s28 }
  0x13   : > { %s5905_s18 = smul.u32 14, %s401_s16 }
  0x14   : > { %s5907_s14 = smul.u32 14, %s7644_s13 }
  0x15   : > { %s404_s19 = sadd.s32 %s6182_s17, %s5905_s18  ;;  %s418_s18 = sadd.s32 2, %s6060_s27 }
  0x16   : > { %s4821_s20 = sshll.u32 %s404_s19, 2  ;;  %s414_s15 = sadd.s32 %s5907_s14, %s6182_s17 }
  0x17   : > { %s6191_s25 = scalar_lea.vmem %s7622_s0, %s4821_s20  ;;  %s4822_s16 = sshll.u32 %s414_s15, 2 }
  0x18   : > { %v448_v6 = vld [vmem:[%s6191_s25] sm:$0xf]  ;;  %v6195_v7 = vld [vmem:[%s6191_s25 + $0x4] sm:$0xf]  ;;  %v6199_v9 = vld [vmem:[%s6191_s25 + $0x8] sm:$0xff]   ;;  %s6251_s21 = scalar_lea.vmem %s7623_s1, %s4822_s16  ;;  %p421_p8 = scmp.lt.s32.totalorder %s418_s18, 9 }
  0x19   : > { %v4827_v8 = vcombine.low %v448_v6, %v6195_v7  ;;  %v499_v13 = vshll.u32 %v6199_v9, 16  ;;  %v6205_v14 = vld [vmem:[%s6191_s25 + $0x10] sm:$0xff]   ;;  %v503_v19 = vshrl.u32 %v6199_v9, 16  ;;  %v6222_v25 = vld [vmem:[%s6191_s25 + $0x18] sm:$0xff]   ;;  %v6236_v31 = vld [vmem:[%s6191_s25 + $0x20] sm:$0xff]   ;;  %v722_v58 = vrot.slane %v6199_v9, 1 }
  0x1a   : > { %v507_v20 = vshll.u32 %v6205_v14, 16  ;;  %v511_v27 = vshrl.u32 %v6205_v14, 16  ;;  %v515_v28 = vshll.u32 %v6222_v25, 16  ;;  %v519_v33 = vshrl.u32 %v6222_v25, 16  ;;  %v833_v38 = vld [vmem:[%s6191_s25 + $0x4] sm:$0xe] }
  0x1b   : > { %v492_v11 = vshrl.u32 %v4827_v8, 16  ;;  %v494_v12 = vshll.u32 %v4827_v8, 16  ;;  %5314 = vmatmul.mubr.msk.bf16.vlgmr.msra.gmra.mrb[0].mxu1 %vm535_vm2, %v4827_v8  ;;  %v501_v16 = vrot.slane %v499_v13, 1  ;;  %v523_v34 = vshll.u32 %v6236_v31, 16  ;;  %v6264_v39 = vld [vmem:[%s6191_s25 + $0x8] sm:$0xf] }
  0x1c   : > { %5356 = vmatpush3.bf16.msra.mxu1 %v901_v10  ;;  %5317 = vmatprep.mubr.msk.bf16.mxu1 %vm6079_vm1, %v6078_v2  ;;  %v509_v24 = vrot.slane %v507_v20, 1  ;;  %v517_v30 = vrot.slane %v515_v28, 1  ;;  %v6256_v37 = vld [vmem:[%s6191_s25 + $0x28] ss:$0 sps:$4 sm:$0x11]   ;;  %v527_v41 = vshrl.u32 %v6236_v31, 16  ;;  %v6270_v43 = vcombine.low %v833_v38, %v6264_v39 }
  0x1d   : > { %v496_v15 = vrot.slane %v494_v12, 1  ;;  %5399 = vmatprep.subr.bf16.mxu1 %v6078_v2  ;;  %v505_v23 = vor.u32 %v503_v19, %v501_v16  ;;  %v525_v36 = vrot.slane %v523_v34, 1  ;;  %v531_v42 = vshll.u32 %v6256_v37, 16  ;;  %s7646_s18 = smov (!%p421_p8, %s418_s18), 9  ;;  %v6273_v44 = vld [vmem:[%s6191_s25 + $0xc] sm:$0xff]   ;;  %v6294_v54 = vld [vmem:[%s6191_s25 + $0x14] sm:$0xff]  }
  0x1e   : > { %v513_v29 = vor.u32 %v511_v27, %v509_v24  ;;  %v521_v35 = vor.u32 %v519_v33, %v517_v30  ;;  %s5908_s22 = smul.u32 14, %s7646_s18  ;;  %v714_v47 = vld [vmem:[%s6191_s25] sm:$0xe]  ;;  %v874_v48 = vrot.slane %v6270_v43, 1  ;;  %v875_v49 = vrot.slane %v6273_v44, 1  ;;  %v6329_v3 = vld [vmem:[%s6191_s25 + $0x24] sm:$0xff]  }
  0x1f   : > { %v497_v18 = vor.u32 %v496_v15, %v492_v11  ;;  %v510_v26 = vsel %vm490_vm3, %v505_v23, %v509_v24  ;;  %v529_v45 = vor.u32 %v527_v41, %v525_v36  ;;  %v533_v46 = vrot.slane %v531_v42, 1  ;;  %v6309_v61 = vld [vmem:[%s6191_s25 + $0x1c] sm:$0xff]   ;;  %v1147_v13 = vld [vmem:[%s6191_s25 + $0x4] sm:$0xc]  ;;  %s7648_s27 = smov (!%p431_p9, %s6060_s27), 7 }
  0x20   : > { %v518_v32 = vsel %vm490_vm3, %v513_v29, %v517_v30  ;;  %v526_v40 = vsel %vm490_vm3, %v521_v35, %v525_v36  ;;  %v4844_v52 = vcombine.low %v714_v47, %v6195_v7  ;;  %s425_s13 = sadd.s32 %s5908_s22, %s6182_s17  ;;  %v876_v55 = vsel %vm720_vm4, %v874_v48, %v875_v49  ;;  %v4888_v29 = vld [vmem:[%s7625_s3 + $0xe] sm:$0x3]  ;;  %v4876_v36 = vld [vmem:[%s7625_s3 + $0xc] sm:$0x3] }
  0x21   : > { %v502_v22 = vsel %vm490_vm3, %v497_v18, %v501_v16  ;;  %v534_v51 = vsel %vm490_vm3, %v529_v45, %v533_v46  ;;  %s4823_s14 = sshll.u32 %s425_s13, 2  ;;  %v877_v60 = vrot.slane %v6294_v54, 1  ;;  %v724_v0 = vrot.slane %v6205_v14, 1 }
  0x22   : > { %5292 = vmatmul.mubr.msk.bf16.vlgmr.msra.gmra.mrb[0].mxu0 %vm535_vm2, %v502_v22  ;;  %v721_v57 = vrot.slane %v4844_v52, 1  ;;  %s6317_s16 = scalar_lea.vmem %s7624_s2, %s4823_s14  ;;  %v879_v1 = vrot.slane %v6309_v61, 1  ;;  %v726_v6 = vrot.slane %v6222_v25, 1  ;;  %v881_v7 = vrot.slane %v6329_v3, 1 }
  0x23   : > { %5334 = vmatpush3.bf16.msra.mxu0 %v748_v21  ;;  %5295 = vmatprep.mubr.msk.bf16.mxu0 %vm6079_vm1, %v6078_v2  ;;  %v878_v63 = vsel %vm720_vm4, %v875_v49, %v877_v60  ;;  %v725_v4 = vsel %vm720_vm4, %v722_v58, %v724_v0  ;;  %v728_v11 = vrot.slane %v6236_v31, 1  ;;  %v4870_v16 = vcombine.low %v1147_v13, %v6264_v39 }
  0x24   : > { %5318 = vmatmul.mubr.msk.bf16.gmra.mrb[4].mxu1 %vm535_vm2, %v6199_v9  ;;  %5377 = vmatprep.subr.bf16.mxu0 %v6078_v2  ;;  %v723_v62 = vsel %vm720_vm4, %v721_v57, %v722_v58  ;;  %v880_v5 = vsel %vm720_vm4, %v877_v60, %v879_v1  ;;  %v727_v8 = vsel %vm720_vm4, %v724_v0, %v726_v6  ;;  %v5965_v9 = vld [vmem:[%s6191_s25 + $0x2c] ss:$0 sps:$4 sm:$0x11]   ;;  %v730_v17 = vrot.slane %v6256_v37, 1 }
  0x25   : > { %5321 = vmatprep.mubr.msk.bf16.mxu1 %vm6079_vm1, %v6078_v2  ;;  %v882_v10 = vsel %vm720_vm4, %v879_v1, %v881_v7  ;;  %v883_v12 = vrot.slane %v5965_v9, 1  ;;  %v994_v18 = vshrl.u32 %v6270_v43, 16  ;;  %v997_v19 = vshll.u32 %v6270_v43, 16  ;;  %v5967_v60 = vld [vmem:[%s6191_s25 + $0x2c] ss:$0 sps:$4 sm:$0x33]  }
  0x26   : > { %v1002_v20 = vshrl.u32 %v6273_v44, 16  ;;  %v1005_v21 = vshll.u32 %v6273_v44, 16  ;;  %v1154_v22 = vrot.slane %v4870_v16, 2  ;;  %v1155_v23 = vrot.slane %v6273_v44, 2 }
  0x27   : > { %v884_v15 = vsel %vm720_vm4, %v881_v7, %v883_v12  ;;  %v731_v24 = vsel %vm720_vm4, %v728_v11, %v730_v17  ;;  %v1011_v34 = vshrl.u32 %v6294_v54, 16  ;;  %v1014_v35 = vshll.u32 %v6294_v54, 16  ;;  %v6432_v17 = vld [vmem:[%s6191_s25 + $0x18] sm:$0xff]  }
  0x28   : > { %v1004_v27 = vrot.slane %v1002_v20, 1  ;;  %v1007_v28 = vrot.slane %v1005_v21, 2  ;;  %v1156_v30 = vsel %vm1153_vm5, %v1154_v22, %v1155_v23  ;;  %v1157_v37 = vrot.slane %v6294_v54, 2 }
  0x29   : > { %v1013_v39 = vrot.slane %v1011_v34, 1  ;;  %v1334_v41 = vsel %vm551_vm0, %v4876_v36, 0  ;;  %v1020_v44 = vshrl.u32 %v6309_v61, 16  ;;  %v1023_v45 = vshll.u32 %v6309_v61, 16 }
  0x2a   : > { %5296 = vmatmul.mubr.msk.bf16.gmra.mrb[4].mxu0 %vm535_vm2, %v510_v26  ;;  %v999_v26 = vrot.slane %v997_v19, 2  ;;  %v1008_v33 = vor.u32 %v1007_v28, %v1004_v27  ;;  %v1158_v42 = vsel %vm1153_vm5, %v1155_v23, %v1157_v37  ;;  %v1159_v46 = vrot.slane %v6309_v61, 2  ;;  %v6448_v28 = vld [vmem:[%s6191_s25 + $0x20] sm:$0xff]  }
  0x2b   : > { %5299 = vmatprep.mubr.msk.bf16.mxu0 %vm6079_vm1, %v6078_v2  ;;  %v1022_v48 = vrot.slane %v1020_v44, 1  ;;  %v1025_v49 = vrot.slane %v1023_v45, 2  ;;  %v1029_v52 = vshrl.u32 %v6329_v3, 16  ;;  %v1032_v53 = vshll.u32 %v6329_v3, 16 }
  0x2c   : > { %5322 = vmatmul.mubr.msk.bf16.gmra.mrb[8].mxu1 %vm535_vm2, %v6205_v14  ;;  %v729_v14 = vsel %vm720_vm4, %v726_v6, %v728_v11  ;;  %v1160_v50 = vsel %vm1153_vm5, %v1157_v37, %v1159_v46  ;;  %v1161_v54 = vrot.slane %v6329_v3, 2  ;;  %v1038_v1 = vshrl.u32 %v5967_v60, 16 }
  0x2d   : > { %5325 = vmatprep.mubr.msk.bf16.mxu1 %vm6079_vm1, %v6078_v2  ;;  %v1031_v58 = vrot.slane %v1029_v52, 1  ;;  %v1041_v3 = vshll.u32 %v5967_v60, 16  ;;  %v1444_v21 = vshrl.u32 %v6432_v17, 16  ;;  %v1447_v22 = vshll.u32 %v6432_v17, 16 }
  0x2e   : > { %v1162_v61 = vsel %vm1153_vm5, %v1159_v46, %v1161_v54  ;;  %v1453_v34 = vshrl.u32 %v6448_v28, 16 }
  0x2f   : > { %v1043_v11 = vrot.slane %v1041_v3, 2  ;;  %v1449_v27 = vrot.slane %v1447_v22, 3  ;;  %v1838_v22 = vld [vmem:[%s6251_s21 + $0x4] sm:$0xf] }
  0x32   : > { %5300 = vmatmul.mubr.msk.bf16.gmra.mrb[8].mxu0 %vm535_vm2, %v518_v32 }
  0x33   : > { %5303 = vmatprep.mubr.msk.bf16.mxu0 %vm6079_vm1, %v6078_v2 }
  0x34   : > { %5326 = vmatmul.mubr.msk.bf16.gmra.mrb[12].mxu1 %vm535_vm2, %v6222_v25  ;;  %v996_v25 = vrot.slane %v994_v18, 1 }
  0x35   : > { %5329 = vmatprep.mubr.msk.bf16.mxu1 %vm6079_vm1, %v6078_v2 }
  0x36   : > { %v1000_v32 = vor.u32 %v999_v26, %v996_v25  ;;  %v1446_v26 = vrot.slane %v1444_v21, 2  ;;  %v1837_v21 = vld [vmem:[%s6251_s21] sm:$0xf] }
  0x38   : > { %v1009_v38 = vsel %vm992_vm6, %v1000_v32, %v1008_v33  ;;  %v4895_v32 = vld [vmem:[%s7625_s3 + $0x10] sm:$0x3] }
  0x39   : > { %v1614_v37 = vsel %vm551_vm0, %v4895_v32, 0 }
  0x3a   : > { %5304 = vmatmul.mubr.msk.bf16.gmra.mrb[12].mxu0 %vm535_vm2, %v526_v40  ;;  %v1016_v40 = vrot.slane %v1014_v35, 2  ;;  %v1456_v35 = vshll.u32 %v6448_v28, 16 }
  0x3b   : > { %5307 = vmatprep.mubr.msk.bf16.mxu0 %vm6079_vm1, %v6078_v2 }
  0x3c   : > { %5330 = vmatmul.mubr.msk.bf16.gmra.mrb[16].mxu1 %vm535_vm2, %v6236_v31  ;;  %v1495_v31 = vsel %vm551_vm0, %v4888_v29, 0  ;;  %v1017_v43 = vor.u32 %v1016_v40, %v1013_v39  ;;  %v1455_v39 = vrot.slane %v1453_v34, 2  ;;  %v1458_v40 = vrot.slane %v1456_v35, 3 }
  0x3d   : > { %5357 = vmatprep.mubr.msk.bf16.mxu1 %vm6079_vm1, %v6078_v2 }
  0x3e   : > { %v1018_v47 = vsel %vm992_vm6, %v1008_v33, %v1017_v43  ;;  %v1450_v33 = vor.u32 %v1449_v27, %v1446_v26  ;;  %v5980_v26 = vld [vmem:[%s6251_s21 + $0x20] sm:$0xff]  }
  0x42   : > { %5308 = vmatmul.mubr.msk.bf16.gmra.mrb[16].mxu0 %vm535_vm2, %v534_v51  ;;  %v1026_v51 = vor.u32 %v1025_v49, %v1022_v48 }
  0x43   : > { %5335 = vmatprep.mubr.msk.bf16.mxu0 %vm6079_vm1, %v6078_v2 }
  0x44   : > { %5358 = vmatmul.mubr.msk.bf16.vlgmr.msra.gmra.mrb[20].mxu1 %vm535_vm2, %v876_v55  ;;  %v1266_v55 = vld [vmem:[%s6191_s25 + $0x8] sm:$0xc]  ;;  %v1027_v57 = vsel %vm992_vm6, %v1017_v43, %v1026_v51  ;;  %v1459_v43 = vor.u32 %v1458_v40, %v1455_v39 }
  0x45   : > { %5400 = vmatpush3.bf16.msra.mxu1 %v1181_v56  ;;  %5361 = vmatprep.mubr.msk.bf16.mxu1 %vm6079_vm1, %v6078_v2  ;;  %v6412_v56 = vld [vmem:[%s6191_s25 + $0xc] sm:$0xf] }
  0x46   : > { %5443 = vmatprep.subr.bf16.mxu1 %v6078_v2 }
  0x4a   : > { %5336 = vmatmul.mubr.msk.bf16.vlgmr.msra.gmra.mrb[20].mxu0 %vm535_vm2, %v723_v62  ;;  %v4877_v62 = vcombine.low %v1266_v55, %v6412_v56 }
  0x4b   : > { %5378 = vmatpush3.bf16.msra.mxu0 %v1062_v59  ;;  %5339 = vmatprep.mubr.msk.bf16.mxu0 %vm6079_vm1, %v6078_v2  ;;  %v1034_v59 = vrot.slane %v1032_v53, 2 }
  0x4c   : > { %5362 = vmatmul.mubr.msk.bf16.gmra.mrb[24].mxu1 %vm535_vm2, %v878_v63  ;;  %5421 = vmatprep.subr.bf16.mxu0 %v6078_v2  ;;  %v6419_v63 = vld [vmem:[%s6191_s25 + $0x10] sm:$0xff]   ;;  %v1430_v6 = vshll.u32 %v4877_v62, 16 }
  0x4d   : > { %5365 = vmatprep.mubr.msk.bf16.mxu1 %vm6079_vm1, %v6078_v2  ;;  %v1035_v0 = vor.u32 %v1034_v59, %v1031_v58  ;;  %v1435_v7 = vshrl.u32 %v6419_v63, 16 }
  0x4f   : > { %v1036_v9 = vsel %vm992_vm6, %v1026_v51, %v1035_v0  ;;  %v1312_v51 = vrot.slane %v6448_v28, 2 }
  0x52   : > { %5340 = vmatmul.mubr.msk.bf16.gmra.mrb[24].mxu0 %vm535_vm2, %v725_v4  ;;  %v1163_v4 = vrot.slane %v5967_v60, 2 }
  0x53   : > { %5343 = vmatprep.mubr.msk.bf16.mxu0 %vm6079_vm1, %v6078_v2 }
  0x54   : > { %5366 = vmatmul.mubr.msk.bf16.gmra.mrb[28].mxu1 %vm535_vm2, %v880_v5  ;;  %v1427_v5 = vshrl.u32 %v4877_v62, 16  ;;  %v1164_v12 = vsel %vm1153_vm5, %v1161_v54, %v1163_v4  ;;  %v1580_v4 = vld [vmem:[%s6191_s25 + $0x8] sm:$0x8] }
  0x55   : > { %5369 = vmatprep.mubr.msk.bf16.mxu1 %vm6079_vm1, %v6078_v2 }
  0x56   : > { %v1429_v13 = vrot.slane %v1427_v5, 2 }
  0x5a   : > { %5344 = vmatmul.mubr.msk.bf16.gmra.mrb[28].mxu0 %vm535_vm2, %v727_v8  ;;  %v1438_v8 = vshll.u32 %v6419_v63, 16 }
  0x5b   : > { %5347 = vmatprep.mubr.msk.bf16.mxu0 %vm6079_vm1, %v6078_v2 }
  0x5c   : > { %5370 = vmatmul.mubr.msk.bf16.gmra.mrb[32].mxu1 %vm535_vm2, %v882_v10  ;;  %v1040_v10 = vrot.slane %v1038_v1, 1  ;;  %v1440_v16 = vrot.slane %v1438_v8, 3  ;;  %v5976_v8 = vld [vmem:[%s6251_s21] sm:$0xff]  }
  0x5d   : > { %5373 = vmatprep.mubr.msk.bf16.mxu1 %vm6079_vm1, %v6078_v2 }
  0x5e   : > { %v1044_v18 = vor.u32 %v1043_v11, %v1040_v10  ;;  %v1588_v11 = vrot.slane %v6419_v63, 3 }
  0x60   : > { %v1045_v23 = vsel %vm992_vm6, %v1035_v0, %v1044_v18  ;;  %v5973_v0 = vld [vmem:[%s6191_s25 + $0x30] ss:$0 sps:$4 sm:$0x33]  }
  0x61   : > { %v1316_v3 = vrot.slane %v5973_v0, 2 }
  0x62   : > { %5348 = vmatmul.mubr.msk.bf16.gmra.mrb[32].mxu0 %vm535_vm2, %v729_v14  ;;  %v1432_v14 = vrot.slane %v1430_v6, 3  ;;  %v4896_v6 = vcombine.low %v1580_v4, %v6412_v56  ;;  %v4913_v56 = vld [vmem:[%s7625_s3 + $0x14] sm:$0x3] }
  0x63   : > { %5351 = vmatprep.mubr.msk.bf16.mxu0 %vm6079_vm1, %v6078_v2 }
  0x64   : > { %5374 = vmatmul.mubr.msk.bf16.gmra.mrb[36].mxu1 %vm535_vm2, %v884_v15  ;;  %v1437_v15 = vrot.slane %v1435_v7, 2  ;;  %v1433_v19 = vor.u32 %v1432_v14, %v1429_v13  ;;  %v4925_v7 = vld [vmem:[%s7625_s3 + $0x16] sm:$0x3]  ;;  %v1587_v10 = vrot.slane %v4896_v6, 3  ;;  %v1938_v13 = vsel %vm551_vm0, %v4913_v56, 0  ;;  %v5977_v14 = vld [vmem:[%s6251_s21 + $0x8] sm:$0xff]  }
  0x65   : > { %5401 = vmatprep.mubr.msk.bf16.mxu1 %vm6079_vm1, %v6078_v2 }
  0x66   : > { %v1441_v20 = vor.u32 %v1440_v16, %v1437_v15  ;;  %v5978_v16 = vld [vmem:[%s6251_s21 + $0x10] sm:$0xff]  }
  0x68   : > { %v1442_v25 = vsel %vm1425_vm7, %v1433_v19, %v1441_v20  ;;  %v5979_v19 = vld [vmem:[%s6251_s21 + $0x18] sm:$0xff]  }
  0x6a   : > { %5352 = vmatmul.mubr.msk.bf16.gmra.mrb[36].mxu0 %vm535_vm2, %v731_v24  ;;  %v4902_v24 = vld [vmem:[%s7625_s3 + $0x12] sm:$0x3] }
  0x6b   : > { %5379 = vmatprep.mubr.msk.bf16.mxu0 %vm6079_vm1, %v6078_v2  ;;  %v1752_v29 = vsel %vm551_vm0, %v4902_v24, 0 }
  0x6c   : > { %5402 = vmatmul.mubr.msk.bf16.vlgmr.msra.gmra.mrb[40].mxu1 %vm535_vm2, %v1156_v30  ;;  %v1307_v30 = vrot.slane %v4877_v62, 2 }
  0x6d   : > { %5444 = vmatpush3.bf16.msra.mxu1 %v1495_v31  ;;  %5405 = vmatprep.mubr.msk.bf16.mxu1 %vm6079_vm1, %v6078_v2  ;;  %v1308_v31 = vrot.slane %v6419_v63, 2  ;;  %v1590_v63 = vrot.slane %v6432_v17, 3 }
  0x6e   : > { %5487 = vmatprep.subr.bf16.mxu1 %v6078_v2 }
  0x6f   : > { %v1309_v36 = vsel %vm1153_vm5, %v1307_v30, %v1308_v31  ;;  %v1591_v15 = vsel %vm1586_vm8, %v1588_v11, %v1590_v63 }
  0x72   : > { %5380 = vmatmul.mubr.msk.bf16.vlgmr.msra.gmra.mrb[40].mxu0 %vm535_vm2, %v1009_v38  ;;  %v1451_v38 = vsel %vm1425_vm7, %v1441_v20, %v1450_v33 }
  0x73   : > { %5422 = vmatpush3.bf16.msra.mxu0 %v1334_v41  ;;  %5383 = vmatprep.mubr.msk.bf16.mxu0 %vm6079_vm1, %v6078_v2  ;;  %v6468_v41 = vld [vmem:[%s6191_s25 + $0x28] sm:$0xff]  }
  0x74   : > { %5406 = vmatmul.mubr.msk.bf16.gmra.mrb[44].mxu1 %vm535_vm2, %v1158_v42  ;;  %5465 = vmatprep.subr.bf16.mxu0 %v6078_v2  ;;  %v1310_v42 = vrot.slane %v6432_v17, 2  ;;  %v1462_v44 = vshrl.u32 %v6468_v41, 16  ;;  %v1465_v45 = vshll.u32 %v6468_v41, 16  ;;  %v1314_v60 = vrot.slane %v6468_v41, 2 }
  0x75   : > { %5409 = vmatprep.mubr.msk.bf16.mxu1 %vm6079_vm1, %v6078_v2  ;;  %v1592_v17 = vrot.slane %v6448_v28, 3  ;;  %v1594_v20 = vrot.slane %v6468_v41, 3 }
  0x76   : > { %v1311_v46 = vsel %vm1153_vm5, %v1308_v31, %v1310_v42  ;;  %v1464_v48 = vrot.slane %v1462_v44, 2  ;;  %v1467_v49 = vrot.slane %v1465_v45, 3  ;;  %v1313_v55 = vsel %vm1153_vm5, %v1310_v42, %v1312_v51  ;;  %v5984_v42 = vld [vmem:[%s6251_s21 + $0x10] sm:$0xff]  }
  0x77   : > { %v1315_v62 = vsel %vm1153_vm5, %v1312_v51, %v1314_v60  ;;  %v1317_v5 = vsel %vm1153_vm5, %v1314_v60, %v1316_v3  ;;  %v1593_v18 = vsel %vm1586_vm8, %v1590_v63, %v1592_v17  ;;  %v1595_v24 = vsel %vm1586_vm8, %v1592_v17, %v1594_v20  ;;  %v5986_v3 = vld [vmem:[%s6251_s21 + $0x20] sm:$0xff]  }
  0x78   : > { %v1468_v52 = vor.u32 %v1467_v49, %v1464_v48  ;;  %v2032_v44 = vrot.slane %v5984_v42, 1 }
  0x7a   : > { %5384 = vmatmul.mubr.msk.bf16.gmra.mrb[44].mxu0 %vm535_vm2, %v1018_v47  ;;  %v1460_v47 = vsel %vm1425_vm7, %v1450_v33, %v1459_v43 }
  0x7b   : > { %5387 = vmatprep.mubr.msk.bf16.mxu0 %vm6079_vm1, %v6078_v2 }
  0x7c   : > { %5410 = vmatmul.mubr.msk.bf16.gmra.mrb[48].mxu1 %vm535_vm2, %v1160_v50  ;;  %v6483_v50 = vld [vmem:[%s6191_s25 + $0x30] ss:$0 sps:$4 sm:$0x77]  }
  0x7d   : > { %5413 = vmatprep.mubr.msk.bf16.mxu1 %vm6079_vm1, %v6078_v2  ;;  %v1471_v53 = vshrl.u32 %v6483_v50, 16  ;;  %v1474_v54 = vshll.u32 %v6483_v50, 16  ;;  %v1596_v28 = vrot.slane %v6483_v50, 3 }
  0x7f   : > { %v1473_v58 = vrot.slane %v1471_v53, 2  ;;  %v1476_v59 = vrot.slane %v1474_v54, 3  ;;  %v1597_v33 = vsel %vm1586_vm8, %v1594_v20, %v1596_v28 }
  0x82   : > { %5388 = vmatmul.mubr.msk.bf16.gmra.mrb[48].mxu0 %vm535_vm2, %v1027_v57  ;;  %v1469_v57 = vsel %vm1425_vm7, %v1459_v43, %v1468_v52  ;;  %v4932_v43 = vld [vmem:[%s7625_s3 + $0x18] sm:$0x3] }
  0x83   : > { %5391 = vmatprep.mubr.msk.bf16.mxu0 %vm6079_vm1, %v6078_v2  ;;  %v2209_v48 = vsel %vm551_vm0, %v4932_v43, 0 }
  0x84   : > { %5414 = vmatmul.mubr.msk.bf16.gmra.mrb[52].mxu1 %vm535_vm2, %v1162_v61  ;;  %v1477_v61 = vor.u32 %v1476_v59, %v1473_v58  ;;  %v1898_v58 = vshrl.u32 %v5984_v42, 16 }
  0x85   : > { %5417 = vmatprep.mubr.msk.bf16.mxu1 %vm6079_vm1, %v6078_v2 }
  0x86   : > { %v1478_v1 = vsel %vm1425_vm7, %v1468_v52, %v1477_v61  ;;  %v5985_v52 = vld [vmem:[%s6251_s21 + $0x18] sm:$0xff]  }
  0x87   : > { %v2034_v53 = vrot.slane %v5985_v52, 1  ;;  %v1902_v59 = vshll.u32 %v5985_v52, 16 }
  0x8a   : > { %5392 = vmatmul.mubr.msk.bf16.gmra.mrb[52].mxu0 %vm535_vm2, %v1036_v9  ;;  %v2056_v9 = vsel %vm551_vm0, %v4925_v7, 0 }
  0x8b   : > { %5395 = vmatprep.mubr.msk.bf16.mxu0 %vm6079_vm1, %v6078_v2 }
  0x8c   : > { %5418 = vmatmul.mubr.msk.bf16.gmra.mrb[56].mxu1 %vm535_vm2, %v1164_v12  ;;  %v1589_v12 = vsel %vm1586_vm8, %v1587_v10, %v1588_v11 }
  0x8d   : > { %5445 = vmatprep.mubr.msk.bf16.mxu1 %vm6079_vm1, %v6078_v2 }
  0x92   : > { %5396 = vmatmul.mubr.msk.bf16.gmra.mrb[56].mxu0 %vm535_vm2, %v1045_v23  ;;  %v2023_v23 = vld [vmem:[%s6251_s21] sm:$0xe] }
  0x93   : > { %5423 = vmatprep.mubr.msk.bf16.mxu0 %vm6079_vm1, %v6078_v2  ;;  %v4926_v27 = vcombine.low %v2023_v23, %v1838_v22 }
  0x94   : > { %5446 = vmatmul.mubr.msk.bf16.vlgmr.msra.gmra.mrb[60].mxu1 %vm535_vm2, %v1442_v25  ;;  %v4914_v25 = vcombine.low %v1837_v21, %v1838_v22  ;;  %v5987_v21 = vld [vmem:[%s6251_s21 + $0x28] ss:$0 sps:$4 sm:$0x11]  }
  0x95   : > { %5488 = vmatpush3.bf16.msra.mxu1 %v1752_v29  ;;  %5449 = vmatprep.mubr.msk.bf16.mxu1 %vm6079_vm1, %v6078_v2  ;;  %v5982_v29 = vld [vmem:[%s6251_s21 + $0x8] sm:$0xff]   ;;  %v2029_v31 = vrot.slane %v4926_v27, 1 }
  0x96   : > { %5531 = vmatprep.subr.bf16.mxu1 %v6078_v2  ;;  %v1881_v30 = vshll.u32 %v4914_v25, 16  ;;  %v2030_v32 = vrot.slane %v5982_v29, 1  ;;  %v1879_v34 = vshrl.u32 %v4914_v25, 16 }
  0x98   : > { %v1883_v35 = vrot.slane %v1881_v30, 1  ;;  %v2033_v49 = vsel %vm720_vm4, %v2030_v32, %v2032_v44 }
  0x9a   : > { %5424 = vmatmul.mubr.msk.bf16.vlgmr.msra.gmra.mrb[60].mxu0 %vm535_vm2, %v1309_v36  ;;  %v1886_v36 = vshll.u32 %v5982_v29, 16  ;;  %v1884_v40 = vor.u32 %v1883_v35, %v1879_v34  ;;  %v1914_v35 = vshrl.u32 %v5986_v3, 16 }
  0x9b   : > { %5466 = vmatpush3.bf16.msra.mxu0 %v1614_v37  ;;  %5427 = vmatprep.mubr.msk.bf16.mxu0 %vm6079_vm1, %v6078_v2  ;;  %v4944_v37 = vld [vmem:[%s7625_s3 + $0x1a] sm:$0x3] }
  0x9c   : > { %5450 = vmatmul.mubr.msk.bf16.gmra.mrb[64].mxu1 %vm535_vm2, %v1451_v38  ;;  %5509 = vmatprep.subr.bf16.mxu0 %v6078_v2  ;;  %v2031_v38 = vsel %vm720_vm4, %v2029_v31, %v2030_v32  ;;  %v2369_v39 = vsel %vm551_vm0, %v4944_v37, 0  ;;  %v1888_v41 = vrot.slane %v1886_v36, 1  ;;  %v1918_v36 = vshll.u32 %v5987_v21, 16 }
  0x9d   : > { %5453 = vmatprep.mubr.msk.bf16.mxu1 %vm6079_vm1, %v6078_v2 }
  0x9e   : > { %v1889_v45 = vsel %vm490_vm3, %v1884_v40, %v1888_v41 }
  0xa2   : > { %5428 = vmatmul.mubr.msk.bf16.gmra.mrb[64].mxu0 %vm535_vm2, %v1311_v46  ;;  %v1890_v46 = vshrl.u32 %v5982_v29, 16 }
  0xa3   : > { %5431 = vmatprep.mubr.msk.bf16.mxu0 %vm6079_vm1, %v6078_v2 }
  0xa4   : > { %5454 = vmatmul.mubr.msk.bf16.gmra.mrb[68].mxu1 %vm535_vm2, %v1460_v47  ;;  %v1894_v47 = vshll.u32 %v5984_v42, 16  ;;  %v1892_v50 = vor.u32 %v1890_v46, %v1888_v41  ;;  %v6644_v46 = vld [vmem:[%s6251_s21 + $0x14] sm:$0xff]  }
  0xa5   : > { %5457 = vmatprep.mubr.msk.bf16.mxu1 %vm6079_vm1, %v6078_v2 }
  0xa6   : > { %v1896_v51 = vrot.slane %v1894_v47, 1 }
  0xa8   : > { %v1900_v0 = vor.u32 %v1898_v58, %v1896_v51 }
  0xaa   : > { %5432 = vmatmul.mubr.msk.bf16.gmra.mrb[68].mxu0 %vm535_vm2, %v1313_v55  ;;  %v1897_v55 = vsel %vm490_vm3, %v1892_v50, %v1896_v51 }
  0xab   : > { %5435 = vmatprep.mubr.msk.bf16.mxu0 %vm6079_vm1, %v6078_v2 }
  0xac   : > { %5458 = vmatmul.mubr.msk.bf16.gmra.mrb[72].mxu1 %vm535_vm2, %v1469_v57 }
  0xad   : > { %5461 = vmatprep.mubr.msk.bf16.mxu1 %vm6079_vm1, %v6078_v2 }
  0xb2   : > { %5436 = vmatmul.mubr.msk.bf16.gmra.mrb[72].mxu0 %vm535_vm2, %v1315_v62  ;;  %v2035_v62 = vsel %vm720_vm4, %v2032_v44, %v2034_v53 }
  0xb3   : > { %5439 = vmatprep.mubr.msk.bf16.mxu0 %vm6079_vm1, %v6078_v2 }
  0xb4   : > { %5462 = vmatmul.mubr.msk.bf16.gmra.mrb[76].mxu1 %vm535_vm2, %v1478_v1  ;;  %v1904_v1 = vrot.slane %v1902_v59, 1 }
  0xb5   : > { %5489 = vmatprep.mubr.msk.bf16.mxu1 %vm6079_vm1, %v6078_v2 }
  0xb6   : > { %v1905_v11 = vsel %vm490_vm3, %v1900_v0, %v1904_v1 }
  0xba   : > { %5440 = vmatmul.mubr.msk.bf16.gmra.mrb[76].mxu0 %vm535_vm2, %v1317_v5  ;;  %v2036_v5 = vrot.slane %v5986_v3, 1 }
  0xbb   : > { %5467 = vmatprep.mubr.msk.bf16.mxu0 %vm6079_vm1, %v6078_v2 }
  0xbc   : > { %5490 = vmatmul.mubr.msk.bf16.vlgmr.msra.gmra.mrb[80].mxu1 %vm535_vm2, %v5976_v8  ;;  %v2141_v8 = vld [vmem:[%s6251_s21 + $0x4] sm:$0xe]  ;;  %v2037_v17 = vsel %vm720_vm4, %v2034_v53, %v2036_v5  ;;  %v2318_v53 = vshrl.u32 %v6644_v46, 16 }
  0xbd   : > { %5532 = vmatpush3.bf16.msra.mxu1 %v2056_v9  ;;  %5493 = vmatprep.mubr.msk.bf16.mxu1 %vm6079_vm1, %v6078_v2  ;;  %v6614_v9 = vld [vmem:[%s6251_s21 + $0x8] sm:$0xf] }
  0xbe   : > { %5575 = vmatprep.subr.bf16.mxu1 %v6078_v2 }
  0xc2   : > { %5468 = vmatmul.mubr.msk.bf16.vlgmr.msra.gmra.mrb[80].mxu0 %vm535_vm2, %v1589_v12  ;;  %v1906_v12 = vshrl.u32 %v5985_v52, 16 }
  0xc3   : > { %5510 = vmatpush3.bf16.msra.mxu0 %v1938_v13  ;;  %5471 = vmatprep.mubr.msk.bf16.mxu0 %vm6079_vm1, %v6078_v2  ;;  %v1910_v13 = vshll.u32 %v5986_v3, 16 }
  0xc4   : > { %5494 = vmatmul.mubr.msk.bf16.gmra.mrb[84].mxu1 %vm535_vm2, %v5977_v14  ;;  %5553 = vmatprep.subr.bf16.mxu0 %v6078_v2  ;;  %v1908_v22 = vor.u32 %v1906_v12, %v1904_v1 }
  0xc5   : > { %5497 = vmatprep.mubr.msk.bf16.mxu1 %vm6079_vm1, %v6078_v2  ;;  %v1912_v23 = vrot.slane %v1910_v13, 1 }
  0xca   : > { %5472 = vmatmul.mubr.msk.bf16.gmra.mrb[84].mxu0 %vm535_vm2, %v1591_v15 }
  0xcb   : > { %5475 = vmatprep.mubr.msk.bf16.mxu0 %vm6079_vm1, %v6078_v2 }
  0xcc   : > { %5498 = vmatmul.mubr.msk.bf16.gmra.mrb[88].mxu1 %vm535_vm2, %v5978_v16 }
  0xcd   : > { %5501 = vmatprep.mubr.msk.bf16.mxu1 %vm6079_vm1, %v6078_v2 }
  0xd2   : > { %5476 = vmatmul.mubr.msk.bf16.gmra.mrb[88].mxu0 %vm535_vm2, %v1593_v18  ;;  %v6621_v18 = vcombine.low %v2141_v8, %v6614_v9  ;;  %v6664_v8 = vld [vmem:[%s6251_s21 + $0x1c] sm:$0xff]  }
  0xd3   : > { %5479 = vmatprep.mubr.msk.bf16.mxu0 %vm6079_vm1, %v6078_v2 }
  0xd4   : > { %5502 = vmatmul.mubr.msk.bf16.gmra.mrb[92].mxu1 %vm535_vm2, %v5979_v19  ;;  %v6624_v19 = vld [vmem:[%s6251_s21 + $0xc] sm:$0xff]   ;;  %v2304_v27 = vshll.u32 %v6621_v18, 16 }
  0xd5   : > { %5505 = vmatprep.mubr.msk.bf16.mxu1 %vm6079_vm1, %v6078_v2  ;;  %v2309_v28 = vshrl.u32 %v6624_v19, 16  ;;  %v2312_v29 = vshll.u32 %v6624_v19, 16  ;;  %v2183_v12 = vrot.slane %v6624_v19, 1 }
  0xd6   : > { %v2306_v43 = vrot.slane %v2304_v27, 2 }
  0xd7   : > { %v2311_v44 = vrot.slane %v2309_v28, 1 }
  0xda   : > { %5480 = vmatmul.mubr.msk.bf16.gmra.mrb[92].mxu0 %vm535_vm2, %v1595_v24  ;;  %v2038_v24 = vrot.slane %v5987_v21, 1 }
  0xdb   : > { %5483 = vmatprep.mubr.msk.bf16.mxu0 %vm6079_vm1, %v6078_v2 }
  0xdc   : > { %5506 = vmatmul.mubr.msk.bf16.gmra.mrb[96].mxu1 %vm535_vm2, %v5980_v26  ;;  %v2301_v26 = vshrl.u32 %v6621_v18, 16 }
  0xdd   : > { %5533 = vmatprep.mubr.msk.bf16.mxu1 %vm6079_vm1, %v6078_v2 }
  0xde   : > { %v2303_v42 = vrot.slane %v2301_v26, 1 }
  0xe0   : > { %v2307_v51 = vor.u32 %v2306_v43, %v2303_v42 }
  0xe2   : > { %5484 = vmatmul.mubr.msk.bf16.gmra.mrb[96].mxu0 %vm535_vm2, %v1597_v33  ;;  %v1913_v33 = vsel %vm490_vm3, %v1908_v22, %v1912_v23 }
  0xe3   : > { %5511 = vmatprep.mubr.msk.bf16.mxu0 %vm6079_vm1, %v6078_v2 }
  0xe4   : > { %5534 = vmatmul.mubr.msk.bf16.vlgmr.msra.gmra.mrb[100].mxu1 %vm535_vm2, %v2031_v38 }
  0xe5   : > { %5576 = vmatpush3.bf16.msra.mxu1 %v2369_v39  ;;  %5537 = vmatprep.mubr.msk.bf16.mxu1 %vm6079_vm1, %v6078_v2  ;;  %v2039_v39 = vsel %vm720_vm4, %v2036_v5, %v2038_v24  ;;  %v2320_v5 = vrot.slane %v2318_v53, 1 }
  0xe6   : > { %5619 = vmatprep.subr.bf16.mxu1 %v6078_v2 }
  0xea   : > { %5512 = vmatmul.mubr.msk.bf16.vlgmr.msra.gmra.mrb[100].mxu0 %vm535_vm2, %v1889_v45  ;;  %v2314_v45 = vrot.slane %v2312_v29, 2 }
  0xeb   : > { %5554 = vmatpush3.bf16.msra.mxu0 %v2209_v48  ;;  %5515 = vmatprep.mubr.msk.bf16.mxu0 %vm6079_vm1, %v6078_v2  ;;  %v1916_v48 = vor.u32 %v1914_v35, %v1912_v23  ;;  %v2185_v35 = vrot.slane %v6644_v46, 1 }
  0xec   : > { %5538 = vmatmul.mubr.msk.bf16.gmra.mrb[104].mxu1 %vm535_vm2, %v2033_v49  ;;  %5597 = vmatprep.subr.bf16.mxu0 %v6078_v2  ;;  %v1920_v49 = vrot.slane %v1918_v36, 1  ;;  %v2315_v52 = vor.u32 %v2314_v45, %v2311_v44 }
  0xed   : > { %5541 = vmatprep.mubr.msk.bf16.mxu1 %vm6079_vm1, %v6078_v2  ;;  %v2186_v44 = vsel %vm720_vm4, %v2183_v12, %v2185_v35 }
  0xee   : > { %v675_v54 = vpop.f32.mrb[0].mxu1  ;;  %v1921_v59 = vsel %vm490_vm3, %v1916_v48, %v1920_v49 }
  0xef   : > { %v5315_v57 = vpop.f32.mrb[1].mxu1 }
  0xf0   : > { %v678_v60 = vpop.f32.mrb[2].mxu1 }
  0xf1   : > { %v5316_v61 = vpop.f32.mrb[3].mxu1 }
  0xf2   : > { %5516 = vmatmul.mubr.msk.bf16.gmra.mrb[104].mxu0 %vm535_vm2, %v1897_v55  ;;  %v4958_v61 = vld [vmem:[%s7625_s3 + $0x1e] sm:$0x3] }
  0xf3   : > { %5519 = vmatprep.mubr.msk.bf16.mxu0 %vm6079_vm1, %v6078_v2 }
  0xf4   : > { %5542 = vmatmul.mubr.msk.bf16.gmra.mrb[108].mxu1 %vm535_vm2, %v2035_v62 }
  0xf5   : > { %v589_v4 = vpop.f32.mrb[0].mxu0  ;;  %5545 = vmatprep.mubr.msk.bf16.mxu1 %vm6079_vm1, %v6078_v2 }
  0xf6   : > { %v6610_v6 = vadd.f32 %v675_v54, %v589_v4  ;;  %v5293_v7 = vpop.f32.mrb[1].mxu0  ;;  %v2321_v54 = vshll.u32 %v6644_v46, 16  ;;  %v2316_v4 = vsel %vm992_vm6, %v2307_v51, %v2315_v52 }
  0xf7   : > { %v592_v10 = vpop.f32.mrb[2].mxu0  ;;  %v683_v56 = vpop.f32.mrb[4].mxu1 }
  0xf8   : > { %v6617_v14 = vadd.f32 %v678_v60, %v592_v10  ;;  %v5294_v63 = vpop.f32.mrb[3].mxu0  ;;  %v5319_v15 = vpop.f32.mrb[5].mxu1  ;;  %v2323_v7 = vrot.slane %v2321_v54, 2  ;;  %v6708_v54 = vld [vmem:[%s6251_s21 + $0x2c] ss:$0 sps:$4 sm:$0x33]  }
  0xf9   : > { %v686_v16 = vpop.f32.mrb[6].mxu1  ;;  %v4951_v63 = vld [vmem:[%s7625_s3 + $0x1c] sm:$0x3] }
  0xfa   : > { %5520 = vmatmul.mubr.msk.bf16.gmra.mrb[108].mxu0 %vm535_vm2, %v1905_v11  ;;  %v5320_v20 = vpop.f32.mrb[7].mxu1  ;;  %v2640_v11 = vsel %vm551_vm0, %v4958_v61, 0  ;;  %v2324_v15 = vor.u32 %v2323_v7, %v2320_v5  ;;  %v2345_v61 = vshrl.u32 %v6708_v54, 16 }
  0xfb   : > { %5523 = vmatprep.mubr.msk.bf16.mxu0 %vm6079_vm1, %v6078_v2 }
  0xfc   : > { %5546 = vmatmul.mubr.msk.bf16.gmra.mrb[112].mxu1 %vm535_vm2, %v2037_v17  ;;  %v2330_v17 = vshll.u32 %v6664_v8, 16  ;;  %v2325_v29 = vsel %vm992_vm6, %v2315_v52, %v2324_v15 }
  0xfd   : > { %v597_v25 = vpop.f32.mrb[4].mxu0  ;;  %5549 = vmatprep.mubr.msk.bf16.mxu1 %vm6079_vm1, %v6078_v2 }
  0xfe   : > { %v5297_v30 = vpop.f32.mrb[5].mxu0  ;;  %v6637_v31 = vadd.f32 %v683_v56, %v597_v25  ;;  %v2182_v56 = vrot.slane %v6621_v18, 1  ;;  %v2487_v25 = vsel %vm551_vm0, %v4951_v63, 0 }
  0xff   : > { %v600_v32 = vpop.f32.mrb[6].mxu0  ;;  %v691_v34 = vpop.f32.mrb[8].mxu1 }
 0x100   : > { %v5298_v37 = vpop.f32.mrb[7].mxu0  ;;  %v5323_v38 = vpop.f32.mrb[9].mxu1  ;;  %v6641_v40 = vadd.f32 %v686_v16, %v600_v32  ;;  %v2327_v16 = vshrl.u32 %v6664_v8, 16  ;;  %v2184_v22 = vsel %vm720_vm4, %v2182_v56, %v2183_v12  ;;  %v2332_v32 = vrot.slane %v2330_v17, 2 }
 0x101   : > { %v694_v41 = vpop.f32.mrb[10].mxu1 }
 0x102   : > { %5524 = vmatmul.mubr.msk.bf16.gmra.mrb[112].mxu0 %vm535_vm2, %v1913_v33  ;;  %v5324_v47 = vpop.f32.mrb[11].mxu1  ;;  %v2329_v30 = vrot.slane %v2327_v16, 1  ;;  %v6689_v33 = vld [vmem:[%s6251_s21 + $0x24] sm:$0xff]  }
 0x103   : > { %5527 = vmatprep.mubr.msk.bf16.mxu0 %vm6079_vm1, %v6078_v2  ;;  %v2336_v38 = vshrl.u32 %v6689_v33, 16 }
 0x104   : > { %5550 = vmatmul.mubr.msk.bf16.gmra.mrb[116].mxu1 %vm535_vm2, %v2039_v39  ;;  %v2333_v37 = vor.u32 %v2332_v32, %v2329_v30  ;;  %v2339_v39 = vshll.u32 %v6689_v33, 16  ;;  %v5993_v30 = vld [vmem:[%s6251_s21 + $0x2c] ss:$0 sps:$4 sm:$0x11]  }
 0x105   : > { %v605_v50 = vpop.f32.mrb[8].mxu0  ;;  %5577 = vmatprep.mubr.msk.bf16.mxu1 %vm6079_vm1, %v6078_v2  ;;  %v2338_v52 = vrot.slane %v2336_v38, 1 }
 0x106   : > { %v5301_v55 = vpop.f32.mrb[9].mxu0  ;;  %v6654_v57 = vadd.f32 %v691_v34, %v605_v50  ;;  %v2334_v51 = vsel %vm992_vm6, %v2324_v15, %v2333_v37  ;;  %v2341_v53 = vrot.slane %v2339_v39, 2  ;;  %v2347_v15 = vrot.slane %v2345_v61, 1  ;;  %v6749_v39 = vld [vmem:[%s6251_s21 + $0x10] sm:$0xff]  }
 0x107   : > { %v608_v58 = vpop.f32.mrb[10].mxu0  ;;  %v699_v60 = vpop.f32.mrb[12].mxu1 }
 0x108   : > { %v5302_v62 = vpop.f32.mrb[11].mxu0  ;;  %v5327_v0 = vpop.f32.mrb[13].mxu1  ;;  %v6660_v1 = vadd.f32 %v694_v41, %v608_v58  ;;  %v2187_v58 = vrot.slane %v6664_v8, 1 }
 0x109   : > { %v702_v3 = vpop.f32.mrb[14].mxu1  ;;  %v2348_v62 = vshll.u32 %v6708_v54, 16 }
 0x10a   : > { %5528 = vmatmul.mubr.msk.bf16.gmra.mrb[116].mxu0 %vm535_vm2, %v1921_v59  ;;  %v5328_v10 = vpop.f32.mrb[15].mxu1  ;;  %v2188_v5 = vsel %vm720_vm4, %v2185_v35, %v2187_v58 }
 0x10b   : > { %5555 = vmatprep.mubr.msk.bf16.mxu0 %vm6079_vm1, %v6078_v2  ;;  %v2350_v16 = vrot.slane %v2348_v62, 2 }
 0x10c   : > { %5578 = vmatmul.mubr.msk.bf16.vlgmr.msra.gmra.mrb[120].mxu1 %vm535_vm2, %v2316_v4 }
 0x10d   : > { %v613_v13 = vpop.f32.mrb[12].mxu0  ;;  %5620 = vmatpush3.bf16.msra.mxu1 %v2640_v11  ;;  %5581 = vmatprep.mubr.msk.bf16.mxu1 %vm6079_vm1, %v6078_v2 }
 0x10e   : > { %v5305_v18 = vpop.f32.mrb[13].mxu0  ;;  %v6680_v20 = vadd.f32 %v699_v60, %v613_v13  ;;  %5663 = vmatprep.subr.bf16.mxu1 %v6078_v2  ;;  %v2342_v60 = vor.u32 %v2341_v53, %v2338_v52 }
 0x10f   : > { %v616_v21 = vpop.f32.mrb[14].mxu0  ;;  %v707_v23 = vpop.f32.mrb[16].mxu1 }
 0x110   : > { %v5306_v24 = vpop.f32.mrb[15].mxu0  ;;  %v5331_v26 = vpop.f32.mrb[17].mxu1  ;;  %v6685_v27 = vadd.f32 %v702_v3, %v616_v21  ;;  %v2343_v63 = vsel %vm992_vm6, %v2333_v37, %v2342_v60  ;;  %v2351_v21 = vor.u32 %v2350_v16, %v2347_v15 }
 0x111   : > { %v710_v28 = vpop.f32.mrb[18].mxu1  ;;  %v2572_v24 = vld [vmem:[%s6251_s21 + $0x8] sm:$0xc] }
 0x112   : > { %5556 = vmatmul.mubr.msk.bf16.vlgmr.msra.gmra.mrb[120].mxu0 %vm535_vm2, %v2184_v22  ;;  %v5332_v34 = vpop.f32.mrb[19].mxu1  ;;  %v2352_v38 = vsel %vm992_vm6, %v2342_v60, %v2351_v21 }
 0x113   : > { %5598 = vmatpush3.bf16.msra.mxu0 %v2487_v25  ;;  %5559 = vmatprep.mubr.msk.bf16.mxu0 %vm6079_vm1, %v6078_v2  ;;  %v6737_v25 = vld [vmem:[%s6251_s21 + $0xc] sm:$0xf] }
 0x114   : > { %5582 = vmatmul.mubr.msk.bf16.gmra.mrb[124].mxu1 %vm535_vm2, %v2325_v29  ;;  %5641 = vmatprep.subr.bf16.mxu0 %v6078_v2 }
 0x115   : > { %v621_v36 = vpop.f32.mrb[16].mxu0  ;;  %5585 = vmatprep.mubr.msk.bf16.mxu1 %vm6079_vm1, %v6078_v2 }
 0x116   : > { %v5309_v41 = vpop.f32.mrb[17].mxu0  ;;  %v6701_v42 = vadd.f32 %v707_v23, %v621_v36 }
 0x117   : > { %v624_v43 = vpop.f32.mrb[18].mxu0  ;;  %v937_v45 = vpop.f32.mrb[20].mxu1 }
 0x118   : > { %v5310_v47 = vpop.f32.mrb[19].mxu0  ;;  %v5359_v48 = vpop.f32.mrb[21].mxu1  ;;  %v6704_v49 = vadd.f32 %v710_v28, %v624_v43 }
 0x119   : > { %v940_v50 = vpop.f32.mrb[22].mxu1  ;;  %v2614_v48 = vrot.slane %v6749_v39, 2 }
 0x11a   : > { %5560 = vmatmul.mubr.msk.bf16.gmra.mrb[124].mxu0 %vm535_vm2, %v2186_v44  ;;  %v5360_v55 = vpop.f32.mrb[23].mxu1  ;;  %v2191_v44 = vrot.slane %v5993_v30, 1 }
 0x11b   : > { %5563 = vmatprep.mubr.msk.bf16.mxu0 %vm6079_vm1, %v6078_v2 }
 0x11c   : > { %5586 = vmatmul.mubr.msk.bf16.gmra.mrb[128].mxu1 %vm535_vm2, %v2334_v51 }
 0x11d   : > { %v784_v59 = vpop.f32.mrb[20].mxu0  ;;  %5589 = vmatprep.mubr.msk.bf16.mxu1 %vm6079_vm1, %v6078_v2 }
 0x11e   : > { %v823_v0 = vadd.f32 %v784_v59, %v6610_v6  ;;  %v5337_v3 = vpop.f32.mrb[21].mxu0  ;;  %v4977_v59 = vld [vmem:[%s7625_s3 + $0x22] sm:$0x3] }
 0x11f   : > { %v787_v4 = vpop.f32.mrb[22].mxu0  ;;  %v945_v7 = vpop.f32.mrb[24].mxu1 }
 0x120   : > { %v824_v10 = vadd.f32 %v787_v4, %v6617_v14  ;;  %v5338_v11 = vpop.f32.mrb[23].mxu0  ;;  %v5363_v56 = vpop.f32.mrb[25].mxu1  ;;  %v6722_v12 = vadd.f32 %v937_v45, %v823_v0  ;;  %v2189_v14 = vrot.slane %v6689_v33, 1  ;;  %v6773_v4 = vld [vmem:[%s6251_s21 + $0x18] sm:$0xff]  }
 0x121   : > { %v948_v13 = vpop.f32.mrb[26].mxu1  ;;  %v4970_v56 = vld [vmem:[%s7625_s3 + $0x20] sm:$0x3] }
 0x122   : > { %5564 = vmatmul.mubr.msk.bf16.gmra.mrb[128].mxu0 %vm535_vm2, %v2188_v5  ;;  %v5364_v6 = vpop.f32.mrb[27].mxu1  ;;  %v6726_v17 = vadd.f32 %v940_v50, %v824_v10  ;;  %v2190_v28 = vsel %vm720_vm4, %v2187_v58, %v2189_v14  ;;  %v2192_v53 = vsel %vm720_vm4, %v2189_v14, %v2191_v44 }
 0x123   : > { %5567 = vmatprep.mubr.msk.bf16.mxu0 %vm6079_vm1, %v6078_v2 }
 0x124   : > { %5590 = vmatmul.mubr.msk.bf16.gmra.mrb[132].mxu1 %vm535_vm2, %v2343_v63 }
 0x125   : > { %v792_v18 = vpop.f32.mrb[24].mxu0  ;;  %5593 = vmatprep.mubr.msk.bf16.mxu1 %vm6079_vm1, %v6078_v2 }
 0x126   : > { %v825_v22 = vadd.f32 %v792_v18, %v6637_v31  ;;  %v5341_v23 = vpop.f32.mrb[25].mxu0  ;;  %v6746_v31 = vcombine.low %v2572_v24, %v6737_v25 }
 0x127   : > { %v795_v26 = vpop.f32.mrb[26].mxu0  ;;  %v953_v29 = vpop.f32.mrb[28].mxu1 }
 0x128   : > { %v6741_v32 = vadd.f32 %v945_v7, %v825_v22  ;;  %v826_v34 = vadd.f32 %v795_v26, %v6641_v40  ;;  %v5342_v35 = vpop.f32.mrb[27].mxu0  ;;  %v5367_v36 = vpop.f32.mrb[29].mxu1  ;;  %v2454_v40 = vld [vmem:[%s6251_s21 + $0x4] sm:$0xc]  ;;  %v2613_v47 = vrot.slane %v6746_v31, 2  ;;  %v2918_v7 = vsel %vm551_vm0, %v4977_v59, 0 }
 0x129   : > { %v956_v37 = vpop.f32.mrb[30].mxu1  ;;  %v4952_v58 = vcombine.low %v2454_v40, %v6614_v9  ;;  %v2800_v22 = vsel %vm551_vm0, %v4970_v56, 0 }
 0x12a   : > { %v6751_v41 = vadd.f32 %v948_v13, %v826_v34  ;;  %5568 = vmatmul.mubr.msk.bf16.gmra.mrb[132].mxu0 %vm535_vm2, %v2190_v28  ;;  %v5368_v43 = vpop.f32.mrb[31].mxu1  ;;  %v2616_v13 = vrot.slane %v6773_v4, 2  ;;  %v6798_v28 = vld [vmem:[%s6251_s21 + $0x20] sm:$0xff]  }
 0x12b   : > { %5571 = vmatprep.mubr.msk.bf16.mxu0 %vm6079_vm1, %v6078_v2  ;;  %v2460_v10 = vrot.slane %v4952_v58, 2  ;;  %v2618_v34 = vrot.slane %v6798_v28, 2 }
 0x12c   : > { %5594 = vmatmul.mubr.msk.bf16.gmra.mrb[136].mxu1 %vm535_vm2, %v2352_v38  ;;  %v2617_v26 = vsel %vm1153_vm5, %v2614_v48, %v2616_v13 }
 0x12d   : > { %v800_v45 = vpop.f32.mrb[28].mxu0  ;;  %5621 = vmatprep.mubr.msk.bf16.mxu1 %vm6079_vm1, %v6078_v2 }
 0x12e   : > { %v827_v50 = vadd.f32 %v800_v45, %v6654_v57  ;;  %v5345_v51 = vpop.f32.mrb[29].mxu0  ;;  %v2615_v57 = vsel %vm1153_vm5, %v2613_v47, %v2614_v48  ;;  %v2619_v48 = vsel %vm1153_vm5, %v2616_v13, %v2618_v34 }
 0x12f   : > { %v803_v52 = vpop.f32.mrb[30].mxu0  ;;  %v961_v55 = vpop.f32.mrb[32].mxu1 }
 0x130   : > { %v6768_v60 = vadd.f32 %v953_v29, %v827_v50  ;;  %v828_v61 = vadd.f32 %v803_v52, %v6660_v1  ;;  %v5346_v62 = vpop.f32.mrb[31].mxu0  ;;  %v5371_v0 = vpop.f32.mrb[33].mxu1  ;;  %v2461_v1 = vrot.slane %v6624_v19, 2  ;;  %v6818_v50 = vld [vmem:[%s6251_s21 + $0x28] sm:$0xff]   ;;  %v2465_v52 = vrot.slane %v6664_v8, 2 }
 0x131   : > { %v964_v3 = vpop.f32.mrb[34].mxu1 }
 0x132   : > { %v6775_v5 = vadd.f32 %v956_v37, %v828_v61  ;;  %5572 = vmatmul.mubr.msk.bf16.gmra.mrb[136].mxu0 %vm535_vm2, %v2192_v53  ;;  %v5372_v9 = vpop.f32.mrb[35].mxu1  ;;  %v2462_v16 = vsel %vm1153_vm5, %v2460_v10, %v2461_v1  ;;  %v2620_v53 = vrot.slane %v6818_v50, 2  ;;  %v6001_v10 = vld [vmem:[%s6251_s21 + $0x30] ss:$0 sps:$4 sm:$0x33]  }
 0x133   : > { %5599 = vmatprep.mubr.msk.bf16.mxu0 %vm6079_vm1, %v6078_v2  ;;  %v2622_v56 = vrot.slane %v6001_v10, 2 }
 0x134   : > { %5622 = vmatmul.mubr.msk.bf16.vlgmr.msra.gmra.mrb[140].mxu1 %vm535_vm2, %v2615_v57 }
 0x135   : > { %v808_v11 = vpop.f32.mrb[32].mxu0  ;;  %5664 = vmatpush3.bf16.msra.mxu1 %v2918_v7  ;;  %5625 = vmatprep.mubr.msk.bf16.mxu1 %vm6079_vm1, %v6078_v2  ;;  %v2621_v7 = vsel %vm1153_vm5, %v2618_v34, %v2620_v53  ;;  %v2740_v34 = vshrl.u32 %v6749_v39, 16 }
 0x136   : > { %v829_v63 = vadd.f32 %v808_v11, %v6680_v20  ;;  %v5349_v15 = vpop.f32.mrb[33].mxu0  ;;  %5707 = vmatprep.subr.bf16.mxu1 %v6078_v2  ;;  %v2467_v11 = vrot.slane %v6689_v33, 2 }
 0x137   : > { %v811_v19 = vpop.f32.mrb[34].mxu0  ;;  %v969_v6 = vpop.f32.mrb[36].mxu1  ;;  %v2885_v15 = vld [vmem:[%s6251_s21 + $0x8] sm:$0x8] }
 0x138   : > { %v6792_v14 = vadd.f32 %v961_v55, %v829_v63  ;;  %v830_v18 = vadd.f32 %v811_v19, %v6685_v27  ;;  %v5350_v21 = vpop.f32.mrb[35].mxu0  ;;  %v5375_v23 = vpop.f32.mrb[37].mxu1  ;;  %v2463_v27 = vrot.slane %v6644_v46, 2 }
 0x139   : > { %v972_v24 = vpop.f32.mrb[38].mxu1 }
 0x13a   : > { %v6800_v20 = vadd.f32 %v964_v3, %v830_v18  ;;  %5600 = vmatmul.mubr.msk.bf16.vlgmr.msra.gmra.mrb[140].mxu0 %vm535_vm2, %v2462_v16  ;;  %v5376_v29 = vpop.f32.mrb[39].mxu1  ;;  %v2464_v38 = vsel %vm1153_vm5, %v2461_v1, %v2463_v27  ;;  %v2466_v61 = vsel %vm1153_vm5, %v2463_v27, %v2465_v52  ;;  %v2468_v16 = vsel %vm1153_vm5, %v2465_v52, %v2467_v11 }
 0x13b   : > { %5642 = vmatpush3.bf16.msra.mxu0 %v2800_v22  ;;  %5603 = vmatprep.mubr.msk.bf16.mxu0 %vm6079_vm1, %v6078_v2  ;;  %v2732_v27 = vshrl.u32 %v6746_v31, 16 }
 0x13c   : > { %5626 = vmatmul.mubr.msk.bf16.gmra.mrb[144].mxu1 %vm535_vm2, %v2617_v26  ;;  %5685 = vmatprep.subr.bf16.mxu0 %v6078_v2  ;;  %v4978_v26 = vcombine.low %v2885_v15, %v6737_v25 }
 0x13d   : > { %v816_v30 = vpop.f32.mrb[36].mxu0  ;;  %5629 = vmatprep.mubr.msk.bf16.mxu1 %vm6079_vm1, %v6078_v2 }
 0x13e   : > { %v831_v35 = vadd.f32 %v816_v30, %v6701_v42  ;;  %v5353_v36 = vpop.f32.mrb[37].mxu0  ;;  %v2735_v30 = vshll.u32 %v6746_v31, 16 }
 0x13f   : > { %v819_v37 = vpop.f32.mrb[38].mxu0  ;;  %v1217_v43 = vpop.f32.mrb[40].mxu1  ;;  %v2891_v36 = vrot.slane %v4978_v26, 3 }
 0x140   : > { %v6813_v44 = vadd.f32 %v969_v6, %v831_v35  ;;  %v832_v46 = vadd.f32 %v819_v37, %v6704_v49  ;;  %v5354_v40 = vpop.f32.mrb[39].mxu0  ;;  %v5403_v45 = vpop.f32.mrb[41].mxu1  ;;  %v2743_v35 = vshll.u32 %v6749_v39, 16  ;;  %v2892_v37 = vrot.slane %v6749_v39, 3 }
 0x141   : > { %v1220_v47 = vpop.f32.mrb[42].mxu1 }
 0x142   : > { %v6820_v51 = vadd.f32 %v972_v24, %v832_v46  ;;  %5604 = vmatmul.mubr.msk.bf16.gmra.mrb[144].mxu0 %vm535_vm2, %v2464_v38  ;;  %v5404_v42 = vpop.f32.mrb[43].mxu1  ;;  %v2623_v24 = vsel %vm1153_vm5, %v2620_v53, %v2622_v56  ;;  %v2737_v46 = vrot.slane %v2735_v30, 3 }
 0x143   : > { %5607 = vmatprep.mubr.msk.bf16.mxu0 %vm6079_vm1, %v6078_v2  ;;  %v4995_v42 = vld [vmem:[%s7625_s3 + $0x26] sm:$0x3] }
 0x144   : > { %5630 = vmatmul.mubr.msk.bf16.gmra.mrb[148].mxu1 %vm535_vm2, %v2619_v48  ;;  %v2745_v48 = vrot.slane %v2743_v35, 3 }
 0x145   : > { %v1098_v49 = vpop.f32.mrb[40].mxu0  ;;  %5633 = vmatprep.mubr.msk.bf16.mxu1 %vm6079_vm1, %v6078_v2 }
 0x146   : > { %v1137_v55 = vadd.f32 %v1098_v49, %v6722_v12  ;;  %v5381_v58 = vpop.f32.mrb[41].mxu0 }
 0x147   : > { %v1101_v59 = vpop.f32.mrb[42].mxu0  ;;  %v1225_v62 = vpop.f32.mrb[44].mxu1 }
 0x148   : > { %v6832_v0 = vadd.f32 %v1217_v43, %v1137_v55  ;;  %v1138_v8 = vadd.f32 %v1101_v59, %v6726_v17  ;;  %v5382_v3 = vpop.f32.mrb[43].mxu0  ;;  %v5407_v57 = vpop.f32.mrb[45].mxu1  ;;  %v2734_v43 = vrot.slane %v2732_v27, 2  ;;  %v2893_v55 = vsel %vm1586_vm8, %v2891_v36, %v2892_v37 }
 0x149   : > { %v1228_v9 = vpop.f32.mrb[46].mxu1  ;;  %v2749_v3 = vshrl.u32 %v6773_v4, 16 }
 0x14a   : > { %v6837_v1 = vadd.f32 %v1220_v47, %v1138_v8  ;;  %5608 = vmatmul.mubr.msk.bf16.gmra.mrb[148].mxu0 %vm535_vm2, %v2466_v61  ;;  %v5408_v12 = vpop.f32.mrb[47].mxu1  ;;  %v2742_v47 = vrot.slane %v2740_v34, 2  ;;  %v3242_v61 = vsel %vm551_vm0, %v4995_v42, 0 }
 0x14b   : > { %5611 = vmatprep.mubr.msk.bf16.mxu0 %vm6079_vm1, %v6078_v2 }
 0x14c   : > { %5634 = vmatmul.mubr.msk.bf16.gmra.mrb[152].mxu1 %vm535_vm2, %v2621_v7  ;;  %v2746_v8 = vor.u32 %v2745_v48, %v2742_v47  ;;  %v2894_v7 = vrot.slane %v6773_v4, 3  ;;  %v2898_v48 = vrot.slane %v6818_v50, 3 }
 0x14d   : > { %v1106_v17 = vpop.f32.mrb[44].mxu0  ;;  %5637 = vmatprep.mubr.msk.bf16.mxu1 %vm6079_vm1, %v6078_v2 }
 0x14e   : > { %v1139_v13 = vadd.f32 %v1106_v17, %v6741_v32  ;;  %v5385_v63 = vpop.f32.mrb[45].mxu0 }
 0x14f   : > { %v1109_v19 = vpop.f32.mrb[46].mxu0  ;;  %v1233_v6 = vpop.f32.mrb[48].mxu1 }
 0x150   : > { %v6849_v18 = vadd.f32 %v1225_v62, %v1139_v13  ;;  %v1140_v21 = vadd.f32 %v1109_v19, %v6751_v41  ;;  %v5386_v33 = vpop.f32.mrb[47].mxu0  ;;  %v5411_v22 = vpop.f32.mrb[49].mxu1  ;;  %v2469_v41 = vrot.slane %v6708_v54, 2  ;;  %v2738_v62 = vor.u32 %v2737_v46, %v2734_v43 }
 0x151   : > { %v1236_v23 = vpop.f32.mrb[50].mxu1  ;;  %v2751_v13 = vrot.slane %v2749_v3, 2 }
 0x152   : > { %v6854_v29 = vadd.f32 %v1228_v9, %v1140_v21  ;;  %5612 = vmatmul.mubr.msk.bf16.gmra.mrb[152].mxu0 %vm535_vm2, %v2468_v16  ;;  %v5412_v32 = vpop.f32.mrb[51].mxu1  ;;  %v2470_v54 = vsel %vm1153_vm5, %v2467_v11, %v2469_v41  ;;  %v4984_v9 = vld [vmem:[%s7625_s3 + $0x24] sm:$0x3]  ;;  %v2747_v17 = vsel %vm1425_vm7, %v2738_v62, %v2746_v8 }
 0x153   : > { %5615 = vmatprep.mubr.msk.bf16.mxu0 %vm6079_vm1, %v6078_v2  ;;  %v2896_v32 = vrot.slane %v6798_v28, 3 }
 0x154   : > { %5638 = vmatmul.mubr.msk.bf16.gmra.mrb[156].mxu1 %vm535_vm2, %v2623_v24  ;;  %v2758_v24 = vshrl.u32 %v6798_v28, 16 }
 0x155   : > { %v1114_v25 = vpop.f32.mrb[48].mxu0  ;;  %5665 = vmatprep.mubr.msk.bf16.mxu1 %vm6079_vm1, %v6078_v2 }
 0x156   : > { %v1141_v31 = vadd.f32 %v1114_v25, %v6768_v60  ;;  %v5389_v38 = vpop.f32.mrb[49].mxu0  ;;  %v2760_v25 = vrot.slane %v2758_v24, 2 }
 0x157   : > { %v1117_v40 = vpop.f32.mrb[50].mxu0  ;;  %v1241_v45 = vpop.f32.mrb[52].mxu1 }
 0x158   : > { %v6873_v52 = vadd.f32 %v1233_v6, %v1141_v31  ;;  %v1142_v49 = vadd.f32 %v1117_v40, %v6775_v5  ;;  %v5390_v39 = vpop.f32.mrb[51].mxu0  ;;  %v5415_v53 = vpop.f32.mrb[53].mxu1  ;;  %v2752_v5 = vshll.u32 %v6773_v4, 16  ;;  %v3056_v6 = vsel %vm551_vm0, %v4984_v9, 0 }
 0x159   : > { %v1244_v60 = vpop.f32.mrb[54].mxu1  ;;  %v2897_v40 = vsel %vm1586_vm8, %v2894_v7, %v2896_v32  ;;  %v3141_v53 = vld [vmem:[%s6317_s16] sm:$0xf] }
 0x15a   : > { %v6877_v58 = vadd.f32 %v1236_v23, %v1142_v49  ;;  %5616 = vmatmul.mubr.msk.bf16.gmra.mrb[156].mxu0 %vm535_vm2, %v2470_v54  ;;  %v5416_v59 = vpop.f32.mrb[55].mxu1  ;;  %v2754_v63 = vrot.slane %v2752_v5, 3  ;;  %v2767_v54 = vshrl.u32 %v6818_v50, 16 }
 0x15b   : > { %5643 = vmatprep.mubr.msk.bf16.mxu0 %vm6079_vm1, %v6078_v2 }
 0x15c   : > { %5666 = vmatmul.mubr.msk.bf16.vlgmr.msra.gmra.mrb[160].mxu1 %vm535_vm2, %v2893_v55  ;;  %v2755_v23 = vor.u32 %v2754_v63, %v2751_v13  ;;  %v2769_v39 = vrot.slane %v2767_v54, 2  ;;  %v6950_v63 = vld [vmem:[%s6317_s16 + $0x8] sm:$0xff]  }
 0x15d   : > { %v1122_v57 = vpop.f32.mrb[52].mxu0  ;;  %5708 = vmatpush3.bf16.msra.mxu1 %v3242_v61  ;;  %5669 = vmatprep.mubr.msk.bf16.mxu1 %vm6079_vm1, %v6078_v2 }
 0x15e   : > { %v1143_v10 = vadd.f32 %v1122_v57, %v6792_v14  ;;  %v5393_v12 = vpop.f32.mrb[53].mxu0  ;;  %5751 = vmatprep.subr.bf16.mxu1 %v6078_v2  ;;  %v2895_v14 = vsel %vm1586_vm8, %v2892_v37, %v2894_v7  ;;  %v2756_v34 = vsel %vm1425_vm7, %v2746_v8, %v2755_v23  ;;  %v6003_v8 = vld [vmem:[%s6251_s21 + $0x30] ss:$0 sps:$4 sm:$0x77]  }
 0x15f   : > { %v1125_v11 = vpop.f32.mrb[54].mxu0  ;;  %v1249_v56 = vpop.f32.mrb[56].mxu1  ;;  %v2900_v13 = vrot.slane %v6003_v8, 3 }
 0x160   : > { %v6895_v15 = vadd.f32 %v1241_v45, %v1143_v10  ;;  %v1144_v19 = vadd.f32 %v1125_v11, %v6800_v20  ;;  %v5394_v16 = vpop.f32.mrb[55].mxu0  ;;  %v5419_v21 = vpop.f32.mrb[57].mxu1  ;;  %v2761_v20 = vshll.u32 %v6798_v28, 16 }
 0x161   : > { %v1252_v4 = vpop.f32.mrb[58].mxu1 }
 0x162   : > { %v6900_v33 = vadd.f32 %v1244_v60, %v1144_v19  ;;  %5644 = vmatmul.mubr.msk.bf16.vlgmr.msra.gmra.mrb[160].mxu0 %vm535_vm2, %v2747_v17  ;;  %v5420_v22 = vpop.f32.mrb[59].mxu1  ;;  %v2763_v36 = vrot.slane %v2761_v20, 3  ;;  %v6932_v60 = vld [vmem:[%s6317_s16 + $0x4] sm:$0xf]  ;;  %v2776_v17 = vshrl.u32 %v6003_v8, 16 }
 0x163   : > { %5686 = vmatpush3.bf16.msra.mxu0 %v3056_v6  ;;  %5647 = vmatprep.mubr.msk.bf16.mxu0 %vm6079_vm1, %v6078_v2  ;;  %v4996_v7 = vcombine.low %v3141_v53, %v6932_v60 }
 0x164   : > { %5670 = vmatmul.mubr.msk.bf16.gmra.mrb[164].mxu1 %vm535_vm2, %v2895_v14  ;;  %5729 = vmatprep.subr.bf16.mxu0 %v6078_v2  ;;  %v2764_v45 = vor.u32 %v2763_v36, %v2760_v25  ;;  %v2778_v22 = vrot.slane %v2776_v17, 2 }
 0x165   : > { %v1130_v26 = vpop.f32.mrb[56].mxu0  ;;  %5673 = vmatprep.mubr.msk.bf16.mxu1 %vm6079_vm1, %v6078_v2  ;;  %v3185_v19 = vshll.u32 %v4996_v7, 16 }
 0x166   : > { %v1145_v27 = vadd.f32 %v1130_v26, %v6813_v44  ;;  %v5397_v30 = vpop.f32.mrb[57].mxu0  ;;  %v2765_v59 = vsel %vm1425_vm7, %v2755_v23, %v2764_v45 }
 0x167   : > { %v1133_v41 = vpop.f32.mrb[58].mxu0  ;;  %v1531_v35 = vpop.f32.mrb[60].mxu1  ;;  %v2901_v30 = vsel %vm1586_vm8, %v2898_v48, %v2900_v13 }
 0x168   : > { %v6914_v37 = vadd.f32 %v1249_v56, %v1145_v27  ;;  %v1146_v31 = vadd.f32 %v1133_v41, %v6820_v51  ;;  %v5398_v38 = vpop.f32.mrb[59].mxu0  ;;  %v5447_v43 = vpop.f32.mrb[61].mxu1  ;;  %v2770_v51 = vshll.u32 %v6818_v50, 16  ;;  %v2779_v56 = vshll.u32 %v6003_v8, 16  ;;  %v5007_v8 = vld [vmem:[%s7625_s3 + $0x28] sm:$0x3] }
 0x169   : > { %v1534_v46 = vpop.f32.mrb[62].mxu1  ;;  %v3183_v41 = vshrl.u32 %v4996_v7, 16  ;;  %v6968_v43 = vld [vmem:[%s6317_s16 + $0x10] sm:$0xff]   ;;  %v6004_v7 = vld [vmem:[%s6317_s16] sm:$0xff]   ;;  %v3360_v13 = vsel %vm551_vm0, %v5007_v8, 0 }
 0x16a   : > { %v6918_v28 = vadd.f32 %v1252_v4, %v1146_v31  ;;  %5648 = vmatmul.mubr.msk.bf16.gmra.mrb[164].mxu0 %vm535_vm2, %v2756_v34  ;;  %v5448_v44 = vpop.f32.mrb[63].mxu1  ;;  %v2772_v62 = vrot.slane %v2770_v51, 3  ;;  %v2781_v23 = vrot.slane %v2779_v56, 3  ;;  %v3187_v34 = vrot.slane %v3185_v19, 1  ;;  %v5014_v51 = vld [vmem:[%s7625_s3 + $0x2a] sm:$0x3] }
 0x16b   : > { %5651 = vmatprep.mubr.msk.bf16.mxu0 %vm6079_vm1, %v6078_v2 }
 0x16c   : > { %5674 = vmatmul.mubr.msk.bf16.gmra.mrb[168].mxu1 %vm535_vm2, %v2897_v40  ;;  %v2773_v11 = vor.u32 %v2772_v62, %v2769_v39  ;;  %v2782_v36 = vor.u32 %v2781_v23, %v2778_v22  ;;  %v3188_v31 = vor.u32 %v3187_v34, %v3183_v41  ;;  %v3513_v62 = vsel %vm551_vm0, %v5014_v51, 0 }
 0x16d   : > { %v1370_v47 = vpop.f32.mrb[60].mxu0  ;;  %5677 = vmatprep.mubr.msk.bf16.mxu1 %vm6079_vm1, %v6078_v2 }
 0x16e   : > { %v1409_v42 = vadd.f32 %v1370_v47, %v6832_v0  ;;  %v5425_v49 = vpop.f32.mrb[61].mxu0  ;;  %v2899_v0 = vsel %vm1586_vm8, %v2896_v32, %v2898_v48  ;;  %v2774_v4 = vsel %vm1425_vm7, %v2764_v45, %v2773_v11  ;;  %v2783_v54 = vsel %vm1425_vm7, %v2773_v11, %v2782_v36 }
 0x16f   : > { %v1373_v55 = vpop.f32.mrb[62].mxu0  ;;  %v1539_v61 = vpop.f32.mrb[64].mxu1 }
 0x170   : > { %v6936_v3 = vadd.f32 %v1531_v35, %v1409_v42  ;;  %v1410_v5 = vadd.f32 %v1373_v55, %v6837_v1  ;;  %v5426_v57 = vpop.f32.mrb[63].mxu0  ;;  %v5451_v50 = vpop.f32.mrb[65].mxu1  ;;  %v3198_v55 = vshll.u32 %v6968_v43, 16 }
 0x171   : > { %v1542_v9 = vpop.f32.mrb[66].mxu1  ;;  %v6994_v50 = vld [vmem:[%s6317_s16 + $0x18] sm:$0xff]  }
 0x172   : > { %v6941_v10 = vadd.f32 %v1534_v46, %v1410_v5  ;;  %5652 = vmatmul.mubr.msk.bf16.gmra.mrb[168].mxu0 %vm535_vm2, %v2765_v59  ;;  %v5452_v12 = vpop.f32.mrb[67].mxu1  ;;  %v3200_v57 = vrot.slane %v3198_v55, 1 }
 0x173   : > { %5655 = vmatprep.mubr.msk.bf16.mxu0 %vm6079_vm1, %v6078_v2 }
 0x174   : > { %5678 = vmatmul.mubr.msk.bf16.gmra.mrb[172].mxu1 %vm535_vm2, %v2899_v0 }
 0x175   : > { %v1378_v1 = vpop.f32.mrb[64].mxu0  ;;  %5681 = vmatprep.mubr.msk.bf16.mxu1 %vm6079_vm1, %v6078_v2 }
 0x176   : > { %v1411_v16 = vadd.f32 %v1378_v1, %v6849_v18  ;;  %v5429_v6 = vpop.f32.mrb[65].mxu0  ;;  %v3190_v18 = vshll.u32 %v6950_v63, 16 }
 0x177   : > { %v1381_v21 = vpop.f32.mrb[66].mxu0  ;;  %v1547_v14 = vpop.f32.mrb[68].mxu1 }
 0x178   : > { %v6954_v24 = vadd.f32 %v1539_v61, %v1411_v16  ;;  %v1412_v20 = vadd.f32 %v1381_v21, %v6854_v29  ;;  %v5430_v26 = vpop.f32.mrb[67].mxu0  ;;  %v5455_v32 = vpop.f32.mrb[69].mxu1  ;;  %v3192_v38 = vrot.slane %v3190_v18, 1  ;;  %v3206_v21 = vshll.u32 %v6994_v50, 16 }
 0x179   : > { %v1550_v27 = vpop.f32.mrb[70].mxu1 }
 0x17a   : > { %v6959_v35 = vadd.f32 %v1542_v9, %v1412_v20  ;;  %5656 = vmatmul.mubr.msk.bf16.gmra.mrb[172].mxu0 %vm535_vm2, %v2774_v4  ;;  %v5456_v25 = vpop.f32.mrb[71].mxu1  ;;  %v3193_v53 = vsel %vm490_vm3, %v3188_v31, %v3192_v38  ;;  %v3208_v23 = vrot.slane %v3206_v21, 1  ;;  %v7016_v20 = vld [vmem:[%s6317_s16 + $0x20] sm:$0xff]  }
 0x17b   : > { %5659 = vmatprep.mubr.msk.bf16.mxu0 %vm6079_vm1, %v6078_v2  ;;  %v3218_v8 = vshrl.u32 %v7016_v20, 16 }
 0x17c   : > { %5682 = vmatmul.mubr.msk.bf16.gmra.mrb[176].mxu1 %vm535_vm2, %v2901_v30 }
 0x17d   : > { %v1386_v29 = vpop.f32.mrb[68].mxu0  ;;  %5709 = vmatprep.mubr.msk.bf16.mxu1 %vm6079_vm1, %v6078_v2 }
 0x17e   : > { %v1413_v46 = vadd.f32 %v1386_v29, %v6873_v52  ;;  %v5433_v40 = vpop.f32.mrb[69].mxu0  ;;  %v3194_v52 = vshrl.u32 %v6950_v63, 16 }
 0x17f   : > { %v1389_v44 = vpop.f32.mrb[70].mxu0  ;;  %v1555_v45 = vpop.f32.mrb[72].mxu1 }
 0x180   : > { %v6975_v47 = vadd.f32 %v1547_v14, %v1413_v46  ;;  %v1414_v48 = vadd.f32 %v1389_v44, %v6877_v58  ;;  %v5434_v42 = vpop.f32.mrb[71].mxu0  ;;  %v5459_v49 = vpop.f32.mrb[73].mxu1  ;;  %v3196_v5 = vor.u32 %v3194_v52, %v3192_v38  ;;  %v3210_v38 = vshrl.u32 %v6994_v50, 16 }
 0x181   : > { %v1558_v39 = vpop.f32.mrb[74].mxu1  ;;  %v3214_v46 = vshll.u32 %v7016_v20, 16  ;;  %v6009_v42 = vld [vmem:[%s6317_s16 + $0x10] sm:$0xff]  }
 0x182   : > { %v6981_v59 = vadd.f32 %v1550_v27, %v1414_v48  ;;  %5660 = vmatmul.mubr.msk.bf16.gmra.mrb[176].mxu0 %vm535_vm2, %v2783_v54  ;;  %v5460_v61 = vpop.f32.mrb[75].mxu1  ;;  %v3201_v6 = vsel %vm490_vm3, %v3196_v5, %v3200_v57  ;;  %v6007_v27 = vld [vmem:[%s6317_s16 + $0x8] sm:$0xff]   ;;  %v3212_v44 = vor.u32 %v3210_v38, %v3208_v23 }
 0x183   : > { %5687 = vmatprep.mubr.msk.bf16.mxu0 %vm6079_vm1, %v6078_v2  ;;  %v3216_v54 = vrot.slane %v3214_v46, 1  ;;  %v5033_v38 = vld [vmem:[%s7625_s3 + $0x2e] sm:$0x3] }
 0x184   : > { %5710 = vmatmul.mubr.msk.bf16.vlgmr.msra.gmra.mrb[180].mxu1 %vm535_vm2, %v3193_v53 }
 0x185   : > { %v1394_v58 = vpop.f32.mrb[72].mxu0  ;;  %5752 = vmatpush3.bf16.msra.mxu1 %v3513_v62  ;;  %5713 = vmatprep.mubr.msk.bf16.mxu1 %vm6079_vm1, %v6078_v2 }
 0x186   : > { %v1415_v9 = vadd.f32 %v1394_v58, %v6895_v15  ;;  %v5437_v0 = vpop.f32.mrb[73].mxu0  ;;  %5795 = vmatprep.subr.bf16.mxu1 %v6078_v2  ;;  %v3202_v15 = vshrl.u32 %v6968_v43, 16  ;;  %v3217_v58 = vsel %vm490_vm3, %v3212_v44, %v3216_v54 }
 0x187   : > { %v1397_v12 = vpop.f32.mrb[74].mxu0  ;;  %v1563_v11 = vpop.f32.mrb[76].mxu1 }
 0x188   : > { %v6999_v17 = vadd.f32 %v1555_v45, %v1415_v9  ;;  %v1416_v56 = vadd.f32 %v1397_v12, %v6900_v33  ;;  %v5438_v1 = vpop.f32.mrb[75].mxu0  ;;  %v5463_v19 = vpop.f32.mrb[77].mxu1  ;;  %v3204_v22 = vor.u32 %v3202_v15, %v3200_v57  ;;  %v7035_v45 = vld [vmem:[%s6317_s16 + $0x28] ss:$0 sps:$4 sm:$0x11]   ;;  %v3220_v9 = vor.u32 %v3218_v8, %v3216_v54 }
 0x189   : > { %v1566_v16 = vpop.f32.mrb[78].mxu1  ;;  %v7057_v1 = vld [vmem:[%s6317_s16 + $0x8] sm:$0xf] }
 0x18a   : > { %v7006_v4 = vadd.f32 %v1558_v39, %v1416_v56  ;;  %5688 = vmatmul.mubr.msk.bf16.vlgmr.msra.gmra.mrb[180].mxu0 %vm535_vm2, %v6004_v7  ;;  %v5464_v14 = vpop.f32.mrb[79].mxu1  ;;  %v3209_v31 = vsel %vm490_vm3, %v3204_v22, %v3208_v23  ;;  %v3445_v56 = vld [vmem:[%s6317_s16 + $0x4] sm:$0xe]  ;;  %v7067_v22 = vld [vmem:[%s6317_s16 + $0xc] sm:$0xff]  }
 0x18b   : > { %5730 = vmatpush3.bf16.msra.mxu0 %v3360_v13  ;;  %5691 = vmatprep.mubr.msk.bf16.mxu0 %vm6079_vm1, %v6078_v2 }
 0x18c   : > { %5714 = vmatmul.mubr.msk.bf16.gmra.mrb[184].mxu1 %vm535_vm2, %v3201_v6  ;;  %5773 = vmatprep.subr.bf16.mxu0 %v6078_v2 }
 0x18d   : > { %v1402_v33 = vpop.f32.mrb[76].mxu0  ;;  %5717 = vmatprep.mubr.msk.bf16.mxu1 %vm6079_vm1, %v6078_v2 }
 0x18e   : > { %v1417_v26 = vadd.f32 %v1402_v33, %v6914_v37  ;;  %v5441_v32 = vpop.f32.mrb[77].mxu0 }
 0x18f   : > { %v1405_v30 = vpop.f32.mrb[78].mxu0  ;;  %v1788_v41 = vpop.f32.mrb[80].mxu1 }
 0x190   : > { %v7020_v34 = vadd.f32 %v1563_v11, %v1417_v26  ;;  %v1418_v18 = vadd.f32 %v1405_v30, %v6918_v28  ;;  %v5442_v25 = vpop.f32.mrb[79].mxu0  ;;  %v5491_v36 = vpop.f32.mrb[81].mxu1  ;;  %v6011_v11 = vld [vmem:[%s6317_s16 + $0x18] sm:$0xff]   ;;  %v3487_v30 = vrot.slane %v7067_v22, 1 }
 0x191   : > { %v1791_v29 = vpop.f32.mrb[82].mxu1  ;;  %v6013_v25 = vld [vmem:[%s6317_s16 + $0x20] sm:$0xff]  }
 0x192   : > { %v7026_v37 = vadd.f32 %v1566_v16, %v1418_v18  ;;  %5692 = vmatmul.mubr.msk.bf16.gmra.mrb[184].mxu0 %vm535_vm2, %v6007_v27  ;;  %v5492_v40 = vpop.f32.mrb[83].mxu1 }
 0x193   : > { %5695 = vmatprep.mubr.msk.bf16.mxu0 %vm6079_vm1, %v6078_v2 }
 0x194   : > { %5718 = vmatmul.mubr.msk.bf16.gmra.mrb[188].mxu1 %vm535_vm2, %v3209_v31 }
 0x195   : > { %v1650_v28 = vpop.f32.mrb[80].mxu0  ;;  %5721 = vmatprep.mubr.msk.bf16.mxu1 %vm6079_vm1, %v6078_v2 }
 0x196   : > { %v1689_v51 = vadd.f32 %v1650_v28, %v6936_v3  ;;  %v5469_v48 = vpop.f32.mrb[81].mxu0  ;;  %v3222_v3 = vshll.u32 %v7035_v45, 16 }
 0x197   : > { %v1653_v49 = vpop.f32.mrb[82].mxu0  ;;  %v1796_v39 = vpop.f32.mrb[84].mxu1 }
 0x198   : > { %v7039_v53 = vadd.f32 %v1788_v41, %v1689_v51  ;;  %v1690_v52 = vadd.f32 %v1653_v49, %v6941_v10  ;;  %v5470_v55 = vpop.f32.mrb[83].mxu0  ;;  %v5495_v61 = vpop.f32.mrb[85].mxu1  ;;  %v3224_v0 = vrot.slane %v3222_v3, 1 }
 0x199   : > { %v1799_v62 = vpop.f32.mrb[86].mxu1 }
 0x19a   : > { %v7045_v5 = vadd.f32 %v1791_v29, %v1690_v52  ;;  %5696 = vmatmul.mubr.msk.bf16.gmra.mrb[188].mxu0 %vm535_vm2, %v6009_v42  ;;  %v5496_v57 = vpop.f32.mrb[87].mxu1  ;;  %v3225_v33 = vsel %vm490_vm3, %v3220_v9, %v3224_v0  ;;  %v3791_v42 = vsel %vm551_vm0, %v5033_v38, 0  ;;  %v5026_v52 = vld [vmem:[%s7625_s3 + $0x2c] sm:$0x3] }
 0x19b   : > { %5699 = vmatprep.mubr.msk.bf16.mxu0 %vm6079_vm1, %v6078_v2  ;;  %v3673_v9 = vsel %vm551_vm0, %v5026_v52, 0 }
 0x19c   : > { %5722 = vmatmul.mubr.msk.bf16.gmra.mrb[192].mxu1 %vm535_vm2, %v3217_v58 }
 0x19d   : > { %v1658_v10 = vpop.f32.mrb[84].mxu0  ;;  %5725 = vmatprep.mubr.msk.bf16.mxu1 %vm6079_vm1, %v6078_v2 }
 0x19e   : > { %v1691_v7 = vadd.f32 %v1658_v10, %v6954_v24  ;;  %v5473_v12 = vpop.f32.mrb[85].mxu0  ;;  %v7064_v24 = vcombine.low %v3445_v56, %v7057_v1 }
 0x19f   : > { %v1661_v13 = vpop.f32.mrb[86].mxu0  ;;  %v1804_v19 = vpop.f32.mrb[88].mxu1 }
 0x1a0   : > { %v7059_v16 = vadd.f32 %v1796_v39, %v1691_v7  ;;  %v1692_v6 = vadd.f32 %v1661_v13, %v6959_v35  ;;  %v5474_v15 = vpop.f32.mrb[87].mxu0  ;;  %v5499_v21 = vpop.f32.mrb[89].mxu1  ;;  %v3327_v35 = vld [vmem:[%s6317_s16] sm:$0xe]  ;;  %v3486_v27 = vrot.slane %v7064_v24, 1 }
 0x1a1   : > { %v1807_v14 = vpop.f32.mrb[90].mxu1  ;;  %v5008_v31 = vcombine.low %v3327_v35, %v6932_v60 }
 0x1a2   : > { %v7069_v23 = vadd.f32 %v1799_v62, %v1692_v6  ;;  %5700 = vmatmul.mubr.msk.bf16.gmra.mrb[192].mxu0 %vm535_vm2, %v6011_v11  ;;  %v5500_v26 = vpop.f32.mrb[91].mxu1  ;;  %v3488_v51 = vsel %vm720_vm4, %v3486_v27, %v3487_v30  ;;  %v7116_v11 = vld [vmem:[%s6317_s16 + $0x1c] sm:$0xff]  }
 0x1a3   : > { %5703 = vmatprep.mubr.msk.bf16.mxu0 %vm6079_vm1, %v6078_v2  ;;  %v3333_v49 = vrot.slane %v5008_v31, 1 }
 0x1a4   : > { %5726 = vmatmul.mubr.msk.bf16.gmra.mrb[196].mxu1 %vm535_vm2, %v3225_v33 }
 0x1a5   : > { %v1666_v32 = vpop.f32.mrb[88].mxu0  ;;  %5753 = vmatprep.mubr.msk.bf16.mxu1 %vm6079_vm1, %v6078_v2 }
 0x1a6   : > { %v1693_v41 = vadd.f32 %v1666_v32, %v6975_v47  ;;  %v5477_v18 = vpop.f32.mrb[89].mxu0  ;;  %v7091_v47 = vld [vmem:[%s6317_s16 + $0x14] sm:$0xff]  }
 0x1a7   : > { %v1669_v36 = vpop.f32.mrb[90].mxu0  ;;  %v1812_v29 = vpop.f32.mrb[92].mxu1  ;;  %v3489_v55 = vrot.slane %v7091_v47, 1 }
 0x1a8   : > { %v7086_v46 = vadd.f32 %v1804_v19, %v1693_v41  ;;  %v1694_v40 = vadd.f32 %v1669_v36, %v6981_v59  ;;  %v5478_v28 = vpop.f32.mrb[91].mxu0  ;;  %v5503_v44 = vpop.f32.mrb[93].mxu1  ;;  %v3334_v59 = vrot.slane %v6950_v63, 1  ;;  %v3491_v19 = vrot.slane %v7116_v11, 1  ;;  %v7136_v41 = vld [vmem:[%s6317_s16 + $0x24] sm:$0xff]  }
 0x1a9   : > { %v1815_v54 = vpop.f32.mrb[94].mxu1  ;;  %v3490_v12 = vsel %vm720_vm4, %v3487_v30, %v3489_v55  ;;  %v3493_v36 = vrot.slane %v7136_v41, 1 }
 0x1aa   : > { %v7093_v48 = vadd.f32 %v1807_v14, %v1694_v40  ;;  %5704 = vmatmul.mubr.msk.bf16.gmra.mrb[196].mxu0 %vm535_vm2, %v6013_v25  ;;  %v5504_v60 = vpop.f32.mrb[95].mxu1  ;;  %v3335_v58 = vsel %vm720_vm4, %v3333_v49, %v3334_v59  ;;  %v3492_v30 = vsel %vm720_vm4, %v3489_v55, %v3491_v19  ;;  %v3338_v25 = vrot.slane %v6994_v50, 1  ;;  %v6021_v49 = vld [vmem:[%s6317_s16 + $0x2c] ss:$0 sps:$4 sm:$0x11]  }
 0x1ab   : > { %5731 = vmatprep.mubr.msk.bf16.mxu0 %vm6079_vm1, %v6078_v2  ;;  %v3495_v52 = vrot.slane %v6021_v49, 1 }
 0x1ac   : > { %5754 = vmatmul.mubr.msk.bf16.vlgmr.msra.gmra.mrb[200].mxu1 %vm535_vm2, %v3488_v51 }
 0x1ad   : > { %v1674_v39 = vpop.f32.mrb[92].mxu0  ;;  %5796 = vmatpush3.bf16.msra.mxu1 %v3791_v42  ;;  %5757 = vmatprep.mubr.msk.bf16.mxu1 %vm6079_vm1, %v6078_v2  ;;  %v3494_v42 = vsel %vm720_vm4, %v3491_v19, %v3493_v36  ;;  %v3613_v19 = vshrl.u32 %v7067_v22, 16 }
 0x1ae   : > { %v1695_v61 = vadd.f32 %v1674_v39, %v6999_v17  ;;  %v5481_v62 = vpop.f32.mrb[93].mxu0  ;;  %5839 = vmatprep.subr.bf16.mxu1 %v6078_v2  ;;  %v3340_v39 = vrot.slane %v7016_v20, 1 }
 0x1af   : > { %v1677_v63 = vpop.f32.mrb[94].mxu0  ;;  %v1820_v8 = vpop.f32.mrb[96].mxu1  ;;  %v3758_v62 = vld [vmem:[%s6317_s16 + $0x4] sm:$0xc] }
 0x1b0   : > { %v7110_v3 = vadd.f32 %v1812_v29, %v1695_v61  ;;  %v1696_v57 = vadd.f32 %v1677_v63, %v7006_v4  ;;  %v5482_v10 = vpop.f32.mrb[95].mxu0  ;;  %v5507_v0 = vpop.f32.mrb[97].mxu1  ;;  %v3336_v4 = vrot.slane %v6968_v43, 1 }
 0x1b1   : > { %v1823_v7 = vpop.f32.mrb[98].mxu1 }
 0x1b2   : > { %v7118_v17 = vadd.f32 %v1815_v54, %v1696_v57  ;;  %5732 = vmatmul.mubr.msk.bf16.vlgmr.msra.gmra.mrb[200].mxu0 %vm535_vm2, %v3335_v58  ;;  %v5508_v56 = vpop.f32.mrb[99].mxu1  ;;  %v3337_v14 = vsel %vm720_vm4, %v3334_v59, %v3336_v4  ;;  %v3339_v40 = vsel %vm720_vm4, %v3336_v4, %v3338_v25  ;;  %v3341_v58 = vsel %vm720_vm4, %v3338_v25, %v3340_v39 }
 0x1b3   : > { %5774 = vmatpush3.bf16.msra.mxu0 %v3673_v9  ;;  %5735 = vmatprep.mubr.msk.bf16.mxu0 %vm6079_vm1, %v6078_v2  ;;  %v3605_v4 = vshrl.u32 %v7064_v24, 16 }
 0x1b4   : > { %5758 = vmatmul.mubr.msk.bf16.gmra.mrb[204].mxu1 %vm535_vm2, %v3490_v12  ;;  %5817 = vmatprep.subr.bf16.mxu0 %v6078_v2  ;;  %v5034_v12 = vcombine.low %v3758_v62, %v7057_v1 }
 0x1b5   : > { %v1682_v13 = vpop.f32.mrb[96].mxu0  ;;  %5761 = vmatprep.mubr.msk.bf16.mxu1 %vm6079_vm1, %v6078_v2 }
 0x1b6   : > { %v1697_v6 = vadd.f32 %v1682_v13, %v7020_v34  ;;  %v5485_v15 = vpop.f32.mrb[97].mxu0  ;;  %v3608_v13 = vshll.u32 %v7064_v24, 16 }
 0x1b7   : > { %v1685_v21 = vpop.f32.mrb[98].mxu0  ;;  %v2092_v33 = vpop.f32.mrb[100].mxu1  ;;  %v3764_v15 = vrot.slane %v5034_v12, 2 }
 0x1b8   : > { %v7131_v26 = vadd.f32 %v1820_v8, %v1697_v6  ;;  %v1698_v43 = vadd.f32 %v1685_v21, %v7026_v37  ;;  %v5486_v35 = vpop.f32.mrb[99].mxu0  ;;  %v5535_v32 = vpop.f32.mrb[101].mxu1  ;;  %v3616_v6 = vshll.u32 %v7067_v22, 16  ;;  %v3765_v21 = vrot.slane %v7067_v22, 2 }
 0x1b9   : > { %v2095_v27 = vpop.f32.mrb[102].mxu1 }
 0x1ba   : > { %v7138_v18 = vadd.f32 %v1823_v7, %v1698_v43  ;;  %5736 = vmatmul.mubr.msk.bf16.gmra.mrb[204].mxu0 %vm535_vm2, %v3337_v14  ;;  %v5536_v34 = vpop.f32.mrb[103].mxu1  ;;  %v3496_v7 = vsel %vm720_vm4, %v3493_v36, %v3495_v52  ;;  %v3610_v43 = vrot.slane %v3608_v13, 2 }
 0x1bb   : > { %5739 = vmatprep.mubr.msk.bf16.mxu0 %vm6079_vm1, %v6078_v2  ;;  %v5052_v34 = vld [vmem:[%s7625_s3 + $0x32] sm:$0x3] }
 0x1bc   : > { %5762 = vmatmul.mubr.msk.bf16.gmra.mrb[208].mxu1 %vm535_vm2, %v3492_v30  ;;  %v3618_v30 = vrot.slane %v3616_v6, 2 }
 0x1bd   : > { %v1974_v37 = vpop.f32.mrb[100].mxu0  ;;  %5765 = vmatprep.mubr.msk.bf16.mxu1 %vm6079_vm1, %v6078_v2 }
 0x1be   : > { %v2013_v29 = vadd.f32 %v1974_v37, %v7039_v53  ;;  %v5513_v31 = vpop.f32.mrb[101].mxu0 }
 0x1bf   : > { %v1977_v38 = vpop.f32.mrb[102].mxu0  ;;  %v2100_v28 = vpop.f32.mrb[104].mxu1 }
 0x1c0   : > { %v7150_v44 = vadd.f32 %v2092_v33, %v2013_v29  ;;  %v2014_v50 = vadd.f32 %v1977_v38, %v7045_v5  ;;  %v5514_v54 = vpop.f32.mrb[103].mxu0  ;;  %v5539_v51 = vpop.f32.mrb[105].mxu1  ;;  %v3607_v33 = vrot.slane %v3605_v4, 1  ;;  %v3766_v29 = vsel %vm1153_vm5, %v3764_v15, %v3765_v21 }
 0x1c1   : > { %v2103_v60 = vpop.f32.mrb[106].mxu1  ;;  %v3622_v54 = vshrl.u32 %v7091_v47, 16 }
 0x1c2   : > { %v7155_v59 = vadd.f32 %v2095_v27, %v2014_v50  ;;  %5740 = vmatmul.mubr.msk.bf16.gmra.mrb[208].mxu0 %vm535_vm2, %v3339_v40  ;;  %v5540_v53 = vpop.f32.mrb[107].mxu1  ;;  %v3615_v27 = vrot.slane %v3613_v19, 1  ;;  %v4104_v40 = vsel %vm551_vm0, %v5052_v34, 0 }
 0x1c3   : > { %5743 = vmatprep.mubr.msk.bf16.mxu0 %vm6079_vm1, %v6078_v2 }
 0x1c4   : > { %5766 = vmatmul.mubr.msk.bf16.gmra.mrb[212].mxu1 %vm535_vm2, %v3494_v42  ;;  %v3619_v50 = vor.u32 %v3618_v30, %v3615_v27  ;;  %v3767_v42 = vrot.slane %v7091_v47, 2  ;;  %v3771_v30 = vrot.slane %v7136_v41, 2 }
 0x1c5   : > { %v1982_v5 = vpop.f32.mrb[104].mxu0  ;;  %5769 = vmatprep.mubr.msk.bf16.mxu1 %vm6079_vm1, %v6078_v2 }
 0x1c6   : > { %v2015_v55 = vadd.f32 %v1982_v5, %v7059_v16  ;;  %v5517_v61 = vpop.f32.mrb[105].mxu0 }
 0x1c7   : > { %v1985_v63 = vpop.f32.mrb[106].mxu0  ;;  %v2108_v8 = vpop.f32.mrb[108].mxu1 }
 0x1c8   : > { %v7167_v57 = vadd.f32 %v2100_v28, %v2015_v55  ;;  %v2016_v10 = vadd.f32 %v1985_v63, %v7069_v23  ;;  %v5518_v20 = vpop.f32.mrb[107].mxu0  ;;  %v5543_v9 = vpop.f32.mrb[109].mxu1  ;;  %v3342_v23 = vrot.slane %v7035_v45, 1  ;;  %v3611_v28 = vor.u32 %v3610_v43, %v3607_v33 }
 0x1c9   : > { %v2111_v0 = vpop.f32.mrb[110].mxu1  ;;  %v3624_v55 = vrot.slane %v3622_v54, 1 }
 0x1ca   : > { %v7172_v56 = vadd.f32 %v2103_v60, %v2016_v10  ;;  %5744 = vmatmul.mubr.msk.bf16.gmra.mrb[212].mxu0 %vm535_vm2, %v3341_v58  ;;  %v5544_v16 = vpop.f32.mrb[111].mxu1  ;;  %v3343_v45 = vsel %vm720_vm4, %v3340_v39, %v3342_v23  ;;  %v5040_v60 = vld [vmem:[%s7625_s3 + $0x30] sm:$0x3]  ;;  %v3620_v5 = vsel %vm992_vm6, %v3611_v28, %v3619_v50 }
 0x1cb   : > { %5747 = vmatprep.mubr.msk.bf16.mxu0 %vm6079_vm1, %v6078_v2  ;;  %v3769_v16 = vrot.slane %v7116_v11, 2 }
 0x1cc   : > { %5770 = vmatmul.mubr.msk.bf16.gmra.mrb[216].mxu1 %vm535_vm2, %v3496_v7  ;;  %v3631_v7 = vshrl.u32 %v7116_v11, 16 }
 0x1cd   : > { %v1990_v1 = vpop.f32.mrb[108].mxu0  ;;  %5797 = vmatprep.mubr.msk.bf16.mxu1 %vm6079_vm1, %v6078_v2 }
 0x1ce   : > { %v2017_v24 = vadd.f32 %v1990_v1, %v7086_v46  ;;  %v5521_v14 = vpop.f32.mrb[109].mxu0  ;;  %v3633_v1 = vrot.slane %v3631_v7, 1 }
 0x1cf   : > { %v1993_v35 = vpop.f32.mrb[110].mxu0  ;;  %v2116_v32 = vpop.f32.mrb[112].mxu1 }
 0x1d0   : > { %v7191_v25 = vadd.f32 %v2108_v8, %v2017_v24  ;;  %v2018_v37 = vadd.f32 %v1993_v35, %v7093_v48  ;;  %v5522_v22 = vpop.f32.mrb[111].mxu0  ;;  %v5547_v36 = vpop.f32.mrb[113].mxu1  ;;  %v3625_v48 = vshll.u32 %v7091_v47, 16  ;;  %v3944_v8 = vsel %vm551_vm0, %v5040_v60, 0 }
 0x1d1   : > { %v2119_v46 = vpop.f32.mrb[114].mxu1  ;;  %v3770_v35 = vsel %vm1153_vm5, %v3767_v42, %v3769_v16  ;;  %v3876_v36 = vld [vmem:[%s6317_s16 + $0x8] sm:$0xc] }
 0x1d2   : > { %v7195_v31 = vadd.f32 %v2111_v0, %v2018_v37  ;;  %5748 = vmatmul.mubr.msk.bf16.gmra.mrb[216].mxu0 %vm535_vm2, %v3343_v45  ;;  %v5548_v38 = vpop.f32.mrb[115].mxu1  ;;  %v3627_v61 = vrot.slane %v3625_v48, 2  ;;  %v3640_v45 = vshrl.u32 %v7136_v41, 16 }
 0x1d3   : > { %5775 = vmatprep.mubr.msk.bf16.mxu0 %vm6079_vm1, %v6078_v2 }
 0x1d4   : > { %5798 = vmatmul.mubr.msk.bf16.vlgmr.msra.gmra.mrb[220].mxu1 %vm535_vm2, %v3766_v29  ;;  %v3628_v0 = vor.u32 %v3627_v61, %v3624_v55  ;;  %v3642_v22 = vrot.slane %v3640_v45, 1 }
 0x1d5   : > { %v1998_v51 = vpop.f32.mrb[112].mxu0  ;;  %5840 = vmatpush3.bf16.msra.mxu1 %v4104_v40  ;;  %5801 = vmatprep.mubr.msk.bf16.mxu1 %vm6079_vm1, %v6078_v2 }
 0x1d6   : > { %v2019_v49 = vadd.f32 %v1998_v51, %v7110_v3  ;;  %v5525_v53 = vpop.f32.mrb[113].mxu0  ;;  %5883 = vmatprep.subr.bf16.mxu1 %v6078_v2  ;;  %v3768_v3 = vsel %vm1153_vm5, %v3765_v21, %v3767_v42  ;;  %v3629_v19 = vsel %vm992_vm6, %v3619_v50, %v3628_v0  ;;  %v6023_v50 = vld [vmem:[%s6317_s16 + $0x2c] ss:$0 sps:$4 sm:$0x33]  }
 0x1d7   : > { %v2001_v39 = vpop.f32.mrb[114].mxu0  ;;  %v2124_v52 = vpop.f32.mrb[116].mxu1  ;;  %v3773_v55 = vrot.slane %v6023_v50, 2 }
 0x1d8   : > { %v7213_v62 = vadd.f32 %v2116_v32, %v2019_v49  ;;  %v2020_v63 = vadd.f32 %v2001_v39, %v7118_v17  ;;  %v5526_v58 = vpop.f32.mrb[115].mxu0  ;;  %v5551_v10 = vpop.f32.mrb[117].mxu1  ;;  %v3634_v17 = vshll.u32 %v7116_v11, 16  ;;  %v7262_v49 = vld [vmem:[%s6317_s16 + $0x10] sm:$0xff]  }
 0x1d9   : > { %v2127_v47 = vpop.f32.mrb[118].mxu1  ;;  %v4047_v10 = vshll.u32 %v7262_v49, 16 }
 0x1da   : > { %v7218_v20 = vadd.f32 %v2119_v46, %v2020_v63  ;;  %5776 = vmatmul.mubr.msk.bf16.vlgmr.msra.gmra.mrb[220].mxu0 %vm535_vm2, %v3620_v5  ;;  %v5552_v9 = vpop.f32.mrb[119].mxu1  ;;  %v3636_v15 = vrot.slane %v3634_v17, 2  ;;  %v7250_v46 = vld [vmem:[%s6317_s16 + $0xc] sm:$0xf] }
 0x1db   : > { %5818 = vmatpush3.bf16.msra.mxu0 %v3944_v8  ;;  %5779 = vmatprep.mubr.msk.bf16.mxu0 %vm6079_vm1, %v6078_v2  ;;  %v7259_v42 = vcombine.low %v3876_v36, %v7250_v46  ;;  %v4044_v8 = vshrl.u32 %v7262_v49, 16  ;;  %v4396_v36 = vld [vmem:[%s7626_s4] sm:$0x3] }
 0x1dc   : > { %5802 = vmatmul.mubr.msk.bf16.gmra.mrb[224].mxu1 %vm535_vm2, %v3768_v3  ;;  %5861 = vmatprep.subr.bf16.mxu0 %v6078_v2  ;;  %v3637_v32 = vor.u32 %v3636_v15, %v3633_v1 }
 0x1dd   : > { %v2006_v12 = vpop.f32.mrb[116].mxu0  ;;  %5805 = vmatprep.mubr.msk.bf16.mxu1 %vm6079_vm1, %v6078_v2  ;;  %v4036_v63 = vshrl.u32 %v7259_v42, 16  ;;  %v4039_v58 = vshll.u32 %v7259_v42, 16 }
 0x1de   : > { %v2021_v4 = vadd.f32 %v2006_v12, %v7131_v26  ;;  %v5529_v13 = vpop.f32.mrb[117].mxu0  ;;  %v3638_v38 = vsel %vm992_vm6, %v3628_v0, %v3637_v32 }
 0x1df   : > { %v2009_v23 = vpop.f32.mrb[118].mxu0  ;;  %v2405_v6 = vpop.f32.mrb[120].mxu1  ;;  %v4038_v1 = vrot.slane %v4036_v63, 2  ;;  %v4041_v15 = vrot.slane %v4039_v58, 3 }
 0x1e0   : > { %v7232_v21 = vadd.f32 %v2124_v52, %v2021_v4  ;;  %v2022_v24 = vadd.f32 %v2009_v23, %v7138_v18  ;;  %v5530_v14 = vpop.f32.mrb[119].mxu0  ;;  %v5579_v33 = vpop.f32.mrb[121].mxu1  ;;  %v3643_v18 = vshll.u32 %v7136_v41, 16  ;;  %v3652_v52 = vshll.u32 %v6023_v50, 16 }
 0x1e1   : > { %v2408_v43 = vpop.f32.mrb[122].mxu1  ;;  %v7283_v14 = vld [vmem:[%s6317_s16 + $0x18] sm:$0xff]  }
 0x1e2   : > { %v7236_v11 = vadd.f32 %v2127_v47, %v2022_v24  ;;  %5780 = vmatmul.mubr.msk.bf16.gmra.mrb[224].mxu0 %vm535_vm2, %v3629_v19  ;;  %v5580_v26 = vpop.f32.mrb[123].mxu1  ;;  %v3645_v28 = vrot.slane %v3643_v18, 2  ;;  %v3654_v12 = vrot.slane %v3652_v52, 2  ;;  %v3774_v19 = vsel %vm1153_vm5, %v3771_v30, %v3773_v55  ;;  %v5059_v52 = vld [vmem:[%s7625_s3 + $0x34] sm:$0x3] }
 0x1e3   : > { %5783 = vmatprep.mubr.msk.bf16.mxu0 %vm6079_vm1, %v6078_v2  ;;  %v4049_v24 = vrot.slane %v4047_v10, 3  ;;  %v4042_v26 = vor.u32 %v4041_v15, %v4038_v1  ;;  %v4056_v18 = vshll.u32 %v7283_v14, 16 }
 0x1e4   : > { %5806 = vmatmul.mubr.msk.bf16.gmra.mrb[228].mxu1 %vm535_vm2, %v3770_v35  ;;  %v3646_v5 = vor.u32 %v3645_v28, %v3642_v22 }
 0x1e5   : > { %v2245_v27 = vpop.f32.mrb[120].mxu0  ;;  %5809 = vmatprep.mubr.msk.bf16.mxu1 %vm6079_vm1, %v6078_v2 }
 0x1e6   : > { %v2284_v34 = vadd.f32 %v2245_v27, %v7150_v44  ;;  %v5557_v37 = vpop.f32.mrb[121].mxu0  ;;  %v3772_v44 = vsel %vm1153_vm5, %v3769_v16, %v3771_v30  ;;  %v3647_v0 = vsel %vm992_vm6, %v3637_v32, %v3646_v5  ;;  %v4053_v32 = vshrl.u32 %v7283_v14, 16 }
 0x1e7   : > { %v2248_v29 = vpop.f32.mrb[122].mxu0  ;;  %v2413_v40 = vpop.f32.mrb[124].mxu1 }
 0x1e8   : > { %v7254_v54 = vadd.f32 %v2405_v6, %v2284_v34  ;;  %v2285_v48 = vadd.f32 %v2248_v29, %v7155_v59  ;;  %v5558_v51 = vpop.f32.mrb[123].mxu0  ;;  %v5583_v41 = vpop.f32.mrb[125].mxu1  ;;  %v3649_v59 = vshrl.u32 %v6023_v50, 16 }
 0x1e9   : > { %v2416_v60 = vpop.f32.mrb[126].mxu1  ;;  %v4055_v51 = vrot.slane %v4053_v32, 2  ;;  %v7305_v41 = vld [vmem:[%s6317_s16 + $0x20] sm:$0xff]  }
 0x1ea   : > { %v7264_v53 = vadd.f32 %v2408_v43, %v2285_v48  ;;  %5784 = vmatmul.mubr.msk.bf16.gmra.mrb[228].mxu0 %vm535_vm2, %v3638_v38  ;;  %v5584_v39 = vpop.f32.mrb[127].mxu1  ;;  %v3651_v17 = vrot.slane %v3649_v59, 1  ;;  %v4065_v63 = vshll.u32 %v7305_v41, 16 }
 0x1eb   : > { %5787 = vmatprep.mubr.msk.bf16.mxu0 %vm6079_vm1, %v6078_v2  ;;  %v4501_v39 = vsel %vm551_vm0, %v4396_v36, 0 }
 0x1ec   : > { %5810 = vmatmul.mubr.msk.bf16.gmra.mrb[232].mxu1 %vm535_vm2, %v3772_v44 }
 0x1ed   : > { %v2253_v61 = vpop.f32.mrb[124].mxu0  ;;  %5813 = vmatprep.mubr.msk.bf16.mxu1 %vm6079_vm1, %v6078_v2 }
 0x1ee   : > { %v2286_v47 = vadd.f32 %v2253_v61, %v7167_v57  ;;  %v5561_v3 = vpop.f32.mrb[125].mxu0  ;;  %v4046_v57 = vrot.slane %v4044_v8, 2  ;;  %v4062_v61 = vshrl.u32 %v7305_v41, 16 }
 0x1ef   : > { %v2256_v9 = vpop.f32.mrb[126].mxu0  ;;  %v2421_v7 = vpop.f32.mrb[128].mxu1 }
 0x1f0   : > { %v7278_v16 = vadd.f32 %v2413_v40, %v2286_v47  ;;  %v2287_v4 = vadd.f32 %v2256_v9, %v7172_v56  ;;  %v5562_v13 = vpop.f32.mrb[127].mxu0  ;;  %v5587_v23 = vpop.f32.mrb[129].mxu1  ;;  %v3655_v56 = vor.u32 %v3654_v12, %v3651_v17  ;;  %v4050_v45 = vor.u32 %v4049_v24, %v4046_v57 }
 0x1f1   : > { %v2424_v6 = vpop.f32.mrb[130].mxu1  ;;  %v4064_v13 = vrot.slane %v4062_v61, 2  ;;  %v4067_v23 = vrot.slane %v4065_v63, 3 }
 0x1f2   : > { %v7285_v33 = vadd.f32 %v2416_v60, %v2287_v4  ;;  %5788 = vmatmul.mubr.msk.bf16.gmra.mrb[232].mxu0 %vm535_vm2, %v3647_v0  ;;  %v5588_v43 = vpop.f32.mrb[131].mxu1  ;;  %v3656_v37 = vsel %vm992_vm6, %v3646_v5, %v3655_v56  ;;  %v4051_v48 = vsel %vm1425_vm7, %v4042_v26, %v4050_v45  ;;  %v3918_v5 = vrot.slane %v7262_v49, 2 }
 0x1f3   : > { %5791 = vmatprep.mubr.msk.bf16.mxu0 %vm6079_vm1, %v6078_v2  ;;  %v4068_v15 = vor.u32 %v4067_v23, %v4064_v13 }
 0x1f4   : > { %5814 = vmatmul.mubr.msk.bf16.gmra.mrb[236].mxu1 %vm535_vm2, %v3774_v19  ;;  %v7331_v19 = vld [vmem:[%s6317_s16 + $0x28] sm:$0xff]  }
 0x1f5   : > { %v2261_v35 = vpop.f32.mrb[128].mxu0  ;;  %5841 = vmatprep.mubr.msk.bf16.mxu1 %vm6079_vm1, %v6078_v2  ;;  %v4071_v57 = vshrl.u32 %v7331_v19, 16  ;;  %v4074_v24 = vshll.u32 %v7331_v19, 16 }
 0x1f6   : > { %v2288_v27 = vadd.f32 %v2261_v35, %v7191_v25  ;;  %v5565_v30 = vpop.f32.mrb[129].mxu0  ;;  %v4058_v25 = vrot.slane %v4056_v18, 3 }
 0x1f7   : > { %v2264_v34 = vpop.f32.mrb[130].mxu0  ;;  %v2429_v22 = vpop.f32.mrb[132].mxu1  ;;  %v4073_v36 = vrot.slane %v4071_v57, 2 }
 0x1f8   : > { %v7300_v29 = vadd.f32 %v2421_v7, %v2288_v27  ;;  %v2289_v38 = vadd.f32 %v2264_v34, %v7195_v31  ;;  %v5566_v40 = vpop.f32.mrb[131].mxu0  ;;  %v5591_v28 = vpop.f32.mrb[133].mxu1  ;;  %v3917_v31 = vrot.slane %v7259_v42, 2  ;;  %v4059_v55 = vor.u32 %v4058_v25, %v4055_v51  ;;  %v7350_v34 = vld [vmem:[%s6317_s16 + $0x30] ss:$0 sps:$4 sm:$0x77]  }
 0x1f9   : > { %v2432_v50 = vpop.f32.mrb[134].mxu1  ;;  %v4222_v7 = vsel %vm551_vm0, %v5059_v52, 0  ;;  %v3922_v28 = vrot.slane %v7305_v41, 2 }
 0x1fa   : > { %v7307_v60 = vadd.f32 %v2424_v6, %v2289_v38  ;;  %5792 = vmatmul.mubr.msk.bf16.gmra.mrb[236].mxu0 %vm535_vm2, %v3656_v37  ;;  %v5592_v44 = vpop.f32.mrb[135].mxu1  ;;  %v3919_v10 = vsel %vm1153_vm5, %v3917_v31, %v3918_v5  ;;  %v4060_v4 = vsel %vm1425_vm7, %v4050_v45, %v4059_v55  ;;  %v4076_v38 = vrot.slane %v4074_v24, 3 }
 0x1fb   : > { %5819 = vmatprep.mubr.msk.bf16.mxu0 %vm6079_vm1, %v6078_v2 }
 0x1fc   : > { %5842 = vmatmul.mubr.msk.bf16.vlgmr.msra.gmra.mrb[240].mxu1 %vm535_vm2, %v4051_v48  ;;  %v4077_v51 = vor.u32 %v4076_v38, %v4073_v36 }
 0x1fd   : > { %v2269_v59 = vpop.f32.mrb[132].mxu0  ;;  %5884 = vmatpush3.bf16.msra.mxu1 %v4501_v39  ;;  %5845 = vmatprep.mubr.msk.bf16.mxu1 %vm6079_vm1, %v6078_v2 }
 0x1fe   : > { %v2290_v42 = vadd.f32 %v2269_v59, %v7213_v62  ;;  %v5569_v58 = vpop.f32.mrb[133].mxu0 }
 0x1ff   : > { %v2272_v8 = vpop.f32.mrb[134].mxu0  ;;  %v2437_v47 = vpop.f32.mrb[136].mxu1 }
 0x200   : > { %v7325_v3 = vadd.f32 %v2429_v22, %v2290_v42  ;;  %v2291_v9 = vadd.f32 %v2272_v8, %v7218_v20  ;;  %v5570_v0 = vpop.f32.mrb[135].mxu0  ;;  %v5595_v17 = vpop.f32.mrb[137].mxu1  ;;  %v3920_v20 = vrot.slane %v7283_v14, 2  ;;  %v4069_v22 = vsel %vm1425_vm7, %v4059_v55, %v4068_v15 }
 0x201   : > { %v2440_v12 = vpop.f32.mrb[138].mxu1  ;;  %v4078_v8 = vsel %vm1425_vm7, %v4068_v15, %v4077_v51 }
 0x202   : > { %v7333_v62 = vadd.f32 %v2432_v50, %v2291_v9  ;;  %5820 = vmatmul.mubr.msk.bf16.vlgmr.msra.gmra.mrb[240].mxu0 %vm535_vm2, %v3919_v10  ;;  %v5596_v6 = vpop.f32.mrb[139].mxu1  ;;  %v3921_v26 = vsel %vm1153_vm5, %v3918_v5, %v3920_v20  ;;  %v4083_v50 = vshll.u32 %v7350_v34, 16  ;;  %v3923_v31 = vsel %vm1153_vm5, %v3920_v20, %v3922_v28  ;;  %v6032_v10 = vld [vmem:[%s6251_s21 + $0x4] sm:$0xfe]  }
 0x203   : > { %5862 = vmatpush3.bf16.msra.mxu0 %v4222_v7  ;;  %5823 = vmatprep.mubr.msk.bf16.mxu0 %vm6079_vm1, %v6078_v2  ;;  %v4433_v17 = vshrl.u32 %v6032_v10, 16 }
 0x204   : > { %5846 = vmatmul.mubr.msk.bf16.gmra.mrb[244].mxu1 %vm535_vm2, %v4060_v4  ;;  %v4085_v42 = vrot.slane %v4083_v50, 3 }
 0x205   : > { %v2277_v1 = vpop.f32.mrb[136].mxu0  ;;  %5849 = vmatprep.mubr.msk.bf16.mxu1 %vm6079_vm1, %v6078_v2 }
 0x206   : > { %v2292_v43 = vadd.f32 %v2277_v1, %v7232_v21  ;;  %v5573_v56 = vpop.f32.mrb[137].mxu0  ;;  %v6030_v1 = vld [vmem:[%s6317_s16 + $0x30] ss:$0 sps:$4 sm:$0x33]  }
 0x207   : > { %v2280_v35 = vpop.f32.mrb[138].mxu0  ;;  %v2676_v45 = vpop.f32.mrb[140].mxu1  ;;  %v3926_v38 = vrot.slane %v6030_v1, 2 }
 0x208   : > { %v7346_v32 = vadd.f32 %v2437_v47, %v2292_v43  ;;  %v2293_v18 = vadd.f32 %v2280_v35, %v7236_v11  ;;  %v5574_v27 = vpop.f32.mrb[139].mxu0  ;;  %v5623_v30 = vpop.f32.mrb[141].mxu1  ;;  %v4080_v11 = vshrl.u32 %v7350_v34, 16  ;;  %v6033_v47 = vld [vmem:[%s6251_s21 + $0xc] sm:$0xff]  }
 0x209   : > { %v2679_v37 = vpop.f32.mrb[142].mxu1  ;;  %v4441_v4 = vshrl.u32 %v6033_v47, 16  ;;  %v4444_v13 = vshll.u32 %v6033_v47, 16  ;;  %v6035_v47 = vld [vmem:[%s6251_s21 + $0x1c] sm:$0xff]  }
 0x20a   : > { %v7353_v40 = vadd.f32 %v2440_v12, %v2293_v18  ;;  %5824 = vmatmul.mubr.msk.bf16.gmra.mrb[244].mxu0 %vm535_vm2, %v3921_v26  ;;  %v5624_v21 = vpop.f32.mrb[143].mxu1  ;;  %v4082_v63 = vrot.slane %v4080_v11, 2  ;;  %v4436_v12 = vshll.u32 %v6032_v10, 16  ;;  %v4435_v18 = vrot.slane %v4433_v17, 1 }
 0x20b   : > { %5827 = vmatprep.mubr.msk.bf16.mxu0 %vm6079_vm1, %v6078_v2  ;;  %v4446_v30 = vrot.slane %v4444_v13, 2  ;;  %v4462_v17 = vshll.u32 %v6035_v47, 16 }
 0x20c   : > { %5850 = vmatmul.mubr.msk.bf16.gmra.mrb[248].mxu1 %vm535_vm2, %v4069_v22  ;;  %v4086_v0 = vor.u32 %v4085_v42, %v4082_v63  ;;  %v4438_v27 = vrot.slane %v4436_v12, 2 }
 0x20d   : > { %v2523_v48 = vpop.f32.mrb[140].mxu0  ;;  %5853 = vmatprep.mubr.msk.bf16.mxu1 %vm6079_vm1, %v6078_v2 }
 0x20e   : > { %v2562_v25 = vadd.f32 %v2523_v48, %v7254_v54  ;;  %v5601_v44 = vpop.f32.mrb[141].mxu0  ;;  %v4087_v35 = vsel %vm1425_vm7, %v4077_v51, %v4086_v0 }
 0x20f   : > { %v2526_v39 = vpop.f32.mrb[142].mxu0  ;;  %v2684_v5 = vpop.f32.mrb[144].mxu1 }
 0x210   : > { %v7366_v59 = vadd.f32 %v2676_v45, %v2562_v25  ;;  %v2563_v52 = vadd.f32 %v2526_v39, %v7264_v53  ;;  %v5602_v55 = vpop.f32.mrb[143].mxu0  ;;  %v5627_v61 = vpop.f32.mrb[145].mxu1  ;;  %v3924_v53 = vrot.slane %v7331_v19, 2 }
 0x211   : > { %v2687_v58 = vpop.f32.mrb[146].mxu1 }
 0x212   : > { %v7372_v9 = vadd.f32 %v2679_v37, %v2563_v52  ;;  %5828 = vmatmul.mubr.msk.bf16.gmra.mrb[248].mxu0 %vm535_vm2, %v3923_v31  ;;  %v5628_v54 = vpop.f32.mrb[147].mxu1  ;;  %v3925_v15 = vsel %vm1153_vm5, %v3922_v28, %v3924_v53  ;;  %v6034_v37 = vld [vmem:[%s6251_s21 + $0x14] sm:$0xff]   ;;  %v4439_v28 = vor.u32 %v4438_v27, %v4435_v18  ;;  %v3927_v39 = vsel %vm1153_vm5, %v3924_v53, %v3926_v38 }
 0x213   : > { %5831 = vmatprep.mubr.msk.bf16.mxu0 %vm6079_vm1, %v6078_v2  ;;  %v4450_v50 = vshrl.u32 %v6034_v37, 16  ;;  %v4453_v48 = vshll.u32 %v6034_v37, 16  ;;  %v4196_v53 = vrot.slane %v7262_v49, 3  ;;  %v4198_v18 = vrot.slane %v7283_v14, 3 }
 0x214   : > { %5854 = vmatmul.mubr.msk.bf16.gmra.mrb[252].mxu1 %vm535_vm2, %v4078_v8 }
 0x215   : > { %v2531_v7 = vpop.f32.mrb[144].mxu0  ;;  %5857 = vmatprep.mubr.msk.bf16.mxu1 %vm6079_vm1, %v6078_v2  ;;  %v4452_v8 = vrot.slane %v4450_v50, 1  ;;  %v4455_v10 = vrot.slane %v4453_v48, 2 }
 0x216   : > { %v2564_v23 = vadd.f32 %v2531_v7, %v7278_v16  ;;  %v5605_v6 = vpop.f32.mrb[145].mxu0  ;;  %v4443_v16 = vrot.slane %v4441_v4, 1  ;;  %v4459_v7 = vshrl.u32 %v6035_v47, 16 }
 0x217   : > { %v2534_v20 = vpop.f32.mrb[146].mxu0  ;;  %v2692_v57 = vpop.f32.mrb[148].mxu1  ;;  %v4456_v0 = vor.u32 %v4455_v10, %v4452_v8 }
 0x218   : > { %v7384_v24 = vadd.f32 %v2684_v5, %v2564_v23  ;;  %v2565_v43 = vadd.f32 %v2534_v20, %v7285_v33  ;;  %v5606_v56 = vpop.f32.mrb[147].mxu0  ;;  %v5631_v26 = vpop.f32.mrb[149].mxu1  ;;  %v4189_v33 = vld [vmem:[%s6317_s16 + $0x8] sm:$0x8]  ;;  %v4447_v11 = vor.u32 %v4446_v30, %v4443_v16  ;;  %s5909_s16 = smul.u32 10, %s7648_s27 }
 0x219   : > { %v2695_v45 = vpop.f32.mrb[150].mxu1  ;;  %v5060_v44 = vcombine.low %v4189_v33, %v7250_v46  ;;  %v4461_v56 = vrot.slane %v4459_v7, 1  ;;  %v6036_v26 = vld [vmem:[%s6251_s21 + $0x24] sm:$0xff]   ;;  %v4199_v33 = vsel %vm1586_vm8, %v4196_v53, %v4198_v18 }
 0x21a   : > { %v7389_v22 = vadd.f32 %v2687_v58, %v2565_v43  ;;  %5832 = vmatmul.mubr.msk.bf16.gmra.mrb[252].mxu0 %vm535_vm2, %v3925_v15  ;;  %v5632_v36 = vpop.f32.mrb[151].mxu1  ;;  %v4448_v58 = vsel %vm992_vm6, %v4439_v28, %v4447_v11  ;;  %v4457_v43 = vsel %vm992_vm6, %v4447_v11, %v4456_v0  ;;  %v4468_v16 = vshrl.u32 %v6036_v26, 16 }
 0x21b   : > { %5835 = vmatprep.mubr.msk.bf16.mxu0 %vm6079_vm1, %v6078_v2  ;;  %v4195_v54 = vrot.slane %v5060_v44, 3  ;;  %v4471_v30 = vshll.u32 %v6036_v26, 16 }
 0x21c   : > { %5858 = vmatmul.mubr.msk.bf16.gmra.mrb[0].mxu1 %vm535_vm2, %v4087_v35  ;;  %v4464_v35 = vrot.slane %v4462_v17, 2 }
 0x21d   : > { %v2539_v21 = vpop.f32.mrb[148].mxu0  ;;  %5885 = vmatprep.mubr.msk.bf16.mxu1 %vm6079_vm1, %v6078_v2  ;;  %v4197_v23 = vsel %vm1586_vm8, %v4195_v54, %v4196_v53  ;;  %v4473_v44 = vrot.slane %v4471_v30, 2 }
 0x21e   : > { %v2566_v51 = vadd.f32 %v2539_v21, %v7300_v29  ;;  %v5609_v25 = vpop.f32.mrb[149].mxu0  ;;  %v4465_v27 = vor.u32 %v4464_v35, %v4461_v56 }
 0x21f   : > { %v2542_v31 = vpop.f32.mrb[150].mxu0  ;;  %v2700_v5 = vpop.f32.mrb[152].mxu1  ;;  %v4470_v25 = vrot.slane %v4468_v16, 1 }
 0x220   : > { %v7401_v52 = vadd.f32 %v2692_v57, %v2566_v51  ;;  %v2567_v55 = vadd.f32 %v2542_v31, %v7307_v60  ;;  %v5610_v61 = vpop.f32.mrb[151].mxu0  ;;  %v5635_v63 = vpop.f32.mrb[153].mxu1  ;;  %v4466_v51 = vsel %vm992_vm6, %v4456_v0, %v4465_v27 }
 0x221   : > { %v2703_v42 = vpop.f32.mrb[154].mxu1 }
 0x222   : > { %v7406_v29 = vadd.f32 %v2695_v45, %v2567_v55  ;;  %5836 = vmatmul.mubr.msk.bf16.gmra.mrb[0].mxu0 %vm535_vm2, %v3927_v39  ;;  %v5636_v46 = vpop.f32.mrb[155].mxu1  ;;  %v6037_v39 = vld [vmem:[%s6251_s21 + $0x2c] ss:$0 sps:$4 sm:$0x33]   ;;  %v4474_v55 = vor.u32 %v4473_v44, %v4470_v25  ;;  %s5910_s21 = smul.u32 80, %s7642_s28 }
 0x223   : > { %5863 = vmatprep.mubr.msk.bf16.mxu0 %vm6079_vm1, %v6078_v2  ;;  %v4477_v61 = vshrl.u32 %v6037_v39, 16  ;;  %v4480_v63 = vshll.u32 %v6037_v39, 16 }
 0x224   : > { %5886 = vmatmul.mubr.msk.bf16.vlgmr.msra.gmra.mrb[4].mxu1 %vm535_vm2, %v4448_v58  ;;  %v4475_v0 = vsel %vm992_vm6, %v4465_v27, %v4474_v55  ;;  %s7505_s24 = sadd.s32 %s5910_s21, %s5909_s16 }
 0x225   : > { %v2547_v60 = vpop.f32.mrb[152].mxu0  ;;  %5889 = vmatprep.mubr.msk.bf16.mxu1 %vm6079_vm1, %v6078_v2  ;;  %v4479_v7 = vrot.slane %v4477_v61, 1  ;;  %v4482_v17 = vrot.slane %v4480_v63, 2  ;;  %s4824_s27 = sshll.u32 %s7505_s24, 2 }
 0x226   : > { %v2568_v12 = vadd.f32 %v2547_v60, %v7325_v3  ;;  %v5613_v4 = vpop.f32.mrb[153].mxu0  ;;  %s7522_s14 = scalar_lea.vmem %s7630_s8, %s4824_s27  ;;  %s7547_s19 = scalar_lea.vmem %s7629_s7, %s4824_s27 }
 0x227   : > { %v2550_v13 = vpop.f32.mrb[154].mxu0  ;;  %v2708_v6 = vpop.f32.mrb[156].mxu1  ;;  %v4202_v4 = vrot.slane %v7331_v19, 3 }
 0x228   : > { %v7417_v20 = vadd.f32 %v2700_v5, %v2568_v12  ;;  %v2569_v49 = vadd.f32 %v2550_v13, %v7333_v62  ;;  %v5614_v1 = vpop.f32.mrb[155].mxu0  ;;  %v5639_v15 = vpop.f32.mrb[157].mxu1  ;;  %v4200_v5 = vrot.slane %v7305_v41, 3  ;;  %v4483_v13 = vor.u32 %v4482_v17, %v4479_v7 }
 0x229   : > { %v2711_v57 = vpop.f32.mrb[158].mxu1 }
 0x22a   : > { %v7422_v45 = vadd.f32 %v2703_v42, %v2569_v49  ;;  %5864 = vmatmul.mubr.msk.bf16.vlgmr.msra.gmra.mrb[4].mxu0 %vm535_vm2, %v4197_v23  ;;  %v5640_v3 = vpop.f32.mrb[159].mxu1  ;;  %v4201_v10 = vsel %vm1586_vm8, %v4198_v18, %v4200_v5  ;;  %v4203_v1 = vsel %vm1586_vm8, %v4200_v5, %v4202_v4  ;;  %v4484_v26 = vsel %vm992_vm6, %v4474_v55, %v4483_v13 }
 0x22b   : > { %5867 = vmatprep.mubr.msk.bf16.mxu0 %vm6079_vm1, %v6078_v2 }
 0x22c   : > { %5890 = vmatmul.mubr.msk.bf16.gmra.mrb[8].mxu1 %vm535_vm2, %v4457_v43 }
 0x22d   : > { %v2555_v62 = vpop.f32.mrb[156].mxu0  ;;  %5893 = vmatprep.mubr.msk.bf16.mxu1 %vm6079_vm1, %v6078_v2 }
 0x22e   : > { %v2570_v37 = vadd.f32 %v2555_v62, %v7346_v32  ;;  %v5617_v36 = vpop.f32.mrb[157].mxu0 }
 0x22f   : > { %v2558_v38 = vpop.f32.mrb[158].mxu0  ;;  %v2954_v21 = vpop.f32.mrb[160].mxu1 }
 0x230   : > { %v7433_v28 = vadd.f32 %v2708_v6, %v2570_v37  ;;  %v2571_v14 = vadd.f32 %v2558_v38, %v7353_v40  ;;  %v5618_v11 = vpop.f32.mrb[159].mxu0  ;;  %v5667_v50 = vpop.f32.mrb[161].mxu1 }
 0x231   : > { %v2957_v48 = vpop.f32.mrb[162].mxu1 }
 0x232   : > { %v7438_v31 = vadd.f32 %v2711_v57, %v2571_v14  ;;  %5868 = vmatmul.mubr.msk.bf16.gmra.mrb[8].mxu0 %vm535_vm2, %v4199_v33  ;;  %v5668_v32 = vpop.f32.mrb[163].mxu1 }
 0x233   : > { %5871 = vmatprep.mubr.msk.bf16.mxu0 %vm6079_vm1, %v6078_v2 }
 0x234   : > { %5894 = vmatmul.mubr.msk.bf16.gmra.mrb[12].mxu1 %vm535_vm2, %v4466_v51 }
 0x235   : > { %v2836_v40 = vpop.f32.mrb[160].mxu0  ;;  %5897 = vmatprep.mubr.msk.bf16.mxu1 %vm6079_vm1, %v6078_v2 }
 0x236   : > { %v2875_v42 = vadd.f32 %v2836_v40, %v7366_v59  ;;  %v5645_v58 = vpop.f32.mrb[161].mxu0 }
 0x237   : > { %v2839_v8 = vpop.f32.mrb[162].mxu0  ;;  %v2962_v47 = vpop.f32.mrb[164].mxu1 }
 0x238   : > { %v7449_v46 = vadd.f32 %v2954_v21, %v2875_v42  ;;  %v2876_v41 = vadd.f32 %v2839_v8, %v7372_v9  ;;  %v5646_v54 = vpop.f32.mrb[163].mxu0  ;;  %v5671_v53 = vpop.f32.mrb[165].mxu1 }
 0x239   : > { %v2965_v60 = vpop.f32.mrb[166].mxu1 }
 0x23a   : > { %v7453_v12 = vadd.f32 %v2957_v48, %v2876_v41  ;;  %5872 = vmatmul.mubr.msk.bf16.gmra.mrb[12].mxu0 %vm535_vm2, %v4201_v10  ;;  %v5672_v59 = vpop.f32.mrb[167].mxu1 }
 0x23b   : > { %5875 = vmatprep.mubr.msk.bf16.mxu0 %vm6079_vm1, %v6078_v2 }
 0x23c   : > { %5898 = vmatmul.mubr.msk.bf16.gmra.mrb[16].mxu1 %vm535_vm2, %v4475_v0 }
 0x23d   : > { %v2844_v9 = vpop.f32.mrb[164].mxu0  ;;  %5901 = vmatprep.mubr.msk.bf16.mxu1 %vm6079_vm1, %v6078_v2 }
 0x23e   : > { %v2877_v23 = vadd.f32 %v2844_v9, %v7384_v24  ;;  %v5649_v6 = vpop.f32.mrb[165].mxu0  ;;  %v4204_v24 = vrot.slane %v7350_v34, 3 }
 0x23f   : > { %v2847_v49 = vpop.f32.mrb[166].mxu0  ;;  %v2970_v15 = vpop.f32.mrb[168].mxu1 }
 0x240   : > { %v7464_v57 = vadd.f32 %v2962_v47, %v2877_v23  ;;  %v2878_v43 = vadd.f32 %v2847_v49, %v7389_v22  ;;  %v5650_v56 = vpop.f32.mrb[167].mxu0  ;;  %v5675_v19 = vpop.f32.mrb[169].mxu1  ;;  %v4205_v30 = vsel %vm1586_vm8, %v4202_v4, %v4204_v24 }
 0x241   : > { %v2973_v35 = vpop.f32.mrb[170].mxu1 }
 0x242   : > { %v2996_v3 = vadd.f32 %v2965_v60, %v2878_v43  ;;  %5876 = vmatmul.mubr.msk.bf16.gmra.mrb[16].mxu0 %vm535_vm2, %v4203_v1  ;;  %v5676_v18 = vpop.f32.mrb[171].mxu1 }
 0x243   : > { %5879 = vmatprep.mubr.msk.bf16.mxu0 %vm6079_vm1, %v6078_v2 }
 0x244   : > { %5902 = vmatmul.mubr.msk.bf16.gmra.mrb[20].mxu1 %vm535_vm2, %v4484_v26 }
 0x245   : > { %v2852_v62 = vpop.f32.mrb[168].mxu0 }
 0x246   : > { %v2879_v27 = vadd.f32 %v2852_v62, %v7401_v52  ;;  %v5653_v22 = vpop.f32.mrb[169].mxu0 }
 0x247   : > { %v2855_v16 = vpop.f32.mrb[170].mxu0  ;;  %v2978_v37 = vpop.f32.mrb[172].mxu1 }
 0x248   : > { %v2997_v36 = vadd.f32 %v2970_v15, %v2879_v27  ;;  %v2880_v38 = vadd.f32 %v2855_v16, %v7406_v29  ;;  %v5654_v33 = vpop.f32.mrb[171].mxu0  ;;  %v5679_v21 = vpop.f32.mrb[173].mxu1 }
 0x249   : > { %v2981_v14 = vpop.f32.mrb[174].mxu1 }
 0x24a   : > { %v2998_v11 = vadd.f32 %v2973_v35, %v2880_v38  ;;  %5880 = vmatmul.mubr.msk.bf16.gmra.mrb[20].mxu0 %vm535_vm2, %v4205_v30  ;;  %v5680_v2 = vpop.f32.mrb[175].mxu1 }
 0x24d   : > { %v2860_v34 = vpop.f32.mrb[172].mxu0 }
 0x24e   : > { %v2881_v50 = vadd.f32 %v2860_v34, %v7417_v20  ;;  %v5657_v48 = vpop.f32.mrb[173].mxu0 }
 0x24f   : > { %v2863_v52 = vpop.f32.mrb[174].mxu0  ;;  %v2986_v51 = vpop.f32.mrb[176].mxu1 }
 0x250   : > { %v2999_v25 = vadd.f32 %v2978_v37, %v2881_v50  ;;  %v2882_v44 = vadd.f32 %v2863_v52, %v7422_v45  ;;  %v5658_v39 = vpop.f32.mrb[175].mxu0  ;;  %v5683_v32 = vpop.f32.mrb[177].mxu1 }
 0x251   : > { %v2989_v5 = vpop.f32.mrb[178].mxu1 }
 0x252   : > { %v3000_v29 = vadd.f32 %v2981_v14, %v2882_v44  ;;  %v5684_v40 = vpop.f32.mrb[179].mxu1 }
 0x255   : > { %v2868_v55 = vpop.f32.mrb[176].mxu0 }
 0x256   : > { %v2883_v61 = vadd.f32 %v2868_v55, %v7433_v28  ;;  %v5661_v63 = vpop.f32.mrb[177].mxu0 }
 0x257   : > { %v2871_v42 = vpop.f32.mrb[178].mxu0  ;;  %v3278_v58 = vpop.f32.mrb[180].mxu1 }
 0x258   : > { %v3001_v8 = vadd.f32 %v2986_v51, %v2883_v61  ;;  %v2884_v20 = vadd.f32 %v2871_v42, %v7438_v31  ;;  %v5662_v10 = vpop.f32.mrb[179].mxu0  ;;  %v5711_v47 = vpop.f32.mrb[181].mxu1 }
 0x259   : > { %v3281_v41 = vpop.f32.mrb[182].mxu1 }
 0x25a   : > { %v3002_v54 = vadd.f32 %v2989_v5, %v2884_v20  ;;  %v5712_v53 = vpop.f32.mrb[183].mxu1 }
 0x25d   : > { %v3092_v45 = vpop.f32.mrb[180].mxu0 }
 0x25e   : > { %v3131_v60 = vadd.f32 %v3092_v45, %v7449_v46  ;;  %v5689_v0 = vpop.f32.mrb[181].mxu0 }
 0x25f   : > { %v3095_v7 = vpop.f32.mrb[182].mxu0  ;;  %v3286_v17 = vpop.f32.mrb[184].mxu1 }
 0x260   : > { %v3317_v59 = vadd.f32 %v3278_v58, %v3131_v60  ;;  %v3132_v28 = vadd.f32 %v3095_v7, %v7453_v12  ;;  %v5690_v4 = vpop.f32.mrb[183].mxu0  ;;  %v5715_v9 = vpop.f32.mrb[185].mxu1 }
 0x261   : > { %v3289_v13 = vpop.f32.mrb[186].mxu1 }
 0x262   : > { %v3318_v23 = vadd.f32 %v3281_v41, %v3132_v28  ;;  %v5716_v6 = vpop.f32.mrb[187].mxu1 }
 0x265   : > { %v3100_v31 = vpop.f32.mrb[184].mxu0 }
 0x266   : > { %v3133_v49 = vadd.f32 %v3100_v31, %v7464_v57  ;;  %v5693_v1 = vpop.f32.mrb[185].mxu0 }
 0x267   : > { %v3103_v15 = vpop.f32.mrb[186].mxu0  ;;  %v3294_v43 = vpop.f32.mrb[188].mxu1 }
 0x268   : > { %v3319_v56 = vadd.f32 %v3286_v17, %v3133_v49  ;;  %v3134_v19 = vadd.f32 %v3103_v15, %v2996_v3  ;;  %v5694_v46 = vpop.f32.mrb[187].mxu0  ;;  %v5719_v35 = vpop.f32.mrb[189].mxu1 }
 0x269   : > { %v3297_v26 = vpop.f32.mrb[190].mxu1 }
 0x26a   : > { %v3320_v18 = vadd.f32 %v3289_v13, %v3134_v19  ;;  %v5720_v24 = vpop.f32.mrb[191].mxu1 }
 0x26d   : > { %v3108_v62 = vpop.f32.mrb[188].mxu0 }
 0x26e   : > { %v3135_v12 = vadd.f32 %v3108_v62, %v2997_v36  ;;  %v5697_v27 = vpop.f32.mrb[189].mxu0 }
 0x26f   : > { %v3111_v22 = vpop.f32.mrb[190].mxu0  ;;  %v3302_v16 = vpop.f32.mrb[192].mxu1 }
 0x270   : > { %v3321_v30 = vadd.f32 %v3294_v43, %v3135_v12  ;;  %v3136_v37 = vadd.f32 %v3111_v22, %v2998_v11  ;;  %v5698_v38 = vpop.f32.mrb[191].mxu0  ;;  %v5723_v33 = vpop.f32.mrb[193].mxu1 }
 0x271   : > { %v3305_v57 = vpop.f32.mrb[194].mxu1 }
 0x272   : > { %v3322_v21 = vadd.f32 %v3297_v26, %v3136_v37  ;;  %v5724_v14 = vpop.f32.mrb[195].mxu1 }
 0x275   : > { %v3116_v2 = vpop.f32.mrb[192].mxu0 }
 0x276   : > { %v3137_v34 = vadd.f32 %v3116_v2, %v2999_v25  ;;  %v5701_v3 = vpop.f32.mrb[193].mxu0 }
 0x277   : > { %v3119_v50 = vpop.f32.mrb[194].mxu0  ;;  %v3310_v48 = vpop.f32.mrb[196].mxu1 }
 0x278   : > { %v3323_v52 = vadd.f32 %v3302_v16, %v3137_v34  ;;  %v3138_v51 = vadd.f32 %v3119_v50, %v3000_v29  ;;  %v5702_v44 = vpop.f32.mrb[195].mxu0  ;;  %v5727_v39 = vpop.f32.mrb[197].mxu1 }
 0x279   : > { %v3313_v36 = vpop.f32.mrb[198].mxu1 }
 0x27a   : > { %v3324_v32 = vadd.f32 %v3305_v57, %v3138_v51  ;;  %v5728_v5 = vpop.f32.mrb[199].mxu1 }
 0x27d   : > { %v3124_v40 = vpop.f32.mrb[196].mxu0 }
 0x27e   : > { %v3139_v55 = vadd.f32 %v3124_v40, %v3001_v8  ;;  %v5705_v11 = vpop.f32.mrb[197].mxu0 }
 0x27f   : > { %v3127_v61 = vpop.f32.mrb[198].mxu0  ;;  %v3549_v63 = vpop.f32.mrb[200].mxu1 }
 0x280   : > { %v3325_v42 = vadd.f32 %v3310_v48, %v3139_v55  ;;  %v3140_v58 = vadd.f32 %v3127_v61, %v3002_v54  ;;  %v5706_v20 = vpop.f32.mrb[199].mxu0  ;;  %v5755_v10 = vpop.f32.mrb[201].mxu1 }
 0x281   : > { %v3552_v25 = vpop.f32.mrb[202].mxu1 }
 0x282   : > { %v3326_v47 = vadd.f32 %v3313_v36, %v3140_v58  ;;  %v5756_v41 = vpop.f32.mrb[203].mxu1 }
 0x285   : > { %v3396_v53 = vpop.f32.mrb[200].mxu0 }
 0x286   : > { %v3435_v45 = vadd.f32 %v3396_v53, %v3317_v59  ;;  %v5733_v29 = vpop.f32.mrb[201].mxu0 }
 0x287   : > { %v3399_v60 = vpop.f32.mrb[202].mxu0  ;;  %v3557_v0 = vpop.f32.mrb[204].mxu1 }
 0x288   : > { %v3588_v7 = vadd.f32 %v3549_v63, %v3435_v45  ;;  %v3436_v17 = vadd.f32 %v3399_v60, %v3318_v23  ;;  %v5734_v28 = vpop.f32.mrb[203].mxu0  ;;  %v5759_v4 = vpop.f32.mrb[205].mxu1 }
 0x289   : > { %v3560_v8 = vpop.f32.mrb[206].mxu1 }
 0x28a   : > { %v3589_v9 = vadd.f32 %v3552_v25, %v3436_v17  ;;  %v5760_v13 = vpop.f32.mrb[207].mxu1 }
 0x28d   : > { %v3404_v6 = vpop.f32.mrb[204].mxu0 }
 0x28e   : > { %v3437_v31 = vadd.f32 %v3404_v6, %v3319_v56  ;;  %v5737_v54 = vpop.f32.mrb[205].mxu0 }
 0x28f   : > { %v3407_v49 = vpop.f32.mrb[206].mxu0  ;;  %v3565_v1 = vpop.f32.mrb[208].mxu1 }
 0x290   : > { %v3590_v15 = vadd.f32 %v3557_v0, %v3437_v31  ;;  %v3438_v43 = vadd.f32 %v3407_v49, %v3320_v18  ;;  %v5738_v19 = vpop.f32.mrb[207].mxu0  ;;  %v5763_v46 = vpop.f32.mrb[209].mxu1 }
 0x291   : > { %v3568_v59 = vpop.f32.mrb[210].mxu1 }
 0x292   : > { %v3591_v35 = vadd.f32 %v3560_v8, %v3438_v43  ;;  %v5764_v26 = vpop.f32.mrb[211].mxu1 }
 0x295   : > { %v3412_v24 = vpop.f32.mrb[208].mxu0 }
 0x296   : > { %v3439_v62 = vadd.f32 %v3412_v24, %v3321_v30  ;;  %v5741_v23 = vpop.f32.mrb[209].mxu0 }
 0x297   : > { %v3415_v12 = vpop.f32.mrb[210].mxu0  ;;  %v3573_v27 = vpop.f32.mrb[212].mxu1 }
 0x298   : > { %v3592_v22 = vadd.f32 %v3565_v1, %v3439_v62  ;;  %v3440_v16 = vadd.f32 %v3415_v12, %v3322_v21  ;;  %v5742_v37 = vpop.f32.mrb[211].mxu0  ;;  %v5767_v38 = vpop.f32.mrb[213].mxu1 }
 0x299   : > { %v3576_v56 = vpop.f32.mrb[214].mxu1 }
 0x29a   : > { %v3593_v33 = vadd.f32 %v3568_v59, %v3440_v16  ;;  %v5768_v57 = vpop.f32.mrb[215].mxu1 }
 0x29d   : > { %v3420_v14 = vpop.f32.mrb[212].mxu0 }
 0x29e   : > { %v3441_v2 = vadd.f32 %v3420_v14, %v3323_v52  ;;  %v5745_v18 = vpop.f32.mrb[213].mxu0 }
 0x29f   : > { %v3423_v34 = vpop.f32.mrb[214].mxu0  ;;  %v3581_v3 = vpop.f32.mrb[216].mxu1 }
 0x2a0   : > { %v3594_v50 = vadd.f32 %v3573_v27, %v3441_v2  ;;  %v3442_v48 = vadd.f32 %v3423_v34, %v3324_v32  ;;  %v5746_v51 = vpop.f32.mrb[215].mxu0  ;;  %v5771_v44 = vpop.f32.mrb[217].mxu1 }
 0x2a1   : > { %v3584_v30 = vpop.f32.mrb[218].mxu1 }
 0x2a2   : > { %v3595_v39 = vadd.f32 %v3576_v56, %v3442_v48  ;;  %v5772_v36 = vpop.f32.mrb[219].mxu1 }
 0x2a5   : > { %v3428_v5 = vpop.f32.mrb[216].mxu0 }
 0x2a6   : > { %v3443_v40 = vadd.f32 %v3428_v5, %v3325_v42  ;;  %v5749_v21 = vpop.f32.mrb[217].mxu0 }
 0x2a7   : > { %v3431_v55 = vpop.f32.mrb[218].mxu0  ;;  %v3827_v11 = vpop.f32.mrb[220].mxu1 }
 0x2a8   : > { %v3596_v61 = vadd.f32 %v3581_v3, %v3443_v40  ;;  %v3444_v63 = vadd.f32 %v3431_v55, %v3326_v47  ;;  %v5750_v58 = vpop.f32.mrb[219].mxu0  ;;  %v5799_v20 = vpop.f32.mrb[221].mxu1 }
 0x2a9   : > { %v3830_v52 = vpop.f32.mrb[222].mxu1 }
 0x2aa   : > { %v3597_v10 = vadd.f32 %v3584_v30, %v3444_v63  ;;  %v5800_v25 = vpop.f32.mrb[223].mxu1 }
 0x2ad   : > { %v3709_v41 = vpop.f32.mrb[220].mxu0 }
 0x2ae   : > { %v3748_v53 = vadd.f32 %v3709_v41, %v3588_v7  ;;  %v5777_v32 = vpop.f32.mrb[221].mxu0 }
 0x2af   : > { %v3712_v45 = vpop.f32.mrb[222].mxu0  ;;  %v3835_v29 = vpop.f32.mrb[224].mxu1 }
 0x2b0   : > { %v3866_v60 = vadd.f32 %v3827_v11, %v3748_v53  ;;  %v3749_v0 = vadd.f32 %v3712_v45, %v3589_v9  ;;  %v5778_v17 = vpop.f32.mrb[223].mxu0  ;;  %v5803_v28 = vpop.f32.mrb[225].mxu1 }
 0x2b1   : > { %v3838_v42 = vpop.f32.mrb[226].mxu1 }
 0x2b2   : > { %v3867_v4 = vadd.f32 %v3830_v52, %v3749_v0  ;;  %v5804_v8 = vpop.f32.mrb[227].mxu1 }
 0x2b5   : > { %v3717_v13 = vpop.f32.mrb[224].mxu0 }
 0x2b6   : > { %v3750_v6 = vadd.f32 %v3717_v13, %v3590_v15  ;;  %v5781_v47 = vpop.f32.mrb[225].mxu0 }
 0x2b7   : > { %v3720_v31 = vpop.f32.mrb[226].mxu0  ;;  %v3843_v54 = vpop.f32.mrb[228].mxu1 }
 0x2b8   : > { %v3868_v49 = vadd.f32 %v3835_v29, %v3750_v6  ;;  %v3751_v1 = vadd.f32 %v3720_v31, %v3591_v35  ;;  %v5782_v43 = vpop.f32.mrb[227].mxu0  ;;  %v5807_v19 = vpop.f32.mrb[229].mxu1 }
 0x2b9   : > { %v3846_v7 = vpop.f32.mrb[230].mxu1 }
 0x2ba   : > { %v3869_v46 = vadd.f32 %v3838_v42, %v3751_v1  ;;  %v5808_v59 = vpop.f32.mrb[231].mxu1 }
 0x2bd   : > { %v3725_v26 = vpop.f32.mrb[228].mxu0 }
 0x2be   : > { %v3752_v24 = vadd.f32 %v3725_v26, %v3592_v22  ;;  %v5785_v9 = vpop.f32.mrb[229].mxu0 }
 0x2bf   : > { %v3728_v62 = vpop.f32.mrb[230].mxu0  ;;  %v3851_v23 = vpop.f32.mrb[232].mxu1 }
 0x2c0   : > { %v3870_v12 = vadd.f32 %v3843_v54, %v3752_v24  ;;  %v3753_v27 = vadd.f32 %v3728_v62, %v3593_v33  ;;  %v5786_v16 = vpop.f32.mrb[231].mxu0  ;;  %v5811_v37 = vpop.f32.mrb[233].mxu1 }
 0x2c1   : > { %v3854_v15 = vpop.f32.mrb[234].mxu1 }
 0x2c2   : > { %v3871_v38 = vadd.f32 %v3846_v7, %v3753_v27  ;;  %v5812_v56 = vpop.f32.mrb[235].mxu1 }
 0x2c5   : > { %v3733_v57 = vpop.f32.mrb[232].mxu0 }
 0x2c6   : > { %v3754_v14 = vadd.f32 %v3733_v57, %v3594_v50  ;;  %v5789_v35 = vpop.f32.mrb[233].mxu0 }
 0x2c7   : > { %v3736_v2 = vpop.f32.mrb[234].mxu0  ;;  %v3859_v18 = vpop.f32.mrb[236].mxu1 }
 0x2c8   : > { %v3872_v34 = vadd.f32 %v3851_v23, %v3754_v14  ;;  %v3755_v3 = vadd.f32 %v3736_v2, %v3595_v39  ;;  %v5790_v48 = vpop.f32.mrb[235].mxu0  ;;  %v5815_v51 = vpop.f32.mrb[237].mxu1 }
 0x2c9   : > { %v3862_v22 = vpop.f32.mrb[238].mxu1 }
 0x2ca   : > { %v3873_v44 = vadd.f32 %v3854_v15, %v3755_v3  ;;  %v5816_v30 = vpop.f32.mrb[239].mxu1 }
 0x2cd   : > { %v3741_v36 = vpop.f32.mrb[236].mxu0 }
 0x2ce   : > { %v3756_v5 = vadd.f32 %v3741_v36, %v3596_v61  ;;  %v5793_v33 = vpop.f32.mrb[237].mxu0 }
 0x2cf   : > { %v3744_v40 = vpop.f32.mrb[238].mxu0  ;;  %v4140_v21 = vpop.f32.mrb[240].mxu1 }
 0x2d0   : > { %v3874_v55 = vadd.f32 %v3859_v18, %v3756_v5  ;;  %v3757_v11 = vadd.f32 %v3744_v40, %v3597_v10  ;;  %v5794_v63 = vpop.f32.mrb[239].mxu0  ;;  %v5843_v58 = vpop.f32.mrb[241].mxu1 }
 0x2d1   : > { %v4143_v50 = vpop.f32.mrb[242].mxu1 }
 0x2d2   : > { %v7484_v20 = vadd.f32 %v3862_v22, %v3757_v11  ;;  %v5844_v52 = vpop.f32.mrb[243].mxu1 }
 0x2d5   : > { %v3980_v25 = vpop.f32.mrb[240].mxu0 }
 0x2d6   : > { %v4019_v39 = vadd.f32 %v3980_v25, %v3866_v60  ;;  %v5821_v41 = vpop.f32.mrb[241].mxu0 }
 0x2d7   : > { %v3983_v53 = vpop.f32.mrb[242].mxu0  ;;  %v4148_v32 = vpop.f32.mrb[244].mxu1  ;;  %v7532_v41 = vld [vmem:[%s7627_s5] ss:$0 sm:$0xff] }
 0x2d8   : > { %v7486_v45 = vadd.f32 %v4140_v21, %v4019_v39  ;;  %v4020_v29 = vadd.f32 %v3983_v53, %v3867_v4  ;;  %v5822_v61 = vpop.f32.mrb[243].mxu0  ;;  %v5847_v0 = vpop.f32.mrb[245].mxu1 }
 0x2d9   : > { %v4151_v17 = vpop.f32.mrb[246].mxu1 }
 0x2da   : > { %v7488_v28 = vadd.f32 %v4143_v50, %v4020_v29  ;;  %v5848_v10 = vpop.f32.mrb[247].mxu1 }
 0x2dd   : > { %v3988_v42 = vpop.f32.mrb[244].mxu0 }
 0x2de   : > { %v4021_v8 = vadd.f32 %v3988_v42, %v3868_v49  ;;  %v5825_v13 = vpop.f32.mrb[245].mxu0 }
 0x2df   : > { %v3991_v6 = vpop.f32.mrb[246].mxu0  ;;  %v4156_v47 = vpop.f32.mrb[248].mxu1 }
 0x2e0   : > { %v7490_v31 = vadd.f32 %v4148_v32, %v4021_v8  ;;  %v4022_v60 = vadd.f32 %v3991_v6, %v3869_v46  ;;  %v5826_v54 = vpop.f32.mrb[247].mxu0  ;;  %v5851_v1 = vpop.f32.mrb[249].mxu1 }
 0x2e1   : > { %v4159_v43 = vpop.f32.mrb[250].mxu1 }
 0x2e2   : > { %v7492_v4 = vadd.f32 %v4151_v17, %v4022_v60  ;;  %v5852_v19 = vpop.f32.mrb[251].mxu1 }
 0x2e5   : > { %v3996_v7 = vpop.f32.mrb[248].mxu0 }
 0x2e6   : > { %v4023_v59 = vadd.f32 %v3996_v7, %v3870_v12  ;;  %v5829_v26 = vpop.f32.mrb[249].mxu0 }
 0x2e7   : > { %v3999_v24 = vpop.f32.mrb[250].mxu0  ;;  %v4164_v49 = vpop.f32.mrb[252].mxu1 }
 0x2e8   : > { %v7495_v9 = vadd.f32 %v4156_v47, %v4023_v59  ;;  %v4024_v62 = vadd.f32 %v3999_v24, %v3871_v38  ;;  %v5830_v23 = vpop.f32.mrb[251].mxu0  ;;  %v5855_v27 = vpop.f32.mrb[253].mxu1 }
 0x2e9   : > { %v4167_v46 = vpop.f32.mrb[254].mxu1 }
 0x2ea   : > { %v7497_v16 = vadd.f32 %v4159_v43, %v4024_v62  ;;  %v5856_v37 = vpop.f32.mrb[255].mxu1 }
 0x2ed   : > { %v4004_v15 = vpop.f32.mrb[252].mxu0 }
 0x2ee   : > { %v4025_v56 = vadd.f32 %v4004_v15, %v3872_v34  ;;  %v5833_v57 = vpop.f32.mrb[253].mxu0  ;;  %v7510_v34 = vld [vmem:[%s7628_s6] ss:$0 sm:$0xff] }
 0x2ef   : > { %v4007_v12 = vpop.f32.mrb[254].mxu0  ;;  %v4172_v14 = vpop.f32.mrb[0].mxu1 }
 0x2f0   : > { %v7501_v35 = vadd.f32 %v4164_v49, %v4025_v56  ;;  %v4026_v2 = vadd.f32 %v4007_v12, %v3873_v44  ;;  %v5834_v18 = vpop.f32.mrb[255].mxu0  ;;  %v5859_v3 = vpop.f32.mrb[1].mxu1 }
 0x2f1   : > { %v4175_v38 = vpop.f32.mrb[2].mxu1 }
 0x2f2   : > { %v7503_v48 = vadd.f32 %v4167_v46, %v4026_v2  ;;  %v5860_v51 = vpop.f32.mrb[3].mxu1 }
 0x2f5   : > { %v4012_v22 = vpop.f32.mrb[0].mxu0 }
 0x2f6   : > { %v4027_v30 = vadd.f32 %v4012_v22, %v3874_v55  ;;  %v5837_v36 = vpop.f32.mrb[1].mxu0 }
 0x2f7   : > { %v4015_v44 = vpop.f32.mrb[2].mxu0  ;;  %v4537_v5 = vpop.f32.mrb[4].mxu1 }
 0x2f8   : > { %v7513_v33 = vadd.f32 %v4172_v14, %v4027_v30  ;;  %v4028_v40 = vadd.f32 %v4015_v44, %v7484_v20  ;;  %v5838_v21 = vpop.f32.mrb[3].mxu0  ;;  %v4538_v11 = vadd.f32 %v7510_v34, %v4537_v5  ;;  %v5887_v63 = vpop.f32.mrb[5].mxu1 }
 0x2f9   : > { %v4540_v55 = vpop.f32.mrb[6].mxu1 }
 0x2fa   : > { %v7524_v58 = vadd.f32 %v4175_v38, %v4028_v40  ;;  %v5111_v50 = vpack.c.bf16 %v4538_v11, %v4538_v11  ;;  %v4541_v52 = vadd.f32 %v7510_v34, %v4540_v55  ;;  %v5888_v20 = vpop.f32.mrb[7].mxu1 }
 0x2fc   : > { %4616 = vst.msk [vmem:[%s7522_s14] sm:$0xf] %vm4374_vm9, %v5111_v50  ;;  %v5112_v25 = vpack.c.bf16 %v4541_v52, %v4541_v52 }
 0x2fd   : > { %v4258_v39 = vpop.f32.mrb[4].mxu0 }
 0x2fe   : > { %v4297_v53 = vadd.f32 %v4258_v39, %v7486_v45  ;;  %v5865_v32 = vpop.f32.mrb[5].mxu0  ;;  %4617 = vst.msk [vmem:[%s7522_s14 + $0x4] sm:$0xf] %vm4374_vm9, %v5112_v25 }
 0x2ff   : > { %v4261_v29 = vpop.f32.mrb[6].mxu0  ;;  %v4545_v61 = vpop.f32.mrb[8].mxu1 }
 0x300   : > { %v4314_v0 = vadd.f32 %v7532_v41, %v4297_v53  ;;  %v4298_v17 = vadd.f32 %v4261_v29, %v7488_v28  ;;  %v5866_v10 = vpop.f32.mrb[7].mxu0  ;;  %v4546_v42 = vadd.f32 %v7510_v34, %v4545_v61  ;;  %v5891_v8 = vpop.f32.mrb[9].mxu1 }
 0x301   : > { %v4548_v13 = vpop.f32.mrb[10].mxu1 }
 0x302   : > { %v4324_v6 = vmax.f32 %v4314_v0, 0.0  ;;  %v4315_v45 = vadd.f32 %v7532_v41, %v4298_v17  ;;  %v5113_v47 = vpack.c.bf16 %v4546_v42, %v4546_v42  ;;  %v4549_v60 = vadd.f32 %v7510_v34, %v4548_v13  ;;  %v5892_v54 = vpop.f32.mrb[11].mxu1 }
 0x304   : > { %v5101_v28 = vpack.c.bf16 %v4324_v6, %v4324_v6  ;;  %v4325_v1 = vmax.f32 %v4315_v45, 0.0  ;;  %4618 = vst.msk [vmem:[%s7522_s14 + $0x8] sm:$0xf] %vm4374_vm9, %v5113_v47  ;;  %v5114_v43 = vpack.c.bf16 %v4549_v60, %v4549_v60 }
 0x305   : > { %v4266_v19 = vpop.f32.mrb[8].mxu0 }
 0x306   : > { %4375 = vst.msk [vmem:[%s7547_s19] sm:$0xf] %vm4374_vm9, %v5101_v28  ;;  %v5102_v7 = vpack.c.bf16 %v4325_v1, %v4325_v1  ;;  %v4299_v59 = vadd.f32 %v4266_v19, %v7490_v31  ;;  %v5869_v26 = vpop.f32.mrb[9].mxu0  ;;  %4619 = vst.msk [vmem:[%s7522_s14 + $0xc] sm:$0xf] %vm4374_vm9, %v5114_v43 }
 0x307   : > { %v4269_v24 = vpop.f32.mrb[10].mxu0  ;;  %v4553_v49 = vpop.f32.mrb[12].mxu1 }
 0x308   : > { %4376 = vst.msk [vmem:[%s7547_s19 + $0x4] sm:$0xf] %vm4374_vm9, %v5102_v7  ;;  %v4316_v62 = vadd.f32 %v7532_v41, %v4299_v59  ;;  %v4300_v23 = vadd.f32 %v4269_v24, %v7492_v4  ;;  %v5870_v27 = vpop.f32.mrb[11].mxu0  ;;  %v4554_v46 = vadd.f32 %v7510_v34, %v4553_v49  ;;  %v5895_v37 = vpop.f32.mrb[13].mxu1 }
 0x309   : > { %v4556_v15 = vpop.f32.mrb[14].mxu1 }
 0x30a   : > { %v4326_v31 = vmax.f32 %v4316_v62, 0.0  ;;  %v4317_v56 = vadd.f32 %v7532_v41, %v4300_v23  ;;  %v5115_v57 = vpack.c.bf16 %v4554_v46, %v4554_v46  ;;  %v4557_v12 = vadd.f32 %v7510_v34, %v4556_v15  ;;  %v5896_v14 = vpop.f32.mrb[15].mxu1 }
 0x30c   : > { %v5103_v2 = vpack.c.bf16 %v4326_v31, %v4326_v31  ;;  %v4327_v18 = vmax.f32 %v4317_v56, 0.0  ;;  %4620 = vst.msk [vmem:[%s7522_s14 + $0x10] sm:$0xf] %vm4374_vm9, %v5115_v57  ;;  %v5116_v3 = vpack.c.bf16 %v4557_v12, %v4557_v12 }
 0x30d   : > { %v4274_v4 = vpop.f32.mrb[12].mxu0 }
 0x30e   : > { %4377 = vst.msk [vmem:[%s7547_s19 + $0x8] sm:$0xf] %vm4374_vm9, %v5103_v2  ;;  %v5104_v38 = vpack.c.bf16 %v4327_v18, %v4327_v18  ;;  %v4301_v51 = vadd.f32 %v4274_v4, %v7495_v9  ;;  %v5873_v22 = vpop.f32.mrb[13].mxu0  ;;  %4621 = vst.msk [vmem:[%s7522_s14 + $0x14] sm:$0xf] %vm4374_vm9, %v5116_v3 }
 0x30f   : > { %v4277_v30 = vpop.f32.mrb[14].mxu0  ;;  %v4561_v36 = vpop.f32.mrb[16].mxu1 }
 0x310   : > { %4378 = vst.msk [vmem:[%s7547_s19 + $0xc] sm:$0xf] %vm4374_vm9, %v5104_v38  ;;  %v4318_v44 = vadd.f32 %v7532_v41, %v4301_v51  ;;  %v4302_v5 = vadd.f32 %v4277_v30, %v7497_v16  ;;  %v5874_v40 = vpop.f32.mrb[15].mxu0  ;;  %v4562_v21 = vadd.f32 %v7510_v34, %v4561_v36  ;;  %v5899_v11 = vpop.f32.mrb[17].mxu1 }
 0x311   : > { %v4564_v63 = vpop.f32.mrb[18].mxu1 }
 0x312   : > { %v4328_v9 = vmax.f32 %v4318_v44, 0.0  ;;  %v4319_v55 = vadd.f32 %v7532_v41, %v4302_v5  ;;  %v5117_v50 = vpack.c.bf16 %v4562_v21, %v4562_v21  ;;  %v4565_v52 = vadd.f32 %v7510_v34, %v4564_v63  ;;  %v5900_v20 = vpop.f32.mrb[19].mxu1 }
 0x314   : > { %v5105_v25 = vpack.c.bf16 %v4328_v9, %v4328_v9  ;;  %v4329_v39 = vmax.f32 %v4319_v55, 0.0  ;;  %4622 = vst.msk [vmem:[%s7522_s14 + $0x18] sm:$0xf] %vm4374_vm9, %v5117_v50  ;;  %v5118_v53 = vpack.c.bf16 %v4565_v52, %v4565_v52 }
 0x315   : > { %v4282_v16 = vpop.f32.mrb[16].mxu0 }
 0x316   : > { %4379 = vst.msk [vmem:[%s7547_s19 + $0x10] sm:$0xf] %vm4374_vm9, %v5105_v25  ;;  %v5106_v32 = vpack.c.bf16 %v4329_v39, %v4329_v39  ;;  %v4303_v29 = vadd.f32 %v4282_v16, %v7501_v35  ;;  %v5877_v61 = vpop.f32.mrb[17].mxu0  ;;  %4623 = vst.msk [vmem:[%s7522_s14 + $0x1c] sm:$0xf] %vm4374_vm9, %v5118_v53 }
 0x317   : > { %v4285_v0 = vpop.f32.mrb[18].mxu0  ;;  %v4569_v17 = vpop.f32.mrb[20].mxu1 }
 0x318   : > { %4380 = vst.msk [vmem:[%s7547_s19 + $0x14] sm:$0xf] %vm4374_vm9, %v5106_v32  ;;  %v4320_v10 = vadd.f32 %v7532_v41, %v4303_v29  ;;  %v4304_v42 = vadd.f32 %v4285_v0, %v7503_v48  ;;  %v5878_v8 = vpop.f32.mrb[19].mxu0  ;;  %v4570_v13 = vadd.f32 %v7510_v34, %v4569_v17  ;;  %v5903_v6 = vpop.f32.mrb[21].mxu1 }
 0x319   : > { %v4572_v45 = vpop.f32.mrb[22].mxu1 }
 0x31a   : > { %v4330_v35 = vmax.f32 %v4320_v10, 0.0  ;;  %v4321_v47 = vadd.f32 %v7532_v41, %v4304_v42  ;;  %v5119_v60 = vpack.c.bf16 %v4570_v13, %v4570_v13  ;;  %v4573_v54 = vadd.f32 %v7510_v34, %v4572_v45  ;;  %v5904_v28 = vpop.f32.mrb[23].mxu1 }
 0x31c   : > { %v5107_v1 = vpack.c.bf16 %v4330_v35, %v4330_v35  ;;  %v4331_v43 = vmax.f32 %v4321_v47, 0.0  ;;  %4624 = vst.msk [vmem:[%s7522_s14 + $0x20] sm:$0xf] %vm4374_vm9, %v5119_v60  ;;  %v5120_v19 = vpack.c.bf16 %v4573_v54, %v4573_v54 }
 0x31d   : > { %v4290_v48 = vpop.f32.mrb[20].mxu0 }
 0x31e   : > { %4381 = vst.msk [vmem:[%s7547_s19 + $0x18] sm:$0xf] %vm4374_vm9, %v5107_v1  ;;  %v5108_v7 = vpack.c.bf16 %v4331_v43, %v4331_v43  ;;  %v4305_v59 = vadd.f32 %v4290_v48, %v7513_v33  ;;  %v5881_v26 = vpop.f32.mrb[21].mxu0  ;;  %4625 = vst.msk [vmem:[%s7522_s14 + $0x24] sm:$0xf] %vm4374_vm9, %v5120_v19 }
 0x31f   : > { %v4293_v24 = vpop.f32.mrb[22].mxu0 }
 0x320   : > { %4382 = vst.msk [vmem:[%s7547_s19 + $0x1c] sm:$0xf] %vm4374_vm9, %v5108_v7  ;;  %v4322_v34 = vadd.f32 %v7532_v41, %v4305_v59  ;;  %v4306_v49 = vadd.f32 %v4293_v24, %v7524_v58  ;;  %v5882_v62 = vpop.f32.mrb[23].mxu0 }
 0x322   : > { %v4332_v23 = vmax.f32 %v4322_v34, 0.0  ;;  %v4323_v27 = vadd.f32 %v7532_v41, %v4306_v49 }
 0x324   : > { %v5109_v46 = vpack.c.bf16 %v4332_v23, %v4332_v23  ;;  %v4333_v37 = vmax.f32 %v4323_v27, 0.0 }
 0x326   : > { %4383 = vst.msk [vmem:[%s7547_s19 + $0x20] sm:$0xf] %vm4374_vm9, %v5109_v46  ;;  %v5110_v15 = vpack.c.bf16 %v4333_v37, %v4333_v37 }
 0x328   : > { %4384 = vst.msk [vmem:[%s7547_s19 + $0x24] sm:$0xf] %vm4374_vm9, %v5110_v15 }
 0x329 PF: > { %s19_s9 = sadd.s32 1, %s6076_s9   ;;  %s7631_s27 = smov %s6068_s29 }
 0x32a   : > { %p16_p10 = scmp.ge.s32.totalorder %s19_s9, 18   ;;  %s7632_s28 = smov %s6072_s30 }
 0x32b   : > { %s7633_s29 = smov %s7636_s10  ;;  %s7634_s30 = smov %s7640_s11 }
 0x32c   :  { %18 = sbr.rel (!%p16_p10) target bundleno = 3 (0x3), region = 122 }

// kernel: bottleneck_forward.4
= control target key start
LH: loop header
LB: loop body
LE: loop exit
PB: predicated region body
PF: predicated region fallthrough
CT: control target
= control target key end

     0   :  { %s5789_s21 = smov 0   ;;  %s5791_s22 = smov 0   ;;  %s7218_s0 = inlined_call_operand.vmem [shape: bf16[2,10,110,8], index: 0, kind: input, shape index: {}, may-alias: {0,1,2}]   ;;  %s7219_s1 = inlined_call_operand.vmem [shape: bf16[2,10,110,8], index: 1, kind: input, shape index: {}, may-alias: {0,1,2}]   ;;  %s7220_s2 = inlined_call_operand.vmem [shape: bf16[2,10,110,8], index: 2, kind: input, shape index: {}, may-alias: {0,1,2}]   ;;  %s7221_s3 = inlined_call_operand.vmem [shape: bf16[27,8,8], index: 3, kind: input, shape index: {}]   ;;  %s7222_s4 = inlined_call_operand.vmem [shape: f32[1,8], index: 4, kind: input, shape index: {}]   ;;  %s7223_s5 = inlined_call_operand.vmem [shape: bf16[2,8,80,8], index: 5, kind: input, shape index: {}]   ;;  %s7224_s6 = inlined_call_operand.vmem [shape: bf16[2,8,80,8], index: 6, kind: output, shape index: {}]  }
   0x1   :  { %s5793_s23 = smov 0   ;;  %s5795_s24 = smov 0  }
   0x2   :  { %s5797_s25 = smov 0  }
   0x3 LB: > { %s25_s26 = sadd.s32 1, %s5742_s23  ;;  %s28_s27 = sadd.s32 1, %s5746_s24  ;;  %s5750_s25 = sphi %s5797_s25, %s16_s25   ;;  %s5746_s24 = sphi %s5795_s24, %s7229_s24   ;;  %s5742_s23 = sphi %s5793_s23, %s7228_s23   ;;  %s5738_s22 = sphi %s5791_s22, %s7227_s22   ;;  %s5734_s21 = sphi %s5789_s21, %s7226_s21  }
   0x4   : > { %p26_p0 = scmp.ge.s32.totalorder %s25_s26, 8  ;;  %p4534_p1 = scmp.ge.s32.totalorder %s5750_s25, 1 }
   0x5   : > { %p288_p2 = scmp.lt.s32.totalorder %s5750_s25, 17 }
   0x6   : > { %s7231_s26 = smov (%p26_p0, %s25_s26), 0  ;;  %s7233_s27 = smov (!%p26_p0, %s28_s27), %s5746_s24 }
   0x7   : > { %p289_p3 = pnand %p4534_p1, %p288_p2  ;;  %p30_p4 = scmp.ge.s32.totalorder %s7233_s27, 2 }
   0x8   : > { %v4540_v0 = vld [vmem:[%s7221_s3 + $0x4] sm:$0xf] (!%p289_p3)  ;;  %vm508_vm0 = vcmask (!%p289_p3), 1043456   ;;  %p355_p5 = scmp.lt.s32.totalorder (!%p289_p3), %s5738_s22, 1  ;;  %v5752_v1 = vmov (!%p289_p3), 0.0   ;;  %p357_p6 = scmp.lt.s32.totalorder (!%p289_p3), %s5734_s21, 9 }
   0x9   : > { %s7235_s27 = smov (%p30_p4, %s7233_s27), 0  ;;  %292 = sbr.rel (%p289_p3) target bundleno = 795 (0x31b), region = 44 }
   0xa   : > { %4989 = vmatprep.subr.bf16.mxu0 (!%p289_p3), %v5752_v1  ;;  %5583 = vmatprep.subr.bf16.mxu1 (!%p289_p3), %v5752_v1  ;;  %v510_v2 = vsel (!%p289_p3), %vm508_vm0, %v4540_v0, 0  ;;  %vm5753_vm1 = vmmov (!%p289_p3), 0   ;;  %vm447_vm2 = vsmask.f32 (!%p289_p3), 7424  ;;  %s364_s14 = sadd.s32 (!%p289_p3), 1, %s5734_s21  ;;  %vm492_vm3 = vcmask (!%p289_p3), 64512  }
   0xb   : > { %4990 = vmatpush3.bf16.msra.mxu0 (!%p289_p3), %v510_v2  ;;  %5584 = vmatpush3.bf16.msra.mxu1 (!%p289_p3), %v510_v2  ;;  %v4557_v17 = vld [vmem:[%s7221_s3 + $0x8] sm:$0xf] (!%p289_p3)  ;;  %v415_v19 = vld [vmem:[%s7221_s3] sm:$0xf] (!%p289_p3)  ;;  %p5889_p7 = scmp.lt.s32.totalorder (!%p289_p3), %s364_s14, 9  ;;  %vm677_vm4 = vcmask (!%p289_p3), 1046528  }
   0xc   : > { %4991 = vmatprep.mubr.msk.bf16.mxu0 (!%p289_p3), %vm5753_vm1, %v5752_v1  ;;  %5003 = vmatprep.mubr.msk.bf16.mxu1 (!%p289_p3), %vm5753_vm1, %v5752_v1  ;;  %v705_v26 = vsel (!%p289_p3), %vm508_vm0, %v4557_v17, 0  ;;  %v596_v31 = vsel (!%p289_p3), %vm508_vm0, %v415_v19, 0  ;;  %v4564_v43 = vld [vmem:[%s7221_s3 + $0xc] sm:$0xf] (!%p289_p3)  ;;  %v4576_v48 = vld [vmem:[%s7221_s3 + $0x10] sm:$0xf] (!%p289_p3) }
   0xd   : > { %5033 = vmatprep.subr.bf16.mxu0 (!%p289_p3), %v5752_v1  ;;  %5011 = vmatprep.subr.bf16.mxu1 (!%p289_p3), %v5752_v1  ;;  %v858_v45 = vsel (!%p289_p3), %vm508_vm0, %v4564_v43, 0  ;;  %v1019_v50 = vsel (!%p289_p3), %vm508_vm0, %v4576_v48, 0  ;;  %vm949_vm5 = vsmask.f32 (!%p289_p3), 6400  ;;  %v4590_v19 = vld [vmem:[%s7221_s3 + $0x18] sm:$0xf] (!%p289_p3) }
   0xe   : > { %vm1110_vm6 = vcmask (!%p289_p3), 1045504   ;;  %vm1382_vm7 = vsmask.f32 (!%p289_p3), 5376  ;;  %vm1543_vm8 = vcmask (!%p289_p3), 1044480   ;;  %p388_p9 = scmp.lt.s32.totalorder (!%p289_p3), %s5734_s21, 7  ;;  %vm4361_vm9 = vcmask (!%p289_p3), 60416  }
  0x10   : > { %s7237_s22 = smov (!%p355_p5, %s5738_s22), 1  ;;  %s7239_s14 = smov (!%p5889_p7, %s364_s14), 9 }
  0x11   : > { %s358_s30 = scalar_select %p357_p6, %s5734_s21, 9 }
  0x12   : > { %s5837_s7 = smul.u32 140, %s7237_s22 }
  0x13   : > { %s5585_s8 = smul.u32 14, %s358_s30 }
  0x14   : > { %s5587_s20 = smul.u32 14, %s7239_s14 }
  0x15   : > { %s361_s9 = sadd.s32 %s5837_s7, %s5585_s8 }
  0x16   : > { %s4535_s10 = sshll.u32 %s361_s9, 2  ;;  %s371_s28 = sadd.s32 %s5587_s20, %s5837_s7 }
  0x17   : > { %s5844_s13 = scalar_lea.vmem %s7218_s0, %s4535_s10  ;;  %s4536_s8 = sshll.u32 %s371_s28, 2 }
  0x18   : > { %v405_v3 = vld [vmem:[%s5844_s13] sm:$0xf]  ;;  %v5848_v4 = vld [vmem:[%s5844_s13 + $0x4] sm:$0xf]  ;;  %v5854_v6 = vld [vmem:[%s5844_s13 + $0x8] sm:$0xff]   ;;  %s375_s9 = sadd.s32 2, %s5734_s21  ;;  %s5932_s12 = scalar_lea.vmem %s7219_s1, %s4536_s8 }
  0x19   : > { %v5851_v5 = vcombine.low %v405_v3, %v5848_v4  ;;  %v456_v9 = vshll.u32 %v5854_v6, 16  ;;  %v5860_v10 = vld [vmem:[%s5844_s13 + $0x18] sm:$0xff]   ;;  %v5863_v11 = vld [vmem:[%s5844_s13 + $0x20] sm:$0xff]   ;;  %v5867_v12 = vld [vmem:[%s5844_s13 + $0x10] sm:$0xff]   ;;  %v460_v22 = vshrl.u32 %v5854_v6, 16  ;;  %v679_v47 = vrot.slane %v5854_v6, 1 }
  0x1a   : > { %v472_v15 = vshll.u32 %v5860_v10, 16  ;;  %v476_v16 = vshrl.u32 %v5860_v10, 16  ;;  %v480_v18 = vshll.u32 %v5863_v11, 16  ;;  %v464_v23 = vshll.u32 %v5867_v12, 16  ;;  %v671_v41 = vld [vmem:[%s5844_s13] sm:$0xe] }
  0x1b   : > { %v449_v7 = vshrl.u32 %v5851_v5, 16  ;;  %v451_v8 = vshll.u32 %v5851_v5, 16  ;;  %v458_v14 = vrot.slane %v456_v9, 1  ;;  %v5881_v24 = vld [vmem:[%s5844_s13 + $0x28] ss:$0 sps:$4 sm:$0x11]   ;;  %v4558_v44 = vcombine.low %v671_v41, %v5848_v4 }
  0x1c   : > { %v474_v21 = vrot.slane %v472_v15, 1  ;;  %v482_v25 = vrot.slane %v480_v18, 1  ;;  %v484_v29 = vshrl.u32 %v5863_v11, 16  ;;  %v488_v30 = vshll.u32 %v5881_v24, 16  ;;  %p378_p8 = scmp.lt.s32.totalorder %s375_s9, 9  ;;  %v5976_v58 = vld [vmem:[%s5844_s13 + $0xc] sm:$0xff]  }
  0x1d   : > { %v453_v13 = vrot.slane %v451_v8, 1  ;;  %v462_v33 = vor.u32 %v460_v22, %v458_v14  ;;  %v466_v34 = vrot.slane %v464_v23, 1  ;;  %v468_v38 = vshrl.u32 %v5867_v12, 16  ;;  %v790_v54 = vld [vmem:[%s5844_s13 + $0x4] sm:$0xe]  ;;  %s7243_s21 = smov (!%p388_p9, %s5734_s21), 7 }
  0x1e   : > { %v478_v28 = vor.u32 %v476_v16, %v474_v21  ;;  %v486_v35 = vor.u32 %v484_v29, %v482_v25  ;;  %v490_v36 = vrot.slane %v488_v30, 1  ;;  %v678_v46 = vrot.slane %v4558_v44, 1  ;;  %s7241_s9 = smov (!%p378_p8, %s375_s9), 9  ;;  %v5966_v56 = vld [vmem:[%s5844_s13 + $0x8] sm:$0xf] }
  0x1f   : > { %v454_v20 = vor.u32 %v453_v13, %v449_v7  ;;  %v467_v37 = vsel %vm447_vm2, %v462_v33, %v466_v34  ;;  %v470_v40 = vor.u32 %v468_v38, %v466_v34  ;;  %v681_v51 = vrot.slane %v5867_v12, 1  ;;  %s5588_s16 = smul.u32 14, %s7241_s9  ;;  %v6038_v34 = vld [vmem:[%s5844_s13 + $0x24] sm:$0xff]   ;;  %v5645_v44 = vld [vmem:[%s5844_s13 + $0x2c] ss:$0 sps:$4 sm:$0x11]  }
  0x20   : > { %v483_v32 = vsel %vm447_vm2, %v478_v28, %v482_v25  ;;  %v491_v39 = vsel %vm447_vm2, %v486_v35, %v490_v36  ;;  %v680_v49 = vsel %vm677_vm4, %v678_v46, %v679_v47  ;;  %v683_v53 = vrot.slane %v5860_v10, 1  ;;  %v6023_v25 = vld [vmem:[%s5844_s13 + $0x1c] sm:$0xff]  }
  0x21   : > { %v459_v27 = vsel %vm447_vm2, %v454_v20, %v458_v14  ;;  %5004 = vmatmul.mubr.msk.bf16.vlgmr.msra.gmra.mrb[0].mxu1 %vm492_vm3, %v483_v32  ;;  %v475_v42 = vsel %vm447_vm2, %v470_v40, %v474_v21  ;;  %v682_v52 = vsel %vm677_vm4, %v679_v47, %v681_v51  ;;  %s382_s17 = sadd.s32 %s5588_s16, %s5837_s7  ;;  %v685_v57 = vrot.slane %v5863_v11, 1 }
  0x22   : > { %4992 = vmatmul.mubr.msk.bf16.vlgmr.msra.gmra.mrb[0].mxu0 %vm492_vm3, %v459_v27  ;;  %5012 = vmatpush3.bf16.msra.mxu1 %v596_v31  ;;  %s4537_s18 = sshll.u32 %s382_s17, 2  ;;  %v684_v55 = vsel %vm677_vm4, %v681_v51, %v683_v53  ;;  %v4565_v59 = vcombine.low %v790_v54, %v5966_v56  ;;  %v959_v61 = vshrl.u32 %v5976_v58, 16  ;;  %v962_v0 = vshll.u32 %v5976_v58, 16 }
  0x23   : > { %5034 = vmatpush3.bf16.msra.mxu0 %v705_v26  ;;  %4995 = vmatprep.mubr.msk.bf16.mxu0 %vm5753_vm1, %v5752_v1  ;;  %s5971_s20 = scalar_lea.vmem %s7220_s2, %s4537_s18  ;;  %v686_v62 = vsel %vm677_vm4, %v683_v53, %v685_v57  ;;  %v687_v2 = vrot.slane %v5881_v24, 1  ;;  %v832_v4 = vrot.slane %v5976_v58, 1  ;;  %v1291_v23 = vsel %vm508_vm0, %v4590_v19, 0  ;;  %v6130_v19 = vld [vmem:[%s5844_s13 + $0x28] sm:$0xff]  }
  0x24   : > { %5077 = vmatprep.subr.bf16.mxu0 %v5752_v1  ;;  %5007 = vmatprep.mubr.msk.bf16.mxu1 %vm5753_vm1, %v5752_v1  ;;  %v951_v60 = vshrl.u32 %v4565_v59, 16  ;;  %v954_v63 = vshll.u32 %v4565_v59, 16  ;;  %v831_v3 = vrot.slane %v4565_v59, 1  ;;  %v961_v7 = vrot.slane %v959_v61, 1  ;;  %v6073_v59 = vld [vmem:[%s5844_s13 + $0xc] sm:$0xf] }
  0x25   : > { %5055 = vmatprep.subr.bf16.mxu1 %v5752_v1  ;;  %v964_v9 = vrot.slane %v962_v0, 2  ;;  %v977_v27 = vshrl.u32 %v6023_v25, 16  ;;  %v980_v28 = vshll.u32 %v6023_v25, 16  ;;  %v836_v29 = vrot.slane %v6023_v25, 1  ;;  %v6084_v0 = vld [vmem:[%s5844_s13 + $0x10] sm:$0xff]  }
  0x26   : > { %v956_v8 = vrot.slane %v954_v63, 2  ;;  %v986_v36 = vshrl.u32 %v6038_v34, 16  ;;  %v838_v38 = vrot.slane %v6038_v34, 1  ;;  %v840_v48 = vrot.slane %v5645_v44, 1 }
  0x27   : > { %v965_v15 = vor.u32 %v964_v9, %v961_v7  ;;  %v979_v31 = vrot.slane %v977_v27, 1  ;;  %v982_v32 = vrot.slane %v980_v28, 2  ;;  %v1112_v61 = vrot.slane %v5976_v58, 2  ;;  %v5653_v28 = vld [vmem:[%s5844_s13 + $0x30] ss:$0 sps:$4 sm:$0x33]  }
  0x28   : > { %v988_v40 = vrot.slane %v986_v36, 1  ;;  %v839_v43 = vsel %vm677_vm4, %v836_v29, %v838_v38  ;;  %v841_v53 = vsel %vm677_vm4, %v838_v38, %v840_v48  ;;  %v1545_v48 = vrot.slane %v6084_v0, 3 }
  0x29   : > { %5008 = vmatmul.mubr.msk.bf16.gmra.mrb[4].mxu1 %vm492_vm3, %v491_v39  ;;  %v983_v35 = vor.u32 %v982_v32, %v979_v31 }
  0x2a   : > { %4996 = vmatmul.mubr.msk.bf16.gmra.mrb[4].mxu0 %vm492_vm3, %v467_v37  ;;  %5013 = vmatprep.mubr.msk.bf16.mxu1 %vm5753_vm1, %v5752_v1  ;;  %v989_v37 = vshll.u32 %v6038_v34, 16 }
  0x2b   : > { %4999 = vmatprep.mubr.msk.bf16.mxu0 %vm5753_vm1, %v5752_v1 }
  0x2c   : > { %v991_v41 = vrot.slane %v989_v37, 2 }
  0x31   : > { %5014 = vmatmul.mubr.msk.bf16.vlgmr.msra.gmra.mrb[8].mxu1 %vm492_vm3, %v5851_v5  ;;  %v4583_v5 = vld [vmem:[%s7221_s3 + $0x14] sm:$0xf] }
  0x32   : > { %5000 = vmatmul.mubr.msk.bf16.gmra.mrb[8].mxu0 %vm492_vm3, %v475_v42  ;;  %5056 = vmatpush3.bf16.msra.mxu1 %v858_v45  ;;  %v1138_v13 = vsel %vm508_vm0, %v4583_v5, 0  ;;  %v6051_v42 = vld [vmem:[%s5844_s13 + $0x2c] ss:$0 sps:$4 sm:$0x33]   ;;  %v992_v45 = vor.u32 %v991_v41, %v988_v40  ;;  %v4616_v41 = vld [vmem:[%s7221_s3 + $0x24] sm:$0xf] }
  0x33   : > { %5035 = vmatprep.mubr.msk.bf16.mxu0 %vm5753_vm1, %v5752_v1  ;;  %5017 = vmatprep.mubr.msk.bf16.mxu1 %vm5753_vm1, %v5752_v1  ;;  %v995_v46 = vshrl.u32 %v6051_v42, 16  ;;  %v998_v47 = vshll.u32 %v6051_v42, 16 }
  0x34   : > { %5099 = vmatprep.subr.bf16.mxu1 %v5752_v1 }
  0x35   : > { %v997_v51 = vrot.slane %v995_v46, 1  ;;  %v1709_v46 = vsel %vm508_vm0, %v4616_v41, 0 }
  0x39   : > { %5018 = vmatmul.mubr.msk.bf16.gmra.mrb[12].mxu1 %vm492_vm3, %v5854_v6  ;;  %v953_v6 = vrot.slane %v951_v60, 1 }
  0x3a   : > { %5036 = vmatmul.mubr.msk.bf16.vlgmr.msra.gmra.mrb[12].mxu0 %vm492_vm3, %v680_v49  ;;  %5021 = vmatprep.mubr.msk.bf16.mxu1 %vm5753_vm1, %v5752_v1  ;;  %v1104_v49 = vld [vmem:[%s5844_s13 + $0x4] sm:$0xc] }
  0x3b   : > { %5078 = vmatpush3.bf16.msra.mxu0 %v1019_v50  ;;  %5039 = vmatprep.mubr.msk.bf16.mxu0 %vm5753_vm1, %v5752_v1  ;;  %v957_v14 = vor.u32 %v956_v8, %v953_v6  ;;  %v993_v50 = vsel %vm949_vm5, %v983_v35, %v992_v45  ;;  %v4584_v54 = vcombine.low %v1104_v49, %v5966_v56  ;;  %v4609_v6 = vld [vmem:[%s7221_s3 + $0x20] sm:$0xf]  ;;  %v6102_v8 = vld [vmem:[%s5844_s13 + $0x18] sm:$0xff]  }
  0x3c   : > { %5121 = vmatprep.subr.bf16.mxu0 %v5752_v1  ;;  %v1571_v9 = vsel %vm508_vm0, %v4609_v6, 0  ;;  %v1401_v38 = vshrl.u32 %v6102_v8, 16 }
  0x3d   : > { %v966_v20 = vsel %vm949_vm5, %v957_v14, %v965_v15  ;;  %v1111_v60 = vrot.slane %v4584_v54, 2  ;;  %v6117_v14 = vld [vmem:[%s5844_s13 + $0x20] sm:$0xff]  }
  0x3e   : > { %v1403_v44 = vrot.slane %v1401_v38, 2 }
  0x41   : > { %5022 = vmatmul.mubr.msk.bf16.gmra.mrb[16].mxu1 %vm492_vm3, %v5867_v12  ;;  %v6002_v12 = vld [vmem:[%s5844_s13 + $0x14] sm:$0xff]  }
  0x42   : > { %5040 = vmatmul.mubr.msk.bf16.gmra.mrb[16].mxu0 %vm492_vm3, %v682_v52  ;;  %5025 = vmatprep.mubr.msk.bf16.mxu1 %vm5753_vm1, %v5752_v1  ;;  %v968_v16 = vshrl.u32 %v6002_v12, 16  ;;  %v971_v17 = vshll.u32 %v6002_v12, 16  ;;  %v834_v18 = vrot.slane %v6002_v12, 1  ;;  %v1000_v52 = vrot.slane %v998_v47, 2 }
  0x43   : > { %5043 = vmatprep.mubr.msk.bf16.mxu0 %vm5753_vm1, %v5752_v1  ;;  %v1114_v5 = vrot.slane %v6002_v12, 2  ;;  %v1267_v12 = vrot.slane %v6102_v8, 2 }
  0x44   : > { %v970_v21 = vrot.slane %v968_v16, 1  ;;  %v973_v22 = vrot.slane %v971_v17, 2  ;;  %v835_v24 = vsel %vm677_vm4, %v832_v4, %v834_v18  ;;  %v837_v33 = vsel %vm677_vm4, %v834_v18, %v836_v29 }
  0x45   : > { %v1269_v16 = vrot.slane %v6117_v14, 2  ;;  %v1118_v17 = vrot.slane %v6038_v34, 2  ;;  %v1273_v34 = vrot.slane %v5653_v28, 2 }
  0x46   : > { %v974_v26 = vor.u32 %v973_v22, %v970_v21  ;;  %v1271_v21 = vrot.slane %v6130_v19, 2  ;;  %v1120_v22 = vrot.slane %v6051_v42, 2 }
  0x47   : > { %v1270_v18 = vsel %vm1110_vm6, %v1267_v12, %v1269_v16 }
  0x48   : > { %v975_v30 = vsel %vm949_vm5, %v965_v15, %v974_v26  ;;  %v984_v39 = vsel %vm949_vm5, %v974_v26, %v983_v35  ;;  %v1395_v26 = vshll.u32 %v6084_v0, 16  ;;  %v1272_v27 = vsel %vm1110_vm6, %v1269_v16, %v1271_v21  ;;  %v1537_v35 = vld [vmem:[%s5844_s13 + $0x8] sm:$0x8] }
  0x49   : > { %5026 = vmatmul.mubr.msk.bf16.gmra.mrb[20].mxu1 %vm492_vm3, %v5860_v10  ;;  %v688_v10 = vsel %vm677_vm4, %v685_v57, %v687_v2  ;;  %v1223_v57 = vld [vmem:[%s5844_s13 + $0x8] sm:$0xc]  ;;  %v1113_v2 = vsel %vm1110_vm6, %v1111_v60, %v1112_v61  ;;  %v1121_v29 = vsel %vm1110_vm6, %v1118_v17, %v1120_v22  ;;  %v1274_v40 = vsel %vm1110_vm6, %v1271_v21, %v1273_v34 }
  0x4a   : > { %5044 = vmatmul.mubr.msk.bf16.gmra.mrb[20].mxu0 %vm492_vm3, %v684_v55  ;;  %5029 = vmatprep.mubr.msk.bf16.mxu1 %vm5753_vm1, %v5752_v1  ;;  %v1001_v55 = vor.u32 %v1000_v52, %v997_v51  ;;  %v4591_v63 = vcombine.low %v1223_v57, %v6073_v59  ;;  %v4610_v42 = vcombine.low %v1537_v35, %v6073_v59  ;;  %v1410_v51 = vshrl.u32 %v6117_v14, 16 }
  0x4b   : > { %5047 = vmatprep.mubr.msk.bf16.mxu0 %vm5753_vm1, %v5752_v1  ;;  %v1413_v52 = vshll.u32 %v6117_v14, 16  ;;  %v1547_v60 = vrot.slane %v6102_v8, 3 }
  0x4c   : > { %v1002_v56 = vsel %vm949_vm5, %v992_v45, %v1001_v55  ;;  %v1264_v58 = vrot.slane %v4591_v63, 2  ;;  %v1544_v47 = vrot.slane %v4610_v42, 3  ;;  %v1412_v57 = vrot.slane %v1410_v51, 2  ;;  %v5662_v51 = vld [vmem:[%s5932_s12 + $0x18] sm:$0xff]  }
  0x4d   : > { %v1415_v59 = vrot.slane %v1413_v52, 3 }
  0x51   : > { %5030 = vmatmul.mubr.msk.bf16.gmra.mrb[24].mxu1 %vm492_vm3, %v5863_v11  ;;  %v833_v11 = vsel %vm677_vm4, %v831_v3, %v832_v4  ;;  %v1265_v4 = vrot.slane %v6084_v0, 2 }
  0x52   : > { %5048 = vmatmul.mubr.msk.bf16.gmra.mrb[24].mxu0 %vm492_vm3, %v686_v62  ;;  %5057 = vmatprep.mubr.msk.bf16.mxu1 %vm5753_vm1, %v5752_v1  ;;  %v4602_v62 = vld [vmem:[%s7221_s3 + $0x1c] sm:$0xf] }
  0x53   : > { %5051 = vmatprep.mubr.msk.bf16.mxu0 %vm5753_vm1, %v5752_v1  ;;  %v1452_v3 = vsel %vm508_vm0, %v4602_v62, 0  ;;  %v1266_v7 = vsel %vm1110_vm6, %v1264_v58, %v1265_v4  ;;  %v1422_v62 = vshll.u32 %v6130_v19, 16  ;;  %v5655_v58 = vld [vmem:[%s5844_s13 + $0x30] ss:$0 sps:$4 sm:$0x77]  }
  0x54   : > { %v1428_v6 = vshrl.u32 %v5655_v58, 16 }
  0x59   : > { %5058 = vmatmul.mubr.msk.bf16.vlgmr.msra.gmra.mrb[28].mxu1 %vm492_vm3, %v833_v11  ;;  %v1116_v11 = vrot.slane %v6023_v25, 2  ;;  %v1392_v25 = vshrl.u32 %v6084_v0, 16 }
  0x5a   : > { %5052 = vmatmul.mubr.msk.bf16.gmra.mrb[28].mxu0 %vm492_vm3, %v688_v10  ;;  %5100 = vmatpush3.bf16.msra.mxu1 %v1138_v13  ;;  %v1115_v10 = vsel %vm1110_vm6, %v1112_v61, %v1114_v5  ;;  %v1268_v13 = vsel %vm1110_vm6, %v1265_v4, %v1267_v12  ;;  %v1416_v61 = vor.u32 %v1415_v59, %v1412_v57  ;;  %v1549_v4 = vrot.slane %v6117_v14, 3  ;;  %v6207_v14 = vld [vmem:[%s5932_s12 + $0x4] sm:$0xf] }
  0x5b   : > { %5079 = vmatprep.mubr.msk.bf16.mxu0 %vm5753_vm1, %v5752_v1  ;;  %5061 = vmatprep.mubr.msk.bf16.mxu1 %vm5753_vm1, %v5752_v1  ;;  %v1117_v15 = vsel %vm1110_vm6, %v1114_v5, %v1116_v11  ;;  %v1394_v32 = vrot.slane %v1392_v25, 2 }
  0x5c   : > { %5143 = vmatprep.subr.bf16.mxu1 %v5752_v1 }
  0x61   : > { %5062 = vmatmul.mubr.msk.bf16.gmra.mrb[32].mxu1 %vm492_vm3, %v835_v24  ;;  %v1387_v24 = vshll.u32 %v4591_v63, 16 }
  0x62   : > { %5080 = vmatmul.mubr.msk.bf16.vlgmr.msra.gmra.mrb[32].mxu0 %vm492_vm3, %v966_v20  ;;  %5065 = vmatprep.mubr.msk.bf16.mxu1 %vm5753_vm1, %v5752_v1  ;;  %v1119_v20 = vsel %vm1110_vm6, %v1116_v11, %v1118_v17  ;;  %v1551_v11 = vrot.slane %v6130_v19, 3 }
  0x63   : > { %5122 = vmatpush3.bf16.msra.mxu0 %v1291_v23  ;;  %5083 = vmatprep.mubr.msk.bf16.mxu0 %vm5753_vm1, %v5752_v1  ;;  %v1384_v23 = vshrl.u32 %v4591_v63, 16  ;;  %v1389_v31 = vrot.slane %v1387_v24, 3  ;;  %v1548_v63 = vsel %vm1543_vm8, %v1545_v48, %v1547_v60 }
  0x64   : > { %5165 = vmatprep.subr.bf16.mxu0 %v5752_v1  ;;  %v1552_v16 = vsel %vm1543_vm8, %v1549_v4, %v1551_v11 }
  0x69   : > { %5066 = vmatmul.mubr.msk.bf16.gmra.mrb[36].mxu1 %vm492_vm3, %v837_v33  ;;  %v1397_v33 = vrot.slane %v1395_v26, 3 }
  0x6a   : > { %5084 = vmatmul.mubr.msk.bf16.gmra.mrb[36].mxu0 %vm492_vm3, %v975_v30  ;;  %5069 = vmatprep.mubr.msk.bf16.mxu1 %vm5753_vm1, %v5752_v1  ;;  %v1386_v30 = vrot.slane %v1384_v23, 2  ;;  %v4639_v23 = vld [vmem:[%s7221_s3 + $0x2c] sm:$0xf] }
  0x6b   : > { %5087 = vmatprep.mubr.msk.bf16.mxu0 %vm5753_vm1, %v5752_v1  ;;  %v1398_v37 = vor.u32 %v1397_v33, %v1394_v32  ;;  %v2013_v28 = vsel %vm508_vm0, %v4639_v23, 0  ;;  %v4646_v32 = vld [vmem:[%s7221_s3 + $0x30] sm:$0xf] }
  0x6c   : > { %v1390_v36 = vor.u32 %v1389_v31, %v1386_v30  ;;  %v6234_v31 = vld [vmem:[%s5932_s12 + $0x10] sm:$0xff]  }
  0x6d   : > { %v1851_v35 = vshll.u32 %v6234_v31, 16  ;;  %v1855_v42 = vshrl.u32 %v6234_v31, 16 }
  0x71   : > { %5070 = vmatmul.mubr.msk.bf16.gmra.mrb[40].mxu1 %vm492_vm3, %v839_v43  ;;  %v1399_v43 = vsel %vm1382_vm7, %v1390_v36, %v1398_v37  ;;  %v5657_v36 = vld [vmem:[%s5932_s12 + $0x8] sm:$0xff]  }
  0x72   : > { %5088 = vmatmul.mubr.msk.bf16.gmra.mrb[40].mxu0 %vm492_vm3, %v984_v39  ;;  %5073 = vmatprep.mubr.msk.bf16.mxu1 %vm5753_vm1, %v5752_v1  ;;  %v1404_v39 = vshll.u32 %v6102_v8, 16  ;;  %v1550_v8 = vsel %vm1543_vm8, %v1547_v60, %v1549_v4 }
  0x73   : > { %5091 = vmatprep.mubr.msk.bf16.mxu0 %vm5753_vm1, %v5752_v1 }
  0x74   : > { %v1406_v45 = vrot.slane %v1404_v39, 3  ;;  %v1853_v39 = vrot.slane %v1851_v35, 1 }
  0x76   : > { %v1407_v49 = vor.u32 %v1406_v45, %v1403_v44  ;;  %v5660_v44 = vld [vmem:[%s5932_s12 + $0x10] sm:$0xff]   ;;  %v1857_v45 = vor.u32 %v1855_v42, %v1853_v39  ;;  %v6351_v42 = vld [vmem:[%s5932_s12 + $0x1c] sm:$0xff]  }
  0x78   : > { %v1408_v55 = vsel %vm1382_vm7, %v1398_v37, %v1407_v49  ;;  %v1417_v0 = vsel %vm1382_vm7, %v1407_v49, %v1416_v61  ;;  %v2166_v37 = vsel %vm508_vm0, %v4646_v32, 0 }
  0x79   : > { %5074 = vmatmul.mubr.msk.bf16.gmra.mrb[44].mxu1 %vm492_vm3, %v841_v53  ;;  %v1546_v53 = vsel %vm1543_vm8, %v1544_v47, %v1545_v48  ;;  %v6266_v47 = vld [vmem:[%s5932_s12 + $0x20] sm:$0xff]  }
  0x7a   : > { %5092 = vmatmul.mubr.msk.bf16.gmra.mrb[44].mxu0 %vm492_vm3, %v993_v50  ;;  %5101 = vmatprep.mubr.msk.bf16.mxu1 %vm5753_vm1, %v5752_v1  ;;  %v4627_v50 = vld [vmem:[%s7221_s3 + $0x28] sm:$0xf]  ;;  %v1871_v59 = vshrl.u32 %v6266_v47, 16 }
  0x7b   : > { %5095 = vmatprep.mubr.msk.bf16.mxu0 %vm5753_vm1, %v5752_v1  ;;  %v1895_v54 = vsel %vm508_vm0, %v4627_v50, 0  ;;  %v1867_v50 = vshll.u32 %v6266_v47, 16 }
  0x81   : > { %5102 = vmatmul.mubr.msk.bf16.vlgmr.msra.gmra.mrb[48].mxu1 %vm492_vm3, %v1113_v2 }
  0x82   : > { %5096 = vmatmul.mubr.msk.bf16.gmra.mrb[48].mxu0 %vm492_vm3, %v1002_v56  ;;  %5144 = vmatpush3.bf16.msra.mxu1 %v1452_v3  ;;  %v1419_v56 = vshrl.u32 %v6130_v19, 16  ;;  %v1424_v3 = vrot.slane %v1422_v62, 3  ;;  %v1553_v19 = vrot.slane %v5655_v58, 3 }
  0x83   : > { %5123 = vmatprep.mubr.msk.bf16.mxu0 %vm5753_vm1, %v5752_v1  ;;  %5105 = vmatprep.mubr.msk.bf16.mxu1 %vm5753_vm1, %v5752_v1 }
  0x84   : > { %5187 = vmatprep.subr.bf16.mxu1 %v5752_v1  ;;  %v1421_v2 = vrot.slane %v1419_v56, 2  ;;  %v1554_v22 = vsel %vm1543_vm8, %v1551_v11, %v1553_v19 }
  0x86   : > { %v1425_v5 = vor.u32 %v1424_v3, %v1421_v2  ;;  %v6296_v2 = vld [vmem:[%s5932_s12 + $0x8] sm:$0xf] }
  0x89   : > { %5106 = vmatmul.mubr.msk.bf16.gmra.mrb[52].mxu1 %vm492_vm3, %v1115_v10  ;;  %v1430_v10 = vrot.slane %v1428_v6, 2 }
  0x8a   : > { %5124 = vmatmul.mubr.msk.bf16.vlgmr.msra.gmra.mrb[52].mxu0 %vm492_vm3, %v1266_v7  ;;  %5109 = vmatprep.mubr.msk.bf16.mxu1 %vm5753_vm1, %v5752_v1  ;;  %v1431_v7 = vshll.u32 %v5655_v58, 16 }
  0x8b   : > { %5166 = vmatpush3.bf16.msra.mxu0 %v1571_v9  ;;  %5127 = vmatprep.mubr.msk.bf16.mxu0 %vm5753_vm1, %v5752_v1  ;;  %v1426_v9 = vsel %vm1382_vm7, %v1416_v61, %v1425_v5  ;;  %v5664_v61 = vld [vmem:[%s5932_s12 + $0x20] sm:$0xff]  }
  0x8c   : > { %5209 = vmatprep.subr.bf16.mxu0 %v5752_v1  ;;  %v1433_v12 = vrot.slane %v1431_v7, 3 }
  0x91   : > { %5110 = vmatmul.mubr.msk.bf16.gmra.mrb[56].mxu1 %vm492_vm3, %v1117_v15  ;;  %v1434_v15 = vor.u32 %v1433_v12, %v1430_v10  ;;  %v6311_v12 = vld [vmem:[%s5932_s12 + $0xc] sm:$0xff]  }
  0x92   : > { %5128 = vmatmul.mubr.msk.bf16.gmra.mrb[56].mxu0 %vm492_vm3, %v1268_v13  ;;  %5113 = vmatprep.mubr.msk.bf16.mxu1 %vm5753_vm1, %v5752_v1  ;;  %v1794_v13 = vld [vmem:[%s5932_s12] sm:$0xf]  ;;  %v2140_v19 = vrot.slane %v6311_v12, 1 }
  0x93   : > { %5131 = vmatprep.mubr.msk.bf16.mxu0 %vm5753_vm1, %v5752_v1  ;;  %v4628_v17 = vcombine.low %v1794_v13, %v6207_v14 }
  0x95   : > { %v1838_v21 = vshll.u32 %v4628_v17, 16  ;;  %v1836_v24 = vshrl.u32 %v4628_v17, 16 }
  0x97   : > { %v1840_v25 = vrot.slane %v1838_v21, 1  ;;  %v1989_v21 = vrot.slane %v6234_v31, 1 }
  0x99   : > { %5114 = vmatmul.mubr.msk.bf16.gmra.mrb[60].mxu1 %vm492_vm3, %v1119_v20  ;;  %v6218_v20 = vld [vmem:[%s5932_s12 + $0x8] sm:$0xff]  }
  0x9a   : > { %5132 = vmatmul.mubr.msk.bf16.gmra.mrb[60].mxu0 %vm492_vm3, %v1270_v18  ;;  %5117 = vmatprep.mubr.msk.bf16.mxu1 %vm5753_vm1, %v5752_v1  ;;  %v1435_v18 = vsel %vm1382_vm7, %v1425_v5, %v1434_v15  ;;  %v1843_v26 = vshll.u32 %v6218_v20, 16  ;;  %v1847_v34 = vshrl.u32 %v6218_v20, 16  ;;  %v1987_v4 = vrot.slane %v6218_v20, 1 }
  0x9b   : > { %5135 = vmatprep.mubr.msk.bf16.mxu0 %vm5753_vm1, %v5752_v1 }
  0x9c   : > { %v1845_v30 = vrot.slane %v1843_v26, 1  ;;  %v1990_v31 = vsel %vm677_vm4, %v1987_v4, %v1989_v21 }
  0x9e   : > { %v1849_v38 = vor.u32 %v1847_v34, %v1845_v30 }
  0xa0   : > { %v1854_v41 = vsel %vm447_vm2, %v1849_v38, %v1853_v39 }
  0xa1   : > { %5118 = vmatmul.mubr.msk.bf16.gmra.mrb[64].mxu1 %vm492_vm3, %v1121_v29  ;;  %v1841_v29 = vor.u32 %v1840_v25, %v1836_v24 }
  0xa2   : > { %5136 = vmatmul.mubr.msk.bf16.gmra.mrb[64].mxu0 %vm492_vm3, %v1272_v27  ;;  %5145 = vmatprep.mubr.msk.bf16.mxu1 %vm5753_vm1, %v5752_v1  ;;  %v5656_v27 = vld [vmem:[%s5932_s12] sm:$0xff]  }
  0xa3   : > { %5139 = vmatprep.mubr.msk.bf16.mxu0 %vm5753_vm1, %v5752_v1  ;;  %v1846_v33 = vsel %vm447_vm2, %v1841_v29, %v1845_v30 }
  0xa9   : > { %5146 = vmatmul.mubr.msk.bf16.vlgmr.msra.gmra.mrb[68].mxu1 %vm492_vm3, %v1399_v43 }
  0xaa   : > { %5140 = vmatmul.mubr.msk.bf16.gmra.mrb[68].mxu0 %vm492_vm3, %v1274_v40  ;;  %5188 = vmatpush3.bf16.msra.mxu1 %v1709_v46  ;;  %v6252_v40 = vld [vmem:[%s5932_s12 + $0x18] sm:$0xff]  }
  0xab   : > { %5167 = vmatprep.mubr.msk.bf16.mxu0 %vm5753_vm1, %v5752_v1  ;;  %5149 = vmatprep.mubr.msk.bf16.mxu1 %vm5753_vm1, %v5752_v1  ;;  %v1859_v43 = vshll.u32 %v6252_v40, 16  ;;  %v1863_v49 = vshrl.u32 %v6252_v40, 16 }
  0xac   : > { %5231 = vmatprep.subr.bf16.mxu1 %v5752_v1 }
  0xad   : > { %v1861_v46 = vrot.slane %v1859_v43, 1 }
  0xaf   : > { %v1862_v48 = vsel %vm447_vm2, %v1857_v45, %v1861_v46  ;;  %v1865_v52 = vor.u32 %v1863_v49, %v1861_v46 }
  0xb1   : > { %5150 = vmatmul.mubr.msk.bf16.gmra.mrb[72].mxu1 %vm492_vm3, %v1408_v55  ;;  %v1980_v55 = vld [vmem:[%s5932_s12] sm:$0xe] }
  0xb2   : > { %5168 = vmatmul.mubr.msk.bf16.vlgmr.msra.gmra.mrb[72].mxu0 %vm492_vm3, %v1546_v53  ;;  %5153 = vmatprep.mubr.msk.bf16.mxu1 %vm5753_vm1, %v5752_v1  ;;  %v1869_v53 = vrot.slane %v1867_v50, 1  ;;  %v4640_v56 = vcombine.low %v1980_v55, %v6207_v14 }
  0xb3   : > { %5210 = vmatpush3.bf16.msra.mxu0 %v1895_v54  ;;  %5171 = vmatprep.mubr.msk.bf16.mxu0 %vm5753_vm1, %v5752_v1  ;;  %v6279_v54 = vld [vmem:[%s5932_s12 + $0x28] ss:$0 sps:$4 sm:$0x11]  }
  0xb4   : > { %5253 = vmatprep.subr.bf16.mxu0 %v5752_v1  ;;  %v1870_v57 = vsel %vm447_vm2, %v1865_v52, %v1869_v53  ;;  %v1875_v60 = vshll.u32 %v6279_v54, 16  ;;  %v1873_v62 = vor.u32 %v1871_v59, %v1869_v53  ;;  %v1986_v58 = vrot.slane %v4640_v56, 1 }
  0xb5   : > { %v1993_v52 = vrot.slane %v6266_v47, 1 }
  0xb6   : > { %v1988_v15 = vsel %vm677_vm4, %v1986_v58, %v1987_v4 }
  0xb9   : > { %5154 = vmatmul.mubr.msk.bf16.gmra.mrb[76].mxu1 %vm492_vm3, %v1417_v0  ;;  %v2098_v0 = vld [vmem:[%s5932_s12 + $0x4] sm:$0xe] }
  0xba   : > { %5172 = vmatmul.mubr.msk.bf16.gmra.mrb[76].mxu0 %vm492_vm3, %v1548_v63  ;;  %5157 = vmatprep.mubr.msk.bf16.mxu1 %vm5753_vm1, %v5752_v1  ;;  %v1877_v63 = vrot.slane %v1875_v60, 1  ;;  %v6308_v10 = vcombine.low %v2098_v0, %v6296_v2 }
  0xbb   : > { %5175 = vmatprep.mubr.msk.bf16.mxu0 %vm5753_vm1, %v5752_v1 }
  0xc1   : > { %5158 = vmatmul.mubr.msk.bf16.gmra.mrb[80].mxu1 %vm492_vm3, %v1426_v9  ;;  %v4658_v9 = vld [vmem:[%s7221_s3 + $0x34] sm:$0xf] }
  0xc2   : > { %5176 = vmatmul.mubr.msk.bf16.gmra.mrb[80].mxu0 %vm492_vm3, %v1550_v8  ;;  %5161 = vmatprep.mubr.msk.bf16.mxu1 %vm5753_vm1, %v5752_v1  ;;  %v1878_v8 = vsel %vm447_vm2, %v1873_v62, %v1877_v63  ;;  %v2326_v17 = vsel %vm508_vm0, %v4658_v9, 0  ;;  %v2258_v9 = vshrl.u32 %v6308_v10, 16 }
  0xc3   : > { %5179 = vmatprep.mubr.msk.bf16.mxu0 %vm5753_vm1, %v5752_v1 }
  0xc9   : > { %5162 = vmatmul.mubr.msk.bf16.gmra.mrb[84].mxu1 %vm492_vm3, %v1435_v18  ;;  %v2139_v18 = vrot.slane %v6308_v10, 1 }
  0xca   : > { %5180 = vmatmul.mubr.msk.bf16.gmra.mrb[84].mxu0 %vm492_vm3, %v1552_v16  ;;  %5189 = vmatprep.mubr.msk.bf16.mxu1 %vm5753_vm1, %v5752_v1 }
  0xcb   : > { %5183 = vmatprep.mubr.msk.bf16.mxu0 %vm5753_vm1, %v5752_v1  ;;  %v2141_v26 = vsel %vm677_vm4, %v2139_v18, %v2140_v19 }
  0xd1   : > { %5190 = vmatmul.mubr.msk.bf16.vlgmr.msra.gmra.mrb[88].mxu1 %vm492_vm3, %v5656_v27  ;;  %v6334_v27 = vld [vmem:[%s5932_s12 + $0x14] sm:$0xff]  }
  0xd2   : > { %5184 = vmatmul.mubr.msk.bf16.gmra.mrb[88].mxu0 %vm492_vm3, %v1554_v22  ;;  %5232 = vmatpush3.bf16.msra.mxu1 %v2013_v28  ;;  %v4665_v22 = vld [vmem:[%s7221_s3 + $0x38] sm:$0xf]  ;;  %v2142_v34 = vrot.slane %v6334_v27, 1 }
  0xd3   : > { %5211 = vmatprep.mubr.msk.bf16.mxu0 %vm5753_vm1, %v5752_v1  ;;  %5193 = vmatprep.mubr.msk.bf16.mxu1 %vm5753_vm1, %v5752_v1  ;;  %v2444_v30 = vsel %vm508_vm0, %v4665_v22, 0 }
  0xd4   : > { %5275 = vmatprep.subr.bf16.mxu1 %v5752_v1 }
  0xd9   : > { %5194 = vmatmul.mubr.msk.bf16.gmra.mrb[92].mxu1 %vm492_vm3, %v5657_v36  ;;  %v1991_v36 = vrot.slane %v6252_v40, 1  ;;  %v2144_v40 = vrot.slane %v6351_v42, 1 }
  0xda   : > { %5212 = vmatmul.mubr.msk.bf16.vlgmr.msra.gmra.mrb[92].mxu0 %vm492_vm3, %v1846_v33  ;;  %5197 = vmatprep.mubr.msk.bf16.mxu1 %vm5753_vm1, %v5752_v1 }
  0xdb   : > { %5254 = vmatpush3.bf16.msra.mxu0 %v2166_v37  ;;  %5215 = vmatprep.mubr.msk.bf16.mxu0 %vm5753_vm1, %v5752_v1  ;;  %v2145_v60 = vsel %vm677_vm4, %v2142_v34, %v2144_v40  ;;  %v1994_v58 = vsel %vm677_vm4, %v1991_v36, %v1993_v52 }
  0xdc   : > { %5297 = vmatprep.subr.bf16.mxu0 %v5752_v1 }
  0xe1   : > { %5198 = vmatmul.mubr.msk.bf16.gmra.mrb[96].mxu1 %vm492_vm3, %v5660_v44 }
  0xe2   : > { %5216 = vmatmul.mubr.msk.bf16.gmra.mrb[96].mxu0 %vm492_vm3, %v1854_v41  ;;  %5201 = vmatprep.mubr.msk.bf16.mxu1 %vm5753_vm1, %v5752_v1  ;;  %v2143_v41 = vsel %vm677_vm4, %v2140_v19, %v2142_v34 }
  0xe3   : > { %5219 = vmatprep.mubr.msk.bf16.mxu0 %vm5753_vm1, %v5752_v1 }
  0xe9   : > { %5202 = vmatmul.mubr.msk.bf16.gmra.mrb[100].mxu1 %vm492_vm3, %v5662_v51 }
  0xea   : > { %5220 = vmatmul.mubr.msk.bf16.gmra.mrb[100].mxu0 %vm492_vm3, %v1862_v48  ;;  %5205 = vmatprep.mubr.msk.bf16.mxu1 %vm5753_vm1, %v5752_v1  ;;  %v1992_v48 = vsel %vm677_vm4, %v1989_v21, %v1991_v36  ;;  %v2411_v36 = vld [vmem:[%s5932_s12 + $0x4] sm:$0xc] }
  0xeb   : > { %5223 = vmatprep.mubr.msk.bf16.mxu0 %vm5753_vm1, %v5752_v1 }
  0xf1   : > { %5206 = vmatmul.mubr.msk.bf16.gmra.mrb[104].mxu1 %vm492_vm3, %v5664_v61  ;;  %v6366_v61 = vld [vmem:[%s5932_s12 + $0x24] sm:$0xff]  }
  0xf2   : > { %5224 = vmatmul.mubr.msk.bf16.gmra.mrb[104].mxu0 %vm492_vm3, %v1870_v57  ;;  %5233 = vmatprep.mubr.msk.bf16.mxu1 %vm5753_vm1, %v5752_v1 }
  0xf3   : > { %5227 = vmatprep.mubr.msk.bf16.mxu0 %vm5753_vm1, %v5752_v1 }
  0xf4   : > { %v6301_v7 = vpop.f32.mrb[0].mxu1 }
  0xf5   : > { %v546_v3 = vpop.f32.mrb[0].mxu0  ;;  %v5005_v13 = vpop.f32.mrb[1].mxu1 }
  0xf6   : > { %v4993_v5 = vpop.f32.mrb[1].mxu0  ;;  %v6313_v14 = vpop.f32.mrb[2].mxu1  ;;  %v2266_v13 = vshrl.u32 %v6311_v12, 16 }
  0xf7   : > { %v549_v6 = vpop.f32.mrb[2].mxu0  ;;  %v5006_v16 = vpop.f32.mrb[3].mxu1  ;;  %v2146_v5 = vrot.slane %v6366_v61, 1 }
  0xf8   : > { %v4994_v11 = vpop.f32.mrb[3].mxu0 }
  0xf9   : > { %5234 = vmatmul.mubr.msk.bf16.vlgmr.msra.gmra.mrb[108].mxu1 %vm492_vm3, %v1988_v15  ;;  %v2261_v11 = vshll.u32 %v6308_v10, 16  ;;  %v2269_v15 = vshll.u32 %v6311_v12, 16 }
  0xfa   : > { %5228 = vmatmul.mubr.msk.bf16.gmra.mrb[108].mxu0 %vm492_vm3, %v1878_v8  ;;  %5276 = vmatpush3.bf16.msra.mxu1 %v2326_v17 }
  0xfb   : > { %5255 = vmatprep.mubr.msk.bf16.mxu0 %vm5753_vm1, %v5752_v1  ;;  %5237 = vmatprep.mubr.msk.bf16.mxu1 %vm5753_vm1, %v5752_v1 }
  0xfc   : > { %5319 = vmatprep.subr.bf16.mxu1 %v5752_v1  ;;  %v6330_v25 = vpop.f32.mrb[4].mxu1 }
  0xfd   : > { %v554_v20 = vpop.f32.mrb[4].mxu0  ;;  %v5009_v29 = vpop.f32.mrb[5].mxu1 }
  0xfe   : > { %v4997_v23 = vpop.f32.mrb[5].mxu0  ;;  %v6337_v32 = vpop.f32.mrb[6].mxu1  ;;  %v2263_v29 = vrot.slane %v2261_v11, 2 }
  0xff   : > { %v557_v24 = vpop.f32.mrb[6].mxu0  ;;  %v5010_v33 = vpop.f32.mrb[7].mxu1 }
 0x100   : > { %v4998_v28 = vpop.f32.mrb[7].mxu0 }
 0x101   : > { %5238 = vmatmul.mubr.msk.bf16.gmra.mrb[112].mxu1 %vm492_vm3, %v1990_v31  ;;  %v2260_v28 = vrot.slane %v2258_v9, 1  ;;  %v2271_v31 = vrot.slane %v2269_v15, 2 }
 0x102   : > { %5256 = vmatmul.mubr.msk.bf16.vlgmr.msra.gmra.mrb[112].mxu0 %vm492_vm3, %v2141_v26  ;;  %5241 = vmatprep.mubr.msk.bf16.mxu1 %vm5753_vm1, %v5752_v1 }
 0x103   : > { %5298 = vmatpush3.bf16.msra.mxu0 %v2444_v30  ;;  %5259 = vmatprep.mubr.msk.bf16.mxu0 %vm5753_vm1, %v5752_v1  ;;  %v2268_v30 = vrot.slane %v2266_v13, 1 }
 0x104   : > { %5341 = vmatprep.subr.bf16.mxu0 %v5752_v1  ;;  %v632_v38 = vpop.f32.mrb[8].mxu1 }
 0x105   : > { %v562_v35 = vpop.f32.mrb[8].mxu0  ;;  %v633_v43 = vadd.f32 %v632_v38, %v546_v3  ;;  %v5015_v44 = vpop.f32.mrb[9].mxu1  ;;  %v2264_v38 = vor.u32 %v2263_v29, %v2260_v28 }
 0x106   : > { %v5001_v37 = vpop.f32.mrb[9].mxu0  ;;  %v635_v46 = vpop.f32.mrb[10].mxu1 }
 0x107   : > { %v565_v39 = vpop.f32.mrb[10].mxu0  ;;  %v636_v49 = vadd.f32 %v635_v46, %v549_v6  ;;  %v5016_v50 = vpop.f32.mrb[11].mxu1  ;;  %v1995_v6 = vrot.slane %v6279_v54, 1  ;;  %v5673_v54 = vld [vmem:[%s5932_s12 + $0x2c] ss:$0 sps:$4 sm:$0x11]  }
 0x108   : > { %v5002_v45 = vpop.f32.mrb[11].mxu0  ;;  %v4672_v50 = vld [vmem:[%s7221_s3 + $0x3c] sm:$0xf] }
 0x109   : > { %5242 = vmatmul.mubr.msk.bf16.gmra.mrb[116].mxu1 %vm492_vm3, %v1992_v48  ;;  %v1996_v10 = vsel %vm677_vm4, %v1993_v52, %v1995_v6  ;;  %v2287_v6 = vshll.u32 %v6351_v42, 16 }
 0x10a   : > { %5260 = vmatmul.mubr.msk.bf16.gmra.mrb[116].mxu0 %vm492_vm3, %v2143_v41  ;;  %5245 = vmatprep.mubr.msk.bf16.mxu1 %vm5753_vm1, %v5752_v1  ;;  %v2272_v41 = vor.u32 %v2271_v31, %v2268_v30  ;;  %v2296_v30 = vshll.u32 %v6366_v61, 16 }
 0x10b   : > { %5263 = vmatprep.mubr.msk.bf16.mxu0 %vm5753_vm1, %v5752_v1 }
 0x10c   : > { %v640_v57 = vpop.f32.mrb[12].mxu1 }
 0x10d   : > { %v741_v51 = vpop.f32.mrb[12].mxu0  ;;  %v641_v56 = vadd.f32 %v640_v57, %v554_v20  ;;  %v5019_v62 = vpop.f32.mrb[13].mxu1  ;;  %v2147_v20 = vsel %vm677_vm4, %v2144_v40, %v2146_v5  ;;  %v4666_v40 = vcombine.low %v2411_v36, %v6296_v2 }
 0x10e   : > { %v5037_v53 = vpop.f32.mrb[13].mxu0  ;;  %v6362_v55 = vadd.f32 %v741_v51, %v633_v43  ;;  %v643_v3 = vpop.f32.mrb[14].mxu1  ;;  %v2275_v43 = vshrl.u32 %v6334_v27, 16 }
 0x10f   : > { %v744_v59 = vpop.f32.mrb[14].mxu0  ;;  %v644_v4 = vadd.f32 %v643_v3, %v557_v24  ;;  %v5020_v47 = vpop.f32.mrb[15].mxu1  ;;  %v2417_v2 = vrot.slane %v4666_v40, 2 }
 0x110   : > { %v5038_v63 = vpop.f32.mrb[15].mxu0  ;;  %v6368_v0 = vadd.f32 %v744_v59, %v636_v49 }
 0x111   : > { %5246 = vmatmul.mubr.msk.bf16.gmra.mrb[120].mxu1 %vm492_vm3, %v1994_v58  ;;  %v2597_v58 = vsel %vm508_vm0, %v4672_v50, 0 }
 0x112   : > { %5264 = vmatmul.mubr.msk.bf16.gmra.mrb[120].mxu0 %vm492_vm3, %v2145_v60  ;;  %5249 = vmatprep.mubr.msk.bf16.mxu1 %vm5753_vm1, %v5752_v1  ;;  %v2273_v60 = vsel %vm949_vm5, %v2264_v38, %v2272_v41 }
 0x113   : > { %5267 = vmatprep.mubr.msk.bf16.mxu0 %vm5753_vm1, %v5752_v1 }
 0x114   : > { %v648_v18 = vpop.f32.mrb[16].mxu1 }
 0x115   : > { %v749_v8 = vpop.f32.mrb[16].mxu0  ;;  %v649_v21 = vadd.f32 %v648_v18, %v562_v35  ;;  %v5023_v22 = vpop.f32.mrb[17].mxu1  ;;  %v2148_v35 = vrot.slane %v5673_v54, 1 }
 0x116   : > { %v6383_v16 = vadd.f32 %v749_v8, %v641_v56  ;;  %v5041_v17 = vpop.f32.mrb[17].mxu0  ;;  %v651_v26 = vpop.f32.mrb[18].mxu1  ;;  %v2277_v56 = vrot.slane %v2275_v43, 1 }
 0x117   : > { %v752_v19 = vpop.f32.mrb[18].mxu0  ;;  %v652_v33 = vadd.f32 %v651_v26, %v565_v39  ;;  %v5024_v34 = vpop.f32.mrb[19].mxu1  ;;  %v2278_v39 = vshll.u32 %v6334_v27, 16  ;;  %v2149_v49 = vsel %vm677_vm4, %v2146_v5, %v2148_v35  ;;  %v2284_v5 = vshrl.u32 %v6351_v42, 16 }
 0x118   : > { %v6387_v23 = vadd.f32 %v752_v19, %v644_v4  ;;  %v5042_v24 = vpop.f32.mrb[19].mxu0 }
 0x119   : > { %5250 = vmatmul.mubr.msk.bf16.gmra.mrb[124].mxu1 %vm492_vm3, %v1996_v10  ;;  %v2280_v62 = vrot.slane %v2278_v39, 2  ;;  %v2286_v22 = vrot.slane %v2284_v5, 1  ;;  %v2289_v24 = vrot.slane %v2287_v6, 2 }
 0x11a   : > { %5268 = vmatmul.mubr.msk.bf16.gmra.mrb[124].mxu0 %vm492_vm3, %v2147_v20  ;;  %5277 = vmatprep.mubr.msk.bf16.mxu1 %vm5753_vm1, %v5752_v1 }
 0x11b   : > { %5271 = vmatprep.mubr.msk.bf16.mxu0 %vm5753_vm1, %v5752_v1  ;;  %v2281_v47 = vor.u32 %v2280_v62, %v2277_v56  ;;  %v2290_v29 = vor.u32 %v2289_v24, %v2286_v22 }
 0x11c   : > { %v656_v46 = vpop.f32.mrb[20].mxu1 }
 0x11d   : > { %v757_v37 = vpop.f32.mrb[20].mxu0  ;;  %v657_v51 = vadd.f32 %v656_v46, %v6301_v7  ;;  %v5027_v52 = vpop.f32.mrb[21].mxu1  ;;  %v2418_v7 = vrot.slane %v6311_v12, 2  ;;  %v2291_v39 = vsel %vm949_vm5, %v2281_v47, %v2290_v29  ;;  %v2298_v46 = vrot.slane %v2296_v30, 2 }
 0x11e   : > { %v6399_v44 = vadd.f32 %v757_v37, %v649_v21  ;;  %v5045_v45 = vpop.f32.mrb[21].mxu0  ;;  %v659_v59 = vpop.f32.mrb[22].mxu1  ;;  %v2282_v21 = vsel %vm949_vm5, %v2272_v41, %v2281_v47 }
 0x11f   : > { %v760_v48 = vpop.f32.mrb[22].mxu0  ;;  %v660_v63 = vadd.f32 %v659_v59, %v6313_v14  ;;  %v5028_v3 = vpop.f32.mrb[23].mxu1  ;;  %v4684_v14 = vld [vmem:[%s7221_s3 + $0x40] sm:$0xf]  ;;  %v2419_v13 = vsel %vm1110_vm6, %v2417_v2, %v2418_v7 }
 0x120   : > { %v6407_v53 = vadd.f32 %v760_v48, %v652_v33  ;;  %v5046_v57 = vpop.f32.mrb[23].mxu0  ;;  %v2757_v20 = vsel %vm508_vm0, %v4684_v14, 0  ;;  %v6452_v48 = vld [vmem:[%s5932_s12 + $0x2c] ss:$0 sps:$4 sm:$0x33]  }
 0x121   : > { %5278 = vmatmul.mubr.msk.bf16.vlgmr.msra.gmra.mrb[128].mxu1 %vm492_vm3, %v2273_v60  ;;  %v2302_v52 = vshrl.u32 %v6452_v48, 16  ;;  %v2305_v57 = vshll.u32 %v6452_v48, 16 }
 0x122   : > { %5272 = vmatmul.mubr.msk.bf16.gmra.mrb[128].mxu0 %vm492_vm3, %v2149_v49  ;;  %5320 = vmatpush3.bf16.msra.mxu1 %v2597_v58 }
 0x123   : > { %5299 = vmatprep.mubr.msk.bf16.mxu0 %vm5753_vm1, %v5752_v1  ;;  %5281 = vmatprep.mubr.msk.bf16.mxu1 %vm5753_vm1, %v5752_v1  ;;  %v2307_v47 = vrot.slane %v2305_v57, 2 }
 0x124   : > { %5363 = vmatprep.subr.bf16.mxu1 %v5752_v1  ;;  %v664_v12 = vpop.f32.mrb[24].mxu1 }
 0x125   : > { %v765_v4 = vpop.f32.mrb[24].mxu0  ;;  %v665_v15 = vadd.f32 %v664_v12, %v6330_v25  ;;  %v5031_v17 = vpop.f32.mrb[25].mxu1  ;;  %v2420_v25 = vrot.slane %v6334_v27, 2  ;;  %v2529_v12 = vld [vmem:[%s5932_s12 + $0x8] sm:$0xc] }
 0x126   : > { %v6424_v8 = vadd.f32 %v765_v4, %v657_v51  ;;  %v5049_v9 = vpop.f32.mrb[25].mxu0  ;;  %v667_v54 = vpop.f32.mrb[26].mxu1  ;;  %v2304_v4 = vrot.slane %v2302_v52, 1 }
 0x127   : > { %v768_v11 = vpop.f32.mrb[26].mxu0  ;;  %v668_v10 = vadd.f32 %v667_v54, %v6337_v32  ;;  %v5032_v26 = vpop.f32.mrb[27].mxu1  ;;  %v2293_v32 = vshrl.u32 %v6366_v61, 16  ;;  %v2421_v27 = vsel %vm1110_vm6, %v2418_v7, %v2420_v25 }
 0x128   : > { %v6429_v18 = vadd.f32 %v768_v11, %v660_v63  ;;  %v5050_v19 = vpop.f32.mrb[27].mxu0  ;;  %v2308_v9 = vor.u32 %v2307_v47, %v2304_v4  ;;  %v6481_v11 = vld [vmem:[%s5932_s12 + $0xc] sm:$0xf]  ;;  %v6492_v26 = vld [vmem:[%s5932_s12 + $0x10] sm:$0xff]  }
 0x129   : > { %5282 = vmatmul.mubr.msk.bf16.gmra.mrb[132].mxu1 %vm492_vm3, %v2282_v21  ;;  %v2295_v45 = vrot.slane %v2293_v32, 1  ;;  %v4673_v22 = vcombine.low %v2529_v12, %v6481_v11  ;;  %v2697_v30 = vshrl.u32 %v6492_v26, 16 }
 0x12a   : > { %5300 = vmatmul.mubr.msk.bf16.vlgmr.msra.gmra.mrb[132].mxu0 %vm492_vm3, %v2419_v13  ;;  %5285 = vmatprep.mubr.msk.bf16.mxu1 %vm5753_vm1, %v5752_v1 }
 0x12b   : > { %5342 = vmatpush3.bf16.msra.mxu0 %v2757_v20  ;;  %5303 = vmatprep.mubr.msk.bf16.mxu0 %vm5753_vm1, %v5752_v1  ;;  %v2299_v51 = vor.u32 %v2298_v46, %v2295_v45  ;;  %v2692_v32 = vshll.u32 %v4673_v22, 16  ;;  %v4691_v46 = vld [vmem:[%s7221_s3 + $0x44] sm:$0xf] }
 0x12c   : > { %5385 = vmatprep.subr.bf16.mxu0 %v5752_v1  ;;  %v894_v34 = vpop.f32.mrb[28].mxu1 }
 0x12d   : > { %v773_v28 = vpop.f32.mrb[28].mxu0  ;;  %v933_v36 = vadd.f32 %v894_v34, %v6362_v55  ;;  %v5059_v37 = vpop.f32.mrb[29].mxu1  ;;  %v2422_v55 = vrot.slane %v6351_v42, 2  ;;  %v2300_v7 = vsel %vm949_vm5, %v2290_v29, %v2299_v51  ;;  %v2689_v29 = vshrl.u32 %v4673_v22, 16 }
 0x12e   : > { %v6444_v31 = vadd.f32 %v773_v28, %v665_v15  ;;  %v5053_v33 = vpop.f32.mrb[29].mxu0  ;;  %v897_v43 = vpop.f32.mrb[30].mxu1 }
 0x12f   : > { %v776_v35 = vpop.f32.mrb[30].mxu0  ;;  %v934_v49 = vadd.f32 %v897_v43, %v6368_v0  ;;  %v5060_v50 = vpop.f32.mrb[31].mxu1  ;;  %v2423_v62 = vsel %vm1110_vm6, %v2420_v25, %v2422_v55  ;;  %v2700_v33 = vshll.u32 %v6492_v26, 16  ;;  %v2691_v37 = vrot.slane %v2689_v29, 2 }
 0x130   : > { %v6448_v38 = vadd.f32 %v776_v35, %v668_v10  ;;  %v5054_v41 = vpop.f32.mrb[31].mxu0  ;;  %v2309_v10 = vsel %vm949_vm5, %v2299_v51, %v2308_v9  ;;  %v2571_v35 = vrot.slane %v6492_v26, 2 }
 0x131   : > { %5286 = vmatmul.mubr.msk.bf16.gmra.mrb[136].mxu1 %vm492_vm3, %v2291_v39  ;;  %v2694_v41 = vrot.slane %v2692_v32, 3 }
 0x132   : > { %5304 = vmatmul.mubr.msk.bf16.gmra.mrb[136].mxu0 %vm492_vm3, %v2421_v27  ;;  %5289 = vmatprep.mubr.msk.bf16.mxu1 %vm5753_vm1, %v5752_v1 }
 0x133   : > { %5307 = vmatprep.mubr.msk.bf16.mxu0 %vm5753_vm1, %v5752_v1 }
 0x134   : > { %v902_v60 = vpop.f32.mrb[32].mxu1 }
 0x135   : > { %v1055_v40 = vpop.f32.mrb[32].mxu0  ;;  %v935_v42 = vadd.f32 %v902_v60, %v6383_v16  ;;  %v5063_v63 = vpop.f32.mrb[33].mxu1  ;;  %v2424_v16 = vrot.slane %v6366_v61, 2 }
 0x136   : > { %v6464_v0 = vadd.f32 %v1055_v40, %v933_v36  ;;  %v5081_v59 = vpop.f32.mrb[33].mxu0  ;;  %v905_v2 = vpop.f32.mrb[34].mxu1 }
 0x137   : > { %v1058_v56 = vpop.f32.mrb[34].mxu0  ;;  %v936_v14 = vadd.f32 %v905_v2, %v6387_v23  ;;  %v5064_v5 = vpop.f32.mrb[35].mxu1  ;;  %v2425_v19 = vsel %vm1110_vm6, %v2422_v55, %v2424_v16  ;;  %v6516_v59 = vld [vmem:[%s5932_s12 + $0x18] sm:$0xff]  }
 0x138   : > { %v6468_v3 = vadd.f32 %v1058_v56, %v934_v49  ;;  %v5082_v58 = vpop.f32.mrb[35].mxu0  ;;  %v2702_v49 = vrot.slane %v2700_v33, 3  ;;  %v2706_v63 = vshrl.u32 %v6516_v59, 16 }
 0x139   : > { %5290 = vmatmul.mubr.msk.bf16.gmra.mrb[140].mxu1 %vm492_vm3, %v2300_v7  ;;  %v2709_v58 = vshll.u32 %v6516_v59, 16  ;;  %v4698_v7 = vld [vmem:[%s7221_s3 + $0x48] sm:$0xf] }
 0x13a   : > { %5308 = vmatmul.mubr.msk.bf16.gmra.mrb[140].mxu0 %vm492_vm3, %v2423_v62  ;;  %5293 = vmatprep.mubr.msk.bf16.mxu1 %vm5753_vm1, %v5752_v1  ;;  %v2875_v62 = vsel %vm508_vm0, %v4691_v46, 0 }
 0x13b   : > { %5311 = vmatprep.mubr.msk.bf16.mxu0 %vm5753_vm1, %v5752_v1  ;;  %v2711_v9 = vrot.slane %v2709_v58, 3 }
 0x13c   : > { %v910_v15 = vpop.f32.mrb[36].mxu1 }
 0x13d   : > { %v1063_v6 = vpop.f32.mrb[36].mxu0  ;;  %v937_v61 = vadd.f32 %v910_v15, %v6399_v44  ;;  %v5067_v20 = vpop.f32.mrb[37].mxu1  ;;  %v2426_v44 = vrot.slane %v6452_v48, 2  ;;  %v2699_v48 = vrot.slane %v2697_v30, 2 }
 0x13e   : > { %v6483_v23 = vadd.f32 %v1063_v6, %v935_v42  ;;  %v5085_v13 = vpop.f32.mrb[37].mxu0  ;;  %v913_v24 = vpop.f32.mrb[38].mxu1  ;;  %v2708_v6 = vrot.slane %v2706_v63, 2 }
 0x13f   : > { %v1066_v17 = vpop.f32.mrb[38].mxu0  ;;  %v938_v25 = vadd.f32 %v913_v24, %v6407_v53  ;;  %v5068_v28 = vpop.f32.mrb[39].mxu1  ;;  %v2570_v53 = vrot.slane %v4673_v22, 2  ;;  %v2427_v45 = vsel %vm1110_vm6, %v2424_v16, %v2426_v44  ;;  %v2703_v42 = vor.u32 %v2702_v49, %v2699_v48 }
 0x140   : > { %v6487_v54 = vadd.f32 %v1066_v17, %v936_v14  ;;  %v5086_v21 = vpop.f32.mrb[39].mxu0 }
 0x141   : > { %5294 = vmatmul.mubr.msk.bf16.gmra.mrb[144].mxu1 %vm492_vm3, %v2309_v10  ;;  %v2572_v57 = vsel %vm1110_vm6, %v2570_v53, %v2571_v35  ;;  %v6542_v21 = vld [vmem:[%s5932_s12 + $0x20] sm:$0xff]  }
 0x142   : > { %5312 = vmatmul.mubr.msk.bf16.gmra.mrb[144].mxu0 %vm492_vm3, %v2425_v19  ;;  %5321 = vmatprep.mubr.msk.bf16.mxu1 %vm5753_vm1, %v5752_v1  ;;  %v3013_v19 = vsel %vm508_vm0, %v4698_v7, 0  ;;  %v2715_v10 = vshrl.u32 %v6542_v21, 16 }
 0x143   : > { %5315 = vmatprep.mubr.msk.bf16.mxu0 %vm5753_vm1, %v5752_v1 }
 0x144   : > { %v918_v43 = vpop.f32.mrb[40].mxu1 }
 0x145   : > { %v1071_v34 = vpop.f32.mrb[40].mxu0  ;;  %v939_v50 = vadd.f32 %v918_v43, %v6424_v8  ;;  %v5071_v55 = vpop.f32.mrb[41].mxu1  ;;  %v2695_v8 = vor.u32 %v2694_v41, %v2691_v37  ;;  %v6562_v43 = vld [vmem:[%s5932_s12 + $0x28] sm:$0xff]  }
 0x146   : > { %v6505_v27 = vadd.f32 %v1071_v34, %v937_v61  ;;  %v5089_v36 = vpop.f32.mrb[41].mxu0  ;;  %v921_v52 = vpop.f32.mrb[42].mxu1  ;;  %v2717_v34 = vrot.slane %v2715_v10, 2  ;;  %v2724_v49 = vshrl.u32 %v6562_v43, 16 }
 0x147   : > { %v1074_v39 = vpop.f32.mrb[42].mxu0  ;;  %v940_v60 = vadd.f32 %v921_v52, %v6429_v18  ;;  %v5072_v56 = vpop.f32.mrb[43].mxu1  ;;  %v2573_v18 = vrot.slane %v6516_v59, 2  ;;  %v2704_v16 = vsel %vm1382_vm7, %v2695_v8, %v2703_v42 }
 0x148   : > { %v6512_v40 = vadd.f32 %v1074_v39, %v938_v25  ;;  %v5090_v51 = vpop.f32.mrb[43].mxu0  ;;  %v2718_v25 = vshll.u32 %v6542_v21, 16 }
 0x149   : > { %5322 = vmatmul.mubr.msk.bf16.vlgmr.msra.gmra.mrb[148].mxu1 %vm492_vm3, %v2572_v57  ;;  %v2574_v20 = vsel %vm1110_vm6, %v2571_v35, %v2573_v18  ;;  %v2726_v57 = vrot.slane %v2724_v49, 2 }
 0x14a   : > { %5316 = vmatmul.mubr.msk.bf16.gmra.mrb[148].mxu0 %vm492_vm3, %v2427_v45  ;;  %5364 = vmatpush3.bf16.msra.mxu1 %v2875_v62  ;;  %v2720_v53 = vrot.slane %v2718_v25, 3 }
 0x14b   : > { %5343 = vmatprep.mubr.msk.bf16.mxu0 %vm5753_vm1, %v5752_v1  ;;  %5325 = vmatprep.mubr.msk.bf16.mxu1 %vm5753_vm1, %v5752_v1 }
 0x14c   : > { %5407 = vmatprep.subr.bf16.mxu1 %v5752_v1  ;;  %v926_v14 = vpop.f32.mrb[44].mxu1 }
 0x14d   : > { %v1079_v2 = vpop.f32.mrb[44].mxu0  ;;  %v941_v12 = vadd.f32 %v926_v14, %v6444_v31  ;;  %v5075_v13 = vpop.f32.mrb[45].mxu1  ;;  %v2712_v31 = vor.u32 %v2711_v9, %v2708_v6  ;;  %v5681_v14 = vld [vmem:[%s5932_s12 + $0x30] ss:$0 sps:$4 sm:$0x33]  }
 0x14e   : > { %v6532_v4 = vadd.f32 %v1079_v2, %v939_v50  ;;  %v5093_v47 = vpop.f32.mrb[45].mxu0  ;;  %v929_v61 = vpop.f32.mrb[46].mxu1  ;;  %v2727_v50 = vshll.u32 %v6562_v43, 16  ;;  %v2579_v13 = vrot.slane %v5681_v14, 2 }
 0x14f   : > { %v1082_v5 = vpop.f32.mrb[46].mxu0  ;;  %v942_v22 = vadd.f32 %v929_v61, %v6448_v38  ;;  %v5076_v24 = vpop.f32.mrb[47].mxu1  ;;  %v2575_v38 = vrot.slane %v6542_v21, 2  ;;  %v2713_v33 = vsel %vm1382_vm7, %v2703_v42, %v2712_v31  ;;  %v6579_v42 = vld [vmem:[%s5932_s12 + $0x30] ss:$0 sps:$4 sm:$0x77]  }
 0x150   : > { %v6537_v15 = vadd.f32 %v1082_v5, %v940_v60  ;;  %v5094_v17 = vpop.f32.mrb[47].mxu0  ;;  %v2729_v8 = vrot.slane %v2727_v50, 3  ;;  %v2736_v9 = vshll.u32 %v6579_v42, 16 }
 0x151   : > { %5326 = vmatmul.mubr.msk.bf16.gmra.mrb[152].mxu1 %vm492_vm3, %v2574_v20  ;;  %v2576_v45 = vsel %vm1110_vm6, %v2573_v18, %v2575_v38 }
 0x152   : > { %5344 = vmatmul.mubr.msk.bf16.vlgmr.msra.gmra.mrb[152].mxu0 %vm492_vm3, %v2704_v16  ;;  %5329 = vmatprep.mubr.msk.bf16.mxu1 %vm5753_vm1, %v5752_v1  ;;  %v2730_v6 = vor.u32 %v2729_v8, %v2726_v57  ;;  %v5684_v8 = vld [vmem:[%s5971_s20] sm:$0xff]  }
 0x153   : > { %5386 = vmatpush3.bf16.msra.mxu0 %v3013_v19  ;;  %5347 = vmatprep.mubr.msk.bf16.mxu0 %vm5753_vm1, %v5752_v1  ;;  %v2842_v19 = vld [vmem:[%s5932_s12 + $0x8] sm:$0x8]  ;;  %s5590_s12 = smul.u32 80, %s7237_s22 }
 0x154   : > { %5429 = vmatprep.subr.bf16.mxu0 %v5752_v1  ;;  %v1174_v44 = vpop.f32.mrb[48].mxu1 }
 0x155   : > { %v1087_v28 = vpop.f32.mrb[48].mxu0  ;;  %v1213_v35 = vadd.f32 %v1174_v44, %v6464_v0  ;;  %v5103_v36 = vpop.f32.mrb[49].mxu1  ;;  %v2721_v0 = vor.u32 %v2720_v53, %v2717_v34 }
 0x156   : > { %v6555_v29 = vadd.f32 %v1087_v28, %v941_v12  ;;  %v5097_v32 = vpop.f32.mrb[49].mxu0  ;;  %v1177_v39 = vpop.f32.mrb[50].mxu1  ;;  %v2849_v36 = vrot.slane %v6492_v26, 3 }
 0x157   : > { %v1090_v30 = vpop.f32.mrb[50].mxu0  ;;  %v1214_v46 = vadd.f32 %v1177_v39, %v6468_v3  ;;  %v5104_v48 = vpop.f32.mrb[51].mxu1  ;;  %v2577_v3 = vrot.slane %v6562_v43, 2  ;;  %v2722_v62 = vsel %vm1382_vm7, %v2712_v31, %v2721_v0  ;;  %v2738_v31 = vrot.slane %v2736_v9, 3 }
 0x158   : > { %v6559_v37 = vadd.f32 %v1090_v30, %v942_v22  ;;  %v5098_v41 = vpop.f32.mrb[51].mxu0  ;;  %v2731_v22 = vsel %vm1382_vm7, %v2721_v0, %v2730_v6  ;;  %v4692_v30 = vcombine.low %v2842_v19, %v6481_v11  ;;  %v2853_v9 = vrot.slane %v6542_v21, 3 }
 0x159   : > { %5330 = vmatmul.mubr.msk.bf16.gmra.mrb[156].mxu1 %vm492_vm3, %v2576_v45  ;;  %v2578_v47 = vsel %vm1110_vm6, %v2575_v38, %v2577_v3  ;;  %v2580_v44 = vsel %vm1110_vm6, %v2577_v3, %v2579_v13  ;;  %v5685_v13 = vld [vmem:[%s5971_s20 + $0x8] sm:$0xff]  }
 0x15a   : > { %5348 = vmatmul.mubr.msk.bf16.gmra.mrb[156].mxu0 %vm492_vm3, %v2713_v33  ;;  %5333 = vmatprep.mubr.msk.bf16.mxu1 %vm5753_vm1, %v5752_v1 }
 0x15b   : > { %5351 = vmatprep.mubr.msk.bf16.mxu0 %vm5753_vm1, %v5752_v1 }
 0x15c   : > { %v1182_v60 = vpop.f32.mrb[52].mxu1 }
 0x15d   : > { %v1327_v55 = vpop.f32.mrb[52].mxu0  ;;  %v1215_v63 = vadd.f32 %v1182_v60, %v6483_v23  ;;  %v5107_v58 = vpop.f32.mrb[53].mxu1  ;;  %v2733_v23 = vshrl.u32 %v6579_v42, 16  ;;  %v2851_v60 = vrot.slane %v6516_v59, 3 }
 0x15e   : > { %v6575_v51 = vadd.f32 %v1327_v55, %v1213_v35  ;;  %v5125_v52 = vpop.f32.mrb[53].mxu0  ;;  %v1185_v7 = vpop.f32.mrb[54].mxu1  ;;  %v2848_v35 = vrot.slane %v4692_v30, 3  ;;  %v5686_v30 = vld [vmem:[%s5971_s20 + $0x10] sm:$0xff]  }
 0x15f   : > { %v1330_v56 = vpop.f32.mrb[54].mxu0  ;;  %v1216_v5 = vadd.f32 %v1185_v7, %v6487_v54  ;;  %v5108_v16 = vpop.f32.mrb[55].mxu1  ;;  %v2735_v24 = vrot.slane %v2733_v23, 2 }
 0x160   : > { %v6582_v2 = vadd.f32 %v1330_v56, %v1214_v46  ;;  %v5126_v18 = vpop.f32.mrb[55].mxu0  ;;  %v4709_v46 = vld [vmem:[%s7221_s3 + $0x4c] sm:$0xf]  ;;  %v2850_v26 = vsel %vm1543_vm8, %v2848_v35, %v2849_v36  ;;  %v2852_v16 = vsel %vm1543_vm8, %v2849_v36, %v2851_v60 }
 0x161   : > { %5334 = vmatmul.mubr.msk.bf16.gmra.mrb[160].mxu1 %vm492_vm3, %v2578_v47  ;;  %v2739_v53 = vor.u32 %v2738_v31, %v2735_v24  ;;  %v3199_v57 = vsel %vm508_vm0, %v4709_v46, 0 }
 0x162   : > { %5352 = vmatmul.mubr.msk.bf16.gmra.mrb[160].mxu0 %vm492_vm3, %v2722_v62  ;;  %5337 = vmatprep.mubr.msk.bf16.mxu1 %vm5753_vm1, %v5752_v1 }
 0x163   : > { %5355 = vmatprep.mubr.msk.bf16.mxu0 %vm5753_vm1, %v5752_v1  ;;  %v2740_v45 = vsel %vm1382_vm7, %v2730_v6, %v2739_v53 }
 0x164   : > { %v1190_v61 = vpop.f32.mrb[56].mxu1 }
 0x165   : > { %v1335_v12 = vpop.f32.mrb[56].mxu0  ;;  %v1217_v10 = vadd.f32 %v1190_v61, %v6505_v27  ;;  %v5111_v25 = vpop.f32.mrb[57].mxu1 }
 0x166   : > { %v6595_v17 = vadd.f32 %v1335_v12, %v1215_v63  ;;  %v5129_v54 = vpop.f32.mrb[57].mxu0  ;;  %v1193_v32 = vpop.f32.mrb[58].mxu1 }
 0x167   : > { %v1338_v20 = vpop.f32.mrb[58].mxu0  ;;  %v1218_v33 = vadd.f32 %v1193_v32, %v6512_v40  ;;  %v5112_v34 = vpop.f32.mrb[59].mxu1 }
 0x168   : > { %v6600_v28 = vadd.f32 %v1338_v20, %v1216_v5  ;;  %v5130_v38 = vpop.f32.mrb[59].mxu0 }
 0x169   : > { %5338 = vmatmul.mubr.msk.bf16.gmra.mrb[164].mxu1 %vm492_vm3, %v2580_v44  ;;  %v2855_v38 = vrot.slane %v6562_v43, 3 }
 0x16a   : > { %5356 = vmatmul.mubr.msk.bf16.gmra.mrb[164].mxu0 %vm492_vm3, %v2731_v22  ;;  %5365 = vmatprep.mubr.msk.bf16.mxu1 %vm5753_vm1, %v5752_v1 }
 0x16b   : > { %5359 = vmatprep.mubr.msk.bf16.mxu0 %vm5753_vm1, %v5752_v1  ;;  %v2856_v43 = vsel %vm1543_vm8, %v2853_v9, %v2855_v38 }
 0x16c   : > { %v1198_v40 = vpop.f32.mrb[60].mxu1 }
 0x16d   : > { %v1343_v27 = vpop.f32.mrb[60].mxu0  ;;  %v1219_v48 = vadd.f32 %v1198_v40, %v6532_v4  ;;  %v5115_v49 = vpop.f32.mrb[61].mxu1 }
 0x16e   : > { %v6612_v41 = vadd.f32 %v1343_v27, %v1217_v10  ;;  %v5133_v11 = vpop.f32.mrb[61].mxu0  ;;  %v1201_v55 = vpop.f32.mrb[62].mxu1  ;;  %v2854_v10 = vsel %vm1543_vm8, %v2851_v60, %v2853_v9  ;;  %v6688_v49 = vld [vmem:[%s5971_s20 + $0x8] sm:$0xff]  }
 0x16f   : > { %v1346_v39 = vpop.f32.mrb[62].mxu0  ;;  %v1220_v3 = vadd.f32 %v1201_v55, %v6537_v15  ;;  %v5116_v52 = vpop.f32.mrb[63].mxu1  ;;  %v4721_v15 = vld [vmem:[%s7221_s3 + $0x50] sm:$0xf] }
 0x170   : > { %v6619_v0 = vadd.f32 %v1346_v39, %v1218_v33  ;;  %v5134_v50 = vpop.f32.mrb[63].mxu0  ;;  %v3317_v59 = vsel %vm508_vm0, %v4721_v15, 0  ;;  %v3098_v33 = vld [vmem:[%s5971_s20] sm:$0xf] }
 0x171   : > { %5366 = vmatmul.mubr.msk.bf16.vlgmr.msra.gmra.mrb[168].mxu1 %vm492_vm3, %v2850_v26  ;;  %v5687_v26 = vld [vmem:[%s5971_s20 + $0x18] sm:$0xff]  }
 0x172   : > { %5360 = vmatmul.mubr.msk.bf16.gmra.mrb[168].mxu0 %vm492_vm3, %v2740_v45  ;;  %5408 = vmatpush3.bf16.msra.mxu1 %v3199_v57 }
 0x173   : > { %5387 = vmatprep.mubr.msk.bf16.mxu0 %vm5753_vm1, %v5752_v1  ;;  %5369 = vmatprep.mubr.msk.bf16.mxu1 %vm5753_vm1, %v5752_v1 }
 0x174   : > { %5451 = vmatprep.subr.bf16.mxu1 %v5752_v1  ;;  %v1206_v63 = vpop.f32.mrb[64].mxu1 }
 0x175   : > { %v1351_v4 = vpop.f32.mrb[64].mxu0  ;;  %v1221_v18 = vadd.f32 %v1206_v63, %v6555_v29  ;;  %v5119_v7 = vpop.f32.mrb[65].mxu1 }
 0x176   : > { %v6634_v56 = vadd.f32 %v1351_v4, %v1219_v48  ;;  %v5137_v62 = vpop.f32.mrb[65].mxu0  ;;  %v1209_v5 = vpop.f32.mrb[66].mxu1  ;;  %v2857_v48 = vrot.slane %v6579_v42, 3 }
 0x177   : > { %v1354_v58 = vpop.f32.mrb[66].mxu0  ;;  %v1222_v6 = vadd.f32 %v1209_v5, %v6559_v37  ;;  %v5120_v23 = vpop.f32.mrb[67].mxu1 }
 0x178   : > { %v6639_v47 = vadd.f32 %v1354_v58, %v1220_v3  ;;  %v5138_v14 = vpop.f32.mrb[67].mxu0  ;;  %v2858_v42 = vsel %vm1543_vm8, %v2855_v38, %v2857_v48  ;;  %v3147_v58 = vshll.u32 %v6688_v49, 16  ;;  %v5688_v23 = vld [vmem:[%s5971_s20 + $0x20] sm:$0xff]  }
 0x179   : > { %5370 = vmatmul.mubr.msk.bf16.gmra.mrb[172].mxu1 %vm492_vm3, %v2852_v16  ;;  %v6707_v16 = vld [vmem:[%s5971_s20 + $0x10] sm:$0xff]  }
 0x17a   : > { %5388 = vmatmul.mubr.msk.bf16.vlgmr.msra.gmra.mrb[172].mxu0 %vm492_vm3, %v5684_v8  ;;  %5373 = vmatprep.mubr.msk.bf16.mxu1 %vm5753_vm1, %v5752_v1  ;;  %v3149_v5 = vrot.slane %v3147_v58, 1 }
 0x17b   : > { %5430 = vmatpush3.bf16.msra.mxu0 %v3317_v59  ;;  %5391 = vmatprep.mubr.msk.bf16.mxu0 %vm5753_vm1, %v5752_v1 }
 0x17c   : > { %5473 = vmatprep.subr.bf16.mxu0 %v5752_v1  ;;  %v1488_v54 = vpop.f32.mrb[68].mxu1 }
 0x17d   : > { %v1359_v29 = vpop.f32.mrb[68].mxu0  ;;  %v1527_v61 = vadd.f32 %v1488_v54, %v6575_v51  ;;  %v5147_v20 = vpop.f32.mrb[69].mxu1 }
 0x17e   : > { %v6652_v12 = vadd.f32 %v1359_v29, %v1221_v18  ;;  %v5141_v37 = vpop.f32.mrb[69].mxu0  ;;  %v1491_v31 = vpop.f32.mrb[70].mxu1 }
 0x17f   : > { %v1362_v19 = vpop.f32.mrb[70].mxu0  ;;  %v1528_v21 = vadd.f32 %v1491_v31, %v6582_v2  ;;  %v5148_v25 = vpop.f32.mrb[71].mxu1  ;;  %v6672_v2 = vld [vmem:[%s5971_s20 + $0x4] sm:$0xf]  ;;  %v4728_v37 = vld [vmem:[%s7221_s3 + $0x54] sm:$0xf] }
 0x180   : > { %v6656_v22 = vadd.f32 %v1362_v19, %v1222_v6  ;;  %v5142_v24 = vpop.f32.mrb[71].mxu0  ;;  %v4710_v39 = vcombine.low %v3098_v33, %v6672_v2  ;;  %v3470_v38 = vsel %vm508_vm0, %v4728_v37, 0 }
 0x181   : > { %5374 = vmatmul.mubr.msk.bf16.gmra.mrb[176].mxu1 %vm492_vm3, %v2854_v10  ;;  %v3151_v10 = vshrl.u32 %v6688_v49, 16 }
 0x182   : > { %5392 = vmatmul.mubr.msk.bf16.gmra.mrb[176].mxu0 %vm492_vm3, %v5685_v13  ;;  %5377 = vmatprep.mubr.msk.bf16.mxu1 %vm5753_vm1, %v5752_v1  ;;  %v3142_v50 = vshll.u32 %v4710_v39, 16  ;;  %v3140_v8 = vshrl.u32 %v4710_v39, 16 }
 0x183   : > { %5395 = vmatprep.mubr.msk.bf16.mxu0 %vm5753_vm1, %v5752_v1  ;;  %v3153_v33 = vor.u32 %v3151_v10, %v3149_v5 }
 0x184   : > { %v1496_v34 = vpop.f32.mrb[72].mxu1  ;;  %v3144_v63 = vrot.slane %v3142_v50, 1  ;;  %v3159_v50 = vshrl.u32 %v6707_v16, 16 }
 0x185   : > { %v1607_v51 = vpop.f32.mrb[72].mxu0  ;;  %v1529_v27 = vadd.f32 %v1496_v34, %v6595_v17  ;;  %v5151_v35 = vpop.f32.mrb[73].mxu1  ;;  %v6735_v34 = vld [vmem:[%s5971_s20 + $0x18] sm:$0xff]  }
 0x186   : > { %v6667_v32 = vadd.f32 %v1607_v51, %v1527_v61  ;;  %v5169_v44 = vpop.f32.mrb[73].mxu0  ;;  %v1499_v40 = vpop.f32.mrb[74].mxu1  ;;  %v3145_v59 = vor.u32 %v3144_v63, %v3140_v8 }
 0x187   : > { %v1610_v53 = vpop.f32.mrb[74].mxu0  ;;  %v1530_v45 = vadd.f32 %v1499_v40, %v6600_v28  ;;  %v5152_v46 = vpop.f32.mrb[75].mxu1  ;;  %v3291_v44 = vrot.slane %v6688_v49, 1 }
 0x188   : > { %v6675_v36 = vadd.f32 %v1610_v53, %v1528_v21  ;;  %v5170_v11 = vpop.f32.mrb[75].mxu0  ;;  %v3150_v31 = vsel %vm447_vm2, %v3145_v59, %v3149_v5  ;;  %v3155_v21 = vshll.u32 %v6707_v16, 16  ;;  %v3167_v5 = vshrl.u32 %v6735_v34, 16 }
 0x189   : > { %5378 = vmatmul.mubr.msk.bf16.gmra.mrb[180].mxu1 %vm492_vm3, %v2856_v43 }
 0x18a   : > { %5396 = vmatmul.mubr.msk.bf16.gmra.mrb[180].mxu0 %vm492_vm3, %v5686_v30  ;;  %5381 = vmatprep.mubr.msk.bf16.mxu1 %vm5753_vm1, %v5752_v1 }
 0x18b   : > { %5399 = vmatprep.mubr.msk.bf16.mxu0 %vm5753_vm1, %v5752_v1 }
 0x18c   : > { %v1504_v3 = vpop.f32.mrb[76].mxu1 }
 0x18d   : > { %v1615_v17 = vpop.f32.mrb[76].mxu0  ;;  %v1531_v57 = vadd.f32 %v1504_v3, %v6612_v41  ;;  %v5155_v4 = vpop.f32.mrb[77].mxu1  ;;  %v3284_v41 = vld [vmem:[%s5971_s20] sm:$0xe] }
 0x18e   : > { %v6690_v55 = vadd.f32 %v1615_v17, %v1529_v27  ;;  %v5173_v28 = vpop.f32.mrb[77].mxu0  ;;  %v1507_v62 = vpop.f32.mrb[78].mxu1  ;;  %v4722_v13 = vcombine.low %v3284_v41, %v6672_v2  ;;  %v4740_v2 = vld [vmem:[%s7221_s3 + $0x58] sm:$0xf] }
 0x18f   : > { %v1618_v52 = vpop.f32.mrb[78].mxu0  ;;  %v1532_v18 = vadd.f32 %v1507_v62, %v6619_v0  ;;  %v5156_v7 = vpop.f32.mrb[79].mxu1  ;;  %v3630_v17 = vsel %vm508_vm0, %v4740_v2, 0  ;;  %v3163_v28 = vshll.u32 %v6735_v34, 16 }
 0x190   : > { %v6694_v60 = vadd.f32 %v1618_v52, %v1530_v45  ;;  %v5174_v15 = vpop.f32.mrb[79].mxu0 }
 0x191   : > { %5382 = vmatmul.mubr.msk.bf16.gmra.mrb[184].mxu1 %vm492_vm3, %v2858_v42  ;;  %v3165_v4 = vrot.slane %v3163_v28, 1 }
 0x192   : > { %5400 = vmatmul.mubr.msk.bf16.gmra.mrb[184].mxu0 %vm492_vm3, %v5687_v26  ;;  %5409 = vmatprep.mubr.msk.bf16.mxu1 %vm5753_vm1, %v5752_v1 }
 0x193   : > { %5403 = vmatprep.mubr.msk.bf16.mxu0 %vm5753_vm1, %v5752_v1 }
 0x194   : > { %v1512_v29 = vpop.f32.mrb[80].mxu1 }
 0x195   : > { %v1623_v14 = vpop.f32.mrb[80].mxu0  ;;  %v1533_v54 = vadd.f32 %v1512_v29, %v6634_v56  ;;  %v5159_v19 = vpop.f32.mrb[81].mxu1  ;;  %v3290_v56 = vrot.slane %v4722_v13, 1  ;;  %v5695_v13 = vld [vmem:[%s5971_s20 + $0x28] ss:$0 sps:$4 sm:$0x11]  }
 0x196   : > { %v6709_v6 = vadd.f32 %v1623_v14, %v1531_v57  ;;  %v5177_v0 = vpop.f32.mrb[81].mxu0  ;;  %v1515_v24 = vpop.f32.mrb[82].mxu1 }
 0x197   : > { %v1626_v9 = vpop.f32.mrb[82].mxu0  ;;  %v1534_v25 = vadd.f32 %v1515_v24, %v6639_v47  ;;  %v5160_v51 = vpop.f32.mrb[83].mxu1  ;;  %v3157_v47 = vrot.slane %v3155_v21, 1  ;;  %v3292_v40 = vsel %vm677_vm4, %v3290_v56, %v3291_v44 }
 0x198   : > { %v6717_v61 = vadd.f32 %v1626_v9, %v1532_v18  ;;  %v5178_v20 = vpop.f32.mrb[83].mxu0  ;;  %v3169_v9 = vor.u32 %v3167_v5, %v3165_v4 }
 0x199   : > { %5410 = vmatmul.mubr.msk.bf16.vlgmr.msra.gmra.mrb[188].mxu1 %vm492_vm3, %v3150_v31  ;;  %v3158_v49 = vsel %vm447_vm2, %v3153_v33, %v3157_v47  ;;  %v3161_v57 = vor.u32 %v3159_v50, %v3157_v47 }
 0x19a   : > { %5404 = vmatmul.mubr.msk.bf16.gmra.mrb[188].mxu0 %vm492_vm3, %v5688_v23  ;;  %5452 = vmatpush3.bf16.msra.mxu1 %v3470_v38 }
 0x19b   : > { %5431 = vmatprep.mubr.msk.bf16.mxu0 %vm5753_vm1, %v5752_v1  ;;  %5413 = vmatprep.mubr.msk.bf16.mxu1 %vm5753_vm1, %v5752_v1  ;;  %v3166_v59 = vsel %vm447_vm2, %v3161_v57, %v3165_v4 }
 0x19c   : > { %5495 = vmatprep.subr.bf16.mxu1 %v5752_v1  ;;  %v1520_v35 = vpop.f32.mrb[84].mxu1 }
 0x19d   : > { %v1631_v30 = vpop.f32.mrb[84].mxu0  ;;  %v1535_v43 = vadd.f32 %v1520_v35, %v6652_v12  ;;  %v5163_v39 = vpop.f32.mrb[85].mxu1  ;;  %v3293_v12 = vrot.slane %v6707_v16, 1  ;;  %v6796_v35 = vld [vmem:[%s5971_s20 + $0x8] sm:$0xf] }
 0x19e   : > { %v6737_v53 = vadd.f32 %v1631_v30, %v1533_v54  ;;  %v5181_v27 = vpop.f32.mrb[85].mxu0  ;;  %v1523_v48 = vpop.f32.mrb[86].mxu1 }
 0x19f   : > { %v1634_v11 = vpop.f32.mrb[86].mxu0  ;;  %v1536_v26 = vadd.f32 %v1523_v48, %v6656_v22  ;;  %v5164_v3 = vpop.f32.mrb[87].mxu1  ;;  %v6758_v22 = vld [vmem:[%s5971_s20 + $0x20] sm:$0xff]   ;;  %v3294_v63 = vsel %vm677_vm4, %v3291_v44, %v3293_v12  ;;  %v3179_v44 = vshll.u32 %v5695_v13, 16 }
 0x1a0   : > { %v6742_v45 = vadd.f32 %v1634_v11, %v1534_v25  ;;  %v5182_v46 = vpop.f32.mrb[87].mxu0  ;;  %v3171_v16 = vshll.u32 %v6758_v22, 16  ;;  %v3175_v56 = vshrl.u32 %v6758_v22, 16  ;;  %v3402_v27 = vld [vmem:[%s5971_s20 + $0x4] sm:$0xe]  ;;  %v6807_v3 = vld [vmem:[%s5971_s20 + $0xc] sm:$0xff]  }
 0x1a1   : > { %5414 = vmatmul.mubr.msk.bf16.gmra.mrb[192].mxu1 %vm492_vm3, %v3158_v49  ;;  %v4729_v50 = vcombine.low %v3402_v27, %v6796_v35 }
 0x1a2   : > { %5432 = vmatmul.mubr.msk.bf16.vlgmr.msra.gmra.mrb[192].mxu0 %vm492_vm3, %v3292_v40  ;;  %5417 = vmatprep.mubr.msk.bf16.mxu1 %vm5753_vm1, %v5752_v1  ;;  %v3173_v37 = vrot.slane %v3171_v16, 1  ;;  %v4747_v16 = vld [vmem:[%s7221_s3 + $0x5c] sm:$0xf] }
 0x1a3   : > { %5474 = vmatpush3.bf16.msra.mxu0 %v3630_v17  ;;  %5435 = vmatprep.mubr.msk.bf16.mxu0 %vm5753_vm1, %v5752_v1  ;;  %v3562_v57 = vshrl.u32 %v4729_v50, 16  ;;  %v3565_v4 = vshll.u32 %v4729_v50, 16 }
 0x1a4   : > { %5517 = vmatprep.subr.bf16.mxu0 %v5752_v1  ;;  %v1745_v42 = vpop.f32.mrb[88].mxu1  ;;  %v3174_v38 = vsel %vm447_vm2, %v3169_v9, %v3173_v37  ;;  %v3177_v2 = vor.u32 %v3175_v56, %v3173_v37  ;;  %v4754_v56 = vld [vmem:[%s7221_s3 + $0x60] sm:$0xf] }
 0x1a5   : > { %v1639_v52 = vpop.f32.mrb[88].mxu0  ;;  %v1784_v58 = vadd.f32 %v1745_v42, %v6667_v32  ;;  %v5191_v18 = vpop.f32.mrb[89].mxu1  ;;  %v3295_v32 = vrot.slane %v6735_v34, 1  ;;  %v3181_v34 = vrot.slane %v3179_v44, 1 }
 0x1a6   : > { %v6760_v15 = vadd.f32 %v1639_v52, %v1535_v43  ;;  %v5185_v62 = vpop.f32.mrb[89].mxu0  ;;  %v1748_v14 = vpop.f32.mrb[90].mxu1  ;;  %v3564_v18 = vrot.slane %v3562_v57, 1 }
 0x1a7   : > { %v1642_v8 = vpop.f32.mrb[90].mxu0  ;;  %v1785_v0 = vadd.f32 %v1748_v14, %v6675_v36  ;;  %v5192_v23 = vpop.f32.mrb[91].mxu1  ;;  %v3296_v24 = vsel %vm677_vm4, %v3293_v12, %v3295_v32  ;;  %v3573_v62 = vshll.u32 %v6807_v3, 16 }
 0x1a8   : > { %v6764_v7 = vadd.f32 %v1642_v8, %v1536_v26  ;;  %v5186_v41 = vpop.f32.mrb[91].mxu0  ;;  %v3182_v26 = vsel %vm447_vm2, %v3177_v2, %v3181_v34  ;;  %v3444_v8 = vrot.slane %v6807_v3, 1 }
 0x1a9   : > { %5418 = vmatmul.mubr.msk.bf16.gmra.mrb[196].mxu1 %vm492_vm3, %v3166_v59  ;;  %v3567_v41 = vrot.slane %v3565_v4, 2  ;;  %v3575_v23 = vrot.slane %v3573_v62, 2 }
 0x1aa   : > { %5436 = vmatmul.mubr.msk.bf16.gmra.mrb[196].mxu0 %vm492_vm3, %v3294_v63  ;;  %5421 = vmatprep.mubr.msk.bf16.mxu1 %vm5753_vm1, %v5752_v1 }
 0x1ab   : > { %5439 = vmatprep.mubr.msk.bf16.mxu0 %vm5753_vm1, %v5752_v1 }
 0x1ac   : > { %v1753_v19 = vpop.f32.mrb[92].mxu1 }
 0x1ad   : > { %v1931_v29 = vpop.f32.mrb[92].mxu0  ;;  %v1786_v31 = vadd.f32 %v1753_v19, %v6690_v55  ;;  %v5195_v10 = vpop.f32.mrb[93].mxu1  ;;  %v3297_v55 = vrot.slane %v6758_v22, 1  ;;  %v3570_v22 = vshrl.u32 %v6807_v3, 16  ;;  %v6830_v19 = vld [vmem:[%s5971_s20 + $0x14] sm:$0xff]  }
 0x1ae   : > { %v6778_v54 = vadd.f32 %v1931_v29, %v1784_v58  ;;  %v5213_v36 = vpop.f32.mrb[93].mxu0  ;;  %v1756_v51 = vpop.f32.mrb[94].mxu1 }
 0x1af   : > { %v1934_v20 = vpop.f32.mrb[94].mxu0  ;;  %v1787_v30 = vadd.f32 %v1756_v51, %v6694_v60  ;;  %v5196_v33 = vpop.f32.mrb[95].mxu1  ;;  %v3298_v39 = vsel %vm677_vm4, %v3295_v32, %v3297_v55  ;;  %v3582_v51 = vshll.u32 %v6830_v19, 16 }
 0x1b0   : > { %v6782_v21 = vadd.f32 %v1934_v20, %v1785_v0  ;;  %v5214_v25 = vpop.f32.mrb[95].mxu0  ;;  %v3572_v0 = vrot.slane %v3570_v22, 1 }
 0x1b1   : > { %5422 = vmatmul.mubr.msk.bf16.gmra.mrb[200].mxu1 %vm492_vm3, %v3174_v38  ;;  %v3579_v25 = vshrl.u32 %v6830_v19, 16  ;;  %v3584_v34 = vrot.slane %v3582_v51, 2 }
 0x1b2   : > { %5440 = vmatmul.mubr.msk.bf16.gmra.mrb[200].mxu0 %vm492_vm3, %v3296_v24  ;;  %5425 = vmatprep.mubr.msk.bf16.mxu1 %vm5753_vm1, %v5752_v1  ;;  %v3576_v10 = vor.u32 %v3575_v23, %v3572_v0 }
 0x1b3   : > { %5443 = vmatprep.mubr.msk.bf16.mxu0 %vm5753_vm1, %v5752_v1  ;;  %v3581_v2 = vrot.slane %v3579_v25, 1 }
 0x1b4   : > { %v1761_v40 = vpop.f32.mrb[96].mxu1 }
 0x1b5   : > { %v1939_v47 = vpop.f32.mrb[96].mxu0  ;;  %v1788_v46 = vadd.f32 %v1761_v40, %v6709_v6  ;;  %v5199_v17 = vpop.f32.mrb[97].mxu1  ;;  %v3299_v6 = vrot.slane %v5695_v13, 1 }
 0x1b6   : > { %v6798_v60 = vadd.f32 %v1939_v47, %v1786_v31  ;;  %v5217_v11 = vpop.f32.mrb[97].mxu0  ;;  %v1764_v28 = vpop.f32.mrb[98].mxu1  ;;  %v3748_v31 = vsel %vm508_vm0, %v4747_v16, 0 }
 0x1b7   : > { %v1942_v43 = vpop.f32.mrb[98].mxu0  ;;  %v1789_v12 = vadd.f32 %v1764_v28, %v6717_v61  ;;  %v5200_v52 = vpop.f32.mrb[99].mxu1  ;;  %v3443_v61 = vrot.slane %v4729_v50, 1  ;;  %v3300_v5 = vsel %vm677_vm4, %v3297_v55, %v3299_v6 }
 0x1b8   : > { %v6802_v48 = vadd.f32 %v1942_v43, %v1787_v30  ;;  %v5218_v49 = vpop.f32.mrb[99].mxu0 }
 0x1b9   : > { %5426 = vmatmul.mubr.msk.bf16.gmra.mrb[204].mxu1 %vm492_vm3, %v3182_v26  ;;  %v3445_v36 = vsel %vm677_vm4, %v3443_v61, %v3444_v8  ;;  %v6856_v49 = vld [vmem:[%s5971_s20 + $0x1c] sm:$0xff]  }
 0x1ba   : > { %5444 = vmatmul.mubr.msk.bf16.gmra.mrb[204].mxu0 %vm492_vm3, %v3298_v39  ;;  %5453 = vmatprep.mubr.msk.bf16.mxu1 %vm5753_vm1, %v5752_v1  ;;  %v3901_v39 = vsel %vm508_vm0, %v4754_v56, 0  ;;  %v3588_v26 = vshrl.u32 %v6856_v49, 16 }
 0x1bb   : > { %5447 = vmatprep.mubr.msk.bf16.mxu0 %vm5753_vm1, %v5752_v1 }
 0x1bc   : > { %v1769_v14 = vpop.f32.mrb[100].mxu1 }
 0x1bd   : > { %v1947_v42 = vpop.f32.mrb[100].mxu0  ;;  %v1790_v32 = vadd.f32 %v1769_v14, %v6737_v53  ;;  %v5203_v29 = vpop.f32.mrb[101].mxu1  ;;  %v3568_v53 = vor.u32 %v3567_v41, %v3564_v18  ;;  %v6876_v14 = vld [vmem:[%s5971_s20 + $0x24] sm:$0xff]  }
 0x1be   : > { %v6819_v63 = vadd.f32 %v1947_v42, %v1788_v46  ;;  %v5221_v58 = vpop.f32.mrb[101].mxu0  ;;  %v1772_v13 = vpop.f32.mrb[102].mxu1  ;;  %v3590_v42 = vrot.slane %v3588_v26, 1  ;;  %v3597_v23 = vshrl.u32 %v6876_v14, 16 }
 0x1bf   : > { %v1950_v59 = vpop.f32.mrb[102].mxu0  ;;  %v1791_v20 = vadd.f32 %v1772_v13, %v6742_v45  ;;  %v5204_v24 = vpop.f32.mrb[103].mxu1  ;;  %v3446_v45 = vrot.slane %v6830_v19, 1  ;;  %v3577_v47 = vsel %vm949_vm5, %v3568_v53, %v3576_v10 }
 0x1c0   : > { %v6826_v9 = vadd.f32 %v1950_v59, %v1789_v12  ;;  %v5222_v37 = vpop.f32.mrb[103].mxu0  ;;  %v3591_v12 = vshll.u32 %v6856_v49, 16 }
 0x1c1   : > { %5454 = vmatmul.mubr.msk.bf16.vlgmr.msra.gmra.mrb[208].mxu1 %vm492_vm3, %v3445_v36  ;;  %v3447_v17 = vsel %vm677_vm4, %v3444_v8, %v3446_v45  ;;  %v3599_v36 = vrot.slane %v3597_v23, 1  ;;  %v4766_v23 = vld [vmem:[%s7221_s3 + $0x64] sm:$0xf] }
 0x1c2   : > { %5448 = vmatmul.mubr.msk.bf16.gmra.mrb[208].mxu0 %vm492_vm3, %v3300_v5  ;;  %5496 = vmatpush3.bf16.msra.mxu1 %v3748_v31  ;;  %v3593_v61 = vrot.slane %v3591_v12, 2 }
 0x1c3   : > { %5475 = vmatprep.mubr.msk.bf16.mxu0 %vm5753_vm1, %v5752_v1  ;;  %5457 = vmatprep.mubr.msk.bf16.mxu1 %vm5753_vm1, %v5752_v1 }
 0x1c4   : > { %5539 = vmatprep.subr.bf16.mxu1 %v5752_v1  ;;  %v1777_v33 = vpop.f32.mrb[104].mxu1 }
 0x1c5   : > { %v1955_v38 = vpop.f32.mrb[104].mxu0  ;;  %v1792_v27 = vadd.f32 %v1777_v33, %v6760_v15  ;;  %v5207_v11 = vpop.f32.mrb[105].mxu1  ;;  %v3585_v15 = vor.u32 %v3584_v34, %v3581_v2  ;;  %v5701_v33 = vld [vmem:[%s5971_s20 + $0x2c] ss:$0 sps:$4 sm:$0x11]  }
 0x1c6   : > { %v6846_v44 = vadd.f32 %v1955_v38, %v1790_v32  ;;  %v5225_v30 = vpop.f32.mrb[105].mxu0  ;;  %v1780_v46 = vpop.f32.mrb[106].mxu1  ;;  %v3600_v32 = vshll.u32 %v6876_v14, 16  ;;  %v3452_v11 = vrot.slane %v5701_v33, 1 }
 0x1c7   : > { %v1958_v55 = vpop.f32.mrb[106].mxu0  ;;  %v1793_v50 = vadd.f32 %v1780_v46, %v6764_v7  ;;  %v5208_v28 = vpop.f32.mrb[107].mxu1  ;;  %v3448_v7 = vrot.slane %v6856_v49, 1  ;;  %v3586_v62 = vsel %vm949_vm5, %v3576_v10, %v3585_v15  ;;  %v6893_v10 = vld [vmem:[%s5971_s20 + $0x2c] ss:$0 sps:$4 sm:$0x33]  }
 0x1c8   : > { %v6851_v40 = vadd.f32 %v1958_v55, %v1791_v20  ;;  %v5226_v43 = vpop.f32.mrb[107].mxu0  ;;  %v3602_v53 = vrot.slane %v3600_v32, 2  ;;  %v3609_v34 = vshll.u32 %v6893_v10, 16  ;;  %v6940_v32 = vld [vmem:[%s5971_s20 + $0x10] sm:$0xff]  }
 0x1c9   : > { %5458 = vmatmul.mubr.msk.bf16.gmra.mrb[212].mxu1 %vm492_vm3, %v3447_v17  ;;  %v3449_v5 = vsel %vm677_vm4, %v3446_v45, %v3448_v7 }
 0x1ca   : > { %5476 = vmatmul.mubr.msk.bf16.vlgmr.msra.gmra.mrb[212].mxu0 %vm492_vm3, %v3577_v47  ;;  %5461 = vmatprep.mubr.msk.bf16.mxu1 %vm5753_vm1, %v5752_v1  ;;  %v3603_v2 = vor.u32 %v3602_v53, %v3599_v36  ;;  %v4061_v53 = vsel %vm508_vm0, %v4766_v23, 0  ;;  %v7003_v23 = vld [vmem:[%s5971_s20 + $0x28] sm:$0xff]  }
 0x1cb   : > { %5518 = vmatpush3.bf16.msra.mxu0 %v3901_v39  ;;  %5479 = vmatprep.mubr.msk.bf16.mxu0 %vm5753_vm1, %v5752_v1  ;;  %v3715_v39 = vld [vmem:[%s5971_s20 + $0x4] sm:$0xc] }
 0x1cc   : > { %5561 = vmatprep.subr.bf16.mxu0 %v5752_v1  ;;  %v2049_v6 = vpop.f32.mrb[108].mxu1 }
 0x1cd   : > { %v1963_v52 = vpop.f32.mrb[108].mxu0  ;;  %v2088_v8 = vadd.f32 %v2049_v6, %v6778_v54  ;;  %v5235_v58 = vpop.f32.mrb[109].mxu1  ;;  %v3594_v54 = vor.u32 %v3593_v61, %v3590_v42 }
 0x1ce   : > { %v6869_v57 = vadd.f32 %v1963_v52, %v1792_v27  ;;  %v5229_v4 = vpop.f32.mrb[109].mxu0  ;;  %v2052_v59 = vpop.f32.mrb[110].mxu1 }
 0x1cf   : > { %v1966_v22 = vpop.f32.mrb[110].mxu0  ;;  %v2089_v16 = vadd.f32 %v2052_v59, %v6782_v21  ;;  %v5236_v0 = vpop.f32.mrb[111].mxu1  ;;  %v3450_v21 = vrot.slane %v6876_v14, 1  ;;  %v3595_v31 = vsel %vm949_vm5, %v3585_v15, %v3594_v54  ;;  %v3611_v15 = vrot.slane %v3609_v34, 2 }
 0x1d0   : > { %v6873_v18 = vadd.f32 %v1966_v22, %v1793_v50  ;;  %v5230_v41 = vpop.f32.mrb[111].mxu0  ;;  %v3604_v50 = vsel %vm949_vm5, %v3594_v54, %v3603_v2  ;;  %v4748_v22 = vcombine.low %v3715_v39, %v6796_v35 }
 0x1d1   : > { %5462 = vmatmul.mubr.msk.bf16.gmra.mrb[216].mxu1 %vm492_vm3, %v3449_v5  ;;  %v3451_v30 = vsel %vm677_vm4, %v3448_v7, %v3450_v21  ;;  %v3453_v6 = vsel %vm677_vm4, %v3450_v21, %v3452_v11 }
 0x1d2   : > { %5480 = vmatmul.mubr.msk.bf16.gmra.mrb[216].mxu0 %vm492_vm3, %v3586_v62  ;;  %5465 = vmatprep.mubr.msk.bf16.mxu1 %vm5753_vm1, %v5752_v1  ;;  %v3721_v35 = vrot.slane %v4748_v22, 2 }
 0x1d3   : > { %5483 = vmatprep.mubr.msk.bf16.mxu0 %vm5753_vm1, %v5752_v1 }
 0x1d4   : > { %v2057_v20 = vpop.f32.mrb[112].mxu1 }
 0x1d5   : > { %v2202_v29 = vpop.f32.mrb[112].mxu0  ;;  %v2090_v25 = vadd.f32 %v2057_v20, %v6798_v60  ;;  %v5239_v51 = vpop.f32.mrb[113].mxu1  ;;  %v3606_v60 = vshrl.u32 %v6893_v10, 16 }
 0x1d6   : > { %v6889_v37 = vadd.f32 %v2202_v29, %v2088_v8  ;;  %v5257_v13 = vpop.f32.mrb[113].mxu0  ;;  %v2060_v56 = vpop.f32.mrb[114].mxu1  ;;  %v6925_v8 = vld [vmem:[%s5971_s20 + $0xc] sm:$0xf] }
 0x1d7   : > { %v2205_v24 = vpop.f32.mrb[114].mxu0  ;;  %v2091_v55 = vadd.f32 %v2060_v56, %v6802_v48  ;;  %v5240_v47 = vpop.f32.mrb[115].mxu1  ;;  %v3608_v28 = vrot.slane %v3606_v60, 1 }
 0x1d8   : > { %v6896_v38 = vadd.f32 %v2205_v24, %v2089_v16  ;;  %v5258_v45 = vpop.f32.mrb[115].mxu0 }
 0x1d9   : > { %5466 = vmatmul.mubr.msk.bf16.gmra.mrb[220].mxu1 %vm492_vm3, %v3451_v30  ;;  %v3612_v61 = vor.u32 %v3611_v15, %v3608_v28  ;;  %v4773_v45 = vld [vmem:[%s7221_s3 + $0x68] sm:$0xf]  ;;  %v3726_v28 = vrot.slane %v6856_v49, 2 }
 0x1da   : > { %5484 = vmatmul.mubr.msk.bf16.gmra.mrb[220].mxu0 %vm492_vm3, %v3595_v31  ;;  %5469 = vmatprep.mubr.msk.bf16.mxu1 %vm5753_vm1, %v5752_v1 }
 0x1db   : > { %5487 = vmatprep.mubr.msk.bf16.mxu0 %vm5753_vm1, %v5752_v1  ;;  %v3613_v0 = vsel %vm949_vm5, %v3603_v2, %v3612_v61  ;;  %v6964_v2 = vld [vmem:[%s5971_s20 + $0x18] sm:$0xff]  }
 0x1dc   : > { %v2065_v46 = vpop.f32.mrb[116].mxu1 }
 0x1dd   : > { %v2210_v27 = vpop.f32.mrb[116].mxu0  ;;  %v2092_v26 = vadd.f32 %v2065_v46, %v6819_v63  ;;  %v5243_v12 = vpop.f32.mrb[117].mxu1  ;;  %v3833_v63 = vld [vmem:[%s5971_s20 + $0x8] sm:$0xc] }
 0x1de   : > { %v6909_v43 = vadd.f32 %v2210_v27, %v2090_v25  ;;  %v5261_v48 = vpop.f32.mrb[117].mxu0  ;;  %v2068_v4 = vpop.f32.mrb[118].mxu1  ;;  %v6937_v54 = vcombine.low %v3833_v63, %v6925_v8  ;;  %v3875_v25 = vrot.slane %v6940_v32, 2 }
 0x1df   : > { %v2213_v17 = vpop.f32.mrb[118].mxu0  ;;  %v2093_v62 = vadd.f32 %v2068_v4, %v6826_v9  ;;  %v5244_v42 = vpop.f32.mrb[119].mxu1  ;;  %v3722_v9 = vrot.slane %v6807_v3, 2  ;;  %v6984_v4 = vld [vmem:[%s5971_s20 + $0x20] sm:$0xff]  }
 0x1e0   : > { %v6914_v52 = vadd.f32 %v2213_v17, %v2091_v55  ;;  %v5262_v7 = vpop.f32.mrb[119].mxu0 }
 0x1e1   : > { %5470 = vmatmul.mubr.msk.bf16.gmra.mrb[224].mxu1 %vm492_vm3, %v3453_v6  ;;  %v3723_v20 = vsel %vm1110_vm6, %v3721_v35, %v3722_v9  ;;  %v3879_v35 = vrot.slane %v6984_v4, 2 }
 0x1e2   : > { %5488 = vmatmul.mubr.msk.bf16.gmra.mrb[224].mxu0 %vm492_vm3, %v3604_v50  ;;  %5497 = vmatprep.mubr.msk.bf16.mxu1 %vm5753_vm1, %v5752_v1 }
 0x1e3   : > { %5491 = vmatprep.mubr.msk.bf16.mxu0 %vm5753_vm1, %v5752_v1 }
 0x1e4   : > { %v2073_v5 = vpop.f32.mrb[120].mxu1 }
 0x1e5   : > { %v2218_v58 = vpop.f32.mrb[120].mxu0  ;;  %v2094_v29 = vadd.f32 %v2073_v5, %v6846_v44  ;;  %v5247_v21 = vpop.f32.mrb[121].mxu1  ;;  %v3874_v44 = vrot.slane %v6937_v54, 2 }
 0x1e6   : > { %v6930_v41 = vadd.f32 %v2218_v58, %v2092_v26  ;;  %v5265_v59 = vpop.f32.mrb[121].mxu0  ;;  %v2076_v36 = vpop.f32.mrb[122].mxu1 }
 0x1e7   : > { %v2221_v16 = vpop.f32.mrb[122].mxu0  ;;  %v2095_v24 = vadd.f32 %v2076_v36, %v6851_v40  ;;  %v5248_v31 = vpop.f32.mrb[123].mxu1  ;;  %v3724_v40 = vrot.slane %v6830_v19, 2  ;;  %v3876_v47 = vsel %vm1110_vm6, %v3874_v44, %v3875_v25  ;;  %v4179_v19 = vsel %vm508_vm0, %v4773_v45, 0 }
 0x1e8   : > { %v6943_v3 = vadd.f32 %v2221_v16, %v2093_v62  ;;  %v5266_v13 = vpop.f32.mrb[123].mxu0 }
 0x1e9   : > { %5498 = vmatmul.mubr.msk.bf16.vlgmr.msra.gmra.mrb[228].mxu1 %vm492_vm3, %v3723_v20  ;;  %v3725_v39 = vsel %vm1110_vm6, %v3722_v9, %v3724_v40  ;;  %v3727_v63 = vsel %vm1110_vm6, %v3724_v40, %v3726_v28  ;;  %v3728_v9 = vrot.slane %v6876_v14, 2  ;;  %v4004_v40 = vshll.u32 %v6940_v32, 16 }
 0x1ea   : > { %5492 = vmatmul.mubr.msk.bf16.gmra.mrb[228].mxu0 %vm492_vm3, %v3613_v0  ;;  %5540 = vmatpush3.bf16.msra.mxu1 %v4061_v53  ;;  %v3881_v53 = vrot.slane %v7003_v23, 2 }
 0x1eb   : > { %5519 = vmatprep.mubr.msk.bf16.mxu0 %vm5753_vm1, %v5752_v1  ;;  %5501 = vmatprep.mubr.msk.bf16.mxu1 %vm5753_vm1, %v5752_v1 }
 0x1ec   : > { %v2081_v33 = vpop.f32.mrb[124].mxu1 }
 0x1ed   : > { %v2226_v51 = vpop.f32.mrb[124].mxu0  ;;  %v2096_v60 = vadd.f32 %v2081_v33, %v6869_v57  ;;  %v5251_v34 = vpop.f32.mrb[125].mxu1  ;;  %v3877_v57 = vrot.slane %v6964_v2, 2 }
 0x1ee   : > { %v6960_v56 = vadd.f32 %v2226_v51, %v2094_v29  ;;  %v5269_v30 = vpop.f32.mrb[125].mxu0  ;;  %v2084_v48 = vpop.f32.mrb[126].mxu1  ;;  %v4001_v51 = vshrl.u32 %v6940_v32, 16 }
 0x1ef   : > { %v2229_v55 = vpop.f32.mrb[126].mxu0  ;;  %v2097_v46 = vadd.f32 %v2084_v48, %v6873_v18  ;;  %v5252_v17 = vpop.f32.mrb[127].mxu1  ;;  %v3878_v7 = vsel %vm1110_vm6, %v3875_v25, %v3877_v57  ;;  %v3880_v0 = vsel %vm1110_vm6, %v3877_v57, %v3879_v35  ;;  %v3993_v25 = vshrl.u32 %v6937_v54, 16 }
 0x1f0   : > { %v6967_v27 = vadd.f32 %v2229_v55, %v2095_v24  ;;  %v5270_v11 = vpop.f32.mrb[127].mxu0  ;;  %v3729_v24 = vsel %vm1110_vm6, %v3726_v28, %v3728_v9  ;;  %v4003_v17 = vrot.slane %v4001_v51, 2  ;;  %v4006_v57 = vrot.slane %v4004_v40, 3 }
 0x1f1   : > { %5502 = vmatmul.mubr.msk.bf16.gmra.mrb[232].mxu1 %vm492_vm3, %v3725_v39  ;;  %v3995_v39 = vrot.slane %v3993_v25, 2 }
 0x1f2   : > { %5520 = vmatmul.mubr.msk.bf16.vlgmr.msra.gmra.mrb[232].mxu0 %vm492_vm3, %v3876_v47  ;;  %5505 = vmatprep.mubr.msk.bf16.mxu1 %vm5753_vm1, %v5752_v1  ;;  %v3882_v47 = vsel %vm1110_vm6, %v3879_v35, %v3881_v53 }
 0x1f3   : > { %5562 = vmatpush3.bf16.msra.mxu0 %v4179_v19  ;;  %5523 = vmatprep.mubr.msk.bf16.mxu0 %vm5753_vm1, %v5752_v1 }
 0x1f4   : > { %v2362_v26 = vpop.f32.mrb[128].mxu1 }
 0x1f5   : > { %v2234_v50 = vpop.f32.mrb[128].mxu0  ;;  %v2401_v6 = vadd.f32 %v2362_v26, %v6889_v37  ;;  %v5279_v22 = vpop.f32.mrb[129].mxu1 }
 0x1f6   : > { %v6980_v15 = vadd.f32 %v2234_v50, %v2096_v60  ;;  %v5273_v18 = vpop.f32.mrb[129].mxu0  ;;  %v2365_v61 = vpop.f32.mrb[130].mxu1 }
 0x1f7   : > { %v2237_v12 = vpop.f32.mrb[130].mxu0  ;;  %v2402_v49 = vadd.f32 %v2365_v61, %v6896_v38  ;;  %v5280_v58 = vpop.f32.mrb[131].mxu1  ;;  %v4146_v18 = vld [vmem:[%s5971_s20 + $0x8] sm:$0x8] }
 0x1f8   : > { %v6987_v62 = vadd.f32 %v2237_v12, %v2097_v46  ;;  %v5274_v42 = vpop.f32.mrb[131].mxu0  ;;  %v4774_v58 = vcombine.low %v4146_v18, %v6925_v8 }
 0x1f9   : > { %5506 = vmatmul.mubr.msk.bf16.gmra.mrb[236].mxu1 %vm492_vm3, %v3727_v63 }
 0x1fa   : > { %5524 = vmatmul.mubr.msk.bf16.gmra.mrb[236].mxu0 %vm492_vm3, %v3878_v7  ;;  %5509 = vmatprep.mubr.msk.bf16.mxu1 %vm5753_vm1, %v5752_v1  ;;  %v4007_v7 = vor.u32 %v4006_v57, %v4003_v17  ;;  %v4152_v8 = vrot.slane %v4774_v58, 3 }
 0x1fb   : > { %5527 = vmatprep.mubr.msk.bf16.mxu0 %vm5753_vm1, %v5752_v1 }
 0x1fc   : > { %v2370_v38 = vpop.f32.mrb[132].mxu1 }
 0x1fd   : > { %v2480_v37 = vpop.f32.mrb[132].mxu0  ;;  %v2403_v29 = vadd.f32 %v2370_v38, %v6909_v43  ;;  %v5283_v21 = vpop.f32.mrb[133].mxu1  ;;  %v3730_v43 = vrot.slane %v6893_v10, 2  ;;  %v5709_v10 = vld [vmem:[%s5971_s20 + $0x30] ss:$0 sps:$4 sm:$0x33]  }
 0x1fe   : > { %v6999_v59 = vadd.f32 %v2480_v37, %v2401_v6  ;;  %v5301_v5 = vpop.f32.mrb[133].mxu0  ;;  %v2373_v20 = vpop.f32.mrb[134].mxu1  ;;  %v4010_v6 = vshrl.u32 %v6964_v2, 16 }
 0x1ff   : > { %v2483_v16 = vpop.f32.mrb[134].mxu0  ;;  %v2404_v14 = vadd.f32 %v2373_v20, %v6914_v52  ;;  %v5284_v31 = vpop.f32.mrb[135].mxu1  ;;  %v3996_v52 = vshll.u32 %v6937_v54, 16  ;;  %v3731_v54 = vsel %vm1110_vm6, %v3728_v9, %v3730_v43 }
 0x200   : > { %v7006_v13 = vadd.f32 %v2483_v16, %v2402_v49  ;;  %v5302_v36 = vpop.f32.mrb[135].mxu0 }
 0x201   : > { %5510 = vmatmul.mubr.msk.bf16.gmra.mrb[240].mxu1 %vm492_vm3, %v3729_v24  ;;  %v3998_v46 = vrot.slane %v3996_v52, 3 }
 0x202   : > { %5528 = vmatmul.mubr.msk.bf16.gmra.mrb[240].mxu0 %vm492_vm3, %v3880_v0  ;;  %5513 = vmatprep.mubr.msk.bf16.mxu1 %vm5753_vm1, %v5752_v1  ;;  %v4012_v0 = vrot.slane %v4010_v6, 2  ;;  %v5711_v6 = vld [vmem:[%s5971_s20 + $0x30] ss:$0 sps:$4 sm:$0x77]   ;;  %s5589_s20 = smul.u32 10, %s7243_s21 }
 0x203   : > { %5531 = vmatprep.mubr.msk.bf16.mxu0 %vm5753_vm1, %v5752_v1  ;;  %v3999_v12 = vor.u32 %v3998_v46, %v3995_v39  ;;  %v4040_v58 = vshll.u32 %v5711_v6, 16 }
 0x204   : > { %v2378_v33 = vpop.f32.mrb[136].mxu1  ;;  %s7135_s7 = sadd.s32 %s5590_s12, %s5589_s20 }
 0x205   : > { %v2488_v44 = vpop.f32.mrb[136].mxu0  ;;  %v2405_v60 = vadd.f32 %v2378_v33, %v6930_v41  ;;  %v5287_v34 = vpop.f32.mrb[137].mxu1  ;;  %v3883_v41 = vrot.slane %v5709_v10, 2  ;;  %v4008_v16 = vsel %vm1382_vm7, %v3999_v12, %v4007_v7  ;;  %s4538_s21 = sshll.u32 %s7135_s7, 2 }
 0x206   : > { %v7022_v45 = vadd.f32 %v2488_v44, %v2403_v29  ;;  %v5305_v30 = vpop.f32.mrb[137].mxu0  ;;  %v2381_v48 = vpop.f32.mrb[138].mxu1  ;;  %v4155_v34 = vrot.slane %v6964_v2, 3  ;;  %s7147_s28 = scalar_lea.vmem %s7223_s5, %s4538_s21  ;;  %s7164_s10 = scalar_lea.vmem %s7224_s6, %s4538_s21 }
 0x207   : > { %v2491_v55 = vpop.f32.mrb[138].mxu0  ;;  %v2406_v50 = vadd.f32 %v2381_v48, %v6943_v3  ;;  %v5288_v28 = vpop.f32.mrb[139].mxu1  ;;  %v4013_v3 = vshll.u32 %v6964_v2, 16  ;;  %v3884_v49 = vsel %vm1110_vm6, %v3881_v53, %v3883_v41 }
 0x208   : > { %v7027_v11 = vadd.f32 %v2491_v55, %v2404_v14  ;;  %v5306_v19 = vpop.f32.mrb[139].mxu0  ;;  %v4019_v14 = vshrl.u32 %v6984_v4, 16 }
 0x209   : > { %5514 = vmatmul.mubr.msk.bf16.gmra.mrb[244].mxu1 %vm492_vm3, %v3731_v54  ;;  %v4015_v29 = vrot.slane %v4013_v3, 3  ;;  %v4028_v54 = vshrl.u32 %v7003_v23, 16 }
 0x20a   : > { %5532 = vmatmul.mubr.msk.bf16.gmra.mrb[244].mxu0 %vm492_vm3, %v3882_v47  ;;  %5541 = vmatprep.mubr.msk.bf16.mxu1 %vm5753_vm1, %v5752_v1  ;;  %v4021_v55 = vrot.slane %v4019_v14, 2  ;;  %v4159_v14 = vrot.slane %v7003_v23, 3 }
 0x20b   : > { %5535 = vmatprep.mubr.msk.bf16.mxu0 %vm5753_vm1, %v5752_v1  ;;  %v4016_v24 = vor.u32 %v4015_v29, %v4012_v0  ;;  %v4030_v12 = vrot.slane %v4028_v54, 2 }
 0x20c   : > { %v2386_v61 = vpop.f32.mrb[140].mxu1 }
 0x20d   : > { %v2496_v26 = vpop.f32.mrb[140].mxu0  ;;  %v2407_v35 = vadd.f32 %v2386_v61, %v6960_v56  ;;  %v5291_v37 = vpop.f32.mrb[141].mxu1  ;;  %v4153_v56 = vrot.slane %v6940_v32, 3  ;;  %v4017_v33 = vsel %vm1382_vm7, %v4007_v7, %v4016_v24 }
 0x20e   : > { %v7040_v22 = vadd.f32 %v2496_v26, %v2405_v60  ;;  %v5309_v42 = vpop.f32.mrb[141].mxu0  ;;  %v2389_v38 = vpop.f32.mrb[142].mxu1 }
 0x20f   : > { %v2499_v63 = vpop.f32.mrb[142].mxu0  ;;  %v2408_v21 = vadd.f32 %v2389_v38, %v6967_v27  ;;  %v5292_v36 = vpop.f32.mrb[143].mxu1  ;;  %v4022_v27 = vshll.u32 %v6984_v4, 16  ;;  %v4154_v25 = vsel %vm1543_vm8, %v4152_v8, %v4153_v56  ;;  %v4156_v57 = vsel %vm1543_vm8, %v4153_v56, %v4155_v34 }
 0x210   : > { %v7045_v9 = vadd.f32 %v2499_v63, %v2406_v50  ;;  %v5310_v5 = vpop.f32.mrb[143].mxu0  ;;  %v4042_v56 = vrot.slane %v4040_v58, 3 }
 0x211   : > { %5542 = vmatmul.mubr.msk.bf16.vlgmr.msra.gmra.mrb[248].mxu1 %vm492_vm3, %v4008_v16  ;;  %v4024_v47 = vrot.slane %v4022_v27, 3 }
 0x212   : > { %5536 = vmatmul.mubr.msk.bf16.gmra.mrb[248].mxu0 %vm492_vm3, %v3884_v49  ;;  %5545 = vmatprep.mubr.msk.bf16.mxu1 %vm5753_vm1, %v5752_v1  ;;  %v4037_v49 = vshrl.u32 %v5711_v6, 16 }
 0x213   : > { %5563 = vmatprep.mubr.msk.bf16.mxu0 %vm5753_vm1, %v5752_v1 }
 0x214   : > { %v2394_v43 = vpop.f32.mrb[144].mxu1  ;;  %v4039_v8 = vrot.slane %v4037_v49, 2 }
 0x215   : > { %v2504_v20 = vpop.f32.mrb[144].mxu0  ;;  %v2409_v32 = vadd.f32 %v2394_v43, %v6980_v15  ;;  %v5295_v52 = vpop.f32.mrb[145].mxu1  ;;  %v4025_v15 = vor.u32 %v4024_v47, %v4021_v55 }
 0x216   : > { %v7058_v31 = vadd.f32 %v2504_v20, %v2407_v35  ;;  %v5313_v53 = vpop.f32.mrb[145].mxu0  ;;  %v2397_v30 = vpop.f32.mrb[146].mxu1  ;;  %v4043_v27 = vor.u32 %v4042_v56, %v4039_v8 }
 0x217   : > { %v2507_v44 = vpop.f32.mrb[146].mxu0  ;;  %v2410_v10 = vadd.f32 %v2397_v30, %v6987_v62  ;;  %v5296_v60 = vpop.f32.mrb[147].mxu1  ;;  %v4031_v62 = vshll.u32 %v7003_v23, 16  ;;  %v4026_v18 = vsel %vm1382_vm7, %v4016_v24, %v4025_v15 }
 0x218   : > { %v7062_v51 = vadd.f32 %v2507_v44, %v2408_v21  ;;  %v5314_v40 = vpop.f32.mrb[147].mxu0 }
 0x219   : > { %5546 = vmatmul.mubr.msk.bf16.gmra.mrb[252].mxu1 %vm492_vm3, %v4017_v33  ;;  %v4033_v7 = vrot.slane %v4031_v62, 3 }
 0x21a   : > { %5564 = vmatmul.mubr.msk.bf16.vlgmr.msra.gmra.mrb[252].mxu0 %vm492_vm3, %v4154_v25  ;;  %5549 = vmatprep.mubr.msk.bf16.mxu1 %vm5753_vm1, %v5752_v1 }
 0x21b   : > { %5567 = vmatprep.mubr.msk.bf16.mxu0 %vm5753_vm1, %v5752_v1  ;;  %v4034_v63 = vor.u32 %v4033_v7, %v4030_v12 }
 0x21c   : > { %v2633_v46 = vpop.f32.mrb[148].mxu1 }
 0x21d   : > { %v2512_v19 = vpop.f32.mrb[148].mxu0  ;;  %v2672_v2 = vadd.f32 %v2633_v46, %v6999_v59  ;;  %v5323_v50 = vpop.f32.mrb[149].mxu1  ;;  %v4157_v59 = vrot.slane %v6984_v4, 3  ;;  %v4035_v36 = vsel %vm1382_vm7, %v4025_v15, %v4034_v63  ;;  %v4044_v23 = vsel %vm1382_vm7, %v4034_v63, %v4043_v27 }
 0x21e   : > { %v7075_v48 = vadd.f32 %v2512_v19, %v2409_v32  ;;  %v5317_v39 = vpop.f32.mrb[149].mxu0  ;;  %v2636_v26 = vpop.f32.mrb[150].mxu1 }
 0x21f   : > { %v2515_v17 = vpop.f32.mrb[150].mxu0  ;;  %v2673_v3 = vadd.f32 %v2636_v26, %v7006_v13  ;;  %v5324_v42 = vpop.f32.mrb[151].mxu1  ;;  %v4158_v38 = vsel %vm1543_vm8, %v4155_v34, %v4157_v59 }
 0x220   : > { %v7079_v28 = vadd.f32 %v2515_v17, %v2410_v10  ;;  %v5318_v41 = vpop.f32.mrb[151].mxu0  ;;  %v4161_v10 = vrot.slane %v5711_v6, 3 }
 0x221   : > { %5550 = vmatmul.mubr.msk.bf16.gmra.mrb[0].mxu1 %vm492_vm3, %v4026_v18 }
 0x222   : > { %5568 = vmatmul.mubr.msk.bf16.gmra.mrb[0].mxu0 %vm492_vm3, %v4156_v57  ;;  %5553 = vmatprep.mubr.msk.bf16.mxu1 %vm5753_vm1, %v5752_v1  ;;  %v4162_v54 = vsel %vm1543_vm8, %v4159_v14, %v4161_v10 }
 0x223   : > { %5571 = vmatprep.mubr.msk.bf16.mxu0 %vm5753_vm1, %v5752_v1 }
 0x224   : > { %v2641_v37 = vpop.f32.mrb[152].mxu1 }
 0x225   : > { %v2793_v61 = vpop.f32.mrb[152].mxu0  ;;  %v2674_v16 = vadd.f32 %v2641_v37, %v7022_v45  ;;  %v5327_v0 = vpop.f32.mrb[153].mxu1 }
 0x226   : > { %v7091_v35 = vadd.f32 %v2793_v61, %v2672_v2  ;;  %v5345_v13 = vpop.f32.mrb[153].mxu0  ;;  %v2644_v21 = vpop.f32.mrb[154].mxu1 }
 0x227   : > { %v2796_v5 = vpop.f32.mrb[154].mxu0  ;;  %v2675_v20 = vadd.f32 %v2644_v21, %v7027_v11  ;;  %v5328_v24 = vpop.f32.mrb[155].mxu1  ;;  %v4160_v11 = vsel %vm1543_vm8, %v4157_v59, %v4159_v14 }
 0x228   : > { %v7095_v4 = vadd.f32 %v2796_v5, %v2673_v3  ;;  %v5346_v29 = vpop.f32.mrb[155].mxu0 }
 0x229   : > { %5554 = vmatmul.mubr.msk.bf16.gmra.mrb[4].mxu1 %vm492_vm3, %v4035_v36 }
 0x22a   : > { %5572 = vmatmul.mubr.msk.bf16.gmra.mrb[4].mxu0 %vm492_vm3, %v4158_v38  ;;  %5557 = vmatprep.mubr.msk.bf16.mxu1 %vm5753_vm1, %v5752_v1 }
 0x22b   : > { %5575 = vmatprep.mubr.msk.bf16.mxu0 %vm5753_vm1, %v5752_v1 }
 0x22c   : > { %v2649_v44 = vpop.f32.mrb[156].mxu1 }
 0x22d   : > { %v2801_v45 = vpop.f32.mrb[156].mxu0  ;;  %v2676_v32 = vadd.f32 %v2649_v44, %v7040_v22  ;;  %v5331_v52 = vpop.f32.mrb[157].mxu1 }
 0x22e   : > { %v2834_v53 = vadd.f32 %v2801_v45, %v2674_v16  ;;  %v5349_v43 = vpop.f32.mrb[157].mxu0  ;;  %v2652_v33 = vpop.f32.mrb[158].mxu1 }
 0x22f   : > { %v2804_v25 = vpop.f32.mrb[158].mxu0  ;;  %v2677_v55 = vadd.f32 %v2652_v33, %v7045_v9  ;;  %v5332_v47 = vpop.f32.mrb[159].mxu1 }
 0x230   : > { %v2835_v40 = vadd.f32 %v2804_v25, %v2675_v20  ;;  %v5350_v30 = vpop.f32.mrb[159].mxu0 }
 0x231   : > { %5558 = vmatmul.mubr.msk.bf16.gmra.mrb[8].mxu1 %vm492_vm3, %v4044_v23 }
 0x232   : > { %5576 = vmatmul.mubr.msk.bf16.gmra.mrb[8].mxu0 %vm492_vm3, %v4160_v11 }
 0x233   : > { %5579 = vmatprep.mubr.msk.bf16.mxu0 %vm5753_vm1, %v5752_v1 }
 0x234   : > { %v2657_v15 = vpop.f32.mrb[160].mxu1 }
 0x235   : > { %v2809_v60 = vpop.f32.mrb[160].mxu0  ;;  %v2678_v62 = vadd.f32 %v2657_v15, %v7058_v31  ;;  %v5335_v39 = vpop.f32.mrb[161].mxu1 }
 0x236   : > { %v2836_v34 = vadd.f32 %v2809_v60, %v2676_v32  ;;  %v5353_v22 = vpop.f32.mrb[161].mxu0  ;;  %v2660_v17 = vpop.f32.mrb[162].mxu1 }
 0x237   : > { %v2812_v19 = vpop.f32.mrb[162].mxu0  ;;  %v2679_v57 = vadd.f32 %v2660_v17, %v7062_v51  ;;  %v5336_v1 = vpop.f32.mrb[163].mxu1 }
 0x238   : > { %v2837_v9 = vadd.f32 %v2812_v19, %v2677_v55  ;;  %v5354_v46 = vpop.f32.mrb[163].mxu0 }
 0x23a   : > { %5580 = vmatmul.mubr.msk.bf16.gmra.mrb[12].mxu0 %vm492_vm3, %v4162_v54 }
 0x23c   : > { %v2665_v18 = vpop.f32.mrb[164].mxu1 }
 0x23d   : > { %v2817_v2 = vpop.f32.mrb[164].mxu0  ;;  %v2680_v12 = vadd.f32 %v2665_v18, %v7075_v48  ;;  %v5339_v7 = vpop.f32.mrb[165].mxu1 }
 0x23e   : > { %v2838_v50 = vadd.f32 %v2817_v2, %v2678_v62  ;;  %v5357_v41 = vpop.f32.mrb[165].mxu0  ;;  %v2668_v31 = vpop.f32.mrb[166].mxu1 }
 0x23f   : > { %v2820_v26 = vpop.f32.mrb[166].mxu0  ;;  %v2681_v42 = vadd.f32 %v2668_v31, %v7079_v28  ;;  %v5340_v59 = vpop.f32.mrb[167].mxu1 }
 0x240   : > { %v2839_v6 = vadd.f32 %v2820_v26, %v2679_v57  ;;  %v5358_v3 = vpop.f32.mrb[167].mxu0 }
 0x244   : > { %v2911_v49 = vpop.f32.mrb[168].mxu1 }
 0x245   : > { %v2825_v61 = vpop.f32.mrb[168].mxu0  ;;  %v2950_v13 = vadd.f32 %v2911_v49, %v7091_v35  ;;  %v5367_v37 = vpop.f32.mrb[169].mxu1 }
 0x246   : > { %v2840_v63 = vadd.f32 %v2825_v61, %v2680_v12  ;;  %v5361_v51 = vpop.f32.mrb[169].mxu0  ;;  %v2914_v16 = vpop.f32.mrb[170].mxu1 }
 0x247   : > { %v2828_v58 = vpop.f32.mrb[170].mxu0  ;;  %v2951_v48 = vadd.f32 %v2914_v16, %v7095_v4  ;;  %v5368_v0 = vpop.f32.mrb[171].mxu1 }
 0x248   : > { %v2841_v5 = vadd.f32 %v2828_v58, %v2681_v42  ;;  %v5362_v38 = vpop.f32.mrb[171].mxu0 }
 0x24c   : > { %v2919_v8 = vpop.f32.mrb[172].mxu1 }
 0x24d   : > { %v3049_v29 = vpop.f32.mrb[172].mxu0  ;;  %v2952_v56 = vadd.f32 %v2919_v8, %v2834_v53  ;;  %v5371_v20 = vpop.f32.mrb[173].mxu1 }
 0x24e   : > { %v3088_v21 = vadd.f32 %v3049_v29, %v2950_v13  ;;  %v5389_v36 = vpop.f32.mrb[173].mxu0  ;;  %v2922_v45 = vpop.f32.mrb[174].mxu1 }
 0x24f   : > { %v3052_v28 = vpop.f32.mrb[174].mxu0  ;;  %v2953_v27 = vadd.f32 %v2922_v45, %v2835_v40  ;;  %v5372_v43 = vpop.f32.mrb[175].mxu1 }
 0x250   : > { %v3089_v24 = vadd.f32 %v3052_v28, %v2951_v48  ;;  %v5390_v14 = vpop.f32.mrb[175].mxu0 }
 0x254   : > { %v2927_v11 = vpop.f32.mrb[176].mxu1 }
 0x255   : > { %v3057_v35 = vpop.f32.mrb[176].mxu0  ;;  %v2954_v52 = vadd.f32 %v2927_v11, %v2836_v34  ;;  %v5375_v4 = vpop.f32.mrb[177].mxu1 }
 0x256   : > { %v3090_v44 = vadd.f32 %v3057_v35, %v2952_v56  ;;  %v5393_v25 = vpop.f32.mrb[177].mxu0  ;;  %v2930_v23 = vpop.f32.mrb[178].mxu1 }
 0x257   : > { %v3060_v32 = vpop.f32.mrb[178].mxu0  ;;  %v2955_v55 = vadd.f32 %v2930_v23, %v2837_v9  ;;  %v5376_v47 = vpop.f32.mrb[179].mxu1 }
 0x258   : > { %v3091_v30 = vadd.f32 %v3060_v32, %v2953_v27  ;;  %v5394_v33 = vpop.f32.mrb[179].mxu0 }
 0x25c   : > { %v2935_v22 = vpop.f32.mrb[180].mxu1 }
 0x25d   : > { %v3065_v10 = vpop.f32.mrb[180].mxu0  ;;  %v2956_v19 = vadd.f32 %v2935_v22, %v2838_v50  ;;  %v5379_v40 = vpop.f32.mrb[181].mxu1 }
 0x25e   : > { %v3092_v53 = vadd.f32 %v3065_v10, %v2954_v52  ;;  %v5397_v60 = vpop.f32.mrb[181].mxu0  ;;  %v2938_v39 = vpop.f32.mrb[182].mxu1 }
 0x25f   : > { %v3068_v15 = vpop.f32.mrb[182].mxu0  ;;  %v2957_v46 = vadd.f32 %v2938_v39, %v2839_v6  ;;  %v5380_v17 = vpop.f32.mrb[183].mxu1 }
 0x260   : > { %v3093_v54 = vadd.f32 %v3068_v15, %v2955_v55  ;;  %v5398_v62 = vpop.f32.mrb[183].mxu0 }
 0x264   : > { %v2943_v2 = vpop.f32.mrb[184].mxu1 }
 0x265   : > { %v3073_v57 = vpop.f32.mrb[184].mxu0  ;;  %v2958_v18 = vadd.f32 %v2943_v2, %v2840_v63  ;;  %v5383_v9 = vpop.f32.mrb[185].mxu1 }
 0x266   : > { %v3094_v34 = vadd.f32 %v3073_v57, %v2956_v19  ;;  %v5401_v1 = vpop.f32.mrb[185].mxu0  ;;  %v2946_v7 = vpop.f32.mrb[186].mxu1 }
 0x267   : > { %v3076_v41 = vpop.f32.mrb[186].mxu0  ;;  %v2959_v3 = vadd.f32 %v2946_v7, %v2841_v5  ;;  %v5384_v31 = vpop.f32.mrb[187].mxu1 }
 0x268   : > { %v3095_v26 = vadd.f32 %v3076_v41, %v2957_v46  ;;  %v5402_v12 = vpop.f32.mrb[187].mxu0 }
 0x26c   : > { %v3235_v61 = vpop.f32.mrb[188].mxu1 }
 0x26d   : > { %v3081_v42 = vpop.f32.mrb[188].mxu0  ;;  %v3274_v49 = vadd.f32 %v3235_v61, %v3088_v21  ;;  %v5411_v6 = vpop.f32.mrb[189].mxu1 }
 0x26e   : > { %v3096_v50 = vadd.f32 %v3081_v42, %v2958_v18  ;;  %v5405_v59 = vpop.f32.mrb[189].mxu0  ;;  %v3238_v37 = vpop.f32.mrb[190].mxu1 }
 0x26f   : > { %v3084_v51 = vpop.f32.mrb[190].mxu0  ;;  %v3275_v38 = vadd.f32 %v3238_v37, %v3089_v24  ;;  %v5412_v16 = vpop.f32.mrb[191].mxu1 }
 0x270   : > { %v3097_v58 = vadd.f32 %v3084_v51, %v2959_v3  ;;  %v5406_v13 = vpop.f32.mrb[191].mxu0 }
 0x274   : > { %v3243_v29 = vpop.f32.mrb[192].mxu1 }
 0x275   : > { %v3353_v48 = vpop.f32.mrb[192].mxu0  ;;  %v3276_v8 = vadd.f32 %v3243_v29, %v3090_v44  ;;  %v5415_v5 = vpop.f32.mrb[193].mxu1 }
 0x276   : > { %v3392_v63 = vadd.f32 %v3353_v48, %v3274_v49  ;;  %v5433_v0 = vpop.f32.mrb[193].mxu0  ;;  %v3246_v20 = vpop.f32.mrb[194].mxu1 }
 0x277   : > { %v3356_v36 = vpop.f32.mrb[194].mxu0  ;;  %v3277_v14 = vadd.f32 %v3246_v20, %v3091_v30  ;;  %v5416_v45 = vpop.f32.mrb[195].mxu1 }
 0x278   : > { %v3393_v28 = vadd.f32 %v3356_v36, %v3275_v38  ;;  %v5434_v56 = vpop.f32.mrb[195].mxu0 }
 0x27c   : > { %v3251_v35 = vpop.f32.mrb[196].mxu1 }
 0x27d   : > { %v3361_v27 = vpop.f32.mrb[196].mxu0  ;;  %v3278_v11 = vadd.f32 %v3251_v35, %v3092_v53  ;;  %v5419_v24 = vpop.f32.mrb[197].mxu1 }
 0x27e   : > { %v3394_v21 = vadd.f32 %v3361_v27, %v3276_v8  ;;  %v5437_v43 = vpop.f32.mrb[197].mxu0  ;;  %v3254_v4 = vpop.f32.mrb[198].mxu1 }
 0x27f   : > { %v3364_v25 = vpop.f32.mrb[198].mxu0  ;;  %v3279_v33 = vadd.f32 %v3254_v4, %v3093_v54  ;;  %v5420_v23 = vpop.f32.mrb[199].mxu1 }
 0x280   : > { %v3395_v32 = vadd.f32 %v3364_v25, %v3277_v14  ;;  %v5438_v52 = vpop.f32.mrb[199].mxu0 }
 0x284   : > { %v3259_v10 = vpop.f32.mrb[200].mxu1 }
 0x285   : > { %v3369_v55 = vpop.f32.mrb[200].mxu0  ;;  %v3280_v22 = vadd.f32 %v3259_v10, %v3094_v34  ;;  %v5423_v30 = vpop.f32.mrb[201].mxu1 }
 0x286   : > { %v3396_v44 = vadd.f32 %v3369_v55, %v3278_v11  ;;  %v5441_v47 = vpop.f32.mrb[201].mxu0  ;;  %v3262_v40 = vpop.f32.mrb[202].mxu1 }
 0x287   : > { %v3372_v60 = vpop.f32.mrb[202].mxu0  ;;  %v3281_v62 = vadd.f32 %v3262_v40, %v3095_v26  ;;  %v5424_v39 = vpop.f32.mrb[203].mxu1 }
 0x288   : > { %v3397_v15 = vadd.f32 %v3372_v60, %v3279_v33  ;;  %v5442_v19 = vpop.f32.mrb[203].mxu0 }
 0x28c   : > { %v3267_v57 = vpop.f32.mrb[204].mxu1 }
 0x28d   : > { %v3377_v46 = vpop.f32.mrb[204].mxu0  ;;  %v3282_v2 = vadd.f32 %v3267_v57, %v3096_v50  ;;  %v5427_v54 = vpop.f32.mrb[205].mxu1 }
 0x28e   : > { %v3398_v53 = vadd.f32 %v3377_v46, %v3280_v22  ;;  %v5445_v17 = vpop.f32.mrb[205].mxu0  ;;  %v3270_v9 = vpop.f32.mrb[206].mxu1 }
 0x28f   : > { %v3380_v1 = vpop.f32.mrb[206].mxu0  ;;  %v3283_v12 = vadd.f32 %v3270_v9, %v3097_v58  ;;  %v5428_v7 = vpop.f32.mrb[207].mxu1 }
 0x290   : > { %v3399_v41 = vadd.f32 %v3380_v1, %v3281_v62  ;;  %v5446_v18 = vpop.f32.mrb[207].mxu0 }
 0x294   : > { %v3506_v42 = vpop.f32.mrb[208].mxu1 }
 0x295   : > { %v3385_v3 = vpop.f32.mrb[208].mxu0  ;;  %v3545_v61 = vadd.f32 %v3506_v42, %v3392_v63  ;;  %v5455_v26 = vpop.f32.mrb[209].mxu1 }
 0x296   : > { %v3400_v34 = vadd.f32 %v3385_v3, %v3282_v2  ;;  %v5449_v31 = vpop.f32.mrb[209].mxu0  ;;  %v3509_v6 = vpop.f32.mrb[210].mxu1 }
 0x297   : > { %v3388_v59 = vpop.f32.mrb[210].mxu0  ;;  %v3546_v13 = vadd.f32 %v3509_v6, %v3393_v28  ;;  %v5456_v37 = vpop.f32.mrb[211].mxu1 }
 0x298   : > { %v3401_v51 = vadd.f32 %v3388_v59, %v3283_v12  ;;  %v5450_v49 = vpop.f32.mrb[211].mxu0 }
 0x29c   : > { %v3514_v48 = vpop.f32.mrb[212].mxu1 }
 0x29d   : > { %v3666_v38 = vpop.f32.mrb[212].mxu0  ;;  %v3547_v29 = vadd.f32 %v3514_v48, %v3394_v21  ;;  %v5459_v58 = vpop.f32.mrb[213].mxu1 }
 0x29e   : > { %v3705_v50 = vadd.f32 %v3666_v38, %v3545_v61  ;;  %v5477_v16 = vpop.f32.mrb[213].mxu0  ;;  %v3517_v5 = vpop.f32.mrb[214].mxu1 }
 0x29f   : > { %v3669_v0 = vpop.f32.mrb[214].mxu0  ;;  %v3548_v56 = vadd.f32 %v3517_v5, %v3395_v32  ;;  %v5460_v20 = vpop.f32.mrb[215].mxu1 }
 0x2a0   : > { %v3706_v36 = vadd.f32 %v3669_v0, %v3546_v13  ;;  %v5478_v8 = vpop.f32.mrb[215].mxu0 }
 0x2a4   : > { %v3522_v27 = vpop.f32.mrb[216].mxu1 }
 0x2a5   : > { %v3674_v14 = vpop.f32.mrb[216].mxu0  ;;  %v3549_v35 = vadd.f32 %v3522_v27, %v3396_v44  ;;  %v5463_v28 = vpop.f32.mrb[217].mxu1 }
 0x2a6   : > { %v3707_v63 = vadd.f32 %v3674_v14, %v3547_v29  ;;  %v5481_v45 = vpop.f32.mrb[217].mxu0  ;;  %v3525_v24 = vpop.f32.mrb[218].mxu1 }
 0x2a7   : > { %v3677_v43 = vpop.f32.mrb[218].mxu0  ;;  %v3550_v52 = vadd.f32 %v3525_v24, %v3397_v15  ;;  %v5464_v4 = vpop.f32.mrb[219].mxu1 }
 0x2a8   : > { %v3708_v25 = vadd.f32 %v3677_v43, %v3548_v56  ;;  %v5482_v11 = vpop.f32.mrb[219].mxu0 }
 0x2ac   : > { %v3530_v55 = vpop.f32.mrb[220].mxu1 }
 0x2ad   : > { %v3682_v33 = vpop.f32.mrb[220].mxu0  ;;  %v3551_v10 = vadd.f32 %v3530_v55, %v3398_v53  ;;  %v5467_v32 = vpop.f32.mrb[221].mxu1 }
 0x2ae   : > { %v3709_v21 = vadd.f32 %v3682_v33, %v3549_v35  ;;  %v5485_v23 = vpop.f32.mrb[221].mxu0  ;;  %v3533_v30 = vpop.f32.mrb[222].mxu1 }
 0x2af   : > { %v3685_v47 = vpop.f32.mrb[222].mxu0  ;;  %v3552_v19 = vadd.f32 %v3533_v30, %v3399_v41  ;;  %v5468_v40 = vpop.f32.mrb[223].mxu1 }
 0x2b0   : > { %v3710_v60 = vadd.f32 %v3685_v47, %v3550_v52  ;;  %v5486_v22 = vpop.f32.mrb[223].mxu0 }
 0x2b4   : > { %v3538_v46 = vpop.f32.mrb[224].mxu1 }
 0x2b5   : > { %v3690_v62 = vpop.f32.mrb[224].mxu0  ;;  %v3553_v57 = vadd.f32 %v3538_v46, %v3400_v34  ;;  %v5471_v15 = vpop.f32.mrb[225].mxu1 }
 0x2b6   : > { %v3711_v44 = vadd.f32 %v3690_v62, %v3551_v10  ;;  %v5489_v39 = vpop.f32.mrb[225].mxu0  ;;  %v3541_v54 = vpop.f32.mrb[226].mxu1 }
 0x2b7   : > { %v3693_v17 = vpop.f32.mrb[226].mxu0  ;;  %v3554_v18 = vadd.f32 %v3541_v54, %v3401_v51  ;;  %v5472_v9 = vpop.f32.mrb[227].mxu1 }
 0x2b8   : > { %v3712_v1 = vadd.f32 %v3693_v17, %v3552_v19  ;;  %v5490_v2 = vpop.f32.mrb[227].mxu0 }
 0x2bc   : > { %v3784_v3 = vpop.f32.mrb[228].mxu1 }
 0x2bd   : > { %v3698_v12 = vpop.f32.mrb[228].mxu0  ;;  %v3823_v42 = vadd.f32 %v3784_v3, %v3705_v50  ;;  %v5499_v41 = vpop.f32.mrb[229].mxu1 }
 0x2be   : > { %v3713_v53 = vadd.f32 %v3698_v12, %v3553_v57  ;;  %v5493_v7 = vpop.f32.mrb[229].mxu0  ;;  %v3787_v26 = vpop.f32.mrb[230].mxu1 }
 0x2bf   : > { %v3701_v31 = vpop.f32.mrb[230].mxu0  ;;  %v3824_v49 = vadd.f32 %v3787_v26, %v3706_v36  ;;  %v5500_v6 = vpop.f32.mrb[231].mxu1 }
 0x2c0   : > { %v3714_v59 = vadd.f32 %v3701_v31, %v3554_v18  ;;  %v5494_v61 = vpop.f32.mrb[231].mxu0 }
 0x2c1   : > { %v4804_v61 = vld [vmem:[%s7147_s28] sm:$0xff]  }
 0x2c4   : > { %v3792_v38 = vpop.f32.mrb[232].mxu1 }
 0x2c5   : > { %v3937_v13 = vpop.f32.mrb[232].mxu0  ;;  %v3825_v48 = vadd.f32 %v3792_v38, %v3707_v63  ;;  %v5503_v51 = vpop.f32.mrb[233].mxu1 }
 0x2c6   : > { %v3976_v34 = vadd.f32 %v3937_v13, %v3823_v42  ;;  %v5521_v37 = vpop.f32.mrb[233].mxu0  ;;  %v3795_v58 = vpop.f32.mrb[234].mxu1  ;;  %v4805_v13 = vunpack.c.l.bf16 %v4804_v61 }
 0x2c7   : > { %v3940_v16 = vpop.f32.mrb[234].mxu0  ;;  %v3826_v8 = vadd.f32 %v3795_v58, %v3708_v25  ;;  %v5504_v5 = vpop.f32.mrb[235].mxu1 }
 0x2c8   : > { %v3977_v0 = vadd.f32 %v3940_v16, %v3824_v49  ;;  %v5522_v29 = vpop.f32.mrb[235].mxu0  ;;  %v7153_v49 = vld [vmem:[%s7222_s4] ss:$0 sm:$0xff] }
 0x2c9   : > { %v4806_v29 = vunpack.c.h.bf16 %v4804_v61 }
 0x2cc   : > { %v3800_v14 = vpop.f32.mrb[236].mxu1 }
 0x2cd   : > { %v3945_v50 = vpop.f32.mrb[236].mxu0  ;;  %v3827_v36 = vadd.f32 %v3800_v14, %v3709_v21  ;;  %v5507_v27 = vpop.f32.mrb[237].mxu1 }
 0x2ce   : > { %v3978_v56 = vadd.f32 %v3945_v50, %v3825_v48  ;;  %v5525_v20 = vpop.f32.mrb[237].mxu0  ;;  %v3803_v28 = vpop.f32.mrb[238].mxu1 }
 0x2cf   : > { %v3948_v45 = vpop.f32.mrb[238].mxu0  ;;  %v3828_v63 = vadd.f32 %v3803_v28, %v3710_v60  ;;  %v5508_v11 = vpop.f32.mrb[239].mxu1 }
 0x2d0   : > { %v7122_v43 = vadd.f32 %v3948_v45, %v3826_v8  ;;  %v5526_v35 = vpop.f32.mrb[239].mxu0  ;;  %v4823_v45 = vld [vmem:[%s7147_s28 + $0x8] sm:$0xff]  }
 0x2d4   : > { %v3808_v4 = vpop.f32.mrb[240].mxu1 }
 0x2d5   : > { %v3953_v24 = vpop.f32.mrb[240].mxu0  ;;  %v3829_v23 = vadd.f32 %v3808_v4, %v3711_v44  ;;  %v5511_v55 = vpop.f32.mrb[241].mxu1  ;;  %v4810_v4 = vunpack.c.h.bf16 %v4823_v45 }
 0x2d6   : > { %v7125_v52 = vadd.f32 %v3953_v24, %v3827_v36  ;;  %v5529_v25 = vpop.f32.mrb[241].mxu0  ;;  %v3811_v10 = vpop.f32.mrb[242].mxu1 }
 0x2d7   : > { %v3956_v33 = vpop.f32.mrb[242].mxu0  ;;  %v3830_v32 = vadd.f32 %v3811_v10, %v3712_v1  ;;  %v5512_v22 = vpop.f32.mrb[243].mxu1 }
 0x2d8   : > { %v7127_v47 = vadd.f32 %v3956_v33, %v3828_v63  ;;  %v5530_v21 = vpop.f32.mrb[243].mxu0 }
 0x2dc   : > { %v3816_v40 = vpop.f32.mrb[244].mxu1 }
 0x2dd   : > { %v3961_v30 = vpop.f32.mrb[244].mxu0  ;;  %v3831_v39 = vadd.f32 %v3816_v40, %v3713_v53  ;;  %v5515_v46 = vpop.f32.mrb[245].mxu1 }
 0x2de   : > { %v7130_v60 = vadd.f32 %v3961_v30, %v3829_v23  ;;  %v5533_v19 = vpop.f32.mrb[245].mxu0  ;;  %v3819_v57 = vpop.f32.mrb[246].mxu1 }
 0x2df   : > { %v3964_v62 = vpop.f32.mrb[246].mxu0  ;;  %v3832_v15 = vadd.f32 %v3819_v57, %v3714_v59  ;;  %v5516_v2 = vpop.f32.mrb[247].mxu1 }
 0x2e0   : > { %v7133_v17 = vadd.f32 %v3964_v62, %v3830_v32  ;;  %v5534_v44 = vpop.f32.mrb[247].mxu0 }
 0x2e4   : > { %v4097_v9 = vpop.f32.mrb[248].mxu1 }
 0x2e5   : > { %v3969_v1 = vpop.f32.mrb[248].mxu0  ;;  %v4136_v7 = vadd.f32 %v4097_v9, %v3976_v34  ;;  %v5543_v53 = vpop.f32.mrb[249].mxu1 }
 0x2e6   : > { %v7138_v54 = vadd.f32 %v3969_v1, %v3831_v39  ;;  %v5537_v18 = vpop.f32.mrb[249].mxu0  ;;  %v4100_v42 = vpop.f32.mrb[250].mxu1  ;;  %v4824_v39 = vld [vmem:[%s7147_s28 + $0x10] sm:$0xff]  }
 0x2e7   : > { %v3972_v12 = vpop.f32.mrb[250].mxu0  ;;  %v4137_v41 = vadd.f32 %v4100_v42, %v3977_v0  ;;  %v5544_v59 = vpop.f32.mrb[251].mxu1  ;;  %v4813_v1 = vunpack.c.l.bf16 %v4824_v39 }
 0x2e8   : > { %v7140_v3 = vadd.f32 %v3972_v12, %v3832_v15  ;;  %v5538_v31 = vpop.f32.mrb[251].mxu0 }
 0x2ec   : > { %v4105_v37 = vpop.f32.mrb[252].mxu1 }
 0x2ed   : > { %v4215_v26 = vpop.f32.mrb[252].mxu0  ;;  %v4138_v16 = vadd.f32 %v4105_v37, %v3978_v56  ;;  %v5547_v51 = vpop.f32.mrb[253].mxu1  ;;  %v4825_v37 = vld [vmem:[%s7147_s28 + $0x18] sm:$0xff]  }
 0x2ee   : > { %v4254_v6 = vadd.f32 %v4215_v26, %v4136_v7  ;;  %v5565_v34 = vpop.f32.mrb[253].mxu0  ;;  %v4108_v8 = vpop.f32.mrb[254].mxu1  ;;  %v4814_v7 = vunpack.c.h.bf16 %v4824_v39 }
 0x2ef   : > { %v4218_v38 = vpop.f32.mrb[254].mxu0  ;;  %v4139_v50 = vadd.f32 %v4108_v8, %v7122_v43  ;;  %v5548_v14 = vpop.f32.mrb[255].mxu1  ;;  %v4809_v43 = vunpack.c.l.bf16 %v4823_v45 }
 0x2f0   : > { %v4271_v48 = vadd.f32 %v7153_v49, %v4254_v6  ;;  %v4255_v0 = vadd.f32 %v4218_v38, %v4137_v41  ;;  %v5566_v58 = vpop.f32.mrb[255].mxu0 }
 0x2f2   : > { %v4301_v5 = vadd.f32 %v4805_v13, %v4271_v48  ;;  %v4272_v20 = vadd.f32 %v7153_v49, %v4255_v0 }
 0x2f4   : > { %v4311_v36 = vmax.f32 %v4301_v5, 0.0  ;;  %v4302_v27 = vadd.f32 %v4806_v29, %v4272_v20  ;;  %v4113_v24 = vpop.f32.mrb[0].mxu1  ;;  %v4817_v29 = vunpack.c.l.bf16 %v4825_v37 }
 0x2f5   : > { %v4223_v56 = vpop.f32.mrb[0].mxu0  ;;  %v4140_v23 = vadd.f32 %v4113_v24, %v7125_v52  ;;  %v5551_v21 = vpop.f32.mrb[1].mxu1 }
 0x2f6   : > { %v4793_v35 = vpack.c.bf16 %v4311_v36, %v4311_v36  ;;  %v4312_v28 = vmax.f32 %v4302_v27, 0.0  ;;  %v4256_v63 = vadd.f32 %v4223_v56, %v4138_v16  ;;  %v5569_v11 = vpop.f32.mrb[1].mxu0  ;;  %v4116_v22 = vpop.f32.mrb[2].mxu1 }
 0x2f7   : > { %v4226_v25 = vpop.f32.mrb[2].mxu0  ;;  %v4141_v19 = vadd.f32 %v4116_v22, %v7127_v47  ;;  %v5552_v62 = vpop.f32.mrb[3].mxu1  ;;  %v4826_v11 = vld [vmem:[%s7147_s28 + $0x20] sm:$0xff]  }
 0x2f8   : > { %4362 = vst.msk [vmem:[%s7164_s10] sm:$0xf] %vm4361_vm9, %v4793_v35  ;;  %v4794_v33 = vpack.c.bf16 %v4312_v28, %v4312_v28  ;;  %v4273_v55 = vadd.f32 %v7153_v49, %v4256_v63  ;;  %v4257_v10 = vadd.f32 %v4226_v25, %v4139_v50  ;;  %v5570_v32 = vpop.f32.mrb[3].mxu0  ;;  %v4818_v50 = vunpack.c.h.bf16 %v4825_v37 }
 0x2fa   : > { %4363 = vst.msk [vmem:[%s7164_s10 + $0x4] sm:$0xf] %vm4361_vm9, %v4794_v33  ;;  %v4303_v30 = vadd.f32 %v4809_v43, %v4273_v55  ;;  %v4274_v40 = vadd.f32 %v7153_v49, %v4257_v10  ;;  %v4821_v55 = vunpack.c.l.bf16 %v4826_v11 }
 0x2fc   : > { %v4313_v46 = vmax.f32 %v4303_v30, 0.0  ;;  %v4304_v44 = vadd.f32 %v4810_v4, %v4274_v40  ;;  %v4121_v9 = vpop.f32.mrb[4].mxu1  ;;  %v4822_v30 = vunpack.c.h.bf16 %v4826_v11 }
 0x2fd   : > { %v4231_v57 = vpop.f32.mrb[4].mxu0  ;;  %v4142_v53 = vadd.f32 %v4121_v9, %v7130_v60  ;;  %v5555_v42 = vpop.f32.mrb[5].mxu1 }
 0x2fe   : > { %v4795_v52 = vpack.c.bf16 %v4313_v46, %v4313_v46  ;;  %v4314_v15 = vmax.f32 %v4304_v44, 0.0  ;;  %v4258_v2 = vadd.f32 %v4231_v57, %v4140_v23  ;;  %v5573_v18 = vpop.f32.mrb[5].mxu0  ;;  %v4124_v61 = vpop.f32.mrb[6].mxu1 }
 0x2ff   : > { %v4234_v12 = vpop.f32.mrb[6].mxu0  ;;  %v4143_v6 = vadd.f32 %v4124_v61, %v7133_v17  ;;  %v5556_v34 = vpop.f32.mrb[7].mxu1 }
 0x300   : > { %4364 = vst.msk [vmem:[%s7164_s10 + $0x8] sm:$0xf] %vm4361_vm9, %v4795_v52  ;;  %v4796_v47 = vpack.c.bf16 %v4314_v15, %v4314_v15  ;;  %v4275_v31 = vadd.f32 %v7153_v49, %v4258_v2  ;;  %v4259_v41 = vadd.f32 %v4234_v12, %v4141_v19  ;;  %v5574_v59 = vpop.f32.mrb[7].mxu0 }
 0x302   : > { %4365 = vst.msk [vmem:[%s7164_s10 + $0xc] sm:$0xf] %vm4361_vm9, %v4796_v47  ;;  %v4305_v26 = vadd.f32 %v4813_v1, %v4275_v31  ;;  %v4276_v13 = vadd.f32 %v7153_v49, %v4259_v41 }
 0x304   : > { %v4315_v38 = vmax.f32 %v4305_v26, 0.0  ;;  %v4306_v16 = vadd.f32 %v4814_v7, %v4276_v13  ;;  %v4129_v8 = vpop.f32.mrb[8].mxu1 }
 0x305   : > { %v4239_v48 = vpop.f32.mrb[8].mxu0  ;;  %v4144_v20 = vadd.f32 %v4129_v8, %v7138_v54  ;;  %v5559_v45 = vpop.f32.mrb[9].mxu1 }
 0x306   : > { %v4797_v60 = vpack.c.bf16 %v4315_v38, %v4315_v38  ;;  %v4316_v51 = vmax.f32 %v4306_v16, 0.0  ;;  %v4260_v0 = vadd.f32 %v4239_v48, %v4142_v53  ;;  %v5577_v58 = vpop.f32.mrb[9].mxu0  ;;  %v4132_v56 = vpop.f32.mrb[10].mxu1 }
 0x307   : > { %v4242_v5 = vpop.f32.mrb[10].mxu0  ;;  %v4145_v28 = vadd.f32 %v4132_v56, %v7140_v3  ;;  %v5560_v43 = vpop.f32.mrb[11].mxu1 }
 0x308   : > { %4366 = vst.msk [vmem:[%s7164_s10 + $0x10] sm:$0xf] %vm4361_vm9, %v4797_v60  ;;  %v4798_v17 = vpack.c.bf16 %v4316_v51, %v4316_v51  ;;  %v4277_v14 = vadd.f32 %v7153_v49, %v4260_v0  ;;  %v4261_v36 = vadd.f32 %v4242_v5, %v4143_v6  ;;  %v5578_v27 = vpop.f32.mrb[11].mxu0 }
 0x30a   : > { %4367 = vst.msk [vmem:[%s7164_s10 + $0x14] sm:$0xf] %vm4361_vm9, %v4798_v17  ;;  %v4307_v35 = vadd.f32 %v4817_v29, %v4277_v14  ;;  %v4278_v63 = vadd.f32 %v7153_v49, %v4261_v36 }
 0x30c   : > { %v4317_v24 = vmax.f32 %v4307_v35, 0.0  ;;  %v4308_v25 = vadd.f32 %v4818_v50, %v4278_v63 }
 0x30d   : > { %v4247_v54 = vpop.f32.mrb[12].mxu0 }
 0x30e   : > { %v4799_v4 = vpack.c.bf16 %v4317_v24, %v4317_v24  ;;  %v4318_v33 = vmax.f32 %v4308_v25, 0.0  ;;  %v4262_v23 = vadd.f32 %v4247_v54, %v4144_v20  ;;  %v5581_v21 = vpop.f32.mrb[13].mxu0 }
 0x30f   : > { %v4250_v10 = vpop.f32.mrb[14].mxu0 }
 0x310   : > { %4368 = vst.msk [vmem:[%s7164_s10 + $0x18] sm:$0xf] %vm4361_vm9, %v4799_v4  ;;  %v4800_v32 = vpack.c.bf16 %v4318_v33, %v4318_v33  ;;  %v4279_v3 = vadd.f32 %v7153_v49, %v4262_v23  ;;  %v4263_v22 = vadd.f32 %v4250_v10, %v4145_v28  ;;  %v5582_v19 = vpop.f32.mrb[15].mxu0 }
 0x312   : > { %4369 = vst.msk [vmem:[%s7164_s10 + $0x1c] sm:$0xf] %vm4361_vm9, %v4800_v32  ;;  %v4309_v40 = vadd.f32 %v4821_v55, %v4279_v3  ;;  %v4280_v62 = vadd.f32 %v7153_v49, %v4263_v22 }
 0x314   : > { %v4319_v39 = vmax.f32 %v4309_v40, 0.0  ;;  %v4310_v46 = vadd.f32 %v4822_v30, %v4280_v62 }
 0x316   : > { %v4801_v44 = vpack.c.bf16 %v4319_v39, %v4319_v39  ;;  %v4320_v57 = vmax.f32 %v4310_v46, 0.0 }
 0x318   : > { %4370 = vst.msk [vmem:[%s7164_s10 + $0x20] sm:$0xf] %vm4361_vm9, %v4801_v44  ;;  %v4802_v52 = vpack.c.bf16 %v4320_v57, %v4320_v57 }
 0x31a   : > { %4371 = vst.msk [vmem:[%s7164_s10 + $0x24] sm:$0xf] %vm4361_vm9, %v4802_v52 }
 0x31b PF: > { %s16_s25 = sadd.s32 1, %s5750_s25   ;;  %s7226_s21 = smov %s5742_s23 }
 0x31c   : > { %p13_p10 = scmp.ge.s32.totalorder %s16_s25, 18   ;;  %s7227_s22 = smov %s5746_s24 }
 0x31d   : > { %s7228_s23 = smov %s7231_s26  ;;  %s7229_s24 = smov %s7235_s27 }
 0x31e   :  { %15 = sbr.rel (!%p13_p10) target bundleno = 3 (0x3), region = 109 }

// kernel: bottleneck_forward.5
= control target key start
LH: loop header
LB: loop body
LE: loop exit
PB: predicated region body
PF: predicated region fallthrough
CT: control target
= control target key end

     0   :  { %s6042_s15 = smov 0   ;;  %s6044_s16 = smov 0   ;;  %s7250_s0 = inlined_call_operand.vmem [shape: bf16[2,10,110,8], index: 0, kind: input, shape index: {}, may-alias: {0,1,2}]   ;;  %s7251_s1 = inlined_call_operand.vmem [shape: bf16[2,10,110,8], index: 1, kind: input, shape index: {}, may-alias: {0,1,2}]   ;;  %s7252_s2 = inlined_call_operand.vmem [shape: bf16[2,10,110,8], index: 2, kind: input, shape index: {}, may-alias: {0,1,2}]   ;;  %s7253_s3 = inlined_call_operand.vmem [shape: bf16[27,8,3], index: 3, kind: input, shape index: {}]   ;;  %s7254_s4 = inlined_call_operand.vmem [shape: f32[2,8,80,3], index: 4, kind: output, shape index: {}]  }
   0x1   :  { %s6046_s17 = smov 0   ;;  %s6048_s18 = smov 0  }
   0x2   :  { %s6050_s19 = smov 0  }
   0x3 LB: > { %s23_s20 = sadd.s32 1, %s6005_s17  ;;  %s26_s21 = sadd.s32 1, %s6009_s18  ;;  %s6013_s19 = sphi %s6050_s19, %s14_s19   ;;  %s6009_s18 = sphi %s6048_s18, %s7258_s18   ;;  %s6005_s17 = sphi %s6046_s17, %s7257_s17   ;;  %s6001_s16 = sphi %s6044_s16, %s7256_s16   ;;  %s5997_s15 = sphi %s6042_s15, %s7255_s15  }
   0x4   : > { %p24_p0 = scmp.ge.s32.totalorder %s23_s20, 8  ;;  %p4328_p1 = scmp.ge.s32.totalorder %s6013_s19, 1 }
   0x5   : > { %p222_p2 = scmp.lt.s32.totalorder %s6013_s19, 17 }
   0x6   : > { %s7260_s20 = smov (%p24_p0, %s23_s20), 0  ;;  %s7262_s21 = smov (!%p24_p0, %s26_s21), %s6009_s18 }
   0x7   : > { %p223_p3 = pnand %p4328_p1, %p222_p2  ;;  %p28_p4 = scmp.ge.s32.totalorder %s7262_s21, 2 }
   0x8   : > { %v4333_v0 = vld [vmem:[%s7253_s3 + $0x4] sm:$0xf] (!%p223_p3)  ;;  %vm420_vm0 = vcmask (!%p223_p3), 1043456   ;;  %v4451_v1 = vld [vmem:[%s7253_s3 + $0x34] sm:$0xf] (!%p223_p3)  ;;  %v6015_v2 = vmov (!%p223_p3), 0.0  }
   0x9   : > { %s7264_s21 = smov (%p28_p4, %s7262_s21), 0  ;;  %226 = sbr.rel (%p223_p3) target bundleno = 789 (0x315), region = 36 }
   0xa   : > { %4737 = vmatprep.subr.bf16.mxu1 (!%p223_p3), %v6015_v2  ;;  %5023 = vmatprep.subr.bf16.mxu0 (!%p223_p3), %v6015_v2  ;;  %v422_v3 = vsel (!%p223_p3), %vm420_vm0, %v4333_v0, 0  ;;  %v6086_v4 = vsel (!%p223_p3), %vm420_vm0, %v4451_v1, 0  ;;  %p276_p5 = scmp.lt.s32.totalorder (!%p223_p3), %s6001_s16, 1  ;;  %p278_p6 = scmp.lt.s32.totalorder (!%p223_p3), %s5997_s15, 9  ;;  %vm6016_vm1 = vmmov (!%p223_p3), 0   ;;  %vm404_vm3 = vcmask (!%p223_p3), 64512  }
   0xb   : > { %4738 = vmatpush3.bf16.msra.mxu1 (!%p223_p3), %v422_v3  ;;  %5024 = vmatpush3.bf16.msra.mxu0 (!%p223_p3), %v6086_v4  ;;  %s285_s26 = sadd.s32 (!%p223_p3), 1, %s5997_s15  ;;  %vm359_vm2 = vsmask.f32 (!%p223_p3), 7424  ;;  %v327_v19 = vld [vmem:[%s7253_s3] sm:$0xf] (!%p223_p3)  ;;  %vm589_vm5 = vcmask (!%p223_p3), 1046528  }
   0xc   : > { %4739 = vmatprep.mubr.msk.bf16.mxu1 (!%p223_p3), %vm6016_vm1, %v6015_v2  ;;  %5025 = vmatprep.mubr.msk.bf16.mxu0 (!%p223_p3), %vm6016_vm1, %v6015_v2  ;;  %p288_p7 = scmp.lt.s32.totalorder (!%p223_p3), %s285_s26, 9  ;;  %v508_v28 = vsel (!%p223_p3), %vm420_vm0, %v327_v19, 0  ;;  %v4458_v35 = vld [vmem:[%s7253_s3 + $0x38] sm:$0xf] (!%p223_p3)  ;;  %vm861_vm4 = vsmask.f32 (!%p223_p3), 6400 }
   0xd   : > { %5045 = vmatprep.subr.bf16.mxu0 (!%p223_p3), %v6015_v2  ;;  %4759 = vmatprep.subr.bf16.mxu1 (!%p223_p3), %v6015_v2  ;;  %v2356_v45 = vsel (!%p223_p3), %vm420_vm0, %v4458_v35, 0  ;;  %vm1022_vm6 = vcmask (!%p223_p3), 1045504   ;;  %vm1455_vm7 = vcmask (!%p223_p3), 1044480   ;;  %vm1294_vm8 = vsmask.f32 (!%p223_p3), 5376  ;;  %p309_p9 = scmp.lt.s32.totalorder (!%p223_p3), %s5997_s15, 7 }
   0xe   : > { %vm4176_vm9 = vcmask (!%p223_p3), 23552  }
  0x10   : > { %s7266_s16 = smov (!%p276_p5, %s6001_s16), 1  ;;  %s7268_s26 = smov (!%p288_p7, %s285_s26), 9 }
  0x11   : > { %s279_s27 = scalar_select %p278_p6, %s5997_s15, 9 }
  0x12   : > { %s6103_s28 = smul.u32 140, %s7266_s16 }
  0x13   : > { %s5843_s29 = smul.u32 14, %s279_s27 }
  0x14   : > { %s5845_s6 = smul.u32 14, %s7268_s26  ;;  %s296_s26 = sadd.s32 2, %s5997_s15 }
  0x15   : > { %s282_s30 = sadd.s32 %s6103_s28, %s5843_s29  ;;  %p299_p8 = scmp.lt.s32.totalorder %s296_s26, 9 }
  0x16   : > { %s4329_s5 = sshll.u32 %s282_s30, 2  ;;  %s292_s10 = sadd.s32 %s5845_s6, %s6103_s28 }
  0x17   : > { %s6109_s9 = scalar_lea.vmem %s7250_s0, %s4329_s5  ;;  %s4330_s11 = sshll.u32 %s292_s10, 2 }
  0x18   : > { %v317_v5 = vld [vmem:[%s6109_s9] sm:$0xf]  ;;  %v6114_v6 = vld [vmem:[%s6109_s9 + $0x4] sm:$0xf]  ;;  %v6120_v8 = vld [vmem:[%s6109_s9 + $0x8] sm:$0xff]   ;;  %s6125_s14 = scalar_lea.vmem %s7251_s1, %s4330_s11  ;;  %s7270_s26 = smov (!%p299_p8, %s296_s26), 9 }
  0x19   : > { %v6117_v7 = vcombine.low %v317_v5, %v6114_v6  ;;  %v6128_v9 = vld [vmem:[%s6109_s9 + $0x10] sm:$0xff]   ;;  %v368_v12 = vshll.u32 %v6120_v8, 16  ;;  %v2010_v13 = vld [vmem:[%s6125_s14 + $0x4] sm:$0xe]  ;;  %v6135_v14 = vld [vmem:[%s6125_s14 + $0x8] sm:$0xf] }
  0x1a   : > { %v6138_v17 = vcombine.low %v2010_v13, %v6135_v14  ;;  %v6141_v18 = vld [vmem:[%s6125_s14 + $0xc] sm:$0xff]   ;;  %v6147_v20 = vld [vmem:[%s6125_s14 + $0x14] sm:$0xff]   ;;  %v372_v21 = vshrl.u32 %v6120_v8, 16  ;;  %v376_v22 = vshll.u32 %v6128_v9, 16  ;;  %v6169_v44 = vld [vmem:[%s6125_s14 + $0x1c] sm:$0xff]   ;;  %v380_v48 = vshrl.u32 %v6128_v9, 16 }
  0x1b   : > { %v361_v10 = vshrl.u32 %v6117_v7, 16  ;;  %v363_v11 = vshll.u32 %v6117_v7, 16  ;;  %v370_v16 = vrot.slane %v368_v12, 1  ;;  %v2178_v26 = vshrl.u32 %v6141_v18, 16  ;;  %v6166_v40 = vld [vmem:[%s6109_s9 + $0x18] sm:$0xff]   ;;  %v6188_v55 = vld [vmem:[%s6109_s9 + $0x20] sm:$0xff]  }
  0x1c   : > { %v2170_v24 = vshrl.u32 %v6138_v17, 16  ;;  %v2173_v25 = vshll.u32 %v6138_v17, 16  ;;  %v2181_v27 = vshll.u32 %v6141_v18, 16  ;;  %v2187_v29 = vshrl.u32 %v6147_v20, 16  ;;  %v583_v59 = vld [vmem:[%s6109_s9] sm:$0xe] }
  0x1d   : > { %v365_v15 = vrot.slane %v363_v11, 1  ;;  %v2180_v33 = vrot.slane %v2178_v26, 1  ;;  %v2190_v36 = vshll.u32 %v6147_v20, 16  ;;  %v374_v38 = vor.u32 %v372_v21, %v370_v16  ;;  %v2323_v11 = vld [vmem:[%s6125_s14 + $0x4] sm:$0xc]  ;;  %s5846_s27 = smul.u32 14, %s7270_s26 }
  0x1e   : > { %v2172_v31 = vrot.slane %v2170_v24, 1  ;;  %v2175_v32 = vrot.slane %v2173_v25, 2  ;;  %v2183_v34 = vrot.slane %v2181_v27, 2  ;;  %v378_v39 = vrot.slane %v376_v22, 1  ;;  %s7272_s15 = smov (!%p309_p9, %s5997_s15), 7 }
  0x1f   : > { %v366_v23 = vor.u32 %v365_v15, %v361_v10  ;;  %v2189_v42 = vrot.slane %v2187_v29, 1  ;;  %v2192_v43 = vrot.slane %v2190_v36, 2  ;;  %v384_v49 = vshll.u32 %v6166_v40, 16  ;;  %v6220_v19 = vld [vmem:[%s6109_s9 + $0x28] ss:$0 sps:$4 sm:$0x11]   ;;  %s303_s29 = sadd.s32 %s5846_s27, %s6103_s28 }
  0x20   : > { %v2176_v37 = vor.u32 %v2175_v32, %v2172_v31  ;;  %v2184_v41 = vor.u32 %v2183_v34, %v2180_v33  ;;  %v379_v47 = vsel %vm359_vm2, %v374_v38, %v378_v39  ;;  %v2196_v51 = vshrl.u32 %v6169_v44, 16  ;;  %s4331_s28 = sshll.u32 %s303_s29, 2  ;;  %v2442_v31 = vld [vmem:[%s6125_s14 + $0xc] sm:$0xf]  ;;  %v6242_v32 = vld [vmem:[%s6125_s14 + $0x10] sm:$0xff]   ;;  %v6252_v34 = vld [vmem:[%s6125_s14 + $0x18] sm:$0xff]  }
  0x21   : > { %v371_v30 = vsel %vm359_vm2, %v366_v23, %v370_v16  ;;  %v2193_v50 = vor.u32 %v2192_v43, %v2189_v42  ;;  %v2199_v52 = vshll.u32 %v6169_v44, 16  ;;  %v382_v53 = vor.u32 %v380_v48, %v378_v39  ;;  %s6247_s8 = scalar_lea.vmem %s7252_s2, %s4331_s28  ;;  %v6262_v42 = vld [vmem:[%s6125_s14 + $0x20] sm:$0xff]  }
  0x22   : > { %4740 = vmatmul.mubr.msk.bf16.vlgmr.msra.gmra.mrb[0].mxu1 %vm404_vm3, %v371_v30  ;;  %v2185_v46 = vsel %vm861_vm4, %v2176_v37, %v2184_v41  ;;  %v386_v54 = vrot.slane %v384_v49, 1  ;;  %v2198_v57 = vrot.slane %v2196_v51, 1  ;;  %v4351_v60 = vcombine.low %v583_v59, %v6114_v6  ;;  %v6286_v51 = vld [vmem:[%s6125_s14 + $0x28] sm:$0xff]  }
  0x23   : > { %4743 = vmatprep.mubr.msk.bf16.mxu1 %vm6016_vm1, %v6015_v2  ;;  %4760 = vmatpush3.bf16.msra.mxu1 %v508_v28  ;;  %v2194_v56 = vsel %vm861_vm4, %v2184_v41, %v2193_v50  ;;  %v2201_v58 = vrot.slane %v2199_v52, 2  ;;  %v591_v61 = vrot.slane %v6120_v8, 1  ;;  %v388_v62 = vshrl.u32 %v6166_v40, 16  ;;  %v2754_v28 = vld [vmem:[%s6125_s14 + $0x8] sm:$0x8] }
  0x24   : > { %4781 = vmatprep.subr.bf16.mxu1 %v6015_v2  ;;  %5026 = vmatmul.mubr.msk.bf16.vlgmr.msra.gmra.mrb[0].mxu0 %vm404_vm3, %v2185_v46  ;;  %v593_v63 = vrot.slane %v6128_v9, 1  ;;  %v387_v0 = vsel %vm359_vm2, %v382_v53, %v386_v54  ;;  %v392_v1 = vshll.u32 %v6188_v55, 16  ;;  %v590_v3 = vrot.slane %v4351_v60, 1  ;;  %v5902_v53 = vld [vmem:[%s6125_s14 + $0x24] sm:$0xff]  }
  0x25   : > { %5046 = vmatpush3.bf16.msra.mxu0 %v2356_v45  ;;  %5029 = vmatprep.mubr.msk.bf16.mxu0 %vm6016_vm1, %v6015_v2  ;;  %v595_v5 = vrot.slane %v6166_v40, 1  ;;  %v6202_v6 = vor.u32 %v2201_v58, %v2198_v57  ;;  %v390_v15 = vor.u32 %v388_v62, %v386_v54  ;;  %v4459_v22 = vcombine.low %v2323_v11, %v6135_v14  ;;  %v4465_v14 = vld [vmem:[%s7253_s3 + $0x3c] sm:$0xf]  ;;  %v4350_v45 = vld [vmem:[%s7253_s3 + $0x8] sm:$0xf] }
  0x26   : > { %5067 = vmatprep.subr.bf16.mxu0 %v6015_v2  ;;  %v6205_v10 = vsel %vm589_vm5, %v591_v61, %v593_v63  ;;  %v6209_v12 = vsel %vm589_vm5, %v590_v3, %v591_v61  ;;  %v394_v16 = vrot.slane %v392_v1, 1  ;;  %v396_v24 = vshrl.u32 %v6188_v55, 16  ;;  %v2441_v59 = vld [vmem:[%s6125_s14 + $0x8] sm:$0xc]  ;;  %v6335_v1 = vld [vmem:[%s6109_s9 + $0xc] sm:$0xff]  }
  0x27   : > { %v6214_v13 = vsel %vm589_vm5, %v593_v63, %v595_v5  ;;  %v2203_v21 = vsel %vm861_vm4, %v2193_v50, %v6202_v6  ;;  %v400_v25 = vshll.u32 %v6220_v19, 16  ;;  %v2329_v26 = vrot.slane %v4459_v22, 2  ;;  %v6339_v3 = vld [vmem:[%s6109_s9 + $0x8] sm:$0xf]  ;;  %v1016_v11 = vld [vmem:[%s6109_s9 + $0x4] sm:$0xc] }
  0x28   : > { %v395_v23 = vsel %vm359_vm2, %v390_v15, %v394_v16  ;;  %v2330_v27 = vrot.slane %v6141_v18, 2  ;;  %v398_v29 = vor.u32 %v396_v24, %v394_v16  ;;  %v2509_v33 = vsel %vm420_vm0, %v4465_v14, 0 }
  0x29   : > { %v402_v30 = vrot.slane %v400_v25, 1  ;;  %v4485_v35 = vcombine.low %v2754_v28, %v2442_v31  ;;  %v2761_v36 = vrot.slane %v6242_v32, 3  ;;  %v2763_v39 = vrot.slane %v6252_v34, 3  ;;  %v4357_v25 = vld [vmem:[%s7253_s3 + $0xc] sm:$0xf] }
  0x2a   : > { %4744 = vmatmul.mubr.msk.bf16.gmra.mrb[4].mxu1 %vm404_vm3, %v379_v47  ;;  %v2331_v18 = vsel %vm1022_vm6, %v2329_v26, %v2330_v27  ;;  %v2332_v41 = vrot.slane %v6147_v20, 2  ;;  %v2765_v47 = vrot.slane %v6262_v42, 3  ;;  %v617_v48 = vsel %vm420_vm0, %v4350_v45, 0  ;;  %v6360_v26 = vld [vmem:[%s6109_s9 + $0x14] sm:$0xff]  }
  0x2b   : > { %4747 = vmatprep.mubr.msk.bf16.mxu1 %vm6016_vm1, %v6015_v2  ;;  %v2760_v37 = vrot.slane %v4485_v35, 3  ;;  %v403_v38 = vsel %vm359_vm2, %v398_v29, %v402_v30  ;;  %v6272_v46 = vsel %vm1455_vm7, %v2761_v36, %v2763_v39  ;;  %v2334_v50 = vrot.slane %v6169_v44, 2 }
  0x2c   : > { %5030 = vmatmul.mubr.msk.bf16.gmra.mrb[4].mxu0 %vm404_vm3, %v2194_v56  ;;  %v2333_v20 = vsel %vm1022_vm6, %v2330_v27, %v2332_v41  ;;  %v6281_v49 = vsel %vm1455_vm7, %v2763_v39, %v2765_v47  ;;  %v2767_v52 = vrot.slane %v6286_v51, 3  ;;  %v5903_v56 = vld [vmem:[%s6125_s14 + $0x2c] ss:$0 sps:$4 sm:$0x33]   ;;  %v4466_v60 = vcombine.low %v2441_v59, %v2442_v31  ;;  %v6378_v31 = vld [vmem:[%s6109_s9 + $0x1c] sm:$0xff]  }
  0x2d   : > { %5033 = vmatprep.mubr.msk.bf16.mxu0 %vm6016_vm1, %v6015_v2  ;;  %v6265_v43 = vsel %vm1455_vm7, %v2760_v37, %v2761_v36  ;;  %v2335_v54 = vsel %vm1022_vm6, %v2332_v41, %v2334_v50  ;;  %v2338_v58 = vrot.slane %v5903_v56, 2  ;;  %v2483_v62 = vrot.slane %v6242_v32, 2  ;;  %v5910_v36 = vld [vmem:[%s6125_s14 + $0x30] ss:$0 sps:$4 sm:$0x33]  }
  0x2e   : > { %v6301_v44 = vsel %vm1455_vm7, %v2765_v47, %v2767_v52  ;;  %v2482_v61 = vrot.slane %v4466_v60, 2  ;;  %v2485_v15 = vrot.slane %v6252_v34, 2  ;;  %v4377_v16 = vcombine.low %v1016_v11, %v6339_v3  ;;  %v4484_v56 = vld [vmem:[%s7253_s3 + $0x44] sm:$0xf] }
  0x2f   : > { %v1026_v27 = vrot.slane %v6360_v26, 2  ;;  %v2487_v14 = vrot.slane %v6262_v42, 2  ;;  %v770_v28 = vsel %vm420_vm0, %v4357_v25, 0  ;;  %v2601_v37 = vshrl.u32 %v4466_v60, 16  ;;  %v702_v59 = vld [vmem:[%s6109_s9 + $0x4] sm:$0xe] }
  0x30   : > { %v2484_v63 = vsel %vm1022_vm6, %v2482_v61, %v2483_v62  ;;  %v1023_v22 = vrot.slane %v4377_v16, 2  ;;  %v2604_v39 = vshll.u32 %v4466_v60, 16  ;;  %v2609_v41 = vshrl.u32 %v6242_v32, 16 }
  0x31   : > { %v2488_v30 = vsel %vm1022_vm6, %v2485_v15, %v2487_v14  ;;  %v2612_v45 = vshll.u32 %v6242_v32, 16  ;;  %v2603_v47 = vrot.slane %v2601_v37, 2  ;;  %v6428_v60 = vcombine.low %v702_v59, %v6339_v3 }
  0x32   : > { %4748 = vmatmul.mubr.msk.bf16.gmra.mrb[8].mxu1 %vm404_vm3, %v387_v0  ;;  %v746_v25 = vrot.slane %v6360_v26, 1 }
  0x33   : > { %4751 = vmatprep.mubr.msk.bf16.mxu1 %vm6016_vm1, %v6015_v2 }
  0x34   : > { %5034 = vmatmul.mubr.msk.bf16.gmra.mrb[8].mxu0 %vm404_vm3, %v2203_v21  ;;  %v1024_v21 = vrot.slane %v6335_v1, 2 }
  0x35   : > { %5047 = vmatprep.mubr.msk.bf16.mxu0 %vm6016_vm1, %v6015_v2 }
  0x36   : > { %v6354_v24 = vsel %vm1022_vm6, %v1023_v22, %v1024_v21  ;;  %v6369_v29 = vsel %vm1022_vm6, %v1024_v21, %v1026_v27  ;;  %v2636_v22 = vshrl.u32 %v6286_v51, 16 }
  0x3a   : > { %4752 = vmatmul.mubr.msk.bf16.gmra.mrb[12].mxu1 %vm404_vm3, %v395_v23  ;;  %v2486_v23 = vsel %vm1022_vm6, %v2483_v62, %v2485_v15  ;;  %v2630_v62 = vshll.u32 %v6262_v42, 16 }
  0x3b   : > { %4755 = vmatprep.mubr.msk.bf16.mxu1 %vm6016_vm1, %v6015_v2 }
  0x3c   : > { %5048 = vmatmul.mubr.msk.bf16.vlgmr.msra.gmra.mrb[0].mxu0 %vm404_vm3, %v2331_v18  ;;  %v1028_v18 = vrot.slane %v6378_v31, 2  ;;  %v2632_v11 = vrot.slane %v2630_v62, 3 }
  0x3d   : > { %5068 = vmatpush3.bf16.msra.mxu0 %v2509_v33  ;;  %5051 = vmatprep.mubr.msk.bf16.mxu0 %vm6016_vm1, %v6015_v2  ;;  %v2489_v33 = vrot.slane %v6286_v51, 2 }
  0x3e   : > { %5089 = vmatprep.subr.bf16.mxu0 %v6015_v2 }
  0x3f   : > { %v2490_v35 = vsel %vm1022_vm6, %v2487_v14, %v2489_v33  ;;  %v2638_v14 = vrot.slane %v2636_v22, 2 }
  0x42   : > { %4756 = vmatmul.mubr.msk.bf16.gmra.mrb[16].mxu1 %vm404_vm3, %v403_v38  ;;  %v2491_v38 = vrot.slane %v5910_v36, 2 }
  0x43   : > { %4761 = vmatprep.mubr.msk.bf16.mxu1 %vm6016_vm1, %v6015_v2 }
  0x44   : > { %5052 = vmatmul.mubr.msk.bf16.gmra.mrb[4].mxu0 %vm404_vm3, %v2333_v20  ;;  %v2492_v20 = vsel %vm1022_vm6, %v2489_v33, %v2491_v38  ;;  %v748_v38 = vrot.slane %v6378_v31, 1 }
  0x45   : > { %5055 = vmatprep.mubr.msk.bf16.mxu0 %vm6016_vm1, %v6015_v2 }
  0x4a   : > { %4762 = vmatmul.mubr.msk.bf16.vlgmr.msra.gmra.mrb[0].mxu1 %vm404_vm3, %v6117_v7  ;;  %v2336_v7 = vrot.slane %v5902_v53, 2  ;;  %v2614_v53 = vrot.slane %v2612_v45, 3 }
  0x4b   : > { %4765 = vmatprep.mubr.msk.bf16.mxu1 %vm6016_vm1, %v6015_v2  ;;  %4782 = vmatpush3.bf16.msra.mxu1 %v617_v48  ;;  %v2606_v48 = vrot.slane %v2604_v39, 3 }
  0x4c   : > { %4803 = vmatprep.subr.bf16.mxu1 %v6015_v2  ;;  %5056 = vmatmul.mubr.msk.bf16.gmra.mrb[8].mxu0 %vm404_vm3, %v2335_v54  ;;  %v2337_v57 = vsel %vm1022_vm6, %v2334_v50, %v2336_v7  ;;  %v2611_v50 = vrot.slane %v2609_v41, 2 }
  0x4d   : > { %5059 = vmatprep.mubr.msk.bf16.mxu0 %vm6016_vm1, %v6015_v2 }
  0x4e   : > { %v2615_v54 = vor.u32 %v2614_v53, %v2611_v50  ;;  %v5918_v53 = vld [vmem:[%s6109_s9 + $0x2c] ss:$0 sps:$4 sm:$0x11]  }
  0x52   : > { %4766 = vmatmul.mubr.msk.bf16.gmra.mrb[4].mxu1 %vm404_vm3, %v6120_v8  ;;  %v2339_v8 = vsel %vm1022_vm6, %v2336_v7, %v2338_v58  ;;  %v2621_v7 = vshll.u32 %v6252_v34, 16 }
  0x53   : > { %4769 = vmatprep.mubr.msk.bf16.mxu1 %vm6016_vm1, %v6015_v2 }
  0x54   : > { %5060 = vmatmul.mubr.msk.bf16.gmra.mrb[12].mxu0 %vm404_vm3, %v2337_v57  ;;  %v2623_v58 = vrot.slane %v2621_v7, 3  ;;  %v866_v7 = vshll.u32 %v6428_v60, 16 }
  0x55   : > { %5063 = vmatprep.mubr.msk.bf16.mxu0 %vm6016_vm1, %v6015_v2 }
  0x56   : > { %v868_v59 = vrot.slane %v866_v7, 2 }
  0x5a   : > { %4770 = vmatmul.mubr.msk.bf16.gmra.mrb[8].mxu1 %vm404_vm3, %v6128_v9  ;;  %v4477_v9 = vld [vmem:[%s7253_s3 + $0x40] sm:$0xf] }
  0x5b   : > { %4773 = vmatprep.mubr.msk.bf16.mxu1 %vm6016_vm1, %v6015_v2  ;;  %v2669_v0 = vsel %vm420_vm0, %v4477_v9, 0  ;;  %v743_v9 = vrot.slane %v6428_v60, 1 }
  0x5c   : > { %5064 = vmatmul.mubr.msk.bf16.gmra.mrb[16].mxu0 %vm404_vm3, %v2339_v8  ;;  %v2787_v8 = vsel %vm420_vm0, %v4484_v56, 0  ;;  %v871_v56 = vshrl.u32 %v6335_v1, 16 }
  0x5d   : > { %5069 = vmatprep.mubr.msk.bf16.mxu0 %vm6016_vm1, %v6015_v2 }
  0x62   : > { %4774 = vmatmul.mubr.msk.bf16.gmra.mrb[12].mxu1 %vm404_vm3, %v6166_v40  ;;  %v599_v40 = vrot.slane %v6220_v19, 1  ;;  %v2627_v19 = vshrl.u32 %v6262_v42, 16  ;;  %v4369_v42 = vld [vmem:[%s7253_s3 + $0x10] sm:$0xf] }
  0x63   : > { %4777 = vmatprep.mubr.msk.bf16.mxu1 %vm6016_vm1, %v6015_v2  ;;  %v931_v21 = vsel %vm420_vm0, %v4369_v42, 0 }
  0x64   : > { %5070 = vmatmul.mubr.msk.bf16.vlgmr.msra.gmra.mrb[0].mxu0 %vm404_vm3, %v2484_v63  ;;  %v744_v63 = vrot.slane %v6335_v1, 1  ;;  %v2629_v3 = vrot.slane %v2627_v19, 2  ;;  %v4376_v19 = vld [vmem:[%s7253_s3 + $0x14] sm:$0xf] }
  0x65   : > { %5090 = vmatpush3.bf16.msra.mxu0 %v2669_v0  ;;  %5073 = vmatprep.mubr.msk.bf16.mxu0 %vm6016_vm1, %v6015_v2 }
  0x66   : > { %5111 = vmatprep.subr.bf16.mxu0 %v6015_v2  ;;  %v745_v15 = vsel %vm589_vm5, %v743_v9, %v744_v63  ;;  %v2633_v16 = vor.u32 %v2632_v11, %v2629_v3  ;;  %v747_v33 = vsel %vm589_vm5, %v744_v63, %v746_v25  ;;  %v889_v3 = vshrl.u32 %v6378_v31, 16 }
  0x68   : > { %v891_v42 = vrot.slane %v889_v3, 1 }
  0x6a   : > { %4778 = vmatmul.mubr.msk.bf16.gmra.mrb[16].mxu1 %vm404_vm3, %v6188_v55 }
  0x6b   : > { %4783 = vmatprep.mubr.msk.bf16.mxu1 %vm6016_vm1, %v6015_v2 }
  0x6c   : > { %5074 = vmatmul.mubr.msk.bf16.gmra.mrb[4].mxu0 %vm404_vm3, %v2486_v23  ;;  %v2639_v23 = vshll.u32 %v6286_v51, 16 }
  0x6d   : > { %5077 = vmatprep.mubr.msk.bf16.mxu0 %vm6016_vm1, %v6015_v2 }
  0x72   : > { %4784 = vmatmul.mubr.msk.bf16.vlgmr.msra.gmra.mrb[0].mxu1 %vm404_vm3, %v6209_v12  ;;  %v6388_v12 = vsel %vm1022_vm6, %v1026_v27, %v1028_v18 }
  0x73   : > { %4787 = vmatprep.mubr.msk.bf16.mxu1 %vm6016_vm1, %v6015_v2  ;;  %4804 = vmatpush3.bf16.msra.mxu1 %v770_v28  ;;  %v2641_v28 = vrot.slane %v2639_v23, 3 }
  0x74   : > { %4825 = vmatprep.subr.bf16.mxu1 %v6015_v2  ;;  %5078 = vmatmul.mubr.msk.bf16.gmra.mrb[8].mxu0 %vm404_vm3, %v2488_v30  ;;  %v6457_v30 = vld [vmem:[%s6125_s14 + $0x30] ss:$0 sps:$4 sm:$0x77]  }
  0x75   : > { %5081 = vmatprep.mubr.msk.bf16.mxu0 %vm6016_vm1, %v6015_v2  ;;  %v2645_v36 = vshrl.u32 %v6457_v30, 16  ;;  %v2648_v37 = vshll.u32 %v6457_v30, 16 }
  0x77   : > { %v2647_v41 = vrot.slane %v2645_v36, 2  ;;  %v2650_v45 = vrot.slane %v2648_v37, 3 }
  0x7a   : > { %4788 = vmatmul.mubr.msk.bf16.gmra.mrb[4].mxu1 %vm404_vm3, %v6205_v10  ;;  %v597_v10 = vrot.slane %v6188_v55, 1  ;;  %v2618_v55 = vshrl.u32 %v6252_v34, 16 }
  0x7b   : > { %4791 = vmatprep.mubr.msk.bf16.mxu1 %vm6016_vm1, %v6015_v2 }
  0x7c   : > { %5082 = vmatmul.mubr.msk.bf16.gmra.mrb[12].mxu0 %vm404_vm3, %v2490_v35  ;;  %v598_v32 = vsel %vm589_vm5, %v595_v5, %v597_v10  ;;  %v2620_v57 = vrot.slane %v2618_v55, 2  ;;  %v600_v34 = vsel %vm589_vm5, %v597_v10, %v599_v40  ;;  %v2642_v35 = vor.u32 %v2641_v28, %v2638_v14 }
  0x7d   : > { %5085 = vmatprep.mubr.msk.bf16.mxu0 %vm6016_vm1, %v6015_v2  ;;  %v749_v10 = vsel %vm589_vm5, %v746_v25, %v748_v38  ;;  %v863_v55 = vshrl.u32 %v6428_v60, 16  ;;  %v874_v40 = vshll.u32 %v6335_v1, 16  ;;  %v2769_v14 = vrot.slane %v6457_v30, 3 }
  0x7e   : > { %v2624_v61 = vor.u32 %v2623_v58, %v2620_v57  ;;  %v2643_v39 = vsel %vm1294_vm8, %v2633_v16, %v2642_v35 }
  0x7f   : > { %v865_v58 = vrot.slane %v863_v55, 1  ;;  %v5925_v55 = vld [vmem:[%s6247_s8 + $0x20] sm:$0xff]  }
  0x80   : > { %v2625_v0 = vsel %vm1294_vm8, %v2615_v54, %v2624_v61  ;;  %v2634_v27 = vsel %vm1294_vm8, %v2624_v61, %v2633_v16  ;;  %v880_v61 = vshrl.u32 %v6360_v26, 16 }
  0x81   : > { %v869_v1 = vor.u32 %v868_v59, %v865_v58  ;;  %v6619_v58 = vld [vmem:[%s6247_s8 + $0x10] sm:$0xff]  }
  0x82   : > { %4792 = vmatmul.mubr.msk.bf16.gmra.mrb[8].mxu1 %vm404_vm3, %v6214_v13  ;;  %v2607_v13 = vor.u32 %v2606_v48, %v2603_v47  ;;  %v6474_v47 = vld [vmem:[%s6109_s9 + $0x24] sm:$0xff]   ;;  %v882_v9 = vrot.slane %v880_v61, 1 }
  0x83   : > { %4795 = vmatprep.mubr.msk.bf16.mxu1 %vm6016_vm1, %v6015_v2  ;;  %v750_v48 = vrot.slane %v6474_v47, 1  ;;  %v901_v22 = vshll.u32 %v6474_v47, 16 }
  0x84   : > { %5086 = vmatmul.mubr.msk.bf16.gmra.mrb[16].mxu0 %vm404_vm3, %v2492_v20  ;;  %v2616_v5 = vsel %vm1294_vm8, %v2607_v13, %v2615_v54  ;;  %v2651_v20 = vor.u32 %v2650_v45, %v2647_v41  ;;  %v4491_v13 = vld [vmem:[%s7253_s3 + $0x48] sm:$0xf]  ;;  %v752_v54 = vrot.slane %v5918_v53, 1  ;;  %v6591_v53 = vld [vmem:[%s6247_s8 + $0x4] sm:$0xf] }
  0x85   : > { %5091 = vmatprep.mubr.msk.bf16.mxu0 %vm6016_vm1, %v6015_v2  ;;  %v903_v25 = vrot.slane %v901_v22, 2  ;;  %v5921_v45 = vld [vmem:[%s6247_s8 + $0x8] sm:$0xff]  }
  0x86   : > { %v2652_v50 = vsel %vm1294_vm8, %v2642_v35, %v2651_v20  ;;  %v753_v57 = vsel %vm589_vm5, %v750_v48, %v752_v54  ;;  %v2770_v35 = vsel %vm1455_vm7, %v2767_v52, %v2769_v14 }
  0x8a   : > { %4796 = vmatmul.mubr.msk.bf16.gmra.mrb[12].mxu1 %vm404_vm3, %v598_v32  ;;  %v751_v32 = vsel %vm589_vm5, %v748_v38, %v750_v48  ;;  %v4502_v38 = vld [vmem:[%s7253_s3 + $0x4c] sm:$0xf]  ;;  %v5923_v48 = vld [vmem:[%s6247_s8 + $0x10] sm:$0xff]  }
  0x8b   : > { %4799 = vmatprep.mubr.msk.bf16.mxu1 %vm6016_vm1, %v6015_v2  ;;  %v3111_v52 = vsel %vm420_vm0, %v4502_v38, 0 }
  0x8c   : > { %5092 = vmatmul.mubr.msk.bf16.vlgmr.msra.gmra.mrb[0].mxu0 %vm404_vm3, %v2616_v5  ;;  %v2925_v5 = vsel %vm420_vm0, %v4491_v13, 0  ;;  %v6603_v13 = vld [vmem:[%s6247_s8 + $0x8] sm:$0xff]  }
  0x8d   : > { %5112 = vmatpush3.bf16.msra.mxu0 %v2787_v8  ;;  %5095 = vmatprep.mubr.msk.bf16.mxu0 %vm6016_vm1, %v6015_v2  ;;  %v873_v8 = vrot.slane %v871_v56, 1  ;;  %v3063_v59 = vshrl.u32 %v6603_v13, 16 }
  0x8e   : > { %5133 = vmatprep.subr.bf16.mxu0 %v6015_v2 }
  0x92   : > { %4800 = vmatmul.mubr.msk.bf16.gmra.mrb[16].mxu1 %vm404_vm3, %v600_v34  ;;  %v876_v34 = vrot.slane %v874_v40, 2  ;;  %v3059_v40 = vshll.u32 %v6603_v13, 16 }
  0x93   : > { %4805 = vmatprep.mubr.msk.bf16.mxu1 %vm6016_vm1, %v6015_v2 }
  0x94   : > { %5096 = vmatmul.mubr.msk.bf16.gmra.mrb[4].mxu0 %vm404_vm3, %v2625_v0  ;;  %v877_v60 = vor.u32 %v876_v34, %v873_v8  ;;  %v1050_v0 = vsel %vm420_vm0, %v4376_v19, 0  ;;  %v3067_v8 = vshll.u32 %v6619_v58, 16  ;;  %v1135_v34 = vld [vmem:[%s6109_s9 + $0x8] sm:$0xc]  ;;  %v6642_v19 = vld [vmem:[%s6109_s9 + $0x10] sm:$0xff]  }
  0x95   : > { %5099 = vmatprep.mubr.msk.bf16.mxu0 %vm6016_vm1, %v6015_v2 }
  0x96   : > { %v878_v62 = vsel %vm861_vm4, %v869_v1, %v877_v60  ;;  %v6633_v1 = vld [vmem:[%s6109_s9 + $0xc] sm:$0xf] }
  0x9a   : > { %4806 = vmatmul.mubr.msk.bf16.vlgmr.msra.gmra.mrb[0].mxu1 %vm404_vm3, %v745_v15 }
  0x9b   : > { %4809 = vmatprep.mubr.msk.bf16.mxu1 %vm6016_vm1, %v6015_v2  ;;  %4826 = vmatpush3.bf16.msra.mxu1 %v931_v21  ;;  %v898_v21 = vshrl.u32 %v6474_v47, 16 }
  0x9c   : > { %4847 = vmatprep.subr.bf16.mxu1 %v6015_v2  ;;  %5100 = vmatmul.mubr.msk.bf16.gmra.mrb[8].mxu0 %vm404_vm3, %v2634_v27  ;;  %v6539_v27 = vld [vmem:[%s6109_s9 + $0x2c] ss:$0 sps:$4 sm:$0x33]  }
  0x9d   : > { %5103 = vmatprep.mubr.msk.bf16.mxu0 %vm6016_vm1, %v6015_v2  ;;  %v900_v23 = vrot.slane %v898_v21, 1 }
  0x9f   : > { %v904_v28 = vor.u32 %v903_v25, %v900_v23  ;;  %v6670_v23 = vld [vmem:[%s6247_s8 + $0x20] sm:$0xff]  }
  0xa2   : > { %4810 = vmatmul.mubr.msk.bf16.gmra.mrb[4].mxu1 %vm404_vm3, %v747_v33  ;;  %v910_v33 = vshll.u32 %v6539_v27, 16 }
  0xa3   : > { %4813 = vmatprep.mubr.msk.bf16.mxu1 %vm6016_vm1, %v6015_v2 }
  0xa4   : > { %5104 = vmatmul.mubr.msk.bf16.gmra.mrb[12].mxu0 %vm404_vm3, %v2643_v39  ;;  %v912_v37 = vrot.slane %v910_v33, 2  ;;  %v5919_v39 = vld [vmem:[%s6247_s8] sm:$0xff]  }
  0xa5   : > { %5107 = vmatprep.mubr.msk.bf16.mxu0 %vm6016_vm1, %v6015_v2  ;;  %v6683_v33 = vld [vmem:[%s6109_s9 + $0x20] sm:$0xff]  }
  0xaa   : > { %4814 = vmatmul.mubr.msk.bf16.gmra.mrb[8].mxu1 %vm404_vm3, %v749_v10  ;;  %v4383_v10 = vld [vmem:[%s7253_s3 + $0x18] sm:$0xf] }
  0xab   : > { %4817 = vmatprep.mubr.msk.bf16.mxu1 %vm6016_vm1, %v6015_v2  ;;  %v1203_v20 = vsel %vm420_vm0, %v4383_v10, 0 }
  0xac   : > { %5108 = vmatmul.mubr.msk.bf16.gmra.mrb[16].mxu0 %vm404_vm3, %v2652_v50  ;;  %v3010_v50 = vld [vmem:[%s6247_s8] sm:$0xf] }
  0xad   : > { %5113 = vmatprep.mubr.msk.bf16.mxu0 %vm6016_vm1, %v6015_v2 }
  0xb2   : > { %4818 = vmatmul.mubr.msk.bf16.gmra.mrb[12].mxu1 %vm404_vm3, %v751_v32  ;;  %v4503_v32 = vcombine.low %v3010_v50, %v6591_v53 }
  0xb3   : > { %4821 = vmatprep.mubr.msk.bf16.mxu1 %vm6016_vm1, %v6015_v2 }
  0xb4   : > { %5114 = vmatmul.mubr.msk.bf16.vlgmr.msra.gmra.mrb[0].mxu0 %vm404_vm3, %v6265_v43  ;;  %v883_v43 = vshll.u32 %v6360_v26, 16  ;;  %v3054_v54 = vshll.u32 %v4503_v32, 16  ;;  %v3052_v7 = vshrl.u32 %v4503_v32, 16  ;;  %v5938_v32 = vld [vmem:[%s6109_s9 + $0x30] ss:$0 sps:$4 sm:$0x33]  }
  0xb5   : > { %5134 = vmatpush3.bf16.msra.mxu0 %v2925_v5  ;;  %5117 = vmatprep.mubr.msk.bf16.mxu0 %vm6016_vm1, %v6015_v2 }
  0xb6   : > { %5155 = vmatprep.subr.bf16.mxu0 %v6015_v2  ;;  %v885_v63 = vrot.slane %v883_v43, 2  ;;  %v3056_v56 = vrot.slane %v3054_v54, 1  ;;  %v6639_v43 = vcombine.low %v1135_v34, %v6633_v1  ;;  %v3205_v34 = vrot.slane %v6619_v58, 1 }
  0xb8   : > { %v886_v26 = vor.u32 %v885_v63, %v882_v9  ;;  %v3069_v9 = vrot.slane %v3067_v8, 1  ;;  %v6647_v63 = vld [vmem:[%s6247_s8 + $0x18] sm:$0xff]  }
  0xb9   : > { %v3079_v14 = vshrl.u32 %v6647_v63, 16 }
  0xba   : > { %4822 = vmatmul.mubr.msk.bf16.gmra.mrb[16].mxu1 %vm404_vm3, %v753_v57  ;;  %v887_v11 = vsel %vm861_vm4, %v877_v60, %v886_v26  ;;  %v3061_v57 = vrot.slane %v3059_v40, 1  ;;  %v1299_v40 = vshll.u32 %v6639_v43, 16 }
  0xbb   : > { %4827 = vmatprep.mubr.msk.bf16.mxu1 %vm6016_vm1, %v6015_v2 }
  0xbc   : > { %5118 = vmatmul.mubr.msk.bf16.gmra.mrb[4].mxu0 %vm404_vm3, %v6272_v46  ;;  %v892_v46 = vshll.u32 %v6378_v31, 16  ;;  %v1032_v31 = vrot.slane %v6539_v27, 2 }
  0xbd   : > { %5121 = vmatprep.mubr.msk.bf16.mxu0 %vm6016_vm1, %v6015_v2 }
  0xbe   : > { %v894_v15 = vrot.slane %v892_v46, 2  ;;  %v3071_v46 = vshrl.u32 %v6619_v58, 16 }
  0xc0   : > { %v895_v16 = vor.u32 %v894_v15, %v891_v42  ;;  %v4395_v42 = vld [vmem:[%s7253_s3 + $0x1c] sm:$0xf]  ;;  %v3073_v21 = vor.u32 %v3071_v46, %v3069_v9  ;;  %v3207_v46 = vrot.slane %v6647_v63, 1 }
  0xc2   : > { %4828 = vmatmul.mubr.msk.bf16.vlgmr.msra.gmra.mrb[0].mxu1 %vm404_vm3, %v878_v62  ;;  %v905_v36 = vsel %vm861_vm4, %v895_v16, %v904_v28  ;;  %v3065_v62 = vor.u32 %v3063_v59, %v3061_v57 }
  0xc3   : > { %4831 = vmatprep.mubr.msk.bf16.mxu1 %vm6016_vm1, %v6015_v2  ;;  %4848 = vmatpush3.bf16.msra.mxu1 %v1050_v0  ;;  %v1176_v0 = vrot.slane %v6639_v43, 2 }
  0xc4   : > { %4869 = vmatprep.subr.bf16.mxu1 %v6015_v2  ;;  %5122 = vmatmul.mubr.msk.bf16.gmra.mrb[8].mxu0 %vm404_vm3, %v6281_v49  ;;  %v896_v49 = vsel %vm861_vm4, %v886_v26, %v895_v16  ;;  %v1177_v26 = vrot.slane %v6642_v19, 2  ;;  %v3070_v3 = vsel %vm359_vm2, %v3065_v62, %v3069_v9  ;;  %v6664_v16 = vld [vmem:[%s6109_s9 + $0x18] sm:$0xff]  }
  0xc5   : > { %5125 = vmatprep.mubr.msk.bf16.mxu0 %vm6016_vm1, %v6015_v2  ;;  %v1179_v25 = vrot.slane %v6664_v16, 2  ;;  %v1316_v62 = vshll.u32 %v6664_v16, 16 }
  0xc6   : > { %v1178_v15 = vsel %vm1022_vm6, %v1176_v0, %v1177_v26  ;;  %v4402_v0 = vld [vmem:[%s7253_s3 + $0x20] sm:$0xf] }
  0xca   : > { %4832 = vmatmul.mubr.msk.bf16.gmra.mrb[4].mxu1 %vm404_vm3, %v887_v11  ;;  %v3075_v11 = vshll.u32 %v6647_v63, 16 }
  0xcb   : > { %4835 = vmatprep.mubr.msk.bf16.mxu1 %vm6016_vm1, %v6015_v2 }
  0xcc   : > { %5126 = vmatmul.mubr.msk.bf16.gmra.mrb[12].mxu0 %vm404_vm3, %v6301_v44  ;;  %v907_v44 = vshrl.u32 %v6539_v27, 16  ;;  %v3077_v22 = vrot.slane %v3075_v11, 1  ;;  %v1483_v11 = vsel %vm420_vm0, %v4402_v0, 0 }
  0xcd   : > { %5129 = vmatprep.mubr.msk.bf16.mxu0 %vm6016_vm1, %v6015_v2 }
  0xce   : > { %v909_v30 = vrot.slane %v907_v44, 1  ;;  %v3078_v27 = vsel %vm359_vm2, %v3073_v21, %v3077_v22  ;;  %v1180_v44 = vsel %vm1022_vm6, %v1177_v26, %v1179_v25  ;;  %v1325_v21 = vshll.u32 %v6683_v33, 16 }
  0xd0   : > { %v913_v51 = vor.u32 %v912_v37, %v909_v30  ;;  %v6688_v30 = vld [vmem:[%s6247_s8 + $0x28] ss:$0 sps:$4 sm:$0x11]   ;;  %v1181_v37 = vrot.slane %v6683_v33, 2 }
  0xd2   : > { %4836 = vmatmul.mubr.msk.bf16.gmra.mrb[8].mxu1 %vm404_vm3, %v896_v49  ;;  %v914_v41 = vsel %vm861_vm4, %v904_v28, %v913_v51  ;;  %v1364_v49 = vsel %vm420_vm0, %v4395_v42, 0  ;;  %v3083_v28 = vshll.u32 %v6670_v23, 16  ;;  %v3091_v51 = vshll.u32 %v6688_v30, 16 }
  0xd3   : > { %4839 = vmatprep.mubr.msk.bf16.mxu1 %vm6016_vm1, %v6015_v2 }
  0xd4   : > { %5130 = vmatmul.mubr.msk.bf16.gmra.mrb[16].mxu0 %vm404_vm3, %v2770_v35  ;;  %v3081_v35 = vor.u32 %v3079_v14, %v3077_v22  ;;  %v3093_v10 = vrot.slane %v3091_v51, 1  ;;  %v3208_v22 = vsel %vm589_vm5, %v3205_v34, %v3207_v46  ;;  %v3314_v51 = vld [vmem:[%s6247_s8 + $0x4] sm:$0xe] }
  0xd5   : > { %5135 = vmatprep.mubr.msk.bf16.mxu0 %vm6016_vm1, %v6015_v2 }
  0xda   : > { %4840 = vmatmul.mubr.msk.bf16.gmra.mrb[12].mxu1 %vm404_vm3, %v905_v36  ;;  %v3085_v36 = vrot.slane %v3083_v28, 1 }
  0xdb   : > { %4843 = vmatprep.mubr.msk.bf16.mxu1 %vm6016_vm1, %v6015_v2 }
  0xdc   : > { %5136 = vmatmul.mubr.msk.bf16.vlgmr.msra.gmra.mrb[0].mxu0 %vm404_vm3, %v5919_v39  ;;  %v3086_v38 = vsel %vm359_vm2, %v3081_v35, %v3085_v36  ;;  %v3087_v39 = vshrl.u32 %v6670_v23, 16 }
  0xdd   : > { %5156 = vmatpush3.bf16.msra.mxu0 %v3111_v52  ;;  %5139 = vmatprep.mubr.msk.bf16.mxu0 %vm6016_vm1, %v6015_v2  ;;  %v1182_v52 = vsel %vm1022_vm6, %v1179_v25, %v1181_v37  ;;  %v1327_v25 = vrot.slane %v1325_v21, 3 }
  0xde   : > { %5177 = vmatprep.subr.bf16.mxu0 %v6015_v2 }
  0xe2   : > { %4844 = vmatmul.mubr.msk.bf16.gmra.mrb[16].mxu1 %vm404_vm3, %v914_v41  ;;  %v6700_v41 = vld [vmem:[%s6109_s9 + $0x28] sm:$0xff]  }
  0xe3   : > { %4849 = vmatprep.mubr.msk.bf16.mxu1 %vm6016_vm1, %v6015_v2  ;;  %v1331_v28 = vshrl.u32 %v6700_v41, 16 }
  0xe4   : > { %5140 = vmatmul.mubr.msk.bf16.gmra.mrb[4].mxu0 %vm404_vm3, %v5921_v45  ;;  %v3089_v45 = vor.u32 %v3087_v39, %v3085_v36  ;;  %v3211_v39 = vrot.slane %v6688_v30, 1  ;;  %v6790_v30 = vld [vmem:[%s6247_s8 + $0xc] sm:$0xff]  }
  0xe5   : > { %5143 = vmatprep.mubr.msk.bf16.mxu0 %vm6016_vm1, %v6015_v2  ;;  %v3485_v21 = vshll.u32 %v6790_v30, 16 }
  0xe6   : > { %v3094_v50 = vsel %vm359_vm2, %v3089_v45, %v3093_v10 }
  0xea   : > { %4850 = vmatmul.mubr.msk.bf16.vlgmr.msra.gmra.mrb[0].mxu1 %vm404_vm3, %v6354_v24  ;;  %v5924_v24 = vld [vmem:[%s6247_s8 + $0x18] sm:$0xff]  }
  0xeb   : > { %4853 = vmatprep.mubr.msk.bf16.mxu1 %vm6016_vm1, %v6015_v2  ;;  %4870 = vmatpush3.bf16.msra.mxu1 %v1203_v20  ;;  %v3196_v20 = vld [vmem:[%s6247_s8] sm:$0xe] }
  0xec   : > { %4891 = vmatprep.subr.bf16.mxu1 %v6015_v2  ;;  %5144 = vmatmul.mubr.msk.bf16.gmra.mrb[8].mxu0 %vm404_vm3, %v5923_v48  ;;  %v1183_v48 = vrot.slane %v6700_v41, 2 }
  0xed   : > { %5147 = vmatprep.mubr.msk.bf16.mxu0 %vm6016_vm1, %v6015_v2 }
  0xee   : > { %v1184_v54 = vsel %vm1022_vm6, %v1181_v37, %v1183_v48  ;;  %v1333_v37 = vrot.slane %v1331_v28, 2 }
  0xf2   : > { %4854 = vmatmul.mubr.msk.bf16.gmra.mrb[4].mxu1 %vm404_vm3, %v6369_v29  ;;  %v1030_v29 = vrot.slane %v6474_v47, 2  ;;  %v4514_v47 = vld [vmem:[%s7253_s3 + $0x50] sm:$0xf] }
  0xf3   : > { %4857 = vmatprep.mubr.msk.bf16.mxu1 %vm6016_vm1, %v6015_v2  ;;  %v3229_v60 = vsel %vm420_vm0, %v4514_v47, 0 }
  0xf4   : > { %5148 = vmatmul.mubr.msk.bf16.gmra.mrb[12].mxu0 %vm404_vm3, %v5924_v24  ;;  %v1031_v5 = vsel %vm1022_vm6, %v1028_v18, %v1030_v29  ;;  %v1033_v61 = vsel %vm1022_vm6, %v1030_v29, %v1032_v31  ;;  %v4515_v24 = vcombine.low %v3196_v20, %v6591_v53  ;;  %v3203_v29 = vrot.slane %v6603_v13, 1 }
  0xf5   : > { %5151 = vmatprep.mubr.msk.bf16.mxu0 %vm6016_vm1, %v6015_v2  ;;  %v1296_v53 = vshrl.u32 %v6639_v43, 16  ;;  %v1313_v43 = vshrl.u32 %v6664_v16, 16 }
  0xf6   : > { %v3206_v9 = vsel %vm589_vm5, %v3203_v29, %v3205_v34 }
  0xf7   : > { %v1298_v31 = vrot.slane %v1296_v53, 2  ;;  %v1315_v26 = vrot.slane %v1313_v43, 2 }
  0xfa   : > { %4858 = vmatmul.mubr.msk.bf16.gmra.mrb[8].mxu1 %vm404_vm3, %v6388_v12  ;;  %v3057_v12 = vor.u32 %v3056_v56, %v3052_v7  ;;  %v4521_v7 = vld [vmem:[%s7253_s3 + $0x54] sm:$0xf]  ;;  %v1185_v56 = vrot.slane %v5938_v32, 2 }
  0xfb   : > { %4861 = vmatprep.mubr.msk.bf16.mxu1 %vm6016_vm1, %v6015_v2 }
  0xfc   : > { %5152 = vmatmul.mubr.msk.bf16.gmra.mrb[16].mxu0 %vm404_vm3, %v5925_v55  ;;  %v3062_v18 = vsel %vm359_vm2, %v3057_v12, %v3061_v57  ;;  %v3202_v55 = vrot.slane %v4515_v24, 1  ;;  %v1307_v12 = vshll.u32 %v6642_v19, 16  ;;  %v3382_v57 = vsel %vm420_vm0, %v4521_v7, 0  ;;  %v4533_v7 = vld [vmem:[%s7253_s3 + $0x58] sm:$0xf] }
  0xfd   : > { %5157 = vmatprep.mubr.msk.bf16.mxu0 %vm6016_vm1, %v6015_v2  ;;  %v1186_v47 = vsel %vm1022_vm6, %v1183_v48, %v1185_v56 }
  0xfe   : > { %v3204_v13 = vsel %vm589_vm5, %v3202_v55, %v3203_v29  ;;  %v1309_v8 = vrot.slane %v1307_v12, 3  ;;  %v3356_v29 = vrot.slane %v6790_v30, 1  ;;  %v3542_v12 = vsel %vm420_vm0, %v4533_v7, 0 }
 0x102   : > { %4862 = vmatmul.mubr.msk.bf16.gmra.mrb[12].mxu1 %vm404_vm3, %v1031_v5  ;;  %v1304_v5 = vshrl.u32 %v6642_v19, 16 }
 0x103   : > { %4865 = vmatprep.mubr.msk.bf16.mxu1 %vm6016_vm1, %v6015_v2 }
 0x104   : > { %5158 = vmatmul.mubr.msk.bf16.vlgmr.msra.gmra.mrb[0].mxu0 %vm404_vm3, %v3062_v18  ;;  %v1301_v18 = vrot.slane %v1299_v40, 3  ;;  %v1306_v59 = vrot.slane %v1304_v5, 2  ;;  %v6806_v40 = vld [vmem:[%s6247_s8 + $0x14] sm:$0xff]   ;;  %v1449_v5 = vld [vmem:[%s6109_s9 + $0x8] sm:$0x8] }
 0x105   : > { %5178 = vmatpush3.bf16.msra.mxu0 %v3229_v60  ;;  %5161 = vmatprep.mubr.msk.bf16.mxu0 %vm6016_vm1, %v6015_v2 }
 0x106   : > { %5199 = vmatprep.subr.bf16.mxu0 %v6015_v2  ;;  %v1302_v60 = vor.u32 %v1301_v18, %v1298_v31  ;;  %v1457_v18 = vrot.slane %v6642_v19, 3 }
 0x10a   : > { %4866 = vmatmul.mubr.msk.bf16.gmra.mrb[16].mxu1 %vm404_vm3, %v1033_v61  ;;  %v1310_v61 = vor.u32 %v1309_v8, %v1306_v59  ;;  %v4409_v8 = vld [vmem:[%s7253_s3 + $0x24] sm:$0xf] }
 0x10b   : > { %4871 = vmatprep.mubr.msk.bf16.mxu1 %vm6016_vm1, %v6015_v2  ;;  %v1621_v19 = vsel %vm420_vm0, %v4409_v8, 0 }
 0x10c   : > { %5162 = vmatmul.mubr.msk.bf16.gmra.mrb[4].mxu0 %vm404_vm3, %v3070_v3  ;;  %v1311_v58 = vsel %vm1294_vm8, %v1302_v60, %v1310_v61  ;;  %v1318_v3 = vrot.slane %v1316_v62, 3  ;;  %v6840_v62 = vld [vmem:[%s6247_s8 + $0x24] sm:$0xff]  }
 0x10d   : > { %5165 = vmatprep.mubr.msk.bf16.mxu0 %vm6016_vm1, %v6015_v2  ;;  %v3362_v0 = vrot.slane %v6840_v62, 1 }
 0x10e   : > { %v1319_v42 = vor.u32 %v1318_v3, %v1315_v26 }
 0x110   : > { %v1320_v63 = vsel %vm1294_vm8, %v1310_v61, %v1319_v42  ;;  %v1459_v61 = vrot.slane %v6664_v16, 3  ;;  %v1461_v16 = vrot.slane %v6683_v33, 3 }
 0x112   : > { %4872 = vmatmul.mubr.msk.bf16.vlgmr.msra.gmra.mrb[0].mxu1 %vm404_vm3, %v1178_v15  ;;  %v1322_v15 = vshrl.u32 %v6683_v33, 16  ;;  %v1462_v3 = vsel %vm1455_vm7, %v1459_v61, %v1461_v16 }
 0x113   : > { %4875 = vmatprep.mubr.msk.bf16.mxu1 %vm6016_vm1, %v6015_v2  ;;  %4892 = vmatpush3.bf16.msra.mxu1 %v1364_v49 }
 0x114   : > { %4913 = vmatprep.subr.bf16.mxu1 %v6015_v2  ;;  %5166 = vmatmul.mubr.msk.bf16.gmra.mrb[8].mxu0 %vm404_vm3, %v3078_v27  ;;  %v1324_v49 = vrot.slane %v1322_v15, 2  ;;  %v3209_v27 = vrot.slane %v6670_v23, 1  ;;  %v6771_v23 = vld [vmem:[%s6109_s9 + $0x30] ss:$0 sps:$4 sm:$0x77]   ;;  %v3482_v15 = vshrl.u32 %v6790_v30, 16 }
 0x115   : > { %5169 = vmatprep.mubr.msk.bf16.mxu0 %vm6016_vm1, %v6015_v2  ;;  %v1340_v10 = vshrl.u32 %v6771_v23, 16  ;;  %v1343_v20 = vshll.u32 %v6771_v23, 16 }
 0x116   : > { %v1328_v14 = vor.u32 %v1327_v25, %v1324_v49  ;;  %v3210_v35 = vsel %vm589_vm5, %v3207_v46, %v3209_v27  ;;  %v3212_v48 = vsel %vm589_vm5, %v3209_v27, %v3211_v39  ;;  %v3484_v25 = vrot.slane %v3482_v15, 1 }
 0x117   : > { %v1342_v32 = vrot.slane %v1340_v10, 2  ;;  %v3487_v27 = vrot.slane %v3485_v21, 2 }
 0x118   : > { %v1329_v36 = vsel %vm1294_vm8, %v1319_v42, %v1328_v14 }
 0x11a   : > { %4876 = vmatmul.mubr.msk.bf16.gmra.mrb[4].mxu1 %vm404_vm3, %v1180_v44  ;;  %v1334_v44 = vshll.u32 %v6700_v41, 16 }
 0x11b   : > { %4879 = vmatprep.mubr.msk.bf16.mxu1 %vm6016_vm1, %v6015_v2 }
 0x11c   : > { %5170 = vmatmul.mubr.msk.bf16.gmra.mrb[12].mxu0 %vm404_vm3, %v3086_v38  ;;  %v1336_v38 = vrot.slane %v1334_v44, 3  ;;  %v3488_v44 = vor.u32 %v3487_v27, %v3484_v25  ;;  %v3636_v25 = vrot.slane %v6806_v40, 2 }
 0x11d   : > { %5173 = vmatprep.mubr.msk.bf16.mxu0 %vm6016_vm1, %v6015_v2 }
 0x11e   : > { %v1337_v45 = vor.u32 %v1336_v38, %v1333_v37  ;;  %v1465_v37 = vrot.slane %v6771_v23, 3 }
 0x120   : > { %v1338_v24 = vsel %vm1294_vm8, %v1328_v14, %v1337_v45 }
 0x122   : > { %4880 = vmatmul.mubr.msk.bf16.gmra.mrb[8].mxu1 %vm404_vm3, %v1182_v52  ;;  %v6778_v52 = vld [vmem:[%s6247_s8 + $0x8] sm:$0xf] }
 0x123   : > { %4883 = vmatprep.mubr.msk.bf16.mxu1 %vm6016_vm1, %v6015_v2 }
 0x124   : > { %5174 = vmatmul.mubr.msk.bf16.gmra.mrb[16].mxu0 %vm404_vm3, %v3094_v50  ;;  %v6787_v50 = vcombine.low %v3314_v51, %v6778_v52 }
 0x125   : > { %5179 = vmatprep.mubr.msk.bf16.mxu0 %vm6016_vm1, %v6015_v2 }
 0x126   : > { %v3355_v55 = vrot.slane %v6787_v50, 1  ;;  %v3477_v42 = vshll.u32 %v6787_v50, 16 }
 0x128   : > { %v3357_v53 = vsel %vm589_vm5, %v3355_v55, %v3356_v29  ;;  %v3479_v49 = vrot.slane %v3477_v42, 2  ;;  %v5947_v55 = vld [vmem:[%s6125_s14] sm:$0xff]   ;;  %v6948_v42 = vld [vmem:[%s6125_s14 + $0x8] sm:$0xff]  }
 0x12a   : > { %4884 = vmatmul.mubr.msk.bf16.gmra.mrb[12].mxu1 %vm404_vm3, %v1184_v54  ;;  %v1345_v54 = vrot.slane %v1343_v20, 3 }
 0x12b   : > { %4887 = vmatprep.mubr.msk.bf16.mxu1 %vm6016_vm1, %v6015_v2 }
 0x12c   : > { %5180 = vmatmul.mubr.msk.bf16.vlgmr.msra.gmra.mrb[0].mxu0 %vm404_vm3, %v3204_v13  ;;  %v1346_v56 = vor.u32 %v1345_v54, %v1342_v32  ;;  %v4420_v54 = vld [vmem:[%s7253_s3 + $0x28] sm:$0xf] }
 0x12d   : > { %5200 = vmatpush3.bf16.msra.mxu0 %v3382_v57  ;;  %5183 = vmatprep.mubr.msk.bf16.mxu0 %vm6016_vm1, %v6015_v2  ;;  %v4403_v57 = vcombine.low %v1449_v5, %v6633_v1  ;;  %v6823_v1 = vld [vmem:[%s6247_s8 + $0x1c] sm:$0xff]   ;;  %v1807_v7 = vsel %vm420_vm0, %v4420_v54, 0 }
 0x12e   : > { %5221 = vmatprep.subr.bf16.mxu0 %v6015_v2  ;;  %v1347_v13 = vsel %vm1294_vm8, %v1337_v45, %v1346_v56  ;;  %v3360_v60 = vrot.slane %v6823_v1, 1  ;;  %v3503_v23 = vshll.u32 %v6823_v1, 16  ;;  %v3509_v56 = vshrl.u32 %v6840_v62, 16 }
 0x12f   : > { %v1456_v31 = vrot.slane %v4403_v57, 3  ;;  %v6908_v57 = vld [vmem:[%s6247_s8 + $0x2c] ss:$0 sps:$4 sm:$0x33]  }
 0x130   : > { %v3363_v26 = vsel %vm589_vm5, %v3360_v60, %v3362_v0  ;;  %v3505_v32 = vrot.slane %v3503_v23, 2  ;;  %v3640_v23 = vrot.slane %v6840_v62, 2 }
 0x131   : > { %v1458_v34 = vsel %vm1455_vm7, %v1456_v31, %v1457_v18 }
 0x132   : > { %4888 = vmatmul.mubr.msk.bf16.gmra.mrb[16].mxu1 %vm404_vm3, %v1186_v47  ;;  %v3358_v47 = vrot.slane %v6806_v40, 1 }
 0x133   : > { %4893 = vmatprep.mubr.msk.bf16.mxu1 %vm6016_vm1, %v6015_v2 }
 0x134   : > { %5184 = vmatmul.mubr.msk.bf16.gmra.mrb[4].mxu0 %vm404_vm3, %v3206_v9  ;;  %v3359_v59 = vsel %vm589_vm5, %v3356_v29, %v3358_v47  ;;  %v3361_v43 = vsel %vm589_vm5, %v3358_v47, %v3360_v60  ;;  %v1460_v9 = vsel %vm1455_vm7, %v1457_v18, %v1459_v61  ;;  %v5948_v47 = vld [vmem:[%s6125_s14 + $0x8] sm:$0xff]   ;;  %v3518_v18 = vshrl.u32 %v6908_v57, 16 }
 0x135   : > { %5187 = vmatprep.mubr.msk.bf16.mxu0 %vm6016_vm1, %v6015_v2 }
 0x13a   : > { %4894 = vmatmul.mubr.msk.bf16.vlgmr.msra.gmra.mrb[0].mxu1 %vm404_vm3, %v1311_v58  ;;  %v5946_v58 = vld [vmem:[%s6247_s8 + $0x2c] ss:$0 sps:$4 sm:$0x11]  }
 0x13b   : > { %4897 = vmatprep.mubr.msk.bf16.mxu1 %vm6016_vm1, %v6015_v2  ;;  %4914 = vmatpush3.bf16.msra.mxu1 %v1483_v11  ;;  %v3364_v46 = vrot.slane %v5946_v58, 1  ;;  %v3474_v11 = vshrl.u32 %v6787_v50, 16  ;;  %v6933_v58 = vld [vmem:[%s6125_s14 + $0x4] sm:$0xf] }
 0x13c   : > { %4935 = vmatprep.subr.bf16.mxu1 %v6015_v2  ;;  %5188 = vmatmul.mubr.msk.bf16.gmra.mrb[8].mxu0 %vm404_vm3, %v3208_v22  ;;  %v1463_v22 = vrot.slane %v6700_v41, 3  ;;  %v4540_v41 = vld [vmem:[%s7253_s3 + $0x5c] sm:$0xf] }
 0x13d   : > { %5191 = vmatprep.mubr.msk.bf16.mxu0 %vm6016_vm1, %v6015_v2  ;;  %v3365_v33 = vsel %vm589_vm5, %v3362_v0, %v3364_v46  ;;  %v3660_v45 = vsel %vm420_vm0, %v4540_v41, 0 }
 0x13e   : > { %v1464_v14 = vsel %vm1455_vm7, %v1461_v16, %v1463_v22  ;;  %v1466_v10 = vsel %vm1455_vm7, %v1463_v22, %v1465_v37  ;;  %v1706_v16 = vld [vmem:[%s6125_s14] sm:$0xf]  ;;  %v3638_v37 = vrot.slane %v6823_v1, 2 }
 0x13f   : > { %v5953_v22 = vld [vmem:[%s6125_s14 + $0x20] sm:$0xff]  }
 0x140   : > { %v3641_v54 = vsel %vm1022_vm6, %v3638_v37, %v3640_v23 }
 0x142   : > { %4898 = vmatmul.mubr.msk.bf16.gmra.mrb[4].mxu1 %vm404_vm3, %v1320_v63  ;;  %v3476_v63 = vrot.slane %v3474_v11, 1  ;;  %v3634_v11 = vrot.slane %v6790_v30, 2 }
 0x143   : > { %4901 = vmatprep.mubr.msk.bf16.mxu1 %vm6016_vm1, %v6015_v2 }
 0x144   : > { %5192 = vmatmul.mubr.msk.bf16.gmra.mrb[12].mxu0 %vm404_vm3, %v3210_v35  ;;  %v3480_v28 = vor.u32 %v3479_v49, %v3476_v63  ;;  %v3491_v35 = vshrl.u32 %v6806_v40, 16  ;;  %v1755_v49 = vshll.u32 %v6948_v42, 16 }
 0x145   : > { %5195 = vmatprep.mubr.msk.bf16.mxu0 %vm6016_vm1, %v6015_v2 }
 0x146   : > { %v3489_v38 = vsel %vm861_vm4, %v3480_v28, %v3488_v44  ;;  %v3493_v39 = vrot.slane %v3491_v35, 1  ;;  %v6963_v28 = vld [vmem:[%s6125_s14 + $0x10] sm:$0xff]   ;;  %v4432_v35 = vld [vmem:[%s7253_s3 + $0x2c] sm:$0xf] }
 0x147   : > { %v1763_v41 = vshll.u32 %v6963_v28, 16 }
 0x14a   : > { %4902 = vmatmul.mubr.msk.bf16.gmra.mrb[8].mxu1 %vm404_vm3, %v1329_v36  ;;  %v3494_v36 = vshll.u32 %v6806_v40, 16 }
 0x14b   : > { %4905 = vmatprep.mubr.msk.bf16.mxu1 %vm6016_vm1, %v6015_v2 }
 0x14c   : > { %5196 = vmatmul.mubr.msk.bf16.gmra.mrb[16].mxu0 %vm404_vm3, %v3212_v48  ;;  %v3496_v51 = vrot.slane %v3494_v36, 2  ;;  %v3500_v48 = vshrl.u32 %v6823_v1, 16  ;;  %v1759_v36 = vshrl.u32 %v6948_v42, 16 }
 0x14d   : > { %5201 = vmatprep.mubr.msk.bf16.mxu0 %vm6016_vm1, %v6015_v2 }
 0x14e   : > { %v3497_v20 = vor.u32 %v3496_v51, %v3493_v39  ;;  %v1765_v51 = vrot.slane %v1763_v41, 1 }
 0x150   : > { %v3498_v50 = vsel %vm861_vm4, %v3488_v44, %v3497_v20  ;;  %v3637_v44 = vsel %vm1022_vm6, %v3634_v11, %v3636_v25 }
 0x152   : > { %4906 = vmatmul.mubr.msk.bf16.gmra.mrb[12].mxu1 %vm404_vm3, %v1338_v24  ;;  %v3502_v24 = vrot.slane %v3500_v48, 1 }
 0x153   : > { %4909 = vmatprep.mubr.msk.bf16.mxu1 %vm6016_vm1, %v6015_v2 }
 0x154   : > { %5202 = vmatmul.mubr.msk.bf16.vlgmr.msra.gmra.mrb[0].mxu0 %vm404_vm3, %v3357_v53  ;;  %v3506_v29 = vor.u32 %v3505_v32, %v3502_v24  ;;  %v3512_v53 = vshll.u32 %v6840_v62, 16  ;;  %v6996_v32 = vld [vmem:[%s6125_s14 + $0x20] sm:$0xff]  }
 0x155   : > { %5222 = vmatpush3.bf16.msra.mxu0 %v3542_v12  ;;  %5205 = vmatprep.mubr.msk.bf16.mxu0 %vm6016_vm1, %v6015_v2  ;;  %v3511_v12 = vrot.slane %v3509_v56, 1  ;;  %v1779_v62 = vshll.u32 %v6996_v32, 16  ;;  %v3745_v56 = vld [vmem:[%s6247_s8 + $0x8] sm:$0xc] }
 0x156   : > { %5243 = vmatprep.subr.bf16.mxu0 %v6015_v2  ;;  %v3507_v5 = vsel %vm861_vm4, %v3497_v20, %v3506_v29  ;;  %v1767_v20 = vshrl.u32 %v6963_v28, 16 }
 0x15a   : > { %4910 = vmatmul.mubr.msk.bf16.gmra.mrb[16].mxu1 %vm404_vm3, %v1347_v13  ;;  %v3514_v13 = vrot.slane %v3512_v53, 2  ;;  %v7008_v53 = vld [vmem:[%s6247_s8 + $0xc] sm:$0xf] }
 0x15b   : > { %4915 = vmatprep.mubr.msk.bf16.mxu1 %vm6016_vm1, %v6015_v2 }
 0x15c   : > { %5206 = vmatmul.mubr.msk.bf16.gmra.mrb[4].mxu0 %vm404_vm3, %v3359_v59  ;;  %v3515_v31 = vor.u32 %v3514_v13, %v3511_v12  ;;  %v3521_v59 = vshll.u32 %v6908_v57, 16  ;;  %v1781_v12 = vrot.slane %v1779_v62, 1  ;;  %v7014_v13 = vld [vmem:[%s6125_s14 + $0x28] ss:$0 sps:$4 sm:$0x11]  }
 0x15d   : > { %5209 = vmatprep.mubr.msk.bf16.mxu0 %vm6016_vm1, %v6015_v2 }
 0x15e   : > { %v3516_v8 = vsel %vm861_vm4, %v3506_v29, %v3515_v31  ;;  %v3523_v60 = vrot.slane %v3521_v59, 2  ;;  %v1783_v59 = vshrl.u32 %v6996_v32, 16 }
 0x162   : > { %4916 = vmatmul.mubr.msk.bf16.vlgmr.msra.gmra.mrb[0].mxu1 %vm404_vm3, %v1458_v34  ;;  %v3520_v34 = vrot.slane %v3518_v18, 1 }
 0x163   : > { %4919 = vmatprep.mubr.msk.bf16.mxu1 %vm6016_vm1, %v6015_v2  ;;  %4936 = vmatpush3.bf16.msra.mxu1 %v1621_v19  ;;  %v5949_v19 = vld [vmem:[%s6125_s14 + $0x10] sm:$0xff]  }
 0x164   : > { %4957 = vmatprep.subr.bf16.mxu1 %v6015_v2  ;;  %5210 = vmatmul.mubr.msk.bf16.gmra.mrb[8].mxu0 %vm404_vm3, %v3361_v43  ;;  %v3524_v61 = vor.u32 %v3523_v60, %v3520_v34  ;;  %v3627_v43 = vld [vmem:[%s6247_s8 + $0x4] sm:$0xc] }
 0x165   : > { %5213 = vmatprep.mubr.msk.bf16.mxu0 %vm6016_vm1, %v6015_v2  ;;  %v4541_v0 = vcombine.low %v3627_v43, %v6778_v52  ;;  %v4547_v52 = vld [vmem:[%s7253_s3 + $0x60] sm:$0xf] }
 0x167   : > { %v3633_v46 = vrot.slane %v4541_v0, 2  ;;  %v7039_v0 = vld [vmem:[%s6247_s8 + $0x18] sm:$0xff]  }
 0x169   : > { %v3635_v21 = vsel %vm1022_vm6, %v3633_v46, %v3634_v11  ;;  %v3789_v11 = vrot.slane %v7039_v0, 2 }
 0x16a   : > { %4920 = vmatmul.mubr.msk.bf16.gmra.mrb[4].mxu1 %vm404_vm3, %v1460_v9  ;;  %v3525_v9 = vsel %vm861_vm4, %v3515_v31, %v3524_v61  ;;  %v7018_v31 = vcombine.low %v3745_v56, %v7008_v53  ;;  %v1785_v61 = vor.u32 %v1783_v59, %v1781_v12  ;;  %v5970_v59 = vld [vmem:[%s6125_s14 + $0xc] sm:$0xff]  }
 0x16b   : > { %4923 = vmatprep.mubr.msk.bf16.mxu1 %vm6016_vm1, %v6015_v2 }
 0x16c   : > { %5214 = vmatmul.mubr.msk.bf16.gmra.mrb[12].mxu0 %vm404_vm3, %v3363_v26  ;;  %v5951_v26 = vld [vmem:[%s6125_s14 + $0x18] sm:$0xff]   ;;  %v3786_v34 = vrot.slane %v7018_v31, 2  ;;  %v3905_v41 = vshrl.u32 %v7018_v31, 16 }
 0x16d   : > { %5217 = vmatprep.mubr.msk.bf16.mxu0 %vm6016_vm1, %v6015_v2 }
 0x172   : > { %4924 = vmatmul.mubr.msk.bf16.gmra.mrb[8].mxu1 %vm404_vm3, %v1462_v3  ;;  %v4421_v3 = vcombine.low %v1706_v16, %v6933_v58  ;;  %v1892_v16 = vld [vmem:[%s6125_s14] sm:$0xe] }
 0x173   : > { %4927 = vmatprep.mubr.msk.bf16.mxu1 %vm6016_vm1, %v6015_v2  ;;  %v4433_v46 = vcombine.low %v1892_v16, %v6933_v58  ;;  %v7056_v58 = vld [vmem:[%s6247_s8 + $0x20] sm:$0xff]  }
 0x174   : > { %5218 = vmatmul.mubr.msk.bf16.gmra.mrb[16].mxu0 %vm404_vm3, %v3365_v33  ;;  %v1750_v15 = vshll.u32 %v4421_v3, 16  ;;  %v3813_v33 = vsel %vm420_vm0, %v4547_v52, 0  ;;  %v1748_v30 = vshrl.u32 %v4421_v3, 16 }
 0x175   : > { %5223 = vmatprep.mubr.msk.bf16.mxu0 %vm6016_vm1, %v6015_v2  ;;  %v1898_v52 = vrot.slane %v4433_v46, 1 }
 0x176   : > { %v1752_v63 = vrot.slane %v1750_v15, 1  ;;  %v1899_v15 = vrot.slane %v6948_v42, 1 }
 0x178   : > { %v1753_v27 = vor.u32 %v1752_v63, %v1748_v30  ;;  %v3791_v30 = vrot.slane %v7056_v58, 2  ;;  %v1901_v63 = vrot.slane %v6963_v28, 1 }
 0x17a   : > { %4928 = vmatmul.mubr.msk.bf16.gmra.mrb[12].mxu1 %vm404_vm3, %v1464_v14  ;;  %v1757_v14 = vrot.slane %v1755_v49, 1  ;;  %v3792_v49 = vsel %vm1022_vm6, %v3789_v11, %v3791_v30 }
 0x17b   : > { %4931 = vmatprep.mubr.msk.bf16.mxu1 %vm6016_vm1, %v6015_v2 }
 0x17c   : > { %5224 = vmatmul.mubr.msk.bf16.vlgmr.msra.gmra.mrb[0].mxu0 %vm404_vm3, %v3489_v38  ;;  %v1758_v40 = vsel %vm359_vm2, %v1753_v27, %v1757_v14  ;;  %v1925_v38 = vsel %vm420_vm0, %v4432_v35, 0  ;;  %v1761_v39 = vor.u32 %v1759_v36, %v1757_v14  ;;  %v1902_v27 = vsel %vm589_vm5, %v1899_v15, %v1901_v63 }
 0x17d   : > { %5244 = vmatpush3.bf16.msra.mxu0 %v3660_v45  ;;  %5227 = vmatprep.mubr.msk.bf16.mxu0 %vm6016_vm1, %v6015_v2  ;;  %v6981_v45 = vld [vmem:[%s6125_s14 + $0x18] sm:$0xff]  }
 0x17e   : > { %5265 = vmatprep.subr.bf16.mxu0 %v6015_v2  ;;  %v1766_v1 = vsel %vm359_vm2, %v1761_v39, %v1765_v51  ;;  %v1771_v48 = vshll.u32 %v6981_v45, 16  ;;  %v1775_v29 = vshrl.u32 %v6981_v45, 16  ;;  %v1903_v28 = vrot.slane %v6981_v45, 1 }
 0x17f   : > { %v1905_v45 = vrot.slane %v6996_v32, 1  ;;  %v4566_v32 = vld [vmem:[%s7253_s3 + $0x68] sm:$0xf] }
 0x180   : > { %v1773_v24 = vrot.slane %v1771_v48, 1 }
 0x182   : > { %4932 = vmatmul.mubr.msk.bf16.gmra.mrb[16].mxu1 %vm404_vm3, %v1466_v10  ;;  %v3639_v10 = vsel %vm1022_vm6, %v3636_v25, %v3638_v37  ;;  %v7073_v25 = vld [vmem:[%s6247_s8 + $0x28] sm:$0xff]   ;;  %v3908_v37 = vshll.u32 %v7018_v31, 16  ;;  %v3931_v31 = vshrl.u32 %v7056_v58, 16 }
 0x183   : > { %4937 = vmatprep.mubr.msk.bf16.mxu1 %vm6016_vm1, %v6015_v2  ;;  %v3793_v14 = vrot.slane %v7073_v25, 2  ;;  %v3943_v16 = vshll.u32 %v7073_v25, 16 }
 0x184   : > { %5228 = vmatmul.mubr.msk.bf16.gmra.mrb[4].mxu0 %vm404_vm3, %v3498_v50  ;;  %v1769_v50 = vor.u32 %v1767_v20, %v1765_v51 }
 0x185   : > { %5231 = vmatprep.mubr.msk.bf16.mxu0 %vm6016_vm1, %v6015_v2  ;;  %v3794_v35 = vsel %vm1022_vm6, %v3791_v30, %v3793_v14 }
 0x18a   : > { %4938 = vmatmul.mubr.msk.bf16.vlgmr.msra.gmra.mrb[0].mxu1 %vm404_vm3, %v5947_v55  ;;  %v1774_v55 = vsel %vm359_vm2, %v1769_v50, %v1773_v24 }
 0x18b   : > { %4941 = vmatprep.mubr.msk.bf16.mxu1 %vm6016_vm1, %v6015_v2  ;;  %4958 = vmatpush3.bf16.msra.mxu1 %v1807_v7  ;;  %v3642_v7 = vrot.slane %v6908_v57, 2  ;;  %v7021_v57 = vld [vmem:[%s6247_s8 + $0x10] sm:$0xff]  }
 0x18c   : > { %4979 = vmatprep.subr.bf16.mxu1 %v6015_v2  ;;  %5232 = vmatmul.mubr.msk.bf16.gmra.mrb[8].mxu0 %vm404_vm3, %v3507_v5  ;;  %v1777_v5 = vor.u32 %v1775_v29, %v1773_v24  ;;  %v3787_v60 = vrot.slane %v7021_v57, 2  ;;  %v3916_v39 = vshll.u32 %v7021_v57, 16  ;;  %v1907_v29 = vrot.slane %v7014_v13, 1 }
 0x18d   : > { %5235 = vmatprep.mubr.msk.bf16.mxu0 %vm6016_vm1, %v6015_v2 }
 0x18e   : > { %v1782_v18 = vsel %vm359_vm2, %v1777_v5, %v1781_v12  ;;  %v3918_v48 = vrot.slane %v3916_v39, 3  ;;  %v4091_v5 = vsel %vm420_vm0, %v4566_v32, 0  ;;  %v1908_v12 = vsel %vm589_vm5, %v1905_v45, %v1907_v29 }
 0x18f   : > { %v4065_v39 = vrot.slane %v7021_v57, 3 }
 0x192   : > { %4942 = vmatmul.mubr.msk.bf16.gmra.mrb[4].mxu1 %vm404_vm3, %v5948_v47  ;;  %v3643_v47 = vsel %vm1022_vm6, %v3640_v23, %v3642_v7  ;;  %v1906_v23 = vsel %vm589_vm5, %v1903_v28, %v1905_v45 }
 0x193   : > { %4945 = vmatprep.mubr.msk.bf16.mxu1 %vm6016_vm1, %v6015_v2 }
 0x194   : > { %5236 = vmatmul.mubr.msk.bf16.gmra.mrb[12].mxu0 %vm404_vm3, %v3516_v8  ;;  %v1787_v8 = vshll.u32 %v7014_v13, 16  ;;  %v2051_v13 = vrot.slane %v6138_v17, 1  ;;  %v5971_v17 = vld [vmem:[%s6125_s14 + $0x14] sm:$0xff]  }
 0x195   : > { %5239 = vmatprep.mubr.msk.bf16.mxu0 %vm6016_vm1, %v6015_v2 }
 0x196   : > { %v1789_v43 = vrot.slane %v1787_v8, 1  ;;  %v2052_v8 = vrot.slane %v5970_v59, 1 }
 0x198   : > { %v1790_v3 = vsel %vm359_vm2, %v1785_v61, %v1789_v43  ;;  %v2053_v61 = vsel %vm589_vm5, %v2051_v13, %v2052_v8 }
 0x19a   : > { %4946 = vmatmul.mubr.msk.bf16.gmra.mrb[8].mxu1 %vm404_vm3, %v5949_v19  ;;  %v4559_v19 = vld [vmem:[%s7253_s3 + $0x64] sm:$0xf] }
 0x19b   : > { %4949 = vmatprep.mubr.msk.bf16.mxu1 %vm6016_vm1, %v6015_v2 }
 0x19c   : > { %5240 = vmatmul.mubr.msk.bf16.gmra.mrb[16].mxu0 %vm404_vm3, %v3525_v9  ;;  %v3788_v9 = vsel %vm1022_vm6, %v3786_v34, %v3787_v60 }
 0x19d   : > { %5245 = vmatprep.mubr.msk.bf16.mxu0 %vm6016_vm1, %v6015_v2 }
 0x1a2   : > { %4950 = vmatmul.mubr.msk.bf16.gmra.mrb[12].mxu1 %vm404_vm3, %v5951_v26  ;;  %v3973_v26 = vsel %vm420_vm0, %v4559_v19, 0 }
 0x1a3   : > { %4953 = vmatprep.mubr.msk.bf16.mxu1 %vm6016_vm1, %v6015_v2 }
 0x1a4   : > { %5246 = vmatmul.mubr.msk.bf16.vlgmr.msra.gmra.mrb[0].mxu0 %vm404_vm3, %v3635_v21  ;;  %v3790_v21 = vsel %vm1022_vm6, %v3787_v60, %v3789_v11  ;;  %v3933_v60 = vrot.slane %v3931_v31, 2  ;;  %v3945_v11 = vrot.slane %v3943_v16, 3 }
 0x1a5   : > { %5266 = vmatpush3.bf16.msra.mxu0 %v3813_v33  ;;  %5249 = vmatprep.mubr.msk.bf16.mxu0 %vm6016_vm1, %v6015_v2  ;;  %v4439_v33 = vld [vmem:[%s7253_s3 + $0x30] sm:$0xf] }
 0x1a6   : > { %5287 = vmatprep.subr.bf16.mxu0 %v6015_v2  ;;  %v2078_v42 = vsel %vm420_vm0, %v4439_v33, 0 }
 0x1aa   : > { %4954 = vmatmul.mubr.msk.bf16.gmra.mrb[16].mxu1 %vm404_vm3, %v5953_v22  ;;  %v1900_v22 = vsel %vm589_vm5, %v1898_v52, %v1899_v15  ;;  %v7140_v52 = vld [vmem:[%s6247_s8 + $0x30] ss:$0 sps:$4 sm:$0x77]  }
 0x1ab   : > { %4959 = vmatprep.mubr.msk.bf16.mxu1 %vm6016_vm1, %v6015_v2  ;;  %v3949_v33 = vshrl.u32 %v7140_v52, 16 }
 0x1ac   : > { %5250 = vmatmul.mubr.msk.bf16.gmra.mrb[4].mxu0 %vm404_vm3, %v3637_v44  ;;  %v5966_v44 = vld [vmem:[%s6247_s8 + $0x30] ss:$0 sps:$4 sm:$0x33]  }
 0x1ad   : > { %5253 = vmatprep.mubr.msk.bf16.mxu0 %vm6016_vm1, %v6015_v2  ;;  %v3795_v36 = vrot.slane %v5966_v44, 2  ;;  %v5973_v44 = vld [vmem:[%s6125_s14 + $0x24] sm:$0xff]  }
 0x1ae   : > { %v2205_v45 = vshrl.u32 %v5973_v44, 16 }
 0x1af   : > { %v3796_v51 = vsel %vm1022_vm6, %v3793_v14, %v3795_v36 }
 0x1b2   : > { %4960 = vmatmul.mubr.msk.bf16.vlgmr.msra.gmra.mrb[0].mxu1 %vm404_vm3, %v1758_v40  ;;  %v1904_v40 = vsel %vm589_vm5, %v1901_v63, %v1903_v28  ;;  %v3951_v63 = vrot.slane %v3949_v33, 2  ;;  %v4058_v28 = vld [vmem:[%s6247_s8 + $0x8] sm:$0x8]  ;;  %s5847_s8 = smul.u32 10, %s7272_s15 }
 0x1b3   : > { %4963 = vmatprep.mubr.msk.bf16.mxu1 %vm6016_vm1, %v6015_v2  ;;  %4980 = vmatpush3.bf16.msra.mxu1 %v1925_v38  ;;  %v3913_v38 = vshrl.u32 %v7021_v57, 16  ;;  %v4567_v36 = vcombine.low %v4058_v28, %v7008_v53  ;;  %v2208_v53 = vshll.u32 %v5973_v44, 16  ;;  %v4067_v57 = vrot.slane %v7039_v0, 3 }
 0x1b4   : > { %5001 = vmatprep.subr.bf16.mxu1 %v6015_v2  ;;  %5254 = vmatmul.mubr.msk.bf16.gmra.mrb[8].mxu0 %vm404_vm3, %v3639_v10  ;;  %v3907_v10 = vrot.slane %v3905_v41, 2 }
 0x1b5   : > { %5257 = vmatprep.mubr.msk.bf16.mxu0 %vm6016_vm1, %v6015_v2  ;;  %v3915_v20 = vrot.slane %v3913_v38, 2  ;;  %v4064_v38 = vrot.slane %v4567_v36, 3 }
 0x1b7   : > { %v3919_v24 = vor.u32 %v3918_v48, %v3915_v20  ;;  %v2207_v20 = vrot.slane %v2205_v45, 1  ;;  %v2210_v48 = vrot.slane %v2208_v53, 2 }
 0x1ba   : > { %4964 = vmatmul.mubr.msk.bf16.gmra.mrb[4].mxu1 %vm404_vm3, %v1766_v1  ;;  %v3910_v1 = vrot.slane %v3908_v37, 3  ;;  %v5969_v37 = vld [vmem:[%s6125_s14 + $0x2c] ss:$0 sps:$4 sm:$0x11]  }
 0x1bb   : > { %4967 = vmatprep.mubr.msk.bf16.mxu1 %vm6016_vm1, %v6015_v2 }
 0x1bc   : > { %5258 = vmatmul.mubr.msk.bf16.gmra.mrb[12].mxu0 %vm404_vm3, %v3641_v54  ;;  %v3911_v50 = vor.u32 %v3910_v1, %v3907_v10  ;;  %v3922_v54 = vshrl.u32 %v7039_v0, 16  ;;  %v4066_v10 = vsel %vm1455_vm7, %v4064_v38, %v4065_v39 }
 0x1bd   : > { %5261 = vmatprep.mubr.msk.bf16.mxu0 %vm6016_vm1, %v6015_v2 }
 0x1be   : > { %v3920_v62 = vsel %vm1294_vm8, %v3911_v50, %v3919_v24  ;;  %v3924_v7 = vrot.slane %v3922_v54, 2  ;;  %v5974_v50 = vld [vmem:[%s6125_s14 + $0x2c] ss:$0 sps:$4 sm:$0x33]  }
 0x1bf   : > { %v2217_v54 = vshll.u32 %v5974_v50, 16 }
 0x1c2   : > { %4968 = vmatmul.mubr.msk.bf16.gmra.mrb[8].mxu1 %vm404_vm3, %v1774_v55  ;;  %v3925_v55 = vshll.u32 %v7039_v0, 16  ;;  %v4069_v0 = vrot.slane %v7056_v58, 3 }
 0x1c3   : > { %4971 = vmatprep.mubr.msk.bf16.mxu1 %vm6016_vm1, %v6015_v2 }
 0x1c4   : > { %5262 = vmatmul.mubr.msk.bf16.gmra.mrb[16].mxu0 %vm404_vm3, %v3643_v47  ;;  %v3927_v56 = vrot.slane %v3925_v55, 3  ;;  %v4068_v55 = vsel %vm1455_vm7, %v4065_v39, %v4067_v57 }
 0x1c5   : > { %5267 = vmatprep.mubr.msk.bf16.mxu0 %vm6016_vm1, %v6015_v2 }
 0x1c6   : > { %v3928_v47 = vor.u32 %v3927_v56, %v3924_v7  ;;  %v4070_v56 = vsel %vm1455_vm7, %v4067_v57, %v4069_v0 }
 0x1c8   : > { %v3929_v34 = vsel %vm1294_vm8, %v3919_v24, %v3928_v47  ;;  %v2214_v24 = vshrl.u32 %v5974_v50, 16 }
 0x1ca   : > { %4972 = vmatmul.mubr.msk.bf16.gmra.mrb[12].mxu1 %vm404_vm3, %v1782_v18  ;;  %v3934_v18 = vshll.u32 %v7056_v58, 16  ;;  %v2216_v29 = vrot.slane %v2214_v24, 1 }
 0x1cb   : > { %4975 = vmatprep.mubr.msk.bf16.mxu1 %vm6016_vm1, %v6015_v2 }
 0x1cc   : > { %5268 = vmatmul.mubr.msk.bf16.vlgmr.msra.gmra.mrb[0].mxu0 %vm404_vm3, %v3788_v9  ;;  %v3936_v19 = vrot.slane %v3934_v18, 3  ;;  %v3940_v9 = vshrl.u32 %v7073_v25, 16 }
 0x1cd   : > { %5288 = vmatpush3.bf16.msra.mxu0 %v3973_v26  ;;  %5271 = vmatprep.mubr.msk.bf16.mxu0 %vm6016_vm1, %v6015_v2  ;;  %v2054_v26 = vrot.slane %v5971_v17, 1 }
 0x1ce   : > { %5309 = vmatprep.subr.bf16.mxu0 %v6015_v2  ;;  %v3937_v43 = vor.u32 %v3936_v19, %v3933_v60  ;;  %v3942_v46 = vrot.slane %v3940_v9, 2 }
 0x1cf   : > { %v2055_v15 = vsel %vm589_vm5, %v2052_v8, %v2054_v26 }
 0x1d2   : > { %4976 = vmatmul.mubr.msk.bf16.gmra.mrb[16].mxu1 %vm404_vm3, %v1790_v3  ;;  %v3938_v3 = vsel %vm1294_vm8, %v3928_v47, %v3937_v43 }
 0x1d3   : > { %4981 = vmatprep.mubr.msk.bf16.mxu1 %vm6016_vm1, %v6015_v2 }
 0x1d4   : > { %5272 = vmatmul.mubr.msk.bf16.gmra.mrb[4].mxu0 %vm404_vm3, %v3790_v21  ;;  %v3946_v21 = vor.u32 %v3945_v11, %v3942_v46 }
 0x1d5   : > { %5275 = vmatprep.mubr.msk.bf16.mxu0 %vm6016_vm1, %v6015_v2 }
 0x1da   : > { %4982 = vmatmul.mubr.msk.bf16.vlgmr.msra.gmra.mrb[0].mxu1 %vm404_vm3, %v1900_v22  ;;  %v5972_v22 = vld [vmem:[%s6125_s14 + $0x1c] sm:$0xff]   ;;  %s5848_s14 = smul.u32 80, %s7266_s16 }
 0x1db   : > { %4985 = vmatprep.mubr.msk.bf16.mxu1 %vm6016_vm1, %v6015_v2  ;;  %5002 = vmatpush3.bf16.msra.mxu1 %v2078_v42  ;;  %v2056_v30 = vrot.slane %v5972_v22, 1  ;;  %v3947_v42 = vsel %vm1294_vm8, %v3937_v43, %v3946_v21 }
 0x1dc   : > { %5331 = vmatprep.subr.bf16.mxu1 %v6015_v2  ;;  %5276 = vmatmul.mubr.msk.bf16.gmra.mrb[8].mxu0 %vm404_vm3, %v3792_v49  ;;  %s313_s30 = sadd.s32 %s5848_s14, %s5847_s8 }
 0x1dd   : > { %5279 = vmatprep.mubr.msk.bf16.mxu0 %vm6016_vm1, %v6015_v2  ;;  %s4332_s9 = sshll.u32 %s313_s30, 3 }
 0x1de   : > { %s7213_s6 = scalar_lea.vmem %s7254_s4, %s4332_s9 }
 0x1e2   : > { %4986 = vmatmul.mubr.msk.bf16.gmra.mrb[4].mxu1 %vm404_vm3, %v1902_v27  ;;  %v2057_v27 = vsel %vm589_vm5, %v2054_v26, %v2056_v30 }
 0x1e3   : > { %4989 = vmatprep.mubr.msk.bf16.mxu1 %vm6016_vm1, %v6015_v2 }
 0x1e4   : > { %5280 = vmatmul.mubr.msk.bf16.gmra.mrb[12].mxu0 %vm404_vm3, %v3794_v35  ;;  %v2058_v35 = vrot.slane %v5973_v44, 1 }
 0x1e5   : > { %5283 = vmatprep.mubr.msk.bf16.mxu0 %vm6016_vm1, %v6015_v2 }
 0x1e6   : > { %v2059_v41 = vsel %vm589_vm5, %v2056_v30, %v2058_v35 }
 0x1ea   : > { %4990 = vmatmul.mubr.msk.bf16.gmra.mrb[8].mxu1 %vm404_vm3, %v1904_v40 }
 0x1eb   : > { %4993 = vmatprep.mubr.msk.bf16.mxu1 %vm6016_vm1, %v6015_v2 }
 0x1ec   : > { %5284 = vmatmul.mubr.msk.bf16.gmra.mrb[16].mxu0 %vm404_vm3, %v3796_v51  ;;  %v2060_v51 = vrot.slane %v5969_v37, 1 }
 0x1ed   : > { %5289 = vmatprep.mubr.msk.bf16.mxu0 %vm6016_vm1, %v6015_v2 }
 0x1ee   : > { %v2061_v1 = vsel %vm589_vm5, %v2058_v35, %v2060_v51 }
 0x1f2   : > { %4994 = vmatmul.mubr.msk.bf16.gmra.mrb[12].mxu1 %vm404_vm3, %v1906_v23  ;;  %v2211_v23 = vor.u32 %v2210_v48, %v2207_v20 }
 0x1f3   : > { %4997 = vmatprep.mubr.msk.bf16.mxu1 %vm6016_vm1, %v6015_v2 }
 0x1f4   : > { %5290 = vmatmul.mubr.msk.bf16.vlgmr.msra.gmra.mrb[0].mxu0 %vm404_vm3, %v3920_v62  ;;  %v2212_v32 = vsel %vm861_vm4, %v6202_v6, %v2211_v23  ;;  %v2219_v62 = vrot.slane %v2217_v54, 2  ;;  %v4071_v6 = vrot.slane %v7073_v25, 3 }
 0x1f5   : > { %5310 = vmatpush3.bf16.msra.mxu0 %v4091_v5  ;;  %5293 = vmatprep.mubr.msk.bf16.mxu0 %vm6016_vm1, %v6015_v2 }
 0x1f6   : > { %v2220_v7 = vor.u32 %v2219_v62, %v2216_v29  ;;  %v4072_v58 = vsel %vm1455_vm7, %v4069_v0, %v4071_v6 }
 0x1f8   : > { %v2221_v5 = vsel %vm861_vm4, %v2211_v23, %v2220_v7 }
 0x1fa   : > { %4998 = vmatmul.mubr.msk.bf16.gmra.mrb[16].mxu1 %vm404_vm3, %v1908_v12  ;;  %v4073_v12 = vrot.slane %v7140_v52, 3 }
 0x1fb   : > { %5003 = vmatprep.mubr.msk.bf16.mxu1 %vm6016_vm1, %v6015_v2 }
 0x1fc   : > { %5294 = vmatmul.mubr.msk.bf16.gmra.mrb[4].mxu0 %vm404_vm3, %v3929_v34  ;;  %v4074_v47 = vsel %vm1455_vm7, %v4071_v6, %v4073_v12 }
 0x1fd   : > { %5297 = vmatprep.mubr.msk.bf16.mxu0 %vm6016_vm1, %v6015_v2 }
 0x202   : > { %5004 = vmatmul.mubr.msk.bf16.vlgmr.msra.gmra.mrb[0].mxu1 %vm404_vm3, %v2053_v61 }
 0x203   : > { %5007 = vmatprep.mubr.msk.bf16.mxu1 %vm6016_vm1, %v6015_v2  ;;  %5332 = vmatpush3.bf16.msra.mxu1 %v6086_v4  ;;  %v3952_v4 = vshll.u32 %v7140_v52, 16 }
 0x204   : > { %5298 = vmatmul.mubr.msk.bf16.gmra.mrb[8].mxu0 %vm404_vm3, %v3938_v3 }
 0x205   : > { %5301 = vmatprep.mubr.msk.bf16.mxu0 %vm6016_vm1, %v6015_v2  ;;  %v3954_v49 = vrot.slane %v3952_v4, 3 }
 0x207   : > { %v3955_v14 = vor.u32 %v3954_v49, %v3951_v63 }
 0x209   : > { %v3956_v40 = vsel %vm1294_vm8, %v3946_v21, %v3955_v14 }
 0x20a   : > { %5008 = vmatmul.mubr.msk.bf16.gmra.mrb[4].mxu1 %vm404_vm3, %v2055_v15 }
 0x20b   : > { %5011 = vmatprep.mubr.msk.bf16.mxu1 %vm6016_vm1, %v6015_v2 }
 0x20c   : > { %5302 = vmatmul.mubr.msk.bf16.gmra.mrb[12].mxu0 %vm404_vm3, %v3947_v42 }
 0x20d   : > { %5305 = vmatprep.mubr.msk.bf16.mxu0 %vm6016_vm1, %v6015_v2 }
 0x212   : > { %5012 = vmatmul.mubr.msk.bf16.gmra.mrb[8].mxu1 %vm404_vm3, %v2057_v27 }
 0x213   : > { %5015 = vmatprep.mubr.msk.bf16.mxu1 %vm6016_vm1, %v6015_v2 }
 0x214   : > { %5306 = vmatmul.mubr.msk.bf16.gmra.mrb[16].mxu0 %vm404_vm3, %v3956_v40 }
 0x215   : > { %5311 = vmatprep.mubr.msk.bf16.mxu0 %vm6016_vm1, %v6015_v2 }
 0x21a   : > { %5016 = vmatmul.mubr.msk.bf16.gmra.mrb[12].mxu1 %vm404_vm3, %v2059_v41 }
 0x21b   : > { %5019 = vmatprep.mubr.msk.bf16.mxu1 %vm6016_vm1, %v6015_v2 }
 0x21c   : > { %5312 = vmatmul.mubr.msk.bf16.vlgmr.msra.gmra.mrb[0].mxu0 %vm404_vm3, %v4066_v10 }
 0x21d   : > { %5315 = vmatprep.mubr.msk.bf16.mxu0 %vm6016_vm1, %v6015_v2 }
 0x222   : > { %5020 = vmatmul.mubr.msk.bf16.gmra.mrb[16].mxu1 %vm404_vm3, %v2061_v1 }
 0x223   : > { %5037 = vmatprep.mubr.msk.bf16.mxu1 %vm6016_vm1, %v6015_v2 }
 0x224   : > { %5316 = vmatmul.mubr.msk.bf16.gmra.mrb[4].mxu0 %vm404_vm3, %v4068_v55 }
 0x225   : > { %5319 = vmatprep.mubr.msk.bf16.mxu0 %vm6016_vm1, %v6015_v2 }
 0x22a   : > { %5038 = vmatmul.mubr.msk.bf16.vlgmr.msra.gmra.mrb[12].mxu1 %vm404_vm3, %v2212_v32 }
 0x22b   : > { %5041 = vmatprep.mubr.msk.bf16.mxu1 %vm6016_vm1, %v6015_v2 }
 0x22c   : > { %5320 = vmatmul.mubr.msk.bf16.gmra.mrb[8].mxu0 %vm404_vm3, %v4070_v56 }
 0x22d   : > { %5323 = vmatprep.mubr.msk.bf16.mxu0 %vm6016_vm1, %v6015_v2 }
 0x232   : > { %5042 = vmatmul.mubr.msk.bf16.gmra.mrb[16].mxu1 %vm404_vm3, %v2221_v5 }
 0x234   : > { %5324 = vmatmul.mubr.msk.bf16.gmra.mrb[12].mxu0 %vm404_vm3, %v4072_v58 }
 0x235   : > { %5327 = vmatprep.mubr.msk.bf16.mxu0 %vm6016_vm1, %v6015_v2 }
 0x23c   : > { %5328 = vmatmul.mubr.msk.bf16.gmra.mrb[16].mxu0 %vm404_vm3, %v4074_v47 }
 0x2d5   : > { %v2114_v31 = vpop.f32.mrb[0].mxu1 }
 0x2d6   : > { %v5005_v25 = vpop.f32.mrb[1].mxu1 }
 0x2d7   : > { %v2117_v18 = vpop.f32.mrb[2].mxu1 }
 0x2d8   : > { %v5006_v13 = vpop.f32.mrb[3].mxu1 }
 0x2dd   : > { %v2122_v59 = vpop.f32.mrb[4].mxu1 }
 0x2de   : > { %v5009_v8 = vpop.f32.mrb[5].mxu1 }
 0x2df   : > { %v2125_v34 = vpop.f32.mrb[6].mxu1 }
 0x2e0   : > { %v5010_v60 = vpop.f32.mrb[7].mxu1 }
 0x2e5   : > { %v2130_v19 = vpop.f32.mrb[8].mxu1 }
 0x2e6   : > { %v5013_v61 = vpop.f32.mrb[9].mxu1 }
 0x2e7   : > { %v2133_v2 = vpop.f32.mrb[10].mxu1 }
 0x2e8   : > { %v5014_v43 = vpop.f32.mrb[11].mxu1 }
 0x2ef   : > { %v4127_v9 = vpop.f32.mrb[0].mxu0 }
 0x2f0   : > { %v5333_v16 = vadd.f32 %v4127_v9, %v2114_v31  ;;  %v5313_v17 = vpop.f32.mrb[1].mxu0 }
 0x2f1   : > { %v4130_v26 = vpop.f32.mrb[2].mxu0 }
 0x2f2   : > { %4177 = vst.msk [vmem:[%s7213_s6] sm:$0xff] %vm4176_vm9, %v5333_v16  ;;  %v5334_v3 = vadd.f32 %v4130_v26, %v2117_v18  ;;  %v5314_v46 = vpop.f32.mrb[3].mxu0 }
 0x2f4   : > { %4178 = vst.msk [vmem:[%s7213_s6 + $0x8] sm:$0xff] %vm4176_vm9, %v5334_v3 }
 0x2f7   : > { %v4135_v11 = vpop.f32.mrb[4].mxu0 }
 0x2f8   : > { %v5335_v52 = vadd.f32 %v4135_v11, %v2122_v59  ;;  %v5317_v15 = vpop.f32.mrb[5].mxu0 }
 0x2f9   : > { %v4138_v21 = vpop.f32.mrb[6].mxu0 }
 0x2fa   : > { %4179 = vst.msk [vmem:[%s7213_s6 + $0x10] sm:$0xff] %vm4176_vm9, %v5335_v52  ;;  %v5336_v33 = vadd.f32 %v4138_v21, %v2125_v34  ;;  %v5318_v4 = vpop.f32.mrb[7].mxu0 }
 0x2fc   : > { %4180 = vst.msk [vmem:[%s7213_s6 + $0x18] sm:$0xff] %vm4176_vm9, %v5336_v33 }
 0x2fd   : > { %v2298_v22 = vpop.f32.mrb[12].mxu1 }
 0x2fe   : > { %v5039_v30 = vpop.f32.mrb[13].mxu1 }
 0x2ff   : > { %v2301_v42 = vpop.f32.mrb[14].mxu1  ;;  %v4143_v49 = vpop.f32.mrb[8].mxu0 }
 0x300   : > { %v5040_v63 = vpop.f32.mrb[15].mxu1  ;;  %v5337_v27 = vadd.f32 %v4143_v49, %v2130_v19  ;;  %v5321_v14 = vpop.f32.mrb[9].mxu0 }
 0x301   : > { %v4146_v28 = vpop.f32.mrb[10].mxu0 }
 0x302   : > { %4181 = vst.msk [vmem:[%s7213_s6 + $0x20] sm:$0xff] %vm4176_vm9, %v5337_v27  ;;  %v5338_v44 = vadd.f32 %v4146_v28, %v2133_v2  ;;  %v5322_v35 = vpop.f32.mrb[11].mxu0 }
 0x304   : > { %4182 = vst.msk [vmem:[%s7213_s6 + $0x28] sm:$0xff] %vm4176_vm9, %v5338_v44 }
 0x305   : > { %v2306_v40 = vpop.f32.mrb[16].mxu1 }
 0x306   : > { %v5043_v36 = vpop.f32.mrb[17].mxu1 }
 0x307   : > { %v2309_v41 = vpop.f32.mrb[18].mxu1  ;;  %v4151_v38 = vpop.f32.mrb[12].mxu0 }
 0x308   : > { %v5044_v37 = vpop.f32.mrb[19].mxu1  ;;  %v5339_v39 = vadd.f32 %v4151_v38, %v2298_v22  ;;  %v5325_v51 = vpop.f32.mrb[13].mxu0 }
 0x309   : > { %v4154_v45 = vpop.f32.mrb[14].mxu0 }
 0x30a   : > { %4183 = vst.msk [vmem:[%s7213_s6 + $0x30] sm:$0xff] %vm4176_vm9, %v5339_v39  ;;  %v5340_v53 = vadd.f32 %v4154_v45, %v2301_v42  ;;  %v5326_v10 = vpop.f32.mrb[15].mxu0 }
 0x30c   : > { %4184 = vst.msk [vmem:[%s7213_s6 + $0x38] sm:$0xff] %vm4176_vm9, %v5340_v53 }
 0x30f   : > { %v4159_v1 = vpop.f32.mrb[16].mxu0 }
 0x310   : > { %v5341_v20 = vadd.f32 %v4159_v1, %v2306_v40  ;;  %v5329_v48 = vpop.f32.mrb[17].mxu0 }
 0x311   : > { %v4162_v57 = vpop.f32.mrb[18].mxu0 }
 0x312   : > { %4185 = vst.msk [vmem:[%s7213_s6 + $0x40] sm:$0xff] %vm4176_vm9, %v5341_v20  ;;  %v5342_v23 = vadd.f32 %v4162_v57, %v2309_v41  ;;  %v5330_v50 = vpop.f32.mrb[19].mxu0 }
 0x314   : > { %4186 = vst.msk [vmem:[%s7213_s6 + $0x48] sm:$0xff] %vm4176_vm9, %v5342_v23 }
 0x315 PF: > { %s14_s19 = sadd.s32 1, %s6013_s19   ;;  %s7255_s15 = smov %s6005_s17 }
 0x316   : > { %p11_p10 = scmp.ge.s32.totalorder %s14_s19, 18   ;;  %s7256_s16 = smov %s6009_s18 }
 0x317   : > { %s7257_s17 = smov %s7260_s20  ;;  %s7258_s18 = smov %s7264_s21 }
 0x318   :  { %13 = sbr.rel (!%p11_p10) target bundleno = 3 (0x3), region = 98 }

</bundles_post_ra>
